<compile_context>
chip_gen: v6e
topology: v6e:2x2x1
jax: 0.10.0
libtpu: 0.0.40
codegen_flags: <defaults>
</compile_context>

<pallas_src>
import functools

import jax
import jax.numpy as jnp
from jax.experimental import pallas as pl
from jax.experimental.pallas import tpu as pltpu

NEG_SLOPE = 0.2       # GATv2Conv default negative_slope
LANE = 128


def _round_up(x, m):
    return ((x + m - 1) // m) * m


# ---------------------------------------------------------------------------
# Fused projection kernel:  [xl | xr] = x @ [Wl | Wr] + [bl | br]
# ---------------------------------------------------------------------------
def gatv2_proj_kernel(x_ref, w_ref, b_ref, xl_ref, xr_ref, *, hc):
    xlr = jnp.dot(x_ref[...], w_ref[...],
                  preferred_element_type=jnp.float32) + b_ref[...]
    # bf16 outputs: halves the HBM write+read between proj and attention.
    xl_ref[...] = xlr[:, :hc].astype(jnp.bfloat16)    # source-side (= values)
    xr_ref[...] = xlr[:, hc:].astype(jnp.bfloat16)    # target-side


def gatv2_project(x_bf, w_cat, b_cat, *, hc):
    n_pad, fin = x_bf.shape
    # proj tile_m: largest of 512/256/128 that divides n_pad (review: 512).
    tile_m = 512 if n_pad % 512 == 0 else (256 if n_pad % 256 == 0 else 128)
    tile_m = min(tile_m, n_pad)
    return pl.pallas_call(
        functools.partial(gatv2_proj_kernel, hc=hc),
        out_shape=(jax.ShapeDtypeStruct((n_pad, hc), jnp.bfloat16),
                   jax.ShapeDtypeStruct((n_pad, hc), jnp.bfloat16)),
        grid=(n_pad // tile_m,),
        in_specs=[pl.BlockSpec((tile_m, fin), lambda i: (i, 0)),
                  pl.BlockSpec((fin, 2 * hc), lambda i: (0, 0)),
                  pl.BlockSpec((1, 2 * hc), lambda i: (0, 0))],
        out_specs=[pl.BlockSpec((tile_m, hc), lambda i: (i, 0)),
                   pl.BlockSpec((tile_m, hc), lambda i: (i, 0))],
        compiler_params=pltpu.CompilerParams(
            dimension_semantics=("parallel",),
            vmem_limit_bytes=32 * 1024 * 1024),
    )(x_bf, w_cat, b_cat)


# ---------------------------------------------------------------------------
# Flash-style attention + aggregation kernel.
# Grid: (head h, target tile i, source tile s).  Online-softmax accumulators in
# VMEM scratch; output written only on the last source step.
# ---------------------------------------------------------------------------
def gatv2_attn_kernel(xl_ref, xr_ref, adj_ref, att_ref, bias_ref, out_ref,
                      m_sc, l_sc, acc_sc):
    si = pl.program_id(2)

    @pl.when(si == 0)
    def _init():
        m_sc[...] = jnp.full_like(m_sc, -jnp.inf)
        l_sc[...] = jnp.zeros_like(l_sc)
        acc_sc[...] = jnp.zeros_like(acc_sc)

    xl = xl_ref[...]                                   # [Ns, C] bf16 (values)
    xr_f = xr_ref[...].astype(jnp.float32)             # [T,  C]
    xl_f = xl.astype(jnp.float32)                      # [Ns, C]

    # pairwise features [T, Ns, C]; elementwise math stays f32 (v5e: no bf16 VPU)
    s = xr_f[:, None, :] + xl_f[None, :, :]
    s = jnp.where(s > 0, s, NEG_SLOPE * s)             # leaky_relu
    e = jnp.sum(s * att_ref[...][None, :, :], axis=-1)  # [T, Ns] raw scores

    edge = adj_ref[...] > 0                            # [T, Ns] indicator

    # online softmax (max taken over raw scores => always finite; non-edges are
    # removed multiplicatively, which equals the -inf additive mask exactly)
    m_prev = m_sc[...]
    m_new = jnp.maximum(m_prev, jnp.max(e, axis=-1, keepdims=True))
    scale = jnp.exp(m_prev - m_new)                    # exp(-inf)=0 on first step
    p = jnp.where(edge, jnp.exp(e - m_new), 0.0)       # [T, Ns]
    l_sc[...] = scale * l_sc[...] + jnp.sum(p, axis=-1, keepdims=True)
    acc_sc[...] = scale * acc_sc[...] + jnp.dot(
        p.astype(jnp.bfloat16), xl, preferred_element_type=jnp.float32)
    m_sc[...] = m_new

    @pl.when(si == pl.num_programs(2) - 1)
    def _finalize():
        # exact f32 divide (review concern about approx reciprocal), fused
        # post-aggregation bias + ELU, single lane-dense store per head slab.
        y = acc_sc[...] / l_sc[...] + bias_ref[...]
        out_ref[...] = jnp.where(y > 0, y, jnp.exp(y) - 1.0)


def gatv2_attention(xl, xr, adj, att_flat, bias, *, heads, out_ch):
    n_pad, hc = xl.shape
    # tile_t/tile_s = 128 keeps the [T, Ns, C] f32 intermediate ~8 MiB and the
    # aggregation K dim MXU-aligned; safe on v7x's 64 MiB VMEM (review).
    tile_t = min(LANE, n_pad)
    tile_s = min(LANE, n_pad)
    grid = (heads, n_pad // tile_t, n_pad // tile_s)
    return pl.pallas_call(
        gatv2_attn_kernel,
        out_shape=jax.ShapeDtypeStruct((n_pad, hc), jnp.float32),
        grid=grid,
        in_specs=[
            pl.BlockSpec((tile_s, out_ch), lambda h, i, s: (s, h)),   # xl tile
            pl.BlockSpec((tile_t, out_ch), lambda h, i, s: (i, h)),   # xr tile
            pl.BlockSpec((tile_t, tile_s), lambda h, i, s: (i, s)),   # adj tile
            pl.BlockSpec((1, out_ch), lambda h, i, s: (0, h)),        # att_h
            pl.BlockSpec((1, out_ch), lambda h, i, s: (0, h)),        # bias_h
        ],
        out_specs=pl.BlockSpec((tile_t, out_ch), lambda h, i, s: (i, h)),
        scratch_shapes=[pltpu.VMEM((tile_t, 1), jnp.float32),         # m
                        pltpu.VMEM((tile_t, 1), jnp.float32),         # l
                        pltpu.VMEM((tile_t, out_ch), jnp.float32)],   # acc
        compiler_params=pltpu.CompilerParams(
            dimension_semantics=("parallel", "parallel", "arbitrary"),
            vmem_limit_bytes=48 * 1024 * 1024),
    )(xl, xr, adj, att_flat, bias)


def gatv2_layer(x, wl, bl, wr, br, att, adj, bias, *, heads, out_ch):
    """One GATv2Conv layer (+ fused ELU); x is [n_pad, Fin] f32, adj bf16."""
    n_pad, fin = x.shape
    hc = heads * out_ch
    assert fin % LANE == 0 and out_ch % LANE == 0, "keep head slabs lane-aligned"

    w_cat = jnp.concatenate([wl, wr], axis=1).astype(jnp.bfloat16)   # [Fin, 2HC]
    b_cat = jnp.concatenate([bl, br], axis=1).astype(jnp.float32)    # [1, 2HC]
    xl, xr = gatv2_project(x.astype(jnp.bfloat16), w_cat, b_cat, hc=hc)

    att_flat = att.reshape(1, hc).astype(jnp.float32)                # [1, HC]
    return gatv2_attention(xl, xr, adj, att_flat, bias.astype(jnp.float32),
                           heads=heads, out_ch=out_ch)


# ---------------------------------------------------------------------------
# Full forward pass (inference).  Nodes are padded to a multiple of 128; padded
# rows get a self-loop (keeps their softmax finite) and zero pool weight, and
# padded columns are zero in adj so real rows never attend to padding.
# ---------------------------------------------------------------------------
def gat_forward(params, x, adj, pool):
    heads, hid = params["heads"], params["hid"]
    n = x.shape[0]
    n_pad = _round_up(max(n, LANE), LANE)
    pad = n_pad - n

    x_p = jnp.pad(x, ((0, pad), (0, 0)))
    adj_p = jnp.pad(adj, ((0, pad), (0, pad)))
    if pad:
        idx = jnp.arange(n, n_pad)
        adj_p = adj_p.at[idx, idx].set(1.0)
    adj_p = adj_p.astype(jnp.bfloat16)            # review: bf16 adjacency stream
    pool_p = jnp.pad(pool, ((0, 0), (0, pad)))

    h = gatv2_layer(x_p, params["wl1"], params["bl1"], params["wr1"], params["br1"],
                    params["att1"], adj_p, params["bias1"],
                    heads=heads, out_ch=hid)
    h = gatv2_layer(h, params["wl2"], params["bl2"], params["wr2"], params["br2"],
                    params["att2"], adj_p, params["bias2"],
                    heads=1, out_ch=hid)

    # global_mean_pool + Linear in plain XLA (tiny [G, 1] output; a Pallas call
    # here is pure launch overhead — review).
    pooled = pool_p @ h                                              # [G, hid]
    return pooled @ params["wlin"] + params["blin"]                  # [G, 1]


if __name__ == "__main__":
    IN_CH, HID, OUT_CH, HEADS = 768, 128, 1, 8
    N_PER_GRAPH, G = 8, 2
    N = N_PER_GRAPH * G

    key = jax.random.PRNGKey(0)
    ks = jax.random.split(key, 16)

    # --- synthetic graph: two ring graphs of 8 nodes each --------------------
    src, dst = [], []
    for g in range(G):
        off = g * N_PER_GRAPH
        for i in range(N_PER_GRAPH):
            j = (i + 1) % N_PER_GRAPH
            src += [off + i, off + j]
            dst += [off + j, off + i]
    edge_index = jnp.array([src, dst], dtype=jnp.int32)              # [2, 32]
    batch = jnp.repeat(jnp.arange(G, dtype=jnp.int32), N_PER_GRAPH)  # [N]

    adj = jnp.zeros((N, N), jnp.float32)
    adj = adj.at[edge_index[1], edge_index[0]].set(1.0)              # adj[tgt, src]
    adj = adj.at[jnp.arange(N), jnp.arange(N)].set(1.0)              # self-loops
    assert bool(jnp.all(jnp.sum(adj, axis=1) > 0)), "need >=1 edge per row"

    pool = (batch[None, :] == jnp.arange(G)[:, None]).astype(jnp.float32)
    pool = pool / jnp.sum(pool, axis=1, keepdims=True)               # [G, N]

    # --- deterministic parameters (shapes per GATv2Conv / Linear) ------------
    def dense(k, fan_in, fan_out):
        return jax.random.normal(k, (fan_in, fan_out), jnp.float32) / jnp.sqrt(fan_in)

    params = dict(
        heads=HEADS, hid=HID,
        # gat1: GATv2Conv(768, 128, heads=8)  -> [N, 1024]
        wl1=dense(ks[0], IN_CH, HEADS * HID),
        bl1=0.01 * jax.random.normal(ks[1], (1, HEADS * HID), jnp.float32),
        wr1=dense(ks[2], IN_CH, HEADS * HID),
        br1=0.01 * jax.random.normal(ks[3], (1, HEADS * HID), jnp.float32),
        att1=jax.random.normal(ks[4], (HEADS, HID), jnp.float32) / jnp.sqrt(HID),
        bias1=0.01 * jax.random.normal(ks[5], (1, HEADS * HID), jnp.float32),
        # gat2: GATv2Conv(1024, 128, heads=1) -> [N, 128]
        wl2=dense(ks[6], HEADS * HID, HID),
        bl2=0.01 * jax.random.normal(ks[7], (1, HID), jnp.float32),
        wr2=dense(ks[8], HEADS * HID, HID),
        br2=0.01 * jax.random.normal(ks[9], (1, HID), jnp.float32),
        att2=jax.random.normal(ks[10], (1, HID), jnp.float32) / jnp.sqrt(HID),
        bias2=0.01 * jax.random.normal(ks[11], (1, HID), jnp.float32),
        # lin: Linear(128, 1)
        wlin=dense(ks[12], HID, OUT_CH),
        blin=0.01 * jax.random.normal(ks[13], (1, OUT_CH), jnp.float32),
    )

    x = jax.random.normal(ks[14], (N, IN_CH), jnp.float32)

    out = gat_forward(params, x, adj, pool)                          # [G, 1]
    jax.block_until_ready(out)
    assert out.shape == (G, OUT_CH)
    assert bool(jnp.all(jnp.isfinite(out)))
    print("KERNEL_OK")
</pallas_src>

<mosaic_0001>
module attributes {stable_mosaic.version = 11 : i64} {
  func.func @gatv2_proj_kernel(%arg0: i32, %arg1: memref<128x768xbf16, #tpu.memory_space<vmem>>, %arg2: memref<768x2048xbf16, #tpu.memory_space<vmem>>, %arg3: memref<1x2048xf32, #tpu.memory_space<vmem>>, %arg4: memref<128x1024xbf16, #tpu.memory_space<vmem>>, %arg5: memref<128x1024xbf16, #tpu.memory_space<vmem>>) attributes {dimension_semantics = [#tpu.dimension_semantics<parallel>], iteration_bounds = array<i64: 1>, scalar_prefetch = 0 : i64, scratch_operands = 0 : i64, tpu.core_type = #tpu.core_type<tc>, window_params = [{transform_indices = @transform_0, window_bounds = array<i64: 128, 768>}, {pipeline_mode = #tpu.pipeline_mode<synchronous>, transform_indices = @transform_1, window_bounds = array<i64: 768, 2048>}, {pipeline_mode = #tpu.pipeline_mode<synchronous>, transform_indices = @transform_2, window_bounds = array<i64: 1, 2048>}, {transform_indices = @transform_3, window_bounds = array<i64: 128, 1024>}, {transform_indices = @transform_4, window_bounds = array<i64: 128, 1024>}]} {
    %c0 = arith.constant 0 : index
    %c0_0 = arith.constant 0 : index
    %0 = vector.load %arg1[%c0, %c0_0] : memref<128x768xbf16, #tpu.memory_space<vmem>>, vector<128x768xbf16>
    %c0_1 = arith.constant 0 : index
    %c0_2 = arith.constant 0 : index
    %1 = vector.load %arg2[%c0_1, %c0_2] : memref<768x2048xbf16, #tpu.memory_space<vmem>>, vector<768x2048xbf16>
    %cst = arith.constant dense<0.000000e+00> : vector<128x2048xf32>
    %2 = tpu.matmul %0, %1, %cst {dimension_numbers = #tpu.dot_dimension_numbers<[1], [0], [0], [1], [0, 0, 1, 1], [], []>} : vector<128x768xbf16>, vector<768x2048xbf16>, vector<128x2048xf32> -> vector<128x2048xf32>
    %c0_3 = arith.constant 0 : index
    %c0_4 = arith.constant 0 : index
    %3 = vector.load %arg3[%c0_3, %c0_4] : memref<1x2048xf32, #tpu.memory_space<vmem>>, vector<1x2048xf32>
    %4 = vector.broadcast %3 : vector<1x2048xf32> to vector<128x2048xf32>
    %5 = arith.addf %2, %4 : vector<128x2048xf32>
    %6 = vector.extract_strided_slice %5 {offsets = [0, 0], sizes = [128, 1024], strides = [1, 1]} : vector<128x2048xf32> to vector<128x1024xf32>
    %7 = arith.truncf %6 : vector<128x1024xf32> to vector<128x1024xbf16>
    %c0_5 = arith.constant 0 : index
    %c0_6 = arith.constant 0 : index
    %8 = vector.load %arg4[%c0_5, %c0_6] : memref<128x1024xbf16, #tpu.memory_space<vmem>>, vector<128x1024xbf16>
    tpu.vector_store %arg4[%c0_5, %c0_6], %7 {strides = array<i32>} : memref<128x1024xbf16, #tpu.memory_space<vmem>>, vector<128x1024xbf16>,
    %9 = vector.extract_strided_slice %5 {offsets = [0, 1024], sizes = [128, 1024], strides = [1, 1]} : vector<128x2048xf32> to vector<128x1024xf32>
    %10 = arith.truncf %9 : vector<128x1024xf32> to vector<128x1024xbf16>
    %c0_7 = arith.constant 0 : index
    %c0_8 = arith.constant 0 : index
    %11 = vector.load %arg5[%c0_7, %c0_8] : memref<128x1024xbf16, #tpu.memory_space<vmem>>, vector<128x1024xbf16>
    tpu.vector_store %arg5[%c0_7, %c0_8], %10 {strides = array<i32>} : memref<128x1024xbf16, #tpu.memory_space<vmem>>, vector<128x1024xbf16>,
    return
  }
  func.func @transform_0(%arg0: i32) -> (i32, i32) {
    %c0_i32 = arith.constant 0 : i32
    %c0_i32_0 = arith.constant 0 : i32
    return %arg0, %c0_i32 : i32, i32
  }
  func.func @transform_1(%arg0: i32) -> (i32, i32) {
    %c0_i32 = arith.constant 0 : i32
    %c0_i32_0 = arith.constant 0 : i32
    %c0_i32_1 = arith.constant 0 : i32
    return %c0_i32, %c0_i32_0 : i32, i32
  }
  func.func @transform_2(%arg0: i32) -> (i32, i32) {
    %c0_i32 = arith.constant 0 : i32
    %c0_i32_0 = arith.constant 0 : i32
    %c0_i32_1 = arith.constant 0 : i32
    return %c0_i32, %c0_i32_0 : i32, i32
  }
  func.func @transform_3(%arg0: i32) -> (i32, i32) {
    %c0_i32 = arith.constant 0 : i32
    %c0_i32_0 = arith.constant 0 : i32
    return %arg0, %c0_i32 : i32, i32
  }
  func.func @transform_4(%arg0: i32) -> (i32, i32) {
    %c0_i32 = arith.constant 0 : i32
    %c0_i32_0 = arith.constant 0 : i32
    return %arg0, %c0_i32 : i32, i32
  }
}

</mosaic_0001>

<bundles_post_ra>
// kernel: tpu_custom_call.1
= control target key start
LH: loop header
LB: loop body
LE: loop exit
PB: predicated region body
PF: predicated region fallthrough
CT: control target
= control target key end

     0   :  { %10 = vsyncpa [#allocation3], 0  ;;  %s13171_s0 = inlined_call_operand.hbm [shape: bf16[128,768], index: 0, kind: input, shape index: {}]   ;;  %s13172_s1 = inlined_call_operand.hbm [shape: bf16[768,2048], index: 1, kind: input, shape index: {}]   ;;  %s13173_s2 = inlined_call_operand.hbm [shape: f32[1,2048], index: 2, kind: input, shape index: {}]   ;;  %s13174_s3 = inlined_call_operand.hbm [shape: bf16[128,1024], index: 3, kind: output, shape index: {0}]   ;;  %s13175_s4 = inlined_call_operand.hbm [shape: bf16[128,1024], index: 4, kind: output, shape index: {1}]  }
   0x1   :  { %11 = vsyncpa [#allocation6], 0 }
   0x2   :  { %12 = vsyncpa [#allocation4], 0 }
   0x3   :  { %13 = vsyncpa [#allocation10], 0  ;;  %s10104_s15 = smov [#allocation5]  }
   0x4   :  { %s31_s16 = sshll.u32 %s10104_s15, 4  ;;  %s32_s16 = int_to_ptr.vmem [resolvable:$true] %s31_s16 }
   0x5   :  { %s10004_s17 = scalar_lea.vmem %s32_s16, 98304  ;;  %p10009_p1 = scmp.lt.s32.totalorder %s32_s16, %s32_s16 }
   0x6   :  { %p10005_p0 = scmp.ne.s32.totalorder %s32_s16, %s10004_s17  ;;  %p10010_p2 = scmp.lt.s32.totalorder %s10004_s17, %s10004_s17 }
   0x8   :  { %p10011_p3 = por %p10010_p2, %p10009_p1 }
   0xa   :  { %p10012_p4 = pnand %p10011_p3, %p10005_p0 }
   0xc   :  { %10015 = shalt.err (!%p10012_p4)
}
   0xd   :  { %s10105_s18 = smov 1024   ;;  %s10106_s19 = smov 64  }
   0xe   :  { %37 = dma.hbm_to_vmem [thread:$0]  %s13172_s1, 98304, %s32_s16, [#allocation6], %s10105_s18, %s10105_s18, %s10106_s19  }
   0xf   :  { %s10107_s22 = smov [#allocation2]  }
  0x10   :  { %s19_s23 = sshll.u32 %s10107_s22, 4  ;;  %s20_s23 = int_to_ptr.vmem [resolvable:$true] %s19_s23 }
  0x11   :  { %s10024_s24 = scalar_lea.vmem %s20_s23, 6144  ;;  %p10029_p6 = scmp.lt.s32.totalorder %s20_s23, %s20_s23 }
  0x12   :  { %p10025_p5 = scmp.ne.s32.totalorder %s20_s23, %s10024_s24  ;;  %p10030_p7 = scmp.lt.s32.totalorder %s10024_s24, %s10024_s24 }
  0x14   :  { %p10031_p8 = por %p10030_p7, %p10029_p6 }
  0x16   :  { %p10032_p9 = pnand %p10031_p8, %p10025_p5 }
  0x18   :  { %10035 = shalt.err (!%p10032_p9)
}
  0x19   :  { %s10108_s25 = smov 384   ;;  %s10109_s26 = smov 24  }
  0x1a   :  { %25 = dma.hbm_to_vmem [thread:$0]  %s13171_s0, 6144, %s20_s23, [#allocation3], %s10108_s25, %s10108_s25, %s10109_s26  }
  0x1b   :  { %s10110_s29 = smov [#allocation7]  }
  0x1c   :  { %s44_s30 = sshll.u32 %s10110_s29, 4  ;;  %s45_s30 = int_to_ptr.vmem [resolvable:$true] %s44_s30 }
  0x1d   :  { %s10044_s1 = scalar_lea.vmem %s45_s30, 256  ;;  %p10049_p11 = scmp.lt.s32.totalorder %s45_s30, %s45_s30 }
  0x1e   :  { %p10045_p10 = scmp.ne.s32.totalorder %s45_s30, %s10044_s1  ;;  %p10050_p12 = scmp.lt.s32.totalorder %s10044_s1, %s10044_s1 }
  0x20   :  { %p10051_p13 = por %p10050_p12, %p10049_p11 }
  0x22   :  { %p10052_p0 = pnand %p10051_p13, %p10045_p10 }
  0x24   :  { %10055 = shalt.err (!%p10052_p0)
}
  0x25   :  { %47 = dma.hbm_to_vmem [thread:$0]  %s13173_s2, 256, %s45_s30, [#allocation6]  }
  0x26   :  { %10096 = dma.done.wait [#allocation3], 6144  }
  0x27   :  { %10097 = vsyncadd [#allocation3], 4294961152 }
  0x28   :  { %10098 = dma.done.wait [#allocation6], 98560  }
  0x29   :  { %10099 = vsyncadd [#allocation6], 4294868736  ;;  %v217_v0 = vld [vmem:[#allocation5 + $0x380] sm:$0xff]  ;;  %s10111_s0 = smov [#allocation8]  }
  0x2a   :  { %v225_v1 = vld [vmem:[#allocation5 + $0x3c0] sm:$0xff]  ;;  %s8650_s2 = sshll.u32 %s10111_s0, 4  ;;  %s8651_s2 = int_to_ptr.vmem [resolvable:$true] %s8650_s2 }
  0x2b   :  { %v473_v2 = vld [vmem:[#allocation5 + $0xb80] sm:$0xff]  ;;  %v8840_v3 = vcombine.high %v217_v0, %v225_v1  ;;  %v8839_v5 = vcombine.low %v217_v0, %v225_v1  ;;  %s10056_s7 = scalar_lea.vmem %s8651_s2, 8192  ;;  %p10061_p2 = scmp.lt.s32.totalorder %s8651_s2, %s8651_s2 }
  0x2c   :  { %v481_v4 = vld [vmem:[#allocation5 + $0xbc0] sm:$0xff]  ;;  %p10057_p1 = scmp.ne.s32.totalorder %s8651_s2, %s10056_s7  ;;  %p10062_p3 = scmp.lt.s32.totalorder %s10056_s7, %s10056_s7 }
  0x2d   :  { %v201_v6 = vld [vmem:[#allocation5 + $0x300] sm:$0xff]  ;;  %v9096_v8 = vcombine.high %v473_v2, %v481_v4  ;;  %v9095_v9 = vcombine.low %v473_v2, %v481_v4  ;;  %5037 = vmatprep.subr.bf16.mxu0 %v8840_v3 }
  0x2e   :  { %v209_v7 = vld [vmem:[#allocation5 + $0x340] sm:$0xff]  ;;  %5038 = vmatpush1.bf16.msra.mxu0 %v8839_v5  ;;  %p10063_p4 = por %p10062_p3, %p10061_p2 }
  0x2f   :  { %v8824_v10 = vcombine.high %v201_v6, %v209_v7  ;;  %v457_v11 = vld [vmem:[#allocation5 + $0xb00] sm:$0xff]  ;;  %5150 = vmatprep.subr.bf16.mxu1 %v9096_v8  ;;  %v8823_v18 = vcombine.low %v201_v6, %v209_v7 }
  0x30   :  { %v465_v12 = vld [vmem:[#allocation5 + $0xb40] sm:$0xff]  ;;  %5151 = vmatpush1.bf16.msra.mxu1 %v9095_v9  ;;  %p10064_p5 = pnand %p10063_p4, %p10057_p1 }
  0x31   :  { %v185_v13 = vld [vmem:[#allocation5 + $0x280] sm:$0xff]  ;;  %v9080_v14 = vcombine.high %v457_v11, %v465_v12  ;;  %5039 = vmatprep.subr.bf16.mxu0 %v8824_v10  ;;  %v9079_v19 = vcombine.low %v457_v11, %v465_v12 }
  0x32   :  { %v193_v15 = vld [vmem:[#allocation5 + $0x2c0] sm:$0xff]  ;;  %5040 = vmatpush1.bf16.msra.mxu0 %v8823_v18 }
  0x33   :  { %v441_v16 = vld [vmem:[#allocation5 + $0xa80] sm:$0xff]  ;;  %v8808_v20 = vcombine.high %v185_v13, %v193_v15  ;;  %5152 = vmatprep.subr.bf16.mxu1 %v9080_v14  ;;  %v8807_v26 = vcombine.low %v185_v13, %v193_v15 }
  0x34   :  { %v449_v17 = vld [vmem:[#allocation5 + $0xac0] sm:$0xff]  ;;  %5153 = vmatpush1.bf16.msra.mxu1 %v9079_v19 }
  0x35   :  { %v9064_v21 = vcombine.high %v441_v16, %v449_v17  ;;  %v169_v22 = vld [vmem:[#allocation5 + $0x200] sm:$0xff]  ;;  %5041 = vmatprep.subr.bf16.mxu0 %v8808_v20  ;;  %v9063_v27 = vcombine.low %v441_v16, %v449_v17 }
  0x36   :  { %v177_v23 = vld [vmem:[#allocation5 + $0x240] sm:$0xff]  ;;  %5042 = vmatpush1.bf16.msra.mxu0 %v8807_v26 }
  0x37   :  { %v425_v24 = vld [vmem:[#allocation5 + $0xa00] sm:$0xff]  ;;  %v8792_v28 = vcombine.high %v169_v22, %v177_v23  ;;  %5154 = vmatprep.subr.bf16.mxu1 %v9064_v21  ;;  %v8791_v34 = vcombine.low %v169_v22, %v177_v23 }
  0x38   :  { %v433_v25 = vld [vmem:[#allocation5 + $0xa40] sm:$0xff]  ;;  %5155 = vmatpush1.bf16.msra.mxu1 %v9063_v27 }
  0x39   :  { %v9048_v29 = vcombine.high %v425_v24, %v433_v25  ;;  %v153_v30 = vld [vmem:[#allocation5 + $0x180] sm:$0xff]  ;;  %5043 = vmatprep.subr.bf16.mxu0 %v8792_v28  ;;  %v9047_v35 = vcombine.low %v425_v24, %v433_v25 }
  0x3a   :  { %v161_v31 = vld [vmem:[#allocation5 + $0x1c0] sm:$0xff]  ;;  %5044 = vmatpush1.bf16.msra.mxu0 %v8791_v34 }
  0x3b   :  { %v409_v32 = vld [vmem:[#allocation5 + $0x980] sm:$0xff]  ;;  %v8776_v36 = vcombine.high %v153_v30, %v161_v31  ;;  %5156 = vmatprep.subr.bf16.mxu1 %v9048_v29  ;;  %v8775_v42 = vcombine.low %v153_v30, %v161_v31 }
  0x3c   :  { %v417_v33 = vld [vmem:[#allocation5 + $0x9c0] sm:$0xff]  ;;  %5157 = vmatpush1.bf16.msra.mxu1 %v9047_v35 }
  0x3d   :  { %v9032_v37 = vcombine.high %v409_v32, %v417_v33  ;;  %v137_v38 = vld [vmem:[#allocation5 + $0x100] sm:$0xff]  ;;  %5045 = vmatprep.subr.bf16.mxu0 %v8776_v36  ;;  %v9031_v43 = vcombine.low %v409_v32, %v417_v33 }
  0x3e   :  { %v145_v39 = vld [vmem:[#allocation5 + $0x140] sm:$0xff]  ;;  %5046 = vmatpush1.bf16.msra.mxu0 %v8775_v42 }
  0x3f   :  { %v393_v40 = vld [vmem:[#allocation5 + $0x900] sm:$0xff]  ;;  %v8760_v44 = vcombine.high %v137_v38, %v145_v39  ;;  %5158 = vmatprep.subr.bf16.mxu1 %v9032_v37  ;;  %v8759_v50 = vcombine.low %v137_v38, %v145_v39 }
  0x40   :  { %v401_v41 = vld [vmem:[#allocation5 + $0x940] sm:$0xff]  ;;  %5159 = vmatpush1.bf16.msra.mxu1 %v9031_v43 }
  0x41   :  { %v9016_v45 = vcombine.high %v393_v40, %v401_v41  ;;  %v121_v46 = vld [vmem:[#allocation5 + $0x80] sm:$0xff]  ;;  %5047 = vmatprep.subr.bf16.mxu0 %v8760_v44  ;;  %v9015_v52 = vcombine.low %v393_v40, %v401_v41 }
  0x42   :  { %v129_v47 = vld [vmem:[#allocation5 + $0xc0] sm:$0xff]  ;;  %5048 = vmatpush1.bf16.msra.mxu0 %v8759_v50 }
  0x43   :  { %v377_v48 = vld [vmem:[#allocation5 + $0x880] sm:$0xff]  ;;  %v8744_v53 = vcombine.high %v121_v46, %v129_v47  ;;  %5160 = vmatprep.subr.bf16.mxu1 %v9016_v45  ;;  %v8743_v60 = vcombine.low %v121_v46, %v129_v47 }
  0x44   :  { %v385_v49 = vld [vmem:[#allocation5 + $0x8c0] sm:$0xff]  ;;  %5161 = vmatpush1.bf16.msra.mxu1 %v9015_v52 }
  0x45   :  { %v105_v51 = vld [vmem:[#allocation5] sm:$0xff]  ;;  %v9000_v55 = vcombine.high %v377_v48, %v385_v49  ;;  %5049 = vmatprep.subr.bf16.mxu0 %v8744_v53  ;;  %v8999_v61 = vcombine.low %v377_v48, %v385_v49 }
  0x46   :  { %v113_v54 = vld [vmem:[#allocation5 + $0x40] sm:$0xff]  ;;  %5050 = vmatpush1.bf16.msra.mxu0 %v8743_v60 }
  0x47   :  { %v10149_v56 = vld [vmem:[#allocation2 + $0x4] ss:$24 sps:$4 sm:$0xff]   ;;  %v8728_v62 = vcombine.high %v105_v51, %v113_v54  ;;  %5162 = vmatprep.subr.bf16.mxu1 %v9000_v55  ;;  %v8727_v4 = vcombine.low %v105_v51, %v113_v54 }
  0x48   :  { %v361_v57 = vld [vmem:[#allocation5 + $0x800] sm:$0xff]  ;;  %5069 = vmatprep.mubr.bf16.mxu0 %v10149_v56  ;;  %5163 = vmatpush1.bf16.msra.mxu1 %v8999_v61 }
  0x49   :  { %v369_v58 = vld [vmem:[#allocation5 + $0x840] sm:$0xff]  ;;  %5051 = vmatprep.subr.bf16.mxu0 %v8728_v62 }
  0x4a   :  { %v9764_v59 = vld [vmem:[#allocation2 + $0xc] ss:$24 sps:$4 sm:$0xff]   ;;  %v8984_v0 = vcombine.high %v361_v57, %v369_v58  ;;  %v8983_v5 = vcombine.low %v361_v57, %v369_v58  ;;  %5052 = vmatpush1.bf16.msra.mxu0 %v8727_v4 }
  0x4b   :  { %v345_v63 = vld [vmem:[#allocation5 + $0x780] sm:$0xff]  ;;  %5182 = vmatprep.mubr.bf16.mxu1 %v9764_v59  ;;  %v226_v4 = vld [vmem:[#allocation5 + $0x3c8] sm:$0xff] }
  0x4c   :  { %v353_v1 = vld [vmem:[#allocation5 + $0x7c0] sm:$0xff]  ;;  %5164 = vmatprep.subr.bf16.mxu1 %v8984_v0 }
  0x4d   :  { %v601_v2 = vld [vmem:[#allocation5 + $0xf80] sm:$0xff]  ;;  %v8968_v6 = vcombine.high %v345_v63, %v353_v1  ;;  %v8967_v12 = vcombine.low %v345_v63, %v353_v1  ;;  %5165 = vmatpush1.bf16.msra.mxu1 %v8983_v5 }
  0x4e   :  { %v609_v3 = vld [vmem:[#allocation5 + $0xfc0] sm:$0xff] }
  0x4f   :  { %v9224_v7 = vcombine.high %v601_v2, %v609_v3  ;;  %v329_v8 = vld [vmem:[#allocation5 + $0x700] sm:$0xff]  ;;  %5053 = vmatprep.subr.bf16.mxu0 %v8968_v6  ;;  %v9223_v13 = vcombine.low %v601_v2, %v609_v3  ;;  %v218_v3 = vld [vmem:[#allocation5 + $0x388] sm:$0xff] }
  0x50   :  { %v337_v9 = vld [vmem:[#allocation5 + $0x740] sm:$0xff]  ;;  %5054 = vmatpush2.bf16.msra.mxu0 %v8967_v12  ;;  %v202_v12 = vld [vmem:[#allocation5 + $0x308] sm:$0xff] }
  0x51   :  { %v585_v10 = vld [vmem:[#allocation5 + $0xf00] sm:$0xff]  ;;  %v8952_v14 = vcombine.high %v329_v8, %v337_v9  ;;  %5166 = vmatprep.subr.bf16.mxu1 %v9224_v7  ;;  %v8951_v20 = vcombine.low %v329_v8, %v337_v9  ;;  %v8842_v8 = vcombine.high %v218_v3, %v226_v4 }
  0x52   :  { %v593_v11 = vld [vmem:[#allocation5 + $0xf40] sm:$0xff]  ;;  %5167 = vmatpush2.bf16.msra.mxu1 %v9223_v13  ;;  %v210_v13 = vld [vmem:[#allocation5 + $0x348] sm:$0xff] }
  0x53   :  { %v9208_v15 = vcombine.high %v585_v10, %v593_v11  ;;  %v313_v16 = vld [vmem:[#allocation5 + $0x680] sm:$0xff]  ;;  %5055 = vmatprep.subr.bf16.mxu0 %v8952_v14  ;;  %v9207_v21 = vcombine.low %v585_v10, %v593_v11 }
  0x54   :  { %v321_v17 = vld [vmem:[#allocation5 + $0x6c0] sm:$0xff]  ;;  %5056 = vmatpush2.bf16.msra.mxu0 %v8951_v20 }
  0x55   :  { %v569_v18 = vld [vmem:[#allocation5 + $0xe80] sm:$0xff]  ;;  %v8936_v22 = vcombine.high %v313_v16, %v321_v17  ;;  %5168 = vmatprep.subr.bf16.mxu1 %v9208_v15  ;;  %v8935_v28 = vcombine.low %v313_v16, %v321_v17  ;;  %v8841_v16 = vcombine.low %v218_v3, %v226_v4 }
  0x56   :  { %v577_v19 = vld [vmem:[#allocation5 + $0xec0] sm:$0xff]  ;;  %5169 = vmatpush2.bf16.msra.mxu1 %v9207_v21 }
  0x57   :  { %v297_v23 = vld [vmem:[#allocation5 + $0x600] sm:$0xff]  ;;  %v9192_v24 = vcombine.high %v569_v18, %v577_v19  ;;  %5057 = vmatprep.subr.bf16.mxu0 %v8936_v22  ;;  %v9191_v29 = vcombine.low %v569_v18, %v577_v19  ;;  %v8826_v18 = vcombine.high %v202_v12, %v210_v13  ;;  %v10154_v19 = vld [vmem:[#allocation2 + $0x34] ss:$24 sps:$4 sm:$0xff]  }
  0x58   :  { %v305_v25 = vld [vmem:[#allocation5 + $0x640] sm:$0xff]  ;;  %5058 = vmatpush2.bf16.msra.mxu0 %v8935_v28  ;;  %v9770_v22 = vld [vmem:[#allocation2 + $0x3c] ss:$24 sps:$4 sm:$0xff]  }
  0x59   :  { %v553_v26 = vld [vmem:[#allocation5 + $0xe00] sm:$0xff]  ;;  %v8920_v30 = vcombine.high %v297_v23, %v305_v25  ;;  %5170 = vmatprep.subr.bf16.mxu1 %v9192_v24  ;;  %v8919_v36 = vcombine.low %v297_v23, %v305_v25  ;;  %v186_v23 = vld [vmem:[#allocation5 + $0x288] sm:$0xff] }
  0x5a   :  { %v561_v27 = vld [vmem:[#allocation5 + $0xe40] sm:$0xff]  ;;  %5171 = vmatpush2.bf16.msra.mxu1 %v9191_v29  ;;  %v194_v24 = vld [vmem:[#allocation5 + $0x2c8] sm:$0xff] }
  0x5b   :  { %v281_v31 = vld [vmem:[#allocation5 + $0x580] sm:$0xff]  ;;  %v9176_v32 = vcombine.high %v553_v26, %v561_v27  ;;  %5059 = vmatprep.subr.bf16.mxu0 %v8920_v30  ;;  %v9175_v37 = vcombine.low %v553_v26, %v561_v27  ;;  %v8825_v26 = vcombine.low %v202_v12, %v210_v13  ;;  %v8810_v28 = vcombine.high %v186_v23, %v194_v24  ;;  %v10184_v12 = vld [vmem:[#allocation2 + $0x98] ss:$24 sps:$4 sm:$0xff]  }
  0x5c   :  { %v289_v33 = vld [vmem:[#allocation5 + $0x5c0] sm:$0xff]  ;;  %5060 = vmatpush2.bf16.msra.mxu0 %v8919_v36  ;;  %v8809_v36 = vcombine.low %v186_v23, %v194_v24  ;;  %v354_v23 = vld [vmem:[#allocation5 + $0x7c8] sm:$0xff] }
  0x5d   :  { %v537_v34 = vld [vmem:[#allocation5 + $0xd80] sm:$0xff]  ;;  %v8904_v38 = vcombine.high %v281_v31, %v289_v33  ;;  %5172 = vmatprep.subr.bf16.mxu1 %v9176_v32  ;;  %v8903_v44 = vcombine.low %v281_v31, %v289_v33  ;;  %v10158_v31 = vld [vmem:[#allocation2 + $0x30] ss:$24 sps:$4 sm:$0xff]  }
  0x5e   :  { %v545_v35 = vld [vmem:[#allocation5 + $0xdc0] sm:$0xff]  ;;  %5173 = vmatpush2.bf16.msra.mxu1 %v9175_v37  ;;  %v170_v32 = vld [vmem:[#allocation5 + $0x208] sm:$0xff] }
  0x5f   :  { %v9160_v39 = vcombine.high %v537_v34, %v545_v35  ;;  %v265_v40 = vld [vmem:[#allocation5 + $0x500] sm:$0xff]  ;;  %5061 = vmatprep.subr.bf16.mxu0 %v8904_v38  ;;  %v9159_v45 = vcombine.low %v537_v34, %v545_v35  ;;  %v178_v33 = vld [vmem:[#allocation5 + $0x248] sm:$0xff]  ;;  %v10160_v34 = vld [vmem:[#allocation2 + $0x38] ss:$24 sps:$4 sm:$0xff]  }
  0x60   :  { %v273_v41 = vld [vmem:[#allocation5 + $0x540] sm:$0xff]  ;;  %5062 = vmatpush2.bf16.msra.mxu0 %v8903_v44  ;;  %v8794_v38 = vcombine.high %v170_v32, %v178_v33  ;;  %v162_v44 = vld [vmem:[#allocation5 + $0x1c8] sm:$0xff] }
  0x61   :  { %v521_v42 = vld [vmem:[#allocation5 + $0xd00] sm:$0xff]  ;;  %v8888_v46 = vcombine.high %v265_v40, %v273_v41  ;;  %5174 = vmatprep.subr.bf16.mxu1 %v9160_v39  ;;  %v8887_v52 = vcombine.low %v265_v40, %v273_v41 }
  0x62   :  { %v529_v43 = vld [vmem:[#allocation5 + $0xd40] sm:$0xff]  ;;  %5175 = vmatpush2.bf16.msra.mxu1 %v9159_v45 }
  0x63   :  { %v9144_v47 = vcombine.high %v521_v42, %v529_v43  ;;  %v249_v48 = vld [vmem:[#allocation5 + $0x480] sm:$0xff]  ;;  %5063 = vmatprep.subr.bf16.mxu0 %v8888_v46  ;;  %v9143_v53 = vcombine.low %v521_v42, %v529_v43  ;;  %v154_v43 = vld [vmem:[#allocation5 + $0x188] sm:$0xff]  ;;  %v8793_v46 = vcombine.low %v170_v32, %v178_v33 }
  0x64   :  { %v257_v49 = vld [vmem:[#allocation5 + $0x4c0] sm:$0xff]  ;;  %5064 = vmatpush2.bf16.msra.mxu0 %v8887_v52  ;;  %v138_v52 = vld [vmem:[#allocation5 + $0x108] sm:$0xff] }
  0x65   :  { %v505_v50 = vld [vmem:[#allocation5 + $0xc80] sm:$0xff]  ;;  %v8872_v54 = vcombine.high %v249_v48, %v257_v49  ;;  %5176 = vmatprep.subr.bf16.mxu1 %v9144_v47  ;;  %v8871_v61 = vcombine.low %v249_v48, %v257_v49  ;;  %v8778_v48 = vcombine.high %v154_v43, %v162_v44  ;;  %v330_v32 = vld [vmem:[#allocation5 + $0x708] sm:$0xff] }
  0x66   :  { %v513_v51 = vld [vmem:[#allocation5 + $0xcc0] sm:$0xff]  ;;  %5177 = vmatpush2.bf16.msra.mxu1 %v9143_v53  ;;  %v146_v53 = vld [vmem:[#allocation5 + $0x148] sm:$0xff] }
  0x67   :  { %v233_v55 = vld [vmem:[#allocation5 + $0x400] sm:$0xff]  ;;  %v9128_v57 = vcombine.high %v505_v50, %v513_v51  ;;  %5065 = vmatprep.subr.bf16.mxu0 %v8872_v54  ;;  %v9127_v62 = vcombine.low %v505_v50, %v513_v51  ;;  %v8761_v3 = vcombine.low %v138_v52, %v146_v53  ;;  %v338_v33 = vld [vmem:[#allocation5 + $0x748] sm:$0xff] }
  0x68   :  { %v241_v58 = vld [vmem:[#allocation5 + $0x440] sm:$0xff]  ;;  %5066 = vmatpush2.bf16.msra.mxu0 %v8871_v61 }
  0x69   :  { %v489_v59 = vld [vmem:[#allocation5 + $0xc00] sm:$0xff]  ;;  %v8856_v63 = vcombine.high %v233_v55, %v241_v58  ;;  %5178 = vmatprep.subr.bf16.mxu1 %v9128_v57  ;;  %v8855_v5 = vcombine.low %v233_v55, %v241_v58  ;;  %v8777_v57 = vcombine.low %v154_v43, %v162_v44 }
  0x6a   :  { %v497_v60 = vld [vmem:[#allocation5 + $0xc40] sm:$0xff]  ;;  %5179 = vmatpush2.bf16.msra.mxu1 %v9127_v62 }
  0x6b   :  { %v729_v0 = vld [vmem:[#allocation5 + $0x1380] sm:$0xff]  ;;  %v9112_v1 = vcombine.high %v489_v59, %v497_v60  ;;  %5067 = vmatprep.subr.bf16.mxu0 %v8856_v63  ;;  %v9111_v6 = vcombine.low %v489_v59, %v497_v60  ;;  %v8762_v59 = vcombine.high %v138_v52, %v146_v53  ;;  %v10174_v60 = vld [vmem:[#allocation2 + $0x94] ss:$24 sps:$4 sm:$0xff]  }
  0x6c   :  { %v737_v2 = vld [vmem:[#allocation5 + $0x13c0] sm:$0xff]  ;;  %5068 = vmatpush2.bf16.msra.mxu0 %v8855_v5  ;;  %v10177_v63 = vld [vmem:[#allocation2 + $0x9c] ss:$24 sps:$4 sm:$0xff]  }
  0x6d   :  { %v9352_v7 = vcombine.high %v729_v0, %v737_v2  ;;  %5180 = vmatprep.subr.bf16.mxu1 %v9112_v1  ;;  %v713_v9 = vld [vmem:[#allocation5 + $0x1300] sm:$0xff]  ;;  %v9351_v15 = vcombine.low %v729_v0, %v737_v2  ;;  %v122_v0 = vld [vmem:[#allocation5 + $0x88] sm:$0xff] }
  0x6e   :  { %v721_v10 = vld [vmem:[#allocation5 + $0x1340] sm:$0xff]  ;;  %5181 = vmatpush2.bf16.msra.mxu1 %v9111_v6  ;;  %v130_v1 = vld [vmem:[#allocation5 + $0xc8] sm:$0xff] }
  0x6f   :  { %v10152_v11 = vld [vmem:[#allocation2] ss:$24 sps:$4 sm:$0xff]   ;;  %5263 = vmatprep.subr.bf16.mxu0 %v9352_v7  ;;  %v9336_v17 = vcombine.high %v713_v9, %v721_v10  ;;  %5376 = vmatprep.subr.bf16.mxu1 %v8842_v8  ;;  %v9335_v25 = vcombine.low %v713_v9, %v721_v10  ;;  %v10162_v39 = vld [vmem:[#allocation2 + $0x64] ss:$24 sps:$4 sm:$0xff]   ;;  %v8746_v5 = vcombine.high %v122_v0, %v130_v1  ;;  %v10182_v8 = vld [vmem:[#allocation2 + $0x90] ss:$24 sps:$4 sm:$0xff]  }
  0x70   :  { %v9767_v14 = vld [vmem:[#allocation2 + $0x8] ss:$24 sps:$4 sm:$0xff]   ;;  %5070 = vmatmul.mubr.bf16.vlgmr.msra.gmra.mxu0 %v10152_v11  ;;  %v10165_v42 = vld [vmem:[#allocation2 + $0x6c] ss:$24 sps:$4 sm:$0xff]  }
  0x71   :  { %v697_v20 = vld [vmem:[#allocation5 + $0x1280] sm:$0xff]  ;;  %5183 = vmatmul.mubr.bf16.vlgmr.msra.gmra.mxu1 %v9767_v14  ;;  %5264 = vmatpush1.bf16.msra.mxu0 %v9351_v15  ;;  %v106_v9 = vld [vmem:[#allocation5 + $0x8] sm:$0xff]  ;;  %v8745_v14 = vcombine.low %v122_v0, %v130_v1 }
  0x72   :  { %v705_v21 = vld [vmem:[#allocation5 + $0x12c0] sm:$0xff]  ;;  %5377 = vmatpush1.bf16.msra.mxu1 %v8841_v16  ;;  %5265 = vmatprep.subr.bf16.mxu0 %v9336_v17  ;;  %v114_v10 = vld [vmem:[#allocation5 + $0x48] sm:$0xff] }
  0x73   :  { %v9320_v27 = vcombine.high %v697_v20, %v705_v21  ;;  %5378 = vmatprep.subr.bf16.mxu1 %v8826_v18  ;;  %5079 = vmatprep.mubr.bf16.mxu0 %v10154_v19  ;;  %v681_v29 = vld [vmem:[#allocation5 + $0x1200] sm:$0xff]  ;;  %v9319_v35 = vcombine.low %v697_v20, %v705_v21  ;;  %v8730_v16 = vcombine.high %v106_v9, %v114_v10 }
  0x74   :  { %v689_v30 = vld [vmem:[#allocation5 + $0x1240] sm:$0xff]  ;;  %5192 = vmatprep.mubr.bf16.mxu1 %v9770_v22  ;;  %v346_v22 = vld [vmem:[#allocation5 + $0x788] sm:$0xff] }
  0x75   :  { %5266 = vmatpush1.bf16.msra.mxu0 %v9335_v25  ;;  %v9304_v37 = vcombine.high %v681_v29, %v689_v30  ;;  %v665_v40 = vld [vmem:[#allocation5 + $0x1180] sm:$0xff]  ;;  %v9303_v45 = vcombine.low %v681_v29, %v689_v30  ;;  %v8729_v25 = vcombine.low %v106_v9, %v114_v10  ;;  %v290_v9 = vld [vmem:[#allocation5 + $0x5c8] sm:$0xff] }
  0x76   :  { %5379 = vmatpush1.bf16.msra.mxu1 %v8825_v26  ;;  %5267 = vmatprep.subr.bf16.mxu0 %v9320_v27  ;;  %v673_v41 = vld [vmem:[#allocation5 + $0x11c0] sm:$0xff]  ;;  %v8970_v27 = vcombine.high %v346_v22, %v354_v23 }
  0x77   :  { %5380 = vmatprep.subr.bf16.mxu1 %v8810_v28  ;;  %v9288_v47 = vcombine.high %v665_v40, %v673_v41  ;;  %v649_v49 = vld [vmem:[#allocation5 + $0x1100] sm:$0xff]  ;;  %v9287_v55 = vcombine.low %v665_v40, %v673_v41  ;;  %v8954_v40 = vcombine.high %v330_v32, %v338_v33  ;;  %v10198_v41 = vld [vmem:[#allocation2 + $0xf4] ss:$24 sps:$4 sm:$0xff]  }
  0x78   :  { %5080 = vmatmul.mubr.bf16.gmra.mxu0 %v10158_v31  ;;  %v657_v50 = vld [vmem:[#allocation5 + $0x1140] sm:$0xff] }
  0x79   :  { %5193 = vmatmul.mubr.bf16.gmra.mxu1 %v10160_v34  ;;  %5268 = vmatpush1.bf16.msra.mxu0 %v9319_v35  ;;  %v10170_v51 = vld [vmem:[#allocation2 + $0x60] ss:$24 sps:$4 sm:$0xff]   ;;  %v9272_v58 = vcombine.high %v649_v49, %v657_v50  ;;  %v9271_v2 = vcombine.low %v649_v49, %v657_v50  ;;  %v10186_v17 = vld [vmem:[#allocation2 + $0xc4] ss:$24 sps:$4 sm:$0xff]   ;;  %v8953_v49 = vcombine.low %v330_v32, %v338_v33 }
  0x7a   :  { %5381 = vmatpush1.bf16.msra.mxu1 %v8809_v36  ;;  %5269 = vmatprep.subr.bf16.mxu0 %v9304_v37  ;;  %v10172_v54 = vld [vmem:[#allocation2 + $0x68] ss:$24 sps:$4 sm:$0xff]   ;;  %v10189_v21 = vld [vmem:[#allocation2 + $0xcc] ss:$24 sps:$4 sm:$0xff]   ;;  %v8969_v37 = vcombine.low %v346_v22, %v354_v23 }
  0x7b   :  { %5382 = vmatprep.subr.bf16.mxu1 %v8794_v38  ;;  %5089 = vmatprep.mubr.bf16.mxu0 %v10162_v39  ;;  %v633_v61 = vld [vmem:[#allocation5 + $0x1080] sm:$0xff]  ;;  %v266_v22 = vld [vmem:[#allocation5 + $0x508] sm:$0xff] }
  0x7c   :  { %5202 = vmatprep.mubr.bf16.mxu1 %v10165_v42  ;;  %v641_v62 = vld [vmem:[#allocation5 + $0x10c0] sm:$0xff]  ;;  %v274_v23 = vld [vmem:[#allocation5 + $0x548] sm:$0xff] }
  0x7d   :  { %5270 = vmatpush1.bf16.msra.mxu0 %v9303_v45  ;;  %v9256_v4 = vcombine.high %v633_v61, %v641_v62  ;;  %v617_v6 = vld [vmem:[#allocation5 + $0x1000] sm:$0xff]  ;;  %v9255_v13 = vcombine.low %v633_v61, %v641_v62  ;;  %v10201_v45 = vld [vmem:[#allocation2 + $0xfc] ss:$24 sps:$4 sm:$0xff]   ;;  %v10208_v61 = vld [vmem:[#allocation2 + $0xf8] ss:$24 sps:$4 sm:$0xff]  }
  0x7e   :  { %5383 = vmatpush1.bf16.msra.mxu1 %v8793_v46  ;;  %5271 = vmatprep.subr.bf16.mxu0 %v9288_v47  ;;  %v625_v7 = vld [vmem:[#allocation5 + $0x1040] sm:$0xff]  ;;  %v314_v46 = vld [vmem:[#allocation5 + $0x688] sm:$0xff] }
  0x7f   :  { %5384 = vmatprep.subr.bf16.mxu1 %v8778_v48  ;;  %v9240_v15 = vcombine.high %v617_v6, %v625_v7  ;;  %v857_v18 = vld [vmem:[#allocation5 + $0x1780] sm:$0xff]  ;;  %v9239_v24 = vcombine.low %v617_v6, %v625_v7  ;;  %v322_v47 = vld [vmem:[#allocation5 + $0x6c8] sm:$0xff] }
  0x80   :  { %5090 = vmatmul.mubr.bf16.gmra.mxu0 %v10170_v51  ;;  %v865_v20 = vld [vmem:[#allocation5 + $0x17c0] sm:$0xff]  ;;  %v8938_v52 = vcombine.high %v314_v46, %v322_v47  ;;  %v8937_v0 = vcombine.low %v314_v46, %v322_v47  ;;  %v282_v7 = vld [vmem:[#allocation5 + $0x588] sm:$0xff] }
  0x81   :  { %5203 = vmatmul.mubr.bf16.gmra.mxu1 %v10172_v54  ;;  %5272 = vmatpush1.bf16.msra.mxu0 %v9287_v55  ;;  %v9480_v26 = vcombine.high %v857_v18, %v865_v20  ;;  %v841_v28 = vld [vmem:[#allocation5 + $0x1700] sm:$0xff]  ;;  %v9479_v36 = vcombine.low %v857_v18, %v865_v20 }
  0x82   :  { %5385 = vmatpush1.bf16.msra.mxu1 %v8777_v57  ;;  %5273 = vmatprep.subr.bf16.mxu0 %v9272_v58  ;;  %v849_v29 = vld [vmem:[#allocation5 + $0x1740] sm:$0xff]  ;;  %v10206_v57 = vld [vmem:[#allocation2 + $0xf0] ss:$24 sps:$4 sm:$0xff]  }
  0x83   :  { %5386 = vmatprep.subr.bf16.mxu1 %v8762_v59  ;;  %5099 = vmatprep.mubr.bf16.mxu0 %v10174_v60  ;;  %v10194_v30 = vld [vmem:[#allocation2 + $0xc0] ss:$24 sps:$4 sm:$0xff]   ;;  %v9464_v38 = vcombine.high %v841_v28, %v849_v29  ;;  %v9463_v48 = vcombine.low %v841_v28, %v849_v29  ;;  %v298_v58 = vld [vmem:[#allocation5 + $0x608] sm:$0xff]  ;;  %v8890_v28 = vcombine.high %v266_v22, %v274_v23 }
  0x84   :  { %5212 = vmatprep.mubr.bf16.mxu1 %v10177_v63  ;;  %v10196_v35 = vld [vmem:[#allocation2 + $0xc8] ss:$24 sps:$4 sm:$0xff]   ;;  %v10213_v6 = vld [vmem:[#allocation2 + $0x12c] ss:$24 sps:$4 sm:$0xff]  }
  0x85   :  { %5274 = vmatpush1.bf16.msra.mxu0 %v9271_v2  ;;  %v825_v43 = vld [vmem:[#allocation5 + $0x1680] sm:$0xff]  ;;  %v306_v59 = vld [vmem:[#allocation5 + $0x648] sm:$0xff] }
  0x86   :  { %5387 = vmatpush1.bf16.msra.mxu1 %v8761_v3  ;;  %5275 = vmatprep.subr.bf16.mxu0 %v9256_v4  ;;  %v833_v44 = vld [vmem:[#allocation5 + $0x16c0] sm:$0xff]  ;;  %v8922_v2 = vcombine.high %v298_v58, %v306_v59  ;;  %v10222_v29 = vld [vmem:[#allocation2 + $0x154] ss:$24 sps:$4 sm:$0xff]  }
  0x87   :  { %5388 = vmatprep.subr.bf16.mxu1 %v8746_v5  ;;  %v9448_v50 = vcombine.high %v825_v43, %v833_v44  ;;  %v809_v53 = vld [vmem:[#allocation5 + $0x1600] sm:$0xff]  ;;  %v9447_v62 = vcombine.low %v825_v43, %v833_v44  ;;  %v8889_v43 = vcombine.low %v266_v22, %v274_v23  ;;  %v722_v22 = vld [vmem:[#allocation5 + $0x1348] sm:$0xff] }
  0x88   :  { %5100 = vmatmul.mubr.bf16.gmra.mxu0 %v10182_v8  ;;  %v817_v55 = vld [vmem:[#allocation5 + $0x1640] sm:$0xff] }
  0x89   :  { %5213 = vmatmul.mubr.bf16.gmra.mxu1 %v10184_v12  ;;  %5276 = vmatpush1.bf16.msra.mxu0 %v9255_v13  ;;  %v9432_v1 = vcombine.high %v809_v53, %v817_v55  ;;  %v10210_v3 = vld [vmem:[#allocation2 + $0x124] ss:$24 sps:$4 sm:$0xff]   ;;  %v9431_v10 = vcombine.low %v809_v53, %v817_v55  ;;  %v8921_v13 = vcombine.low %v298_v58, %v306_v59  ;;  %v10218_v20 = vld [vmem:[#allocation2 + $0x120] ss:$24 sps:$4 sm:$0xff]  }
  0x8a   :  { %5389 = vmatpush1.bf16.msra.mxu1 %v8745_v14  ;;  %5277 = vmatprep.subr.bf16.mxu0 %v9240_v15  ;;  %v793_v4 = vld [vmem:[#allocation5 + $0x1580] sm:$0xff]  ;;  %v8906_v15 = vcombine.high %v282_v7, %v290_v9  ;;  %v10232_v53 = vld [vmem:[#allocation2 + $0x158] ss:$24 sps:$4 sm:$0xff]  }
  0x8b   :  { %5390 = vmatprep.subr.bf16.mxu1 %v8730_v16  ;;  %5109 = vmatprep.mubr.bf16.mxu0 %v10186_v17  ;;  %v801_v5 = vld [vmem:[#allocation5 + $0x15c0] sm:$0xff] }
  0x8c   :  { %5222 = vmatprep.mubr.bf16.mxu1 %v10189_v21  ;;  %v9416_v14 = vcombine.high %v793_v4, %v801_v5  ;;  %v777_v16 = vld [vmem:[#allocation5 + $0x1500] sm:$0xff] }
  0x8d   :  { %5278 = vmatpush1.bf16.msra.mxu0 %v9239_v24  ;;  %v785_v18 = vld [vmem:[#allocation5 + $0x1540] sm:$0xff] }
  0x8e   :  { %5391 = vmatpush1.bf16.msra.mxu1 %v8729_v25  ;;  %5279 = vmatprep.subr.bf16.mxu0 %v9480_v26  ;;  %v10220_v24 = vld [vmem:[#allocation2 + $0x128] ss:$24 sps:$4 sm:$0xff]   ;;  %v9415_v25 = vcombine.low %v793_v4, %v801_v5  ;;  %v8905_v26 = vcombine.low %v282_v7, %v290_v9 }
  0x8f   :  { %5392 = vmatprep.subr.bf16.mxu1 %v8970_v27  ;;  %v9400_v27 = vcombine.high %v777_v16, %v785_v18  ;;  %v761_v32 = vld [vmem:[#allocation5 + $0x1480] sm:$0xff]  ;;  %v730_v4 = vld [vmem:[#allocation5 + $0x1388] sm:$0xff] }
  0x90   :  { %5110 = vmatmul.mubr.bf16.gmra.mxu0 %v10194_v30  ;;  %v769_v33 = vld [vmem:[#allocation5 + $0x14c0] sm:$0xff]  ;;  %v738_v5 = vld [vmem:[#allocation5 + $0x13c8] sm:$0xff] }
  0x91   :  { %5223 = vmatmul.mubr.bf16.gmra.mxu1 %v10196_v35  ;;  %5280 = vmatpush2.bf16.msra.mxu0 %v9479_v36  ;;  %v10225_v36 = vld [vmem:[#allocation2 + $0x15c] ss:$24 sps:$4 sm:$0xff]   ;;  %v9384_v44 = vcombine.high %v761_v32, %v769_v33  ;;  %v745_v47 = vld [vmem:[#allocation5 + $0x1400] sm:$0xff]  ;;  %v9383_v55 = vcombine.low %v761_v32, %v769_v33  ;;  %v442_v32 = vld [vmem:[#allocation5 + $0xa88] sm:$0xff] }
  0x92   :  { %5393 = vmatpush2.bf16.msra.mxu1 %v8969_v37  ;;  %5281 = vmatprep.subr.bf16.mxu0 %v9464_v38  ;;  %v250_v37 = vld [vmem:[#allocation5 + $0x488] sm:$0xff] }
  0x93   :  { %5394 = vmatprep.subr.bf16.mxu1 %v8954_v40  ;;  %5119 = vmatprep.mubr.bf16.mxu0 %v10198_v41  ;;  %v258_v38 = vld [vmem:[#allocation5 + $0x4c8] sm:$0xff]  ;;  %v9399_v40 = vcombine.low %v777_v16, %v785_v18 }
  0x94   :  { %5232 = vmatprep.mubr.bf16.mxu1 %v10201_v45  ;;  %v8874_v46 = vcombine.high %v250_v37, %v258_v38  ;;  %v8873_v58 = vcombine.low %v250_v37, %v258_v38  ;;  %v10240_v16 = vld [vmem:[#allocation2 + $0x10] ss:$24 sps:$4 sm:$0xff]  }
  0x95   :  { %5282 = vmatpush2.bf16.msra.mxu0 %v9463_v48  ;;  %v753_v48 = vld [vmem:[#allocation5 + $0x1440] sm:$0xff]  ;;  %v714_v18 = vld [vmem:[#allocation5 + $0x1308] sm:$0xff] }
  0x96   :  { %5395 = vmatpush2.bf16.msra.mxu1 %v8953_v49  ;;  %5283 = vmatprep.subr.bf16.mxu0 %v9448_v50  ;;  %v10230_v49 = vld [vmem:[#allocation2 + $0x150] ss:$24 sps:$4 sm:$0xff]   ;;  %v9368_v59 = vcombine.high %v745_v47, %v753_v48  ;;  %v9367_v7 = vcombine.low %v745_v47, %v753_v48  ;;  %v10248_v48 = vld [vmem:[#allocation2 + $0x40] ss:$24 sps:$4 sm:$0xff]  }
  0x97   :  { %5396 = vmatprep.subr.bf16.mxu1 %v8938_v52  ;;  %v234_v50 = vld [vmem:[#allocation5 + $0x408] sm:$0xff] }
  0x98   :  { %5120 = vmatmul.mubr.bf16.gmra.mxu0 %v10206_v57  ;;  %v242_v52 = vld [vmem:[#allocation5 + $0x448] sm:$0xff] }
  0x99   :  { %5233 = vmatmul.mubr.bf16.gmra.mxu1 %v10208_v61  ;;  %5284 = vmatpush2.bf16.msra.mxu0 %v9447_v62  ;;  %v8858_v62 = vcombine.high %v234_v50, %v242_v52  ;;  %v8857_v9 = vcombine.low %v234_v50, %v242_v52  ;;  %v450_v33 = vld [vmem:[#allocation5 + $0xac8] sm:$0xff] }
  0x9a   :  { %5397 = vmatpush2.bf16.msra.mxu1 %v8937_v0  ;;  %5285 = vmatprep.subr.bf16.mxu0 %v9432_v1  ;;  %v10234_v0 = vld [vmem:[#allocation2 + $0x14] ss:$24 sps:$4 sm:$0xff]  }
  0x9b   :  { %5398 = vmatprep.subr.bf16.mxu1 %v8922_v2  ;;  %5129 = vmatprep.mubr.bf16.mxu0 %v10210_v3  ;;  %v474_v1 = vld [vmem:[#allocation5 + $0xb88] sm:$0xff] }
  0x9c   :  { %5242 = vmatprep.mubr.bf16.mxu1 %v10213_v6  ;;  %v482_v2 = vld [vmem:[#allocation5 + $0xbc8] sm:$0xff] }
  0x9d   :  { %5286 = vmatpush2.bf16.msra.mxu0 %v9431_v10  ;;  %v9098_v10 = vcombine.high %v474_v1, %v482_v2  ;;  %v9097_v23 = vcombine.low %v474_v1, %v482_v2  ;;  %v698_v37 = vld [vmem:[#allocation5 + $0x1288] sm:$0xff] }
  0x9e   :  { %5399 = vmatpush2.bf16.msra.mxu1 %v8921_v13  ;;  %5287 = vmatprep.subr.bf16.mxu0 %v9416_v14  ;;  %v9354_v13 = vcombine.high %v730_v4, %v738_v5  ;;  %v458_v14 = vld [vmem:[#allocation5 + $0xb08] sm:$0xff] }
  0x9f   :  { %5400 = vmatprep.subr.bf16.mxu1 %v8906_v15  ;;  %v466_v15 = vld [vmem:[#allocation5 + $0xb48] sm:$0xff] }
  0xa0   :  { %5130 = vmatmul.mubr.bf16.gmra.mxu0 %v10218_v20  ;;  %v9081_v38 = vcombine.low %v458_v14, %v466_v15  ;;  %v434_v47 = vld [vmem:[#allocation5 + $0xa48] sm:$0xff] }
  0xa1   :  { %5243 = vmatmul.mubr.bf16.gmra.mxu1 %v10220_v24  ;;  %5288 = vmatpush2.bf16.msra.mxu0 %v9415_v25  ;;  %v9353_v25 = vcombine.low %v730_v4, %v738_v5  ;;  %v682_v50 = vld [vmem:[#allocation5 + $0x1208] sm:$0xff] }
  0xa2   :  { %5401 = vmatpush2.bf16.msra.mxu1 %v8905_v26  ;;  %5289 = vmatprep.subr.bf16.mxu0 %v9400_v27  ;;  %v9082_v26 = vcombine.high %v458_v14, %v466_v15  ;;  %v9338_v27 = vcombine.high %v714_v18, %v722_v22  ;;  %v690_v52 = vld [vmem:[#allocation5 + $0x1248] sm:$0xff] }
  0xa3   :  { %5402 = vmatprep.subr.bf16.mxu1 %v8890_v28  ;;  %5139 = vmatprep.mubr.bf16.mxu0 %v10222_v29  ;;  %v10242_v28 = vld [vmem:[#allocation2 + $0x44] ss:$24 sps:$4 sm:$0xff]   ;;  %v410_v1 = vld [vmem:[#allocation5 + $0x988] sm:$0xff] }
  0xa4   :  { %5252 = vmatprep.mubr.bf16.mxu1 %v10225_v36  ;;  %v418_v2 = vld [vmem:[#allocation5 + $0x9c8] sm:$0xff] }
  0xa5   :  { %5290 = vmatpush2.bf16.msra.mxu0 %v9399_v40  ;;  %v9337_v40 = vcombine.low %v714_v18, %v722_v22  ;;  %v666_v4 = vld [vmem:[#allocation5 + $0x1188] sm:$0xff] }
  0xa6   :  { %5403 = vmatpush2.bf16.msra.mxu1 %v8889_v43  ;;  %5291 = vmatprep.subr.bf16.mxu0 %v9384_v44  ;;  %v9066_v43 = vcombine.high %v442_v32, %v450_v33  ;;  %v402_v14 = vld [vmem:[#allocation5 + $0x948] sm:$0xff] }
  0xa7   :  { %5404 = vmatprep.subr.bf16.mxu1 %v8874_v46  ;;  %v426_v46 = vld [vmem:[#allocation5 + $0xa08] sm:$0xff] }
  0xa8   :  { %5140 = vmatmul.mubr.bf16.gmra.mxu0 %v10230_v49  ;;  %v9049_v5 = vcombine.low %v426_v46, %v434_v47  ;;  %v10256_v15 = vld [vmem:[#allocation2 + $0x70] ss:$24 sps:$4 sm:$0xff]  }
  0xa9   :  { %5253 = vmatmul.mubr.bf16.gmra.mxu1 %v10232_v53  ;;  %5292 = vmatpush2.bf16.msra.mxu0 %v9383_v55  ;;  %v650_v18 = vld [vmem:[#allocation5 + $0x1108] sm:$0xff] }
  0xaa   :  { %5405 = vmatpush2.bf16.msra.mxu1 %v8873_v58  ;;  %5293 = vmatprep.subr.bf16.mxu0 %v9368_v59  ;;  %v9050_v58 = vcombine.high %v426_v46, %v434_v47  ;;  %v9306_v59 = vcombine.high %v682_v50, %v690_v52  ;;  %v658_v22 = vld [vmem:[#allocation5 + $0x1148] sm:$0xff]  ;;  %v10264_v47 = vld [vmem:[#allocation2 + $0xa0] ss:$24 sps:$4 sm:$0xff]  }
  0xab   :  { %5406 = vmatprep.subr.bf16.mxu1 %v8858_v62  ;;  %5295 = vmatprep.mubr.bf16.mxu0 %v10234_v0  ;;  %v10250_v62 = vld [vmem:[#allocation2 + $0x74] ss:$24 sps:$4 sm:$0xff]  }
  0xac   :  { %5408 = vmatprep.mubr.bf16.mxu1 %v10149_v56  ;;  %v706_v56 = vld [vmem:[#allocation5 + $0x12c8] sm:$0xff] }
  0xad   :  { %5294 = vmatpush2.bf16.msra.mxu0 %v9367_v7  ;;  %v9322_v44 = vcombine.high %v698_v37, %v706_v56  ;;  %v9321_v55 = vcombine.low %v698_v37, %v706_v56  ;;  %v9305_v7 = vcombine.low %v682_v50, %v690_v52  ;;  %v634_v37 = vld [vmem:[#allocation5 + $0x1088] sm:$0xff] }
  0xae   :  { %5407 = vmatpush2.bf16.msra.mxu1 %v8857_v9  ;;  %5489 = vmatprep.subr.bf16.mxu0 %v9098_v10  ;;  %v9034_v9 = vcombine.high %v410_v1, %v418_v2  ;;  %v370_v46 = vld [vmem:[#allocation5 + $0x848] sm:$0xff] }
  0xaf   :  { %5602 = vmatprep.subr.bf16.mxu1 %v9354_v13  ;;  %v394_v13 = vld [vmem:[#allocation5 + $0x908] sm:$0xff] }
  0xb0   :  { %5296 = vmatmul.mubr.bf16.vlgmr.msra.gmra.mxu0 %v10240_v16  ;;  %v9017_v56 = vcombine.low %v394_v13, %v402_v14  ;;  %v618_v50 = vld [vmem:[#allocation5 + $0x1008] sm:$0xff] }
  0xb1   :  { %5409 = vmatmul.mubr.bf16.vlgmr.msra.gmra.mxu1 %v10152_v11  ;;  %5490 = vmatpush1.bf16.msra.mxu0 %v9097_v23  ;;  %v9065_v11 = vcombine.low %v442_v32, %v450_v33  ;;  %v378_v32 = vld [vmem:[#allocation5 + $0x888] sm:$0xff] }
  0xb2   :  { %5603 = vmatpush1.bf16.msra.mxu1 %v9353_v25  ;;  %5491 = vmatprep.subr.bf16.mxu0 %v9082_v26  ;;  %v9018_v25 = vcombine.high %v394_v13, %v402_v14  ;;  %v9274_v26 = vcombine.high %v650_v18, %v658_v22  ;;  %v386_v33 = vld [vmem:[#allocation5 + $0x8c8] sm:$0xff] }
  0xb3   :  { %5604 = vmatprep.subr.bf16.mxu1 %v9338_v27  ;;  %5305 = vmatprep.mubr.bf16.mxu0 %v10242_v28  ;;  %v10258_v27 = vld [vmem:[#allocation2 + $0xa4] ss:$24 sps:$4 sm:$0xff]   ;;  %v626_v52 = vld [vmem:[#allocation5 + $0x1048] sm:$0xff] }
  0xb4   :  { %5418 = vmatprep.mubr.bf16.mxu1 %v10154_v19  ;;  %v674_v19 = vld [vmem:[#allocation5 + $0x11c8] sm:$0xff] }
  0xb5   :  { %5492 = vmatpush1.bf16.msra.mxu0 %v9081_v38  ;;  %v9290_v10 = vcombine.high %v666_v4, %v674_v19  ;;  %v9289_v23 = vcombine.low %v666_v4, %v674_v19  ;;  %v9273_v38 = vcombine.low %v650_v18, %v658_v22  ;;  %v858_v4 = vld [vmem:[#allocation5 + $0x1788] sm:$0xff] }
  0xb6   :  { %5605 = vmatpush1.bf16.msra.mxu1 %v9337_v40  ;;  %5493 = vmatprep.subr.bf16.mxu0 %v9066_v43  ;;  %v9002_v40 = vcombine.high %v378_v32, %v386_v33  ;;  %v594_v13 = vld [vmem:[#allocation5 + $0xf48] sm:$0xff] }
  0xb7   :  { %5606 = vmatprep.subr.bf16.mxu1 %v9322_v44  ;;  %v362_v44 = vld [vmem:[#allocation5 + $0x808] sm:$0xff] }
  0xb8   :  { %5306 = vmatmul.mubr.bf16.gmra.mxu0 %v10248_v48  ;;  %v8985_v19 = vcombine.low %v362_v44, %v370_v46  ;;  %v10272_v14 = vld [vmem:[#allocation2 + $0xd0] ss:$24 sps:$4 sm:$0xff]  }
  0xb9   :  { %5419 = vmatmul.mubr.bf16.gmra.mxu1 %v10158_v31  ;;  %5494 = vmatpush1.bf16.msra.mxu0 %v9065_v11  ;;  %v9033_v31 = vcombine.low %v410_v1, %v418_v2  ;;  %v602_v1 = vld [vmem:[#allocation5 + $0xf88] sm:$0xff] }
  0xba   :  { %5607 = vmatpush1.bf16.msra.mxu1 %v9321_v55  ;;  %5495 = vmatprep.subr.bf16.mxu0 %v9050_v58  ;;  %v8986_v55 = vcombine.high %v362_v44, %v370_v46  ;;  %v9242_v58 = vcombine.high %v618_v50, %v626_v52  ;;  %v610_v2 = vld [vmem:[#allocation5 + $0xfc8] sm:$0xff]  ;;  %v10280_v46 = vld [vmem:[#allocation2 + $0x100] ss:$24 sps:$4 sm:$0xff]  }
  0xbb   :  { %5608 = vmatprep.subr.bf16.mxu1 %v9306_v59  ;;  %5315 = vmatprep.mubr.bf16.mxu0 %v10250_v62  ;;  %v10266_v59 = vld [vmem:[#allocation2 + $0xd4] ss:$24 sps:$4 sm:$0xff]  }
  0xbc   :  { %5428 = vmatprep.mubr.bf16.mxu1 %v10162_v39  ;;  %v642_v39 = vld [vmem:[#allocation5 + $0x10c8] sm:$0xff] }
  0xbd   :  { %5496 = vmatpush1.bf16.msra.mxu0 %v9049_v5  ;;  %v9258_v43 = vcombine.high %v634_v37, %v642_v39  ;;  %v9257_v11 = vcombine.low %v634_v37, %v642_v39  ;;  %v9241_v5 = vcombine.low %v618_v50, %v626_v52  ;;  %v842_v18 = vld [vmem:[#allocation5 + $0x1708] sm:$0xff] }
  0xbe   :  { %5609 = vmatpush1.bf16.msra.mxu1 %v9305_v7  ;;  %5497 = vmatprep.subr.bf16.mxu0 %v9034_v9  ;;  %v9226_v7 = vcombine.high %v602_v1, %v610_v2  ;;  %v850_v22 = vld [vmem:[#allocation5 + $0x1748] sm:$0xff] }
  0xbf   :  { %5610 = vmatprep.subr.bf16.mxu1 %v9290_v10  ;;  %v586_v10 = vld [vmem:[#allocation5 + $0xf08] sm:$0xff] }
  0xc0   :  { %5316 = vmatmul.mubr.bf16.gmra.mxu0 %v10256_v15  ;;  %v826_v37 = vld [vmem:[#allocation5 + $0x1688] sm:$0xff]  ;;  %v9209_v39 = vcombine.low %v586_v10, %v594_v13 }
  0xc1   :  { %5429 = vmatmul.mubr.bf16.gmra.mxu1 %v10170_v51  ;;  %5498 = vmatpush1.bf16.msra.mxu0 %v9033_v31  ;;  %v9001_v51 = vcombine.low %v378_v32, %v386_v33  ;;  %v570_v32 = vld [vmem:[#allocation5 + $0xe88] sm:$0xff] }
  0xc2   :  { %5611 = vmatpush1.bf16.msra.mxu1 %v9289_v23  ;;  %5499 = vmatprep.subr.bf16.mxu0 %v9018_v25  ;;  %v9210_v23 = vcombine.high %v586_v10, %v594_v13  ;;  %v9466_v25 = vcombine.high %v842_v18, %v850_v22  ;;  %v578_v33 = vld [vmem:[#allocation5 + $0xec8] sm:$0xff] }
  0xc3   :  { %5612 = vmatprep.subr.bf16.mxu1 %v9274_v26  ;;  %5325 = vmatprep.mubr.bf16.mxu0 %v10258_v27  ;;  %v10274_v26 = vld [vmem:[#allocation2 + $0x104] ss:$24 sps:$4 sm:$0xff]   ;;  %v562_v44 = vld [vmem:[#allocation5 + $0xe48] sm:$0xff] }
  0xc4   :  { %5438 = vmatprep.mubr.bf16.mxu1 %v10174_v60  ;;  %v866_v60 = vld [vmem:[#allocation5 + $0x17c8] sm:$0xff] }
  0xc5   :  { %5500 = vmatpush1.bf16.msra.mxu0 %v9017_v56  ;;  %v9482_v9 = vcombine.high %v858_v4, %v866_v60  ;;  %v9481_v31 = vcombine.low %v858_v4, %v866_v60  ;;  %v9465_v56 = vcombine.low %v842_v18, %v850_v22  ;;  %v810_v50 = vld [vmem:[#allocation5 + $0x1608] sm:$0xff] }
  0xc6   :  { %5613 = vmatpush1.bf16.msra.mxu1 %v9273_v38  ;;  %5501 = vmatprep.subr.bf16.mxu0 %v9002_v40  ;;  %v9194_v38 = vcombine.high %v570_v32, %v578_v33  ;;  %v818_v52 = vld [vmem:[#allocation5 + $0x1648] sm:$0xff] }
  0xc7   :  { %5614 = vmatprep.subr.bf16.mxu1 %v9258_v43  ;;  %v554_v43 = vld [vmem:[#allocation5 + $0xe08] sm:$0xff] }
  0xc8   :  { %5326 = vmatmul.mubr.bf16.gmra.mxu0 %v10264_v47  ;;  %v794_v4 = vld [vmem:[#allocation5 + $0x1588] sm:$0xff]  ;;  %v9177_v60 = vcombine.low %v554_v43, %v562_v44 }
  0xc9   :  { %5439 = vmatmul.mubr.bf16.gmra.mxu1 %v10182_v8  ;;  %5502 = vmatpush1.bf16.msra.mxu0 %v9001_v51  ;;  %v9225_v8 = vcombine.low %v602_v1, %v610_v2  ;;  %v538_v1 = vld [vmem:[#allocation5 + $0xd88] sm:$0xff] }
  0xca   :  { %5615 = vmatpush1.bf16.msra.mxu1 %v9257_v11  ;;  %5503 = vmatprep.subr.bf16.mxu0 %v8986_v55  ;;  %v9178_v11 = vcombine.high %v554_v43, %v562_v44  ;;  %v9434_v55 = vcombine.high %v810_v50, %v818_v52  ;;  %v546_v2 = vld [vmem:[#allocation5 + $0xdc8] sm:$0xff]  ;;  %v10296_v44 = vld [vmem:[#allocation2 + $0x160] ss:$24 sps:$4 sm:$0xff]  }
  0xcb   :  { %5616 = vmatprep.subr.bf16.mxu1 %v9242_v58  ;;  %5335 = vmatprep.mubr.bf16.mxu0 %v10266_v59  ;;  %v10282_v58 = vld [vmem:[#allocation2 + $0x134] ss:$24 sps:$4 sm:$0xff]   ;;  %v10288_v13 = vld [vmem:[#allocation2 + $0x130] ss:$24 sps:$4 sm:$0xff]  }
  0xcc   :  { %5448 = vmatprep.mubr.bf16.mxu1 %v10186_v17  ;;  %v834_v17 = vld [vmem:[#allocation5 + $0x16c8] sm:$0xff] }
  0xcd   :  { %5504 = vmatpush1.bf16.msra.mxu0 %v8985_v19  ;;  %v9450_v40 = vcombine.high %v826_v37, %v834_v17  ;;  %v9449_v51 = vcombine.low %v826_v37, %v834_v17  ;;  %v9433_v19 = vcombine.low %v810_v50, %v818_v52  ;;  %v530_v10 = vld [vmem:[#allocation5 + $0xd48] sm:$0xff] }
  0xce   :  { %5617 = vmatpush1.bf16.msra.mxu1 %v9241_v5  ;;  %5505 = vmatprep.subr.bf16.mxu0 %v9226_v7  ;;  %v9162_v5 = vcombine.high %v538_v1, %v546_v2  ;;  %v778_v18 = vld [vmem:[#allocation5 + $0x1508] sm:$0xff] }
  0xcf   :  { %5618 = vmatprep.subr.bf16.mxu1 %v9482_v9  ;;  %v522_v9 = vld [vmem:[#allocation5 + $0xd08] sm:$0xff] }
  0xd0   :  { %5336 = vmatmul.mubr.bf16.gmra.mxu0 %v10272_v14  ;;  %v786_v22 = vld [vmem:[#allocation5 + $0x1548] sm:$0xff]  ;;  %v9145_v17 = vcombine.low %v522_v9, %v530_v10 }
  0xd1   :  { %5449 = vmatmul.mubr.bf16.gmra.mxu1 %v10194_v30  ;;  %5506 = vmatpush2.bf16.msra.mxu0 %v9225_v8  ;;  %v9193_v30 = vcombine.low %v570_v32, %v578_v33  ;;  %v506_v32 = vld [vmem:[#allocation5 + $0xc88] sm:$0xff] }
  0xd2   :  { %5619 = vmatpush2.bf16.msra.mxu1 %v9481_v31  ;;  %5507 = vmatprep.subr.bf16.mxu0 %v9210_v23  ;;  %v9146_v31 = vcombine.high %v522_v9, %v530_v10  ;;  %v9402_v23 = vcombine.high %v778_v18, %v786_v22  ;;  %v514_v33 = vld [vmem:[#allocation5 + $0xcc8] sm:$0xff]  ;;  %v211_v9 = vld [vmem:[#allocation5 + $0x350] sm:$0xff] }
  0xd3   :  { %5620 = vmatprep.subr.bf16.mxu1 %v9466_v25  ;;  %5345 = vmatprep.mubr.bf16.mxu0 %v10274_v26  ;;  %v10290_v25 = vld [vmem:[#allocation2 + $0x164] ss:$24 sps:$4 sm:$0xff]   ;;  %v762_v37 = vld [vmem:[#allocation5 + $0x1488] sm:$0xff]  ;;  %v459_v10 = vld [vmem:[#allocation5 + $0xb10] sm:$0xff] }
  0xd4   :  { %5458 = vmatprep.mubr.bf16.mxu1 %v10198_v41  ;;  %v802_v41 = vld [vmem:[#allocation5 + $0x15c8] sm:$0xff] }
  0xd5   :  { %5508 = vmatpush2.bf16.msra.mxu0 %v9209_v39  ;;  %v9418_v7 = vcombine.high %v794_v4, %v802_v41  ;;  %v9417_v8 = vcombine.low %v794_v4, %v802_v41  ;;  %v9401_v39 = vcombine.low %v778_v18, %v786_v22  ;;  %v498_v43 = vld [vmem:[#allocation5 + $0xc48] sm:$0xff]  ;;  %v483_v4 = vld [vmem:[#allocation5 + $0xbd0] sm:$0xff] }
  0xd6   :  { %5621 = vmatpush2.bf16.msra.mxu1 %v9465_v56  ;;  %5509 = vmatprep.subr.bf16.mxu0 %v9194_v38  ;;  %v9130_v56 = vcombine.high %v506_v32, %v514_v33  ;;  %v746_v50 = vld [vmem:[#allocation5 + $0x1408] sm:$0xff]  ;;  %v467_v18 = vld [vmem:[#allocation5 + $0xb50] sm:$0xff] }
  0xd7   :  { %5622 = vmatprep.subr.bf16.mxu1 %v9450_v40  ;;  %v490_v40 = vld [vmem:[#allocation5 + $0xc08] sm:$0xff] }
  0xd8   :  { %5346 = vmatmul.mubr.bf16.gmra.mxu0 %v10280_v46  ;;  %v754_v52 = vld [vmem:[#allocation5 + $0x1448] sm:$0xff] }
  0xd9   :  { %5459 = vmatmul.mubr.bf16.gmra.mxu1 %v10206_v57  ;;  %5510 = vmatpush2.bf16.msra.mxu0 %v9193_v30  ;;  %v9161_v57 = vcombine.low %v538_v1, %v546_v2  ;;  %v227_v1 = vld [vmem:[#allocation5 + $0x3d0] sm:$0xff]  ;;  %v9369_v41 = vcombine.low %v746_v50, %v754_v52 }
  0xda   :  { %5623 = vmatpush2.bf16.msra.mxu1 %v9449_v51  ;;  %5511 = vmatprep.subr.bf16.mxu0 %v9178_v11  ;;  %v9114_v51 = vcombine.high %v490_v40, %v498_v43  ;;  %v9370_v11 = vcombine.high %v746_v50, %v754_v52  ;;  %v475_v2 = vld [vmem:[#allocation5 + $0xb90] sm:$0xff] }
  0xdb   :  { %5624 = vmatprep.subr.bf16.mxu1 %v9434_v55  ;;  %5355 = vmatprep.mubr.bf16.mxu0 %v10282_v58  ;;  %v219_v55 = vld [vmem:[#allocation5 + $0x390] sm:$0xff]  ;;  %v9099_v22 = vcombine.low %v475_v2, %v483_v4 }
  0xdc   :  { %5468 = vmatprep.mubr.bf16.mxu1 %v10210_v3  ;;  %v770_v3 = vld [vmem:[#allocation5 + $0x14c8] sm:$0xff]  ;;  %v435_v50 = vld [vmem:[#allocation5 + $0xa50] sm:$0xff] }
  0xdd   :  { %5512 = vmatpush2.bf16.msra.mxu0 %v9177_v60  ;;  %v9386_v38 = vcombine.high %v762_v37, %v770_v3  ;;  %v9385_v30 = vcombine.low %v762_v37, %v770_v3  ;;  %v8844_v60 = vcombine.high %v219_v55, %v227_v1  ;;  %v451_v37 = vld [vmem:[#allocation5 + $0xad0] sm:$0xff]  ;;  %v9083_v3 = vcombine.low %v459_v10, %v467_v18 }
  0xde   :  { %5625 = vmatpush2.bf16.msra.mxu1 %v9433_v19  ;;  %5513 = vmatprep.subr.bf16.mxu0 %v9162_v5  ;;  %v10300_v19 = vld [vmem:[#allocation2 + $0xc] ss:$24 sps:$4 sm:$0xff]   ;;  %v9100_v5 = vcombine.high %v475_v2, %v483_v4 }
  0xdf   :  { %5626 = vmatprep.subr.bf16.mxu1 %v9418_v7  ;;  %v203_v7 = vld [vmem:[#allocation5 + $0x310] sm:$0xff] }
  0xe0   :  { %5356 = vmatmul.mubr.bf16.gmra.mxu0 %v10288_v13 }
  0xe1   :  { %5469 = vmatmul.mubr.bf16.gmra.mxu1 %v10218_v20  ;;  %5514 = vmatpush2.bf16.msra.mxu0 %v9161_v57  ;;  %v9129_v20 = vcombine.low %v506_v32, %v514_v33  ;;  %v8828_v57 = vcombine.high %v203_v7, %v211_v9  ;;  %v10304_v32 = vld [vmem:[#allocation2 + $0x8] ss:$24 sps:$4 sm:$0xff]   ;;  %v443_v33 = vld [vmem:[#allocation5 + $0xa90] sm:$0xff] }
  0xe2   :  { %5627 = vmatpush2.bf16.msra.mxu1 %v9417_v8  ;;  %5515 = vmatprep.subr.bf16.mxu0 %v9146_v31  ;;  %v9084_v8 = vcombine.high %v459_v10, %v467_v18  ;;  %v187_v31 = vld [vmem:[#allocation5 + $0x290] sm:$0xff]  ;;  %v9067_v52 = vcombine.low %v443_v33, %v451_v37 }
  0xe3   :  { %5628 = vmatprep.subr.bf16.mxu1 %v9402_v23  ;;  %5365 = vmatprep.mubr.bf16.mxu0 %v10290_v25  ;;  %v195_v23 = vld [vmem:[#allocation5 + $0x2d0] sm:$0xff] }
  0xe4   :  { %5478 = vmatprep.mubr.bf16.mxu1 %v10222_v29  ;;  %v9113_v29 = vcombine.low %v490_v40, %v498_v43  ;;  %v179_v40 = vld [vmem:[#allocation5 + $0x250] sm:$0xff] }
  0xe5   :  { %5516 = vmatpush2.bf16.msra.mxu0 %v9145_v17  ;;  %v8812_v17 = vcombine.high %v187_v31, %v195_v23  ;;  %v427_v43 = vld [vmem:[#allocation5 + $0xa10] sm:$0xff] }
  0xe6   :  { %5629 = vmatpush2.bf16.msra.mxu1 %v9401_v39  ;;  %5517 = vmatprep.subr.bf16.mxu0 %v9130_v56  ;;  %v10308_v39 = vld [vmem:[#allocation2 + $0x3c] ss:$24 sps:$4 sm:$0xff]   ;;  %v9068_v56 = vcombine.high %v443_v33, %v451_v37  ;;  %v9051_v2 = vcombine.low %v427_v43, %v435_v50 }
  0xe7   :  { %5630 = vmatprep.subr.bf16.mxu1 %v9386_v38  ;;  %v171_v38 = vld [vmem:[#allocation5 + $0x210] sm:$0xff] }
  0xe8   :  { %5366 = vmatmul.mubr.bf16.gmra.mxu0 %v10296_v44  ;;  %v123_v18 = vld [vmem:[#allocation5 + $0x90] sm:$0xff] }
  0xe9   :  { %5479 = vmatmul.mubr.bf16.gmra.mxu1 %v10230_v49  ;;  %5518 = vmatpush2.bf16.msra.mxu0 %v9129_v20  ;;  %v8843_v49 = vcombine.low %v219_v55, %v227_v1  ;;  %v8796_v20 = vcombine.high %v171_v38, %v179_v40  ;;  %v411_v55 = vld [vmem:[#allocation5 + $0x990] sm:$0xff] }
  0xea   :  { %5631 = vmatpush2.bf16.msra.mxu1 %v9385_v30  ;;  %5519 = vmatprep.subr.bf16.mxu0 %v9114_v51  ;;  %v9052_v30 = vcombine.high %v427_v43, %v435_v50  ;;  %v155_v51 = vld [vmem:[#allocation5 + $0x190] sm:$0xff] }
  0xeb   :  { %5632 = vmatprep.subr.bf16.mxu1 %v9370_v11  ;;  %5521 = vmatprep.mubr.bf16.mxu0 %v10300_v19  ;;  %v163_v11 = vld [vmem:[#allocation5 + $0x1d0] sm:$0xff] }
  0xec   :  { %5634 = vmatprep.mubr.bf16.mxu1 %v10234_v0  ;;  %v8827_v0 = vcombine.low %v203_v7, %v211_v9  ;;  %v419_v1 = vld [vmem:[#allocation5 + $0x9d0] sm:$0xff]  ;;  %v8780_v4 = vcombine.high %v155_v51, %v163_v11  ;;  %v8779_v7 = vcombine.low %v155_v51, %v163_v11 }
  0xed   :  { %5520 = vmatpush2.bf16.msra.mxu0 %v9113_v29  ;;  %v9036_v29 = vcombine.high %v411_v55, %v419_v1  ;;  %v115_v33 = vld [vmem:[#allocation5 + $0x50] sm:$0xff] }
  0xee   :  { %5633 = vmatpush2.bf16.msra.mxu1 %v9369_v41  ;;  %5715 = vmatprep.subr.bf16.mxu0 %v8844_v60  ;;  %v139_v41 = vld [vmem:[#allocation5 + $0x110] sm:$0xff] }
  0xef   :  { %5828 = vmatprep.subr.bf16.mxu1 %v9100_v5  ;;  %v147_v60 = vld [vmem:[#allocation5 + $0x150] sm:$0xff] }
  0xf0   :  { %5522 = vmatmul.mubr.bf16.vlgmr.msra.gmra.mxu0 %v10304_v32  ;;  %v395_v5 = vld [vmem:[#allocation5 + $0x910] sm:$0xff]  ;;  %v8764_v9 = vcombine.high %v139_v41, %v147_v60 }
  0xf1   :  { %5635 = vmatmul.mubr.bf16.vlgmr.msra.gmra.mxu1 %v10240_v16  ;;  %5716 = vmatpush1.bf16.msra.mxu0 %v8843_v49  ;;  %v8811_v16 = vcombine.low %v187_v31, %v195_v23  ;;  %v131_v49 = vld [vmem:[#allocation5 + $0xd0] sm:$0xff] }
  0xf2   :  { %5829 = vmatpush1.bf16.msra.mxu1 %v9099_v22  ;;  %5717 = vmatprep.subr.bf16.mxu0 %v8828_v57  ;;  %v387_v22 = vld [vmem:[#allocation5 + $0x8d0] sm:$0xff] }
  0xf3   :  { %5830 = vmatprep.subr.bf16.mxu1 %v9084_v8  ;;  %5531 = vmatprep.mubr.bf16.mxu0 %v10308_v39  ;;  %v8748_v8 = vcombine.high %v123_v18, %v131_v49  ;;  %v107_v23 = vld [vmem:[#allocation5 + $0x10] sm:$0xff] }
  0xf4   :  { %5644 = vmatprep.mubr.bf16.mxu1 %v10242_v28  ;;  %v8795_v28 = vcombine.low %v171_v38, %v179_v40  ;;  %v363_v37 = vld [vmem:[#allocation5 + $0x810] sm:$0xff] }
  0xf5   :  { %5718 = vmatpush1.bf16.msra.mxu0 %v8827_v0  ;;  %v8747_v0 = vcombine.low %v123_v18, %v131_v49  ;;  %v355_v38 = vld [vmem:[#allocation5 + $0x7d0] sm:$0xff] }
  0xf6   :  { %5831 = vmatpush1.bf16.msra.mxu1 %v9083_v3  ;;  %5719 = vmatprep.subr.bf16.mxu0 %v8812_v17  ;;  %v8732_v3 = vcombine.high %v107_v23, %v115_v33  ;;  %v611_v40 = vld [vmem:[#allocation5 + $0xfd0] sm:$0xff] }
  0xf7   :  { %5832 = vmatprep.subr.bf16.mxu1 %v9068_v56  ;;  %v347_v56 = vld [vmem:[#allocation5 + $0x790] sm:$0xff] }
  0xf8   :  { %5532 = vmatmul.mubr.bf16.gmra.mxu0 %v10160_v34  ;;  %v403_v34 = vld [vmem:[#allocation5 + $0x950] sm:$0xff]  ;;  %v8972_v50 = vcombine.high %v347_v56, %v355_v38  ;;  %v8971_v51 = vcombine.low %v347_v56, %v355_v38 }
  0xf9   :  { %5645 = vmatmul.mubr.bf16.gmra.mxu1 %v10248_v48  ;;  %5720 = vmatpush1.bf16.msra.mxu0 %v8811_v16  ;;  %v9035_v48 = vcombine.low %v411_v55, %v419_v1  ;;  %v9020_v10 = vcombine.high %v395_v5, %v403_v34  ;;  %v9019_v57 = vcombine.low %v395_v5, %v403_v34  ;;  %v315_v1 = vld [vmem:[#allocation5 + $0x690] sm:$0xff] }
  0xfa   :  { %5833 = vmatpush1.bf16.msra.mxu1 %v9067_v52  ;;  %5721 = vmatprep.subr.bf16.mxu0 %v8796_v20  ;;  %v331_v52 = vld [vmem:[#allocation5 + $0x710] sm:$0xff] }
  0xfb   :  { %5834 = vmatprep.subr.bf16.mxu1 %v9052_v30  ;;  %5541 = vmatprep.mubr.bf16.mxu0 %v10165_v42  ;;  %v379_v42 = vld [vmem:[#allocation5 + $0x890] sm:$0xff] }
  0xfc   :  { %5654 = vmatprep.mubr.bf16.mxu1 %v10250_v62  ;;  %v8763_v62 = vcombine.low %v139_v41, %v147_v60  ;;  %v9004_v31 = vcombine.high %v379_v42, %v387_v22  ;;  %v339_v20 = vld [vmem:[#allocation5 + $0x750] sm:$0xff] }
  0xfd   :  { %5722 = vmatpush1.bf16.msra.mxu0 %v8795_v28  ;;  %v587_v30 = vld [vmem:[#allocation5 + $0xf10] sm:$0xff]  ;;  %v8956_v11 = vcombine.high %v331_v52, %v339_v20 }
  0xfe   :  { %5835 = vmatpush1.bf16.msra.mxu1 %v9051_v2  ;;  %5723 = vmatprep.subr.bf16.mxu0 %v8780_v4  ;;  %v323_v28 = vld [vmem:[#allocation5 + $0x6d0] sm:$0xff] }
  0xff   :  { %5836 = vmatprep.subr.bf16.mxu1 %v9036_v29  ;;  %v579_v2 = vld [vmem:[#allocation5 + $0xed0] sm:$0xff]  ;;  %v8940_v29 = vcombine.high %v315_v1, %v323_v28 }
 0x100   :  { %5542 = vmatmul.mubr.bf16.gmra.mxu0 %v10172_v54  ;;  %v371_v54 = vld [vmem:[#allocation5 + $0x850] sm:$0xff] }
 0x101   :  { %5655 = vmatmul.mubr.bf16.gmra.mxu1 %v10256_v15  ;;  %5724 = vmatpush1.bf16.msra.mxu0 %v8779_v7  ;;  %v9003_v15 = vcombine.low %v379_v42, %v387_v22  ;;  %v8988_v17 = vcombine.high %v363_v37, %v371_v54  ;;  %v8987_v43 = vcombine.low %v363_v37, %v371_v54  ;;  %v299_v60 = vld [vmem:[#allocation5 + $0x610] sm:$0xff] }
 0x102   :  { %5837 = vmatpush1.bf16.msra.mxu1 %v9035_v48  ;;  %5725 = vmatprep.subr.bf16.mxu0 %v8764_v9  ;;  %v307_v5 = vld [vmem:[#allocation5 + $0x650] sm:$0xff]  ;;  %v8939_v7 = vcombine.low %v315_v1, %v323_v28  ;;  %v212_v1 = vld [vmem:[#allocation5 + $0x358] sm:$0xff] }
 0x103   :  { %5838 = vmatprep.subr.bf16.mxu1 %v9020_v10  ;;  %5551 = vmatprep.mubr.bf16.mxu0 %v10177_v63  ;;  %v603_v63 = vld [vmem:[#allocation5 + $0xf90] sm:$0xff]  ;;  %v8924_v48 = vcombine.high %v299_v60, %v307_v5 }
 0x104   :  { %5664 = vmatprep.mubr.bf16.mxu1 %v10258_v27  ;;  %v8731_v27 = vcombine.low %v107_v23, %v115_v33  ;;  %v9228_v16 = vcombine.high %v603_v63, %v611_v40  ;;  %v555_v34 = vld [vmem:[#allocation5 + $0xe10] sm:$0xff] }
 0x105   :  { %5726 = vmatpush1.bf16.msra.mxu0 %v8763_v62  ;;  %v283_v10 = vld [vmem:[#allocation5 + $0x590] sm:$0xff] }
 0x106   :  { %5839 = vmatpush1.bf16.msra.mxu1 %v9019_v57  ;;  %5727 = vmatprep.subr.bf16.mxu0 %v8748_v8  ;;  %v291_v18 = vld [vmem:[#allocation5 + $0x5d0] sm:$0xff] }
 0x107   :  { %5840 = vmatprep.subr.bf16.mxu1 %v9004_v31  ;;  %v547_v49 = vld [vmem:[#allocation5 + $0xdd0] sm:$0xff]  ;;  %v8908_v22 = vcombine.high %v283_v10, %v291_v18  ;;  %v8907_v23 = vcombine.low %v283_v10, %v291_v18 }
 0x108   :  { %5552 = vmatmul.mubr.bf16.gmra.mxu0 %v10184_v12  ;;  %v595_v12 = vld [vmem:[#allocation5 + $0xf50] sm:$0xff] }
 0x109   :  { %5665 = vmatmul.mubr.bf16.gmra.mxu1 %v10264_v47  ;;  %5728 = vmatpush1.bf16.msra.mxu0 %v8747_v0  ;;  %v9227_v47 = vcombine.low %v603_v63, %v611_v40  ;;  %v9212_v55 = vcombine.high %v587_v30, %v595_v12  ;;  %v9211_v4 = vcombine.low %v587_v30, %v595_v12  ;;  %v267_v57 = vld [vmem:[#allocation5 + $0x510] sm:$0xff] }
 0x10a   :  { %5841 = vmatpush1.bf16.msra.mxu1 %v9003_v15  ;;  %5729 = vmatprep.subr.bf16.mxu0 %v8732_v3  ;;  %v275_v8 = vld [vmem:[#allocation5 + $0x550] sm:$0xff] }
 0x10b   :  { %5842 = vmatprep.subr.bf16.mxu1 %v8988_v17  ;;  %5561 = vmatprep.mubr.bf16.mxu0 %v10189_v21  ;;  %v571_v21 = vld [vmem:[#allocation5 + $0xe90] sm:$0xff]  ;;  %v8892_v33 = vcombine.high %v267_v57, %v275_v8 }
 0x10c   :  { %5674 = vmatprep.mubr.bf16.mxu1 %v10266_v59  ;;  %v8955_v59 = vcombine.low %v331_v52, %v339_v20  ;;  %v9196_v41 = vcombine.high %v571_v21, %v579_v2  ;;  %v523_v31 = vld [vmem:[#allocation5 + $0xd10] sm:$0xff]  ;;  %v228_v20 = vld [vmem:[#allocation5 + $0x3d8] sm:$0xff] }
 0x10d   :  { %5730 = vmatpush1.bf16.msra.mxu0 %v8731_v27  ;;  %v251_v54 = vld [vmem:[#allocation5 + $0x490] sm:$0xff] }
 0x10e   :  { %5843 = vmatpush1.bf16.msra.mxu1 %v8987_v43  ;;  %5731 = vmatprep.subr.bf16.mxu0 %v8972_v50  ;;  %v259_v0 = vld [vmem:[#allocation5 + $0x4d0] sm:$0xff] }
 0x10f   :  { %5844 = vmatprep.subr.bf16.mxu1 %v9228_v16  ;;  %v515_v15 = vld [vmem:[#allocation5 + $0xcd0] sm:$0xff]  ;;  %v8876_v17 = vcombine.high %v251_v54, %v259_v0  ;;  %v8875_v27 = vcombine.low %v251_v54, %v259_v0  ;;  %v164_v54 = vld [vmem:[#allocation5 + $0x1d8] sm:$0xff] }
 0x110   :  { %5562 = vmatmul.mubr.bf16.gmra.mxu0 %v10196_v35  ;;  %v563_v35 = vld [vmem:[#allocation5 + $0xe50] sm:$0xff] }
 0x111   :  { %5675 = vmatmul.mubr.bf16.gmra.mxu1 %v10272_v14  ;;  %5732 = vmatpush2.bf16.msra.mxu0 %v8971_v51  ;;  %v9195_v14 = vcombine.low %v571_v21, %v579_v2  ;;  %v9180_v9 = vcombine.high %v555_v34, %v563_v35  ;;  %v9179_v42 = vcombine.low %v555_v34, %v563_v35  ;;  %v235_v38 = vld [vmem:[#allocation5 + $0x410] sm:$0xff]  ;;  %v10338_v51 = vld [vmem:[#allocation2 + $0x4] ss:$24 sps:$4 sm:$0xff]  }
 0x112   :  { %5845 = vmatpush2.bf16.msra.mxu1 %v9227_v47  ;;  %5733 = vmatprep.subr.bf16.mxu0 %v8956_v11  ;;  %v243_v63 = vld [vmem:[#allocation5 + $0x450] sm:$0xff] }
 0x113   :  { %5846 = vmatprep.subr.bf16.mxu1 %v9212_v55  ;;  %5571 = vmatprep.mubr.bf16.mxu0 %v10201_v45  ;;  %v539_v45 = vld [vmem:[#allocation5 + $0xd90] sm:$0xff]  ;;  %v8860_v43 = vcombine.high %v235_v38, %v243_v63 }
 0x114   :  { %5684 = vmatprep.mubr.bf16.mxu1 %v10274_v26  ;;  %v8923_v26 = vcombine.low %v299_v60, %v307_v5  ;;  %v9164_v62 = vcombine.high %v539_v45, %v547_v49  ;;  %v491_v40 = vld [vmem:[#allocation5 + $0xc10] sm:$0xff]  ;;  %v188_v60 = vld [vmem:[#allocation5 + $0x298] sm:$0xff] }
 0x115   :  { %5734 = vmatpush2.bf16.msra.mxu0 %v8955_v59  ;;  %v731_v16 = vld [vmem:[#allocation5 + $0x1390] sm:$0xff] }
 0x116   :  { %5847 = vmatpush2.bf16.msra.mxu1 %v9211_v4  ;;  %5735 = vmatprep.subr.bf16.mxu0 %v8940_v29  ;;  %v739_v52 = vld [vmem:[#allocation5 + $0x13d0] sm:$0xff] }
 0x117   :  { %5848 = vmatprep.subr.bf16.mxu1 %v9196_v41  ;;  %v9356_v12 = vcombine.high %v731_v16, %v739_v52  ;;  %v715_v11 = vld [vmem:[#allocation5 + $0x1310] sm:$0xff]  ;;  %v10344_v41 = vld [vmem:[#allocation2] ss:$24 sps:$4 sm:$0xff]  }
 0x118   :  { %5572 = vmatmul.mubr.bf16.gmra.mxu0 %v10208_v61  ;;  %v531_v61 = vld [vmem:[#allocation5 + $0xd50] sm:$0xff] }
 0x119   :  { %5685 = vmatmul.mubr.bf16.gmra.mxu1 %v10280_v46  ;;  %5736 = vmatpush2.bf16.msra.mxu0 %v8939_v7  ;;  %v9163_v46 = vcombine.low %v539_v45, %v547_v49  ;;  %v9148_v37 = vcombine.high %v523_v31, %v531_v61  ;;  %v9147_v3 = vcombine.low %v523_v31, %v531_v61  ;;  %v723_v55 = vld [vmem:[#allocation5 + $0x1350] sm:$0xff] }
 0x11a   :  { %5849 = vmatpush2.bf16.msra.mxu1 %v9195_v14  ;;  %5737 = vmatprep.subr.bf16.mxu0 %v8924_v48  ;;  %v9340_v21 = vcombine.high %v715_v11, %v723_v55  ;;  %v699_v59 = vld [vmem:[#allocation5 + $0x1290] sm:$0xff]  ;;  %v9339_v34 = vcombine.low %v715_v11, %v723_v55 }
 0x11b   :  { %5850 = vmatprep.subr.bf16.mxu1 %v9180_v9  ;;  %5581 = vmatprep.mubr.bf16.mxu0 %v10213_v6  ;;  %v507_v6 = vld [vmem:[#allocation5 + $0xc90] sm:$0xff] }
 0x11c   :  { %5694 = vmatprep.mubr.bf16.mxu1 %v10282_v58  ;;  %v8891_v58 = vcombine.low %v267_v57, %v275_v8  ;;  %v9132_v56 = vcombine.high %v507_v6, %v515_v15  ;;  %v707_v4 = vld [vmem:[#allocation5 + $0x12d0] sm:$0xff] }
 0x11d   :  { %5738 = vmatpush2.bf16.msra.mxu0 %v8923_v26  ;;  %v9324_v14 = vcombine.high %v699_v59, %v707_v4  ;;  %v10354_v9 = vld [vmem:[#allocation2 + $0x34] ss:$24 sps:$4 sm:$0xff]   ;;  %v180_v26 = vld [vmem:[#allocation5 + $0x258] sm:$0xff] }
 0x11e   :  { %5851 = vmatpush2.bf16.msra.mxu1 %v9179_v42  ;;  %5739 = vmatprep.subr.bf16.mxu0 %v8908_v22  ;;  %v683_v18 = vld [vmem:[#allocation5 + $0x1210] sm:$0xff]  ;;  %v9323_v22 = vcombine.low %v699_v59, %v707_v4 }
 0x11f   :  { %5852 = vmatprep.subr.bf16.mxu1 %v9164_v62  ;;  %v691_v45 = vld [vmem:[#allocation5 + $0x1250] sm:$0xff] }
 0x120   :  { %5582 = vmatmul.mubr.bf16.gmra.mxu0 %v10220_v24  ;;  %v499_v24 = vld [vmem:[#allocation5 + $0xc50] sm:$0xff]  ;;  %v9308_v8 = vcombine.high %v683_v18, %v691_v45 }
 0x121   :  { %5695 = vmatmul.mubr.bf16.gmra.mxu1 %v10288_v13  ;;  %5740 = vmatpush2.bf16.msra.mxu0 %v8907_v23  ;;  %v9131_v13 = vcombine.low %v507_v6, %v515_v15  ;;  %v9116_v50 = vcombine.high %v491_v40, %v499_v24  ;;  %v9115_v30 = vcombine.low %v491_v40, %v499_v24  ;;  %v667_v23 = vld [vmem:[#allocation5 + $0x1190] sm:$0xff] }
 0x122   :  { %5853 = vmatpush2.bf16.msra.mxu1 %v9163_v46  ;;  %5741 = vmatprep.subr.bf16.mxu0 %v8892_v33  ;;  %v675_v46 = vld [vmem:[#allocation5 + $0x11d0] sm:$0xff]  ;;  %v9307_v15 = vcombine.low %v683_v18, %v691_v45 }
 0x123   :  { %5854 = vmatprep.subr.bf16.mxu1 %v9148_v37  ;;  %5591 = vmatprep.mubr.bf16.mxu0 %v10225_v36  ;;  %v220_v36 = vld [vmem:[#allocation5 + $0x398] sm:$0xff]  ;;  %v651_v40 = vld [vmem:[#allocation5 + $0x1110] sm:$0xff] }
 0x124   :  { %5704 = vmatprep.mubr.bf16.mxu1 %v10290_v25  ;;  %v8859_v25 = vcombine.low %v235_v38, %v243_v63  ;;  %v8846_v47 = vcombine.high %v220_v36, %v228_v20  ;;  %v8845_v28 = vcombine.low %v220_v36, %v228_v20  ;;  %v156_v37 = vld [vmem:[#allocation5 + $0x198] sm:$0xff]  ;;  %v659_v24 = vld [vmem:[#allocation5 + $0x1150] sm:$0xff] }
 0x125   :  { %5742 = vmatpush2.bf16.msra.mxu0 %v8891_v58  ;;  %v9841_v6 = vld [vmem:[#allocation2 + $0x38] ss:$24 sps:$4 sm:$0xff]   ;;  %v10377_v38 = vld [vmem:[#allocation2 + $0x64] ss:$24 sps:$4 sm:$0xff]   ;;  %v8782_v63 = vcombine.high %v156_v37, %v164_v54  ;;  %v8781_v20 = vcombine.low %v156_v37, %v164_v54 }
 0x126   :  { %5855 = vmatpush2.bf16.msra.mxu1 %v9147_v3  ;;  %5743 = vmatprep.subr.bf16.mxu0 %v8876_v17  ;;  %v9292_v17 = vcombine.high %v667_v23, %v675_v46  ;;  %v643_v11 = vld [vmem:[#allocation5 + $0x10d0] sm:$0xff] }
 0x127   :  { %5856 = vmatprep.subr.bf16.mxu1 %v9132_v56  ;;  %v9847_v45 = vld [vmem:[#allocation2 + $0x9c] ss:$24 sps:$4 sm:$0xff]  }
 0x128   :  { %5592 = vmatmul.mubr.bf16.gmra.mxu0 %v10232_v53  ;;  %v204_v53 = vld [vmem:[#allocation5 + $0x318] sm:$0xff]  ;;  %v859_v54 = vld [vmem:[#allocation5 + $0x1790] sm:$0xff] }
 0x129   :  { %5705 = vmatmul.mubr.bf16.gmra.mxu1 %v10296_v44  ;;  %5744 = vmatpush2.bf16.msra.mxu0 %v8875_v27  ;;  %v9355_v44 = vcombine.low %v731_v16, %v739_v52  ;;  %v8830_v2 = vcombine.high %v204_v53, %v212_v1  ;;  %v8829_v7 = vcombine.low %v204_v53, %v212_v1  ;;  %v10390_v53 = vld [vmem:[#allocation2 + $0x60] ss:$24 sps:$4 sm:$0xff]  }
 0x12a   :  { %5857 = vmatpush2.bf16.msra.mxu1 %v9131_v13  ;;  %5745 = vmatprep.subr.bf16.mxu0 %v8860_v43  ;;  %v9843_v13 = vld [vmem:[#allocation2 + $0x6c] ss:$24 sps:$4 sm:$0xff]   ;;  %v140_v43 = vld [vmem:[#allocation5 + $0x118] sm:$0xff]  ;;  %v9291_v52 = vcombine.low %v667_v23, %v675_v46 }
 0x12b   :  { %5858 = vmatprep.subr.bf16.mxu1 %v9116_v50  ;;  %5747 = vmatprep.mubr.bf16.mxu0 %v10338_v51  ;;  %v148_v50 = vld [vmem:[#allocation5 + $0x158] sm:$0xff] }
 0x12c   :  { %5860 = vmatprep.mubr.bf16.mxu1 %v10300_v19  ;;  %v196_v19 = vld [vmem:[#allocation5 + $0x2d8] sm:$0xff]  ;;  %v8765_v4 = vcombine.low %v140_v43, %v148_v50 }
 0x12d   :  { %5746 = vmatpush2.bf16.msra.mxu0 %v8859_v25  ;;  %v8814_v10 = vcombine.high %v188_v60, %v196_v19  ;;  %v8813_v57 = vcombine.low %v188_v60, %v196_v19  ;;  %v9276_v25 = vcombine.high %v651_v40, %v659_v24  ;;  %v124_v1 = vld [vmem:[#allocation5 + $0x98] sm:$0xff] }
 0x12e   :  { %5859 = vmatpush2.bf16.msra.mxu1 %v9115_v30  ;;  %5941 = vmatprep.subr.bf16.mxu0 %v9356_v12  ;;  %v8766_v12 = vcombine.high %v140_v43, %v148_v50 }
 0x12f   :  { %6054 = vmatprep.subr.bf16.mxu1 %v8846_v47  ;;  %v635_v47 = vld [vmem:[#allocation5 + $0x1090] sm:$0xff] }
 0x130   :  { %v10342_v29 = vpop.f32.mrf.mxu0  ;;  %5748 = vmatmul.mubr.bf16.vlgmr.msra.gmra.mxu0 %v10344_v41  ;;  %v9260_v60 = vcombine.high %v635_v47, %v643_v11 }
 0x131   :  { %v10347_v5 = vpop.f32.mrf.mxu1  ;;  %5861 = vmatmul.mubr.bf16.vlgmr.msra.gmra.mxu1 %v10304_v32  ;;  %5942 = vmatpush1.bf16.msra.mxu0 %v9355_v44  ;;  %v172_v32 = vld [vmem:[#allocation5 + $0x218] sm:$0xff] }
 0x132   :  { %6055 = vmatpush1.bf16.msra.mxu1 %v8845_v28  ;;  %v10350_v35 = vpop.f32.mrf.mxu0  ;;  %5943 = vmatprep.subr.bf16.mxu0 %v9340_v21  ;;  %v8798_v61 = vcombine.high %v172_v32, %v180_v26  ;;  %v8797_v3 = vcombine.low %v172_v32, %v180_v26  ;;  %v132_v44 = vld [vmem:[#allocation5 + $0xd8] sm:$0xff]  ;;  %v9845_v21 = vld [vmem:[#allocation2 + $0x68] ss:$24 sps:$4 sm:$0xff]  }
 0x133   :  { %v10352_v48 = vpop.f32.mrf.mxu1  ;;  %6056 = vmatprep.subr.bf16.mxu1 %v8830_v2  ;;  %5757 = vmatprep.mubr.bf16.mxu0 %v10354_v9  ;;  %v9275_v2 = vcombine.low %v651_v40, %v659_v24  ;;  %v108_v32 = vld [vmem:[#allocation5 + $0x18] sm:$0xff] }
 0x134   :  { %v10357_v49 = vpop.f32.mrf.mxu0  ;;  %5870 = vmatprep.mubr.bf16.mxu1 %v10308_v39  ;;  %v10368_v39 = vld [vmem:[#allocation2 + $0x30] ss:$24 sps:$4 sm:$0xff]   ;;  %v116_v26 = vld [vmem:[#allocation5 + $0x58] sm:$0xff] }
 0x135   :  { %v10360_v42 = vpop.f32.mrf.mxu1  ;;  %5944 = vmatpush1.bf16.msra.mxu0 %v9339_v34  ;;  %v10399_v34 = vld [vmem:[#allocation2 + $0x94] ss:$24 sps:$4 sm:$0xff]   ;;  %v8734_v37 = vcombine.high %v108_v32, %v116_v26  ;;  %v9849_v24 = vld [vmem:[#allocation2 + $0x98] ss:$24 sps:$4 sm:$0xff]   ;;  %v8733_v50 = vcombine.low %v108_v32, %v116_v26 }
 0x136   :  { %6057 = vmatpush1.bf16.msra.mxu1 %v8829_v7  ;;  %v10362_v62 = vpop.f32.mrf.mxu0  ;;  %5945 = vmatprep.subr.bf16.mxu0 %v9324_v14  ;;  %v8750_v7 = vcombine.high %v124_v1, %v132_v44  ;;  %v619_v14 = vld [vmem:[#allocation5 + $0x1010] sm:$0xff] }
 0x137   :  { %v10364_v31 = vpop.f32.mrf.mxu1  ;;  %6058 = vmatprep.subr.bf16.mxu1 %v8814_v10  ;;  %v627_v10 = vld [vmem:[#allocation5 + $0x1050] sm:$0xff] }
 0x138   :  { %v10366_v33 = vpop.f32.mrf.mxu0  ;;  %5758 = vmatmul.mubr.bf16.gmra.mxu0 %v10368_v39  ;;  %v9244_v23 = vcombine.high %v619_v14, %v627_v10  ;;  %v827_v26 = vld [vmem:[#allocation5 + $0x1690] sm:$0xff] }
 0x139   :  { %v10371_v0 = vpop.f32.mrf.mxu1  ;;  %5871 = vmatmul.mubr.bf16.gmra.mxu1 %v9841_v6  ;;  %5946 = vmatpush1.bf16.msra.mxu0 %v9323_v22  ;;  %v867_v6 = vld [vmem:[#allocation5 + $0x17d0] sm:$0xff] }
 0x13a   :  { %6059 = vmatpush1.bf16.msra.mxu1 %v8813_v57  ;;  %v10373_v58 = vpop.f32.mrf.mxu0  ;;  %5947 = vmatprep.subr.bf16.mxu0 %v9308_v8  ;;  %v9259_v57 = vcombine.low %v635_v47, %v643_v11  ;;  %v843_v47 = vld [vmem:[#allocation5 + $0x1710] sm:$0xff] }
 0x13b   :  { %v10375_v56 = vpop.f32.mrf.mxu1  ;;  %6060 = vmatprep.subr.bf16.mxu1 %v8798_v61  ;;  %5767 = vmatprep.mubr.bf16.mxu0 %v10377_v38  ;;  %v8749_v61 = vcombine.low %v124_v1, %v132_v44  ;;  %v851_v11 = vld [vmem:[#allocation5 + $0x1750] sm:$0xff]  ;;  %v9851_v44 = vld [vmem:[#allocation2 + $0xcc] ss:$24 sps:$4 sm:$0xff]  }
 0x13c   :  { %v10380_v27 = vpop.f32.mrf.mxu0  ;;  %5880 = vmatprep.mubr.bf16.mxu1 %v9843_v13  ;;  %v9243_v13 = vcombine.low %v619_v14, %v627_v10  ;;  %v9468_v10 = vcombine.high %v843_v47, %v851_v11 }
 0x13d   :  { %v10382_v16 = vpop.f32.mrf.mxu1  ;;  %5948 = vmatpush1.bf16.msra.mxu0 %v9307_v15 }
 0x13e   :  { %6061 = vmatpush1.bf16.msra.mxu1 %v8797_v3  ;;  %v10384_v36 = vpop.f32.mrf.mxu0  ;;  %5949 = vmatprep.subr.bf16.mxu0 %v9292_v17  ;;  %v10412_v3 = vld [vmem:[#allocation2 + $0x90] ss:$24 sps:$4 sm:$0xff]   ;;  %v348_v17 = vld [vmem:[#allocation5 + $0x798] sm:$0xff] }
 0x13f   :  { %v10386_v30 = vpop.f32.mrf.mxu1  ;;  %6062 = vmatprep.subr.bf16.mxu1 %v8782_v63  ;;  %v356_v63 = vld [vmem:[#allocation5 + $0x7d8] sm:$0xff] }
 0x140   :  { %v10388_v55 = vpop.f32.mrf.mxu0  ;;  %5768 = vmatmul.mubr.bf16.gmra.mxu0 %v10390_v53  ;;  %v8973_v14 = vcombine.low %v348_v17, %v356_v63 }
 0x141   :  { %v10393_v28 = vpop.f32.mrf.mxu1  ;;  %5881 = vmatmul.mubr.bf16.gmra.mxu1 %v9845_v21  ;;  %5950 = vmatpush1.bf16.msra.mxu0 %v9291_v52  ;;  %v9484_v52 = vcombine.high %v859_v54, %v867_v6  ;;  %v332_v21 = vld [vmem:[#allocation5 + $0x718] sm:$0xff] }
 0x142   :  { %6063 = vmatpush1.bf16.msra.mxu1 %v8781_v20  ;;  %v10395_v59 = vpop.f32.mrf.mxu0  ;;  %5951 = vmatprep.subr.bf16.mxu0 %v9276_v25  ;;  %v10421_v25 = vld [vmem:[#allocation2 + $0xc4] ss:$24 sps:$4 sm:$0xff]  }
 0x143   :  { %v10397_v19 = vpop.f32.mrf.mxu1  ;;  %6064 = vmatprep.subr.bf16.mxu1 %v8766_v12  ;;  %5777 = vmatprep.mubr.bf16.mxu0 %v10399_v34  ;;  %13248 = vst [vmem:[#allocation15_spill] sm:$0xff] %v10421_v25  ;;  %v8974_v12 = vcombine.high %v348_v17, %v356_v63  ;;  %v9467_v17 = vcombine.low %v843_v47, %v851_v11  ;;  %v300_v47 = vld [vmem:[#allocation5 + $0x618] sm:$0xff] }
 0x144   :  { %v10402_v18 = vpop.f32.mrf.mxu0  ;;  %5890 = vmatprep.mubr.bf16.mxu1 %v9847_v45  ;;  %v308_v11 = vld [vmem:[#allocation5 + $0x658] sm:$0xff] }
 0x145   :  { %v10404_v22 = vpop.f32.mrf.mxu1  ;;  %5952 = vmatpush1.bf16.msra.mxu0 %v9275_v2  ;;  %v340_v2 = vld [vmem:[#allocation5 + $0x758] sm:$0xff] }
 0x146   :  { %6065 = vmatpush1.bf16.msra.mxu1 %v8765_v4  ;;  %v10406_v8 = vpop.f32.mrf.mxu0  ;;  %5953 = vmatprep.subr.bf16.mxu0 %v9260_v60  ;;  %v9483_v60 = vcombine.low %v859_v54, %v867_v6  ;;  %v8958_v32 = vcombine.high %v332_v21, %v340_v2  ;;  %v324_v54 = vld [vmem:[#allocation5 + $0x6d8] sm:$0xff] }
 0x147   :  { %v10408_v46 = vpop.f32.mrf.mxu1  ;;  %6066 = vmatprep.subr.bf16.mxu1 %v8750_v7 }
 0x148   :  { %v10410_v15 = vpop.f32.mrf.mxu0  ;;  %5778 = vmatmul.mubr.bf16.gmra.mxu0 %v10412_v3 }
 0x149   :  { %v10415_v40 = vpop.f32.mrf.mxu1  ;;  %5891 = vmatmul.mubr.bf16.gmra.mxu1 %v9849_v24  ;;  %5954 = vmatpush1.bf16.msra.mxu0 %v9259_v57  ;;  %v835_v57 = vld [vmem:[#allocation5 + $0x16d0] sm:$0xff]  ;;  %v9853_v24 = vld [vmem:[#allocation2 + $0xc8] ss:$24 sps:$4 sm:$0xff]  }
 0x14a   :  { %6067 = vmatpush1.bf16.msra.mxu1 %v8749_v61  ;;  %v10417_v43 = vpop.f32.mrf.mxu0  ;;  %5955 = vmatprep.subr.bf16.mxu0 %v9244_v23  ;;  %v10434_v23 = vld [vmem:[#allocation2 + $0xc0] ss:$24 sps:$4 sm:$0xff]  }
 0x14b   :  { %v10419_v20 = vpop.f32.mrf.mxu1  ;;  %6068 = vmatprep.subr.bf16.mxu1 %v8734_v37  ;;  %5787 = vmatprep.mubr.bf16.mxu0 %v10421_v25  ;;  %13251 = vst [vmem:[#allocation18_spill] sm:$0xff] %v10434_v23  ;;  %v316_v37 = vld [vmem:[#allocation5 + $0x698] sm:$0xff] }
 0x14c   :  { %v10424_v1 = vpop.f32.mrf.mxu0  ;;  %5900 = vmatprep.mubr.bf16.mxu1 %v9851_v44  ;;  %v8942_v44 = vcombine.high %v316_v37, %v324_v54 }
 0x14d   :  { %v10426_v4 = vpop.f32.mrf.mxu1  ;;  %5956 = vmatpush1.bf16.msra.mxu0 %v9243_v13  ;;  %v8957_v13 = vcombine.low %v332_v21, %v340_v2  ;;  %v9451_v21 = vcombine.low %v827_v26, %v835_v57 }
 0x14e   :  { %13249 = vst [vmem:[#allocation16_spill] sm:$0xff] %v10426_v4  ;;  %6069 = vmatpush1.bf16.msra.mxu1 %v8733_v50  ;;  %v10428_v7 = vpop.f32.mrf.mxu0  ;;  %5957 = vmatprep.subr.bf16.mxu0 %v9484_v52  ;;  %v9452_v50 = vcombine.high %v827_v26, %v835_v57  ;;  %v292_v26 = vld [vmem:[#allocation5 + $0x5d8] sm:$0xff] }
 0x14f   :  { %v10430_v45 = vpop.f32.mrf.mxu1  ;;  %6070 = vmatprep.subr.bf16.mxu1 %v8974_v12  ;;  %v10443_v12 = vld [vmem:[#allocation2 + $0xf4] ss:$24 sps:$4 sm:$0xff]  }
 0x150   :  { %13250 = vst [vmem:[#allocation17_spill] sm:$0xff] %v10430_v45  ;;  %v10432_v61 = vpop.f32.mrf.mxu0  ;;  %5788 = vmatmul.mubr.bf16.gmra.mxu0 %v10434_v23  ;;  %13255 = vst [vmem:[#allocation22_spill] sm:$0xff] %v10443_v12  ;;  %v811_v23 = vld [vmem:[#allocation5 + $0x1610] sm:$0xff] }
 0x151   :  { %v10437_v6 = vpop.f32.mrf.mxu1  ;;  %5901 = vmatmul.mubr.bf16.gmra.mxu1 %v9853_v24  ;;  %5958 = vmatpush2.bf16.msra.mxu0 %v9483_v60  ;;  %v9855_v60 = vld [vmem:[#allocation2 + $0xfc] ss:$24 sps:$4 sm:$0xff]  }
 0x152   :  { %13252 = vst [vmem:[#allocation19_spill] sm:$0xff] %v10437_v6  ;;  %6071 = vmatpush2.bf16.msra.mxu1 %v8973_v14  ;;  %v10439_v63 = vpop.f32.mrf.mxu0  ;;  %5959 = vmatprep.subr.bf16.mxu0 %v9468_v10  ;;  %v819_v6 = vld [vmem:[#allocation5 + $0x1650] sm:$0xff]  ;;  %v8941_v10 = vcombine.low %v316_v37, %v324_v54 }
 0x153   :  { %13253 = vst [vmem:[#allocation20_spill] sm:$0xff] %v10439_v63  ;;  %v10441_v52 = vpop.f32.mrf.mxu1  ;;  %6072 = vmatprep.subr.bf16.mxu1 %v8958_v32  ;;  %5797 = vmatprep.mubr.bf16.mxu0 %v10443_v12  ;;  %v9436_v32 = vcombine.high %v811_v23, %v819_v6  ;;  %v8926_v12 = vcombine.high %v300_v47, %v308_v11  ;;  %v10480_v63 = vld [vmem:[#allocation2 + $0x120] ss:$24 sps:$4 sm:$0xff]  }
 0x154   :  { %13254 = vst [vmem:[#allocation21_spill] sm:$0xff] %v10441_v52  ;;  %v10446_v45 = vpop.f32.mrf.mxu0  ;;  %5910 = vmatprep.mubr.bf16.mxu1 %v9855_v60  ;;  %v795_v52 = vld [vmem:[#allocation5 + $0x1590] sm:$0xff]  ;;  %v9435_v37 = vcombine.low %v811_v23, %v819_v6  ;;  %v9859_v23 = vld [vmem:[#allocation2 + $0x12c] ss:$24 sps:$4 sm:$0xff]   ;;  %v268_v6 = vld [vmem:[#allocation5 + $0x518] sm:$0xff] }
 0x155   :  { %13256 = vst [vmem:[#allocation23_spill] sm:$0xff] %v10446_v45  ;;  %v10448_v14 = vpop.f32.mrf.mxu1  ;;  %5960 = vmatpush2.bf16.msra.mxu0 %v9467_v17  ;;  %v803_v45 = vld [vmem:[#allocation5 + $0x15d0] sm:$0xff]  ;;  %v284_v17 = vld [vmem:[#allocation5 + $0x598] sm:$0xff]  ;;  %13272 = vst [vmem:[#allocation39_spill] sm:$0xff] %v10480_v63 }
 0x156   :  { %13257 = vst [vmem:[#allocation24_spill] sm:$0xff] %v10448_v14  ;;  %6073 = vmatpush2.bf16.msra.mxu1 %v8957_v13  ;;  %v10450_v2 = vpop.f32.mrf.mxu0  ;;  %5961 = vmatprep.subr.bf16.mxu0 %v9452_v50  ;;  %v10456_v60 = vld [vmem:[#allocation2 + $0xf0] ss:$24 sps:$4 sm:$0xff]   ;;  %v8925_v50 = vcombine.low %v300_v47, %v308_v11  ;;  %v10465_v14 = vld [vmem:[#allocation2 + $0x124] ss:$24 sps:$4 sm:$0xff]   ;;  %v9419_v47 = vcombine.low %v795_v52, %v803_v45 }
 0x157   :  { %13258 = vst [vmem:[#allocation25_spill] sm:$0xff] %v10450_v2  ;;  %v10452_v24 = vpop.f32.mrf.mxu1  ;;  %6074 = vmatprep.subr.bf16.mxu1 %v8942_v44  ;;  %13261 = vst [vmem:[#allocation28_spill] sm:$0xff] %v10456_v60  ;;  %v9857_v13 = vld [vmem:[#allocation2 + $0xf8] ss:$24 sps:$4 sm:$0xff]   ;;  %v9420_v44 = vcombine.high %v795_v52, %v803_v45  ;;  %v877_v2 = vlaneseq  ;;  %v8909_v11 = vcombine.low %v284_v17, %v292_v26 }
 0x158   :  { %13259 = vst [vmem:[#allocation26_spill] sm:$0xff] %v10452_v24  ;;  %v10454_v4 = vpop.f32.mrf.mxu0  ;;  %5798 = vmatmul.mubr.bf16.gmra.mxu0 %v10456_v60  ;;  %13265 = vst [vmem:[#allocation32_spill] sm:$0xff] %v10465_v14  ;;  %v8910_v60 = vcombine.high %v284_v17, %v292_v26  ;;  %v252_v45 = vld [vmem:[#allocation5 + $0x498] sm:$0xff]  ;;  %v9861_v17 = vld [vmem:[#allocation2 + $0x128] ss:$24 sps:$4 sm:$0xff]  }
 0x159   :  { %13260 = vst [vmem:[#allocation27_spill] sm:$0xff] %v10454_v4  ;;  %v10459_v57 = vpop.f32.mrf.mxu1  ;;  %5911 = vmatmul.mubr.bf16.gmra.mxu1 %v9857_v13  ;;  %5962 = vmatpush2.bf16.msra.mxu0 %v9451_v21  ;;  %v779_v4 = vld [vmem:[#allocation5 + $0x1510] sm:$0xff]  ;;  %v276_v21 = vld [vmem:[#allocation5 + $0x558] sm:$0xff]  ;;  %v10476_v25 = vshrl.u32 %v877_v2, 7 }
 0x15a   :  { %13262 = vst [vmem:[#allocation29_spill] sm:$0xff] %v10459_v57  ;;  %6075 = vmatpush2.bf16.msra.mxu1 %v8941_v10  ;;  %v10461_v54 = vpop.f32.mrf.mxu0  ;;  %5963 = vmatprep.subr.bf16.mxu0 %v9436_v32  ;;  %v787_v57 = vld [vmem:[#allocation5 + $0x1550] sm:$0xff]  ;;  %v260_v52 = vld [vmem:[#allocation5 + $0x4d8] sm:$0xff]  ;;  %v8893_v2 = vcombine.low %v268_v6, %v276_v21 }
 0x15b   :  { %13263 = vst [vmem:[#allocation30_spill] sm:$0xff] %v10461_v54  ;;  %v10463_v24 = vpop.f32.mrf.mxu1  ;;  %6076 = vmatprep.subr.bf16.mxu1 %v8926_v12  ;;  %5807 = vmatprep.mubr.bf16.mxu0 %v10465_v14  ;;  %v9404_v32 = vcombine.high %v779_v4, %v787_v57  ;;  %v763_v54 = vld [vmem:[#allocation5 + $0x1490] sm:$0xff]  ;;  %13270 = vst [vmem:[#allocation37_spill] sm:$0xff] %v10476_v25  ;;  %v9403_v26 = vcombine.low %v779_v4, %v787_v57  ;;  %v236_v57 = vld [vmem:[#allocation5 + $0x418] sm:$0xff] }
 0x15c   :  { %13264 = vst [vmem:[#allocation31_spill] sm:$0xff] %v10463_v24  ;;  %v10468_v13 = vpop.f32.mrf.mxu0  ;;  %5920 = vmatprep.mubr.bf16.mxu1 %v9859_v23  ;;  %v8894_v24 = vcombine.high %v268_v6, %v276_v21  ;;  %v9863_v4 = vld [vmem:[#allocation2 + $0x15c] ss:$24 sps:$4 sm:$0xff]   ;;  %v10495_v6 = vld [vmem:[#allocation7] sm:$0xff] }
 0x15d   :  { %13266 = vst [vmem:[#allocation33_spill] sm:$0xff] %v10468_v13  ;;  %v10470_v10 = vpop.f32.mrf.mxu1  ;;  %5964 = vmatpush2.bf16.msra.mxu0 %v9435_v37  ;;  %v771_v13 = vld [vmem:[#allocation5 + $0x14d0] sm:$0xff]  ;;  %13278 = vst [vmem:[#allocation45_spill] sm:$0xff] %v10495_v6 }
 0x15e   :  { %13267 = vst [vmem:[#allocation34_spill] sm:$0xff] %v10470_v10  ;;  %6077 = vmatpush2.bf16.msra.mxu1 %v8925_v50  ;;  %v10472_v12 = vpop.f32.mrf.mxu0  ;;  %5965 = vmatprep.subr.bf16.mxu0 %v9420_v44  ;;  %v9388_v50 = vcombine.high %v763_v54, %v771_v13  ;;  %v747_v10 = vld [vmem:[#allocation5 + $0x1410] sm:$0xff] }
 0x15f   :  { %13268 = vst [vmem:[#allocation35_spill] sm:$0xff] %v10472_v12  ;;  %v10474_v14 = vpop.f32.mrf.mxu1  ;;  %6078 = vmatprep.subr.bf16.mxu1 %v8910_v60  ;;  %v13282_v12 = vsub.s32 0, %v10476_v25 }
 0x160   :  { %13269 = vst [vmem:[#allocation36_spill] sm:$0xff] %v10474_v14  ;;  %v10478_v23 = vpop.f32.mrf.mxu0  ;;  %5808 = vmatmul.mubr.bf16.gmra.mxu0 %v10480_v63  ;;  %v10489_v14 = vld [vmem:[#allocation2 + $0x154] ss:$24 sps:$4 sm:$0xff]   ;;  %v8878_v63 = vcombine.high %v252_v45, %v260_v52 }
 0x161   :  { %13271 = vst [vmem:[#allocation38_spill] sm:$0xff] %v10478_v23  ;;  %v10483_v37 = vpop.f32.mrf.mxu1  ;;  %5921 = vmatmul.mubr.bf16.gmra.mxu1 %v9861_v17  ;;  %5966 = vmatpush2.bf16.msra.mxu0 %v9419_v47  ;;  %13276 = vst [vmem:[#allocation43_spill] sm:$0xff] %v10489_v14  ;;  %v484_v23 = vld [vmem:[#allocation5 + $0xbd8] sm:$0xff]  ;;  %v10507_v21 = vrot.slane %v10495_v6, %v13282_v12 }
 0x162   :  { %13273 = vst [vmem:[#allocation40_spill] sm:$0xff] %v10483_v37  ;;  %6079 = vmatpush2.bf16.msra.mxu1 %v8909_v11  ;;  %v10485_v60 = vpop.f32.mrf.mxu0  ;;  %5967 = vmatprep.subr.bf16.mxu0 %v9404_v32  ;;  %v755_v37 = vld [vmem:[#allocation5 + $0x1450] sm:$0xff]  ;;  %v244_v11 = vld [vmem:[#allocation5 + $0x458] sm:$0xff]  ;;  %v9387_v32 = vcombine.low %v763_v54, %v771_v13 }
 0x163   :  { %13274 = vst [vmem:[#allocation41_spill] sm:$0xff] %v10485_v60  ;;  %v10487_v44 = vpop.f32.mrf.mxu1  ;;  %6080 = vmatprep.subr.bf16.mxu1 %v8894_v24  ;;  %5817 = vmatprep.mubr.bf16.mxu0 %v10489_v14  ;;  %v9372_v17 = vcombine.high %v747_v10, %v755_v37  ;;  %v10511_v54 = vld [vmem:[#allocation2 + $0x150] ss:$24 sps:$4 sm:$0xff]   ;;  %v732_v13 = vld [vmem:[#allocation5 + $0x1398] sm:$0xff]  ;;  %v9371_v12 = vcombine.low %v747_v10, %v755_v37 }
 0x164   :  { %13275 = vst [vmem:[#allocation42_spill] sm:$0xff] %v10487_v44  ;;  %v10493_v47 = vpop.f32.mrf.mxu0  ;;  %5930 = vmatprep.mubr.bf16.mxu1 %v9863_v4  ;;  %v8877_v44 = vcombine.low %v252_v45, %v260_v52  ;;  %v8862_v4 = vcombine.high %v236_v57, %v244_v11  ;;  %13284 = vst [vmem:[#allocation50_spill] sm:$0xff] %v10511_v54  ;;  %v740_v45 = vld [vmem:[#allocation5 + $0x13d8] sm:$0xff]  ;;  %v13285_v52 = vsub.s32 1, %v10476_v25 }
 0x165   :  { %13277 = vst [vmem:[#allocation44_spill] sm:$0xff] %v10493_v47  ;;  %v10498_v24 = vpop.f32.mrf.mxu1  ;;  %5968 = vmatpush2.bf16.msra.mxu0 %v9403_v26  ;;  %v476_v47 = vld [vmem:[#allocation5 + $0xb98] sm:$0xff] }
 0x166   :  { %13279 = vst [vmem:[#allocation46_spill] sm:$0xff] %v10498_v24  ;;  %6081 = vmatpush2.bf16.msra.mxu1 %v8893_v2  ;;  %v10500_v14 = vpop.f32.mrf.mxu0  ;;  %5969 = vmatprep.subr.bf16.mxu0 %v9388_v50  ;;  %v9865_v2 = vld [vmem:[#allocation2 + $0x158] ss:$24 sps:$4 sm:$0xff]  }
 0x167   :  { %13280 = vst [vmem:[#allocation47_spill] sm:$0xff] %v10500_v14  ;;  %v10502_v60 = vpop.f32.mrf.mxu1  ;;  %6082 = vmatprep.subr.bf16.mxu1 %v8878_v63  ;;  %v10517_v63 = vrot.slane %v10495_v6, %v13285_v52  ;;  %v10525_v14 = vld [vmem:[#allocation2 + $0x14] ss:$24 sps:$4 sm:$0xff]   ;;  %v9358_v52 = vcombine.high %v732_v13, %v740_v45  ;;  %v460_v6 = vld [vmem:[#allocation5 + $0xb18] sm:$0xff] }
 0x168   :  { %13281 = vst [vmem:[#allocation48_spill] sm:$0xff] %v10502_v60  ;;  %v10509_v24 = vpop.f32.mrf.mxu0  ;;  %5818 = vmatmul.mubr.bf16.gmra.mxu0 %v10511_v54  ;;  %v8861_v60 = vcombine.low %v236_v57, %v244_v11  ;;  %13288 = vst [vmem:[#allocation53_spill] sm:$0xff] %v10525_v14  ;;  %v716_v37 = vld [vmem:[#allocation5 + $0x1318] sm:$0xff]  ;;  %v9101_v11 = vcombine.low %v476_v47, %v484_v23 }
 0x169   :  { %13283 = vst [vmem:[#allocation49_spill] sm:$0xff] %v10509_v24  ;;  %v10519_v26 = vpop.f32.mrf.mxu1  ;;  %5931 = vmatmul.mubr.bf16.gmra.mxu1 %v9865_v2  ;;  %5970 = vmatpush2.bf16.msra.mxu0 %v9387_v32  ;;  %v9102_v24 = vcombine.high %v476_v47, %v484_v23  ;;  %v5072_v32 = vadd.f32 %v10342_v29, %v10507_v21  ;;  %v708_v47 = vld [vmem:[#allocation5 + $0x12d8] sm:$0xff] }
 0x16a   :  { %13286 = vst [vmem:[#allocation51_spill] sm:$0xff] %v10519_v26  ;;  %6083 = vmatpush2.bf16.msra.mxu1 %v8877_v44  ;;  %v10521_v50 = vpop.f32.mrf.mxu0  ;;  %5971 = vmatprep.subr.bf16.mxu0 %v9372_v17  ;;  %v468_v26 = vld [vmem:[#allocation5 + $0xb58] sm:$0xff]  ;;  %v5074_v17 = vadd.f32 %v10350_v35, %v10517_v63  ;;  %v9357_v2 = vcombine.low %v732_v13, %v740_v45 }
 0x16b   :  { %v10523_v54 = vpop.f32.mrf.mxu1  ;;  %6084 = vmatprep.subr.bf16.mxu1 %v8862_v4  ;;  %5973 = vmatprep.mubr.bf16.mxu0 %v10525_v14  ;;  %v724_v44 = vld [vmem:[#allocation5 + $0x1358] sm:$0xff]  ;;  %v9086_v14 = vcombine.high %v460_v6, %v468_v26  ;;  %v5185_v35 = vadd.f32 %v10347_v5, %v5072_v32  ;;  %v9085_v23 = vcombine.low %v460_v6, %v468_v26 }
 0x16c   :  { %13287 = vst [vmem:[#allocation52_spill] sm:$0xff] %v10523_v54  ;;  %v10530_v10 = vpop.f32.mrf.mxu0  ;;  %6086 = vmatprep.mubr.bf16.mxu1 %v10338_v51  ;;  %v10541_v51 = vld [vmem:[#allocation5 + $0xa98] sm:$0xff]  ;;  %v5076_v13 = vadd.f32 %v10357_v49, %v10507_v21  ;;  %v5078_v45 = vadd.f32 %v10362_v62, %v10517_v63 }
 0x16d   :  { %13289 = vst [vmem:[#allocation54_spill] sm:$0xff] %v10530_v10  ;;  %v10535_v57 = vpop.f32.mrf.mxu1  ;;  %5972 = vmatpush2.bf16.msra.mxu0 %v9371_v12  ;;  %v9342_v10 = vcombine.high %v716_v37, %v724_v44  ;;  %v10543_v54 = vld [vmem:[#allocation5 + $0xad8] sm:$0xff] }
 0x16e   :  { %13290 = vst [vmem:[#allocation55_spill] sm:$0xff] %v10535_v57  ;;  %6085 = vmatpush2.bf16.msra.mxu1 %v8861_v60  ;;  %v10537_v4 = vpop.f32.mrf.mxu0  ;;  %6167 = vmatprep.subr.bf16.mxu0 %v9102_v24  ;;  %v10546_v57 = vld [vmem:[#allocation2 + $0x10] ss:$24 sps:$4 sm:$0xff]   ;;  %v700_v60 = vld [vmem:[#allocation5 + $0x1298] sm:$0xff]  ;;  %v5187_v24 = vadd.f32 %v10352_v48, %v5074_v17  ;;  %v9070_v6 = vcombine.high %v10541_v51, %v10543_v54 }
 0x16f   :  { %v10539_v29 = vpop.f32.mrf.mxu1  ;;  %6280 = vmatprep.subr.bf16.mxu1 %v9358_v52  ;;  %13291 = vst [vmem:[#allocation56_spill] sm:$0xff] %v10546_v57  ;;  %v9341_v52 = vcombine.low %v716_v37, %v724_v44  ;;  %v10561_v49 = vld [vmem:[#allocation2 + $0x44] ss:$24 sps:$4 sm:$0xff]   ;;  %v9326_v62 = vcombine.high %v700_v60, %v708_v47  ;;  %v5084_v37 = vadd.f32 %v10373_v58, %v10517_v63 }
 0x170   :  { %v5297_v25 = vpop.f32.mrf.mxu0  ;;  %5974 = vmatmul.mubr.bf16.vlgmr.msra.gmra.mxu0 %v10546_v57  ;;  %13292 = vst [vmem:[#allocation57_spill] sm:$0xff] %v10561_v49  ;;  %v10564_v17 = vld [vmem:[#allocation5 + $0xa18] sm:$0xff]  ;;  %v9325_v58 = vcombine.low %v700_v60, %v708_v47 }
 0x171   :  { %v10554_v12 = vpop.f32.mrf.mxu1  ;;  %6087 = vmatmul.mubr.bf16.vlgmr.msra.gmra.mxu1 %v10344_v41  ;;  %6168 = vmatpush1.bf16.msra.mxu0 %v9101_v11  ;;  %v5298_v26 = vadd.f32 %v5297_v25, %v5185_v35  ;;  %v10566_v41 = vld [vmem:[#allocation5 + $0xa58] sm:$0xff]  ;;  %v5189_v11 = vadd.f32 %v10360_v42, %v5076_v13 }
 0x172   :  { %6281 = vmatpush1.bf16.msra.mxu1 %v9357_v2  ;;  %v5299_v5 = vpop.f32.mrf.mxu0  ;;  %6169 = vmatprep.subr.bf16.mxu0 %v9086_v14  ;;  %v5082_v14 = vadd.f32 %v10366_v33, %v10507_v21  ;;  %v684_v44 = vld [vmem:[#allocation5 + $0x1218] sm:$0xff]  ;;  %v5191_v2 = vadd.f32 %v10364_v31, %v5078_v45  ;;  %v9053_v47 = vcombine.low %v10564_v17, %v10566_v41 }
 0x173   :  { %v5300_v48 = vadd.f32 %v5299_v5, %v5187_v24  ;;  %v10559_v32 = vpop.f32.mrf.mxu1  ;;  %6282 = vmatprep.subr.bf16.mxu1 %v9342_v10  ;;  %5983 = vmatprep.mubr.bf16.mxu0 %v10561_v49  ;;  %v692_v10 = vld [vmem:[#allocation5 + $0x1258] sm:$0xff]  ;;  %v9069_v5 = vcombine.low %v10541_v51, %v10543_v54  ;;  %v5197_v51 = vadd.f32 %v10375_v56, %v5084_v37 }
 0x174   :  { %v5301_v25 = vpop.f32.mrf.mxu0  ;;  %6096 = vmatprep.mubr.bf16.mxu1 %v10354_v9  ;;  %v9054_v9 = vcombine.high %v10564_v17, %v10566_v41  ;;  %v9310_v31 = vcombine.high %v684_v44, %v692_v10  ;;  %v10583_v13 = vld [vmem:[#allocation5 + $0x998] sm:$0xff]  ;;  %v5195_v54 = vadd.f32 %v10371_v0, %v5082_v14  ;;  %v9309_v14 = vcombine.low %v684_v44, %v692_v10 }
 0x175   :  { %v9623_v35 = vpack.c.bf16 %v5300_v48, %v5298_v26  ;;  %v10575_v24 = vpop.f32.mrf.mxu1  ;;  %6170 = vmatpush1.bf16.msra.mxu0 %v9085_v23  ;;  %v5302_v49 = vadd.f32 %v5301_v25, %v5189_v11  ;;  %v10585_v23 = vld [vmem:[#allocation5 + $0x9d8] sm:$0xff]  ;;  %v5086_v26 = vadd.f32 %v10380_v27, %v10507_v21  ;;  %v5088_v48 = vadd.f32 %v10384_v36, %v10517_v63  ;;  %v10605_v36 = vld [vmem:[#allocation2 + $0x74] ss:$24 sps:$4 sm:$0xff]  }
 0x176   :  { %6283 = vmatpush1.bf16.msra.mxu1 %v9341_v52  ;;  %v5303_v33 = vpop.f32.mrf.mxu0  ;;  %6171 = vmatprep.subr.bf16.mxu0 %v9070_v6  ;;  %v10589_v60 = vld [vmem:[#allocation2 + $0x40] ss:$24 sps:$4 sm:$0xff]   ;;  %v9038_v17 = vcombine.high %v10583_v13, %v10585_v23  ;;  %v5092_v25 = vadd.f32 %v10388_v55, %v10507_v21  ;;  %v5094_v44 = vadd.f32 %v10395_v59, %v10517_v63 }
 0x177   :  { %8133 = vst [vmem:[#allocation8] sm:$0xff] %v9623_v35  ;;  %v5304_v57 = vadd.f32 %v5303_v33, %v5191_v2  ;;  %v10581_v42 = vpop.f32.mrf.mxu1  ;;  %6284 = vmatprep.subr.bf16.mxu1 %v9326_v62  ;;  %v668_v52 = vld [vmem:[#allocation5 + $0x1198] sm:$0xff]  ;;  %v5199_v35 = vadd.f32 %v10382_v16, %v5086_v26 }
 0x178   :  { %v5307_v45 = vpop.f32.mrf.mxu0  ;;  %5984 = vmatmul.mubr.bf16.gmra.mxu0 %v10589_v60  ;;  %v676_v6 = vld [vmem:[#allocation5 + $0x11d8] sm:$0xff] }
 0x179   :  { %v9627_v62 = vpack.c.bf16 %v5304_v57, %v5302_v49  ;;  %v10598_v0 = vpop.f32.mrf.mxu1  ;;  %6097 = vmatmul.mubr.bf16.gmra.mxu1 %v10368_v39  ;;  %6172 = vmatpush1.bf16.msra.mxu0 %v9069_v5  ;;  %v5308_v41 = vadd.f32 %v5307_v45, %v5195_v54  ;;  %v9294_v57 = vcombine.high %v668_v52, %v676_v6  ;;  %v10608_v39 = vld [vmem:[#allocation5 + $0x918] sm:$0xff] }
 0x17a   :  { %6285 = vmatpush1.bf16.msra.mxu1 %v9325_v58  ;;  %v5309_v56 = vpop.f32.mrf.mxu0  ;;  %6173 = vmatprep.subr.bf16.mxu0 %v9054_v9  ;;  %v10610_v49 = vld [vmem:[#allocation5 + $0x958] sm:$0xff]  ;;  %v5201_v5 = vadd.f32 %v10386_v30, %v5088_v48  ;;  %v9037_v9 = vcombine.low %v10583_v13, %v10585_v23  ;;  %v9293_v59 = vcombine.low %v668_v52, %v676_v6  ;;  %v10633_v52 = vld [vmem:[#allocation2 + $0x70] ss:$24 sps:$4 sm:$0xff]  }
 0x17b   :  { %8137 = vst [vmem:[#allocation8 + $0x20] sm:$0xff] %v9627_v62  ;;  %v5310_v37 = vadd.f32 %v5309_v56, %v5197_v51  ;;  %v10603_v27 = vpop.f32.mrf.mxu1  ;;  %6286 = vmatprep.subr.bf16.mxu1 %v9310_v31  ;;  %5993 = vmatprep.mubr.bf16.mxu0 %v10605_v36  ;;  %v652_v11 = vld [vmem:[#allocation5 + $0x1118] sm:$0xff]  ;;  %v5205_v13 = vadd.f32 %v10393_v28, %v5092_v25 }
 0x17c   :  { %v5311_v10 = vpop.f32.mrf.mxu0  ;;  %6106 = vmatprep.mubr.bf16.mxu1 %v10377_v38  ;;  %v660_v2 = vld [vmem:[#allocation5 + $0x1158] sm:$0xff]  ;;  %v9022_v38 = vcombine.high %v10608_v39, %v10610_v49  ;;  %v5207_v23 = vadd.f32 %v10397_v19, %v5094_v44  ;;  %v9021_v6 = vcombine.low %v10608_v39, %v10610_v49  ;;  %v5096_v62 = vadd.f32 %v10402_v18, %v10507_v21 }
 0x17d   :  { %v9631_v33 = vpack.c.bf16 %v5310_v37, %v5308_v41  ;;  %v10619_v58 = vpop.f32.mrf.mxu1  ;;  %6174 = vmatpush1.bf16.msra.mxu0 %v9053_v47  ;;  %v5312_v31 = vadd.f32 %v5311_v10, %v5199_v35  ;;  %v9278_v30 = vcombine.high %v652_v11, %v660_v2  ;;  %v10627_v51 = vld [vmem:[#allocation5 + $0x898] sm:$0xff]  ;;  %v5098_v56 = vadd.f32 %v10406_v8, %v10517_v63 }
 0x17e   :  { %6287 = vmatpush1.bf16.msra.mxu1 %v9309_v14  ;;  %v5313_v55 = vpop.f32.mrf.mxu0  ;;  %6175 = vmatprep.subr.bf16.mxu0 %v9038_v17  ;;  %v10629_v45 = vld [vmem:[#allocation5 + $0x8d8] sm:$0xff]  ;;  %v9277_v17 = vcombine.low %v652_v11, %v660_v2  ;;  %v5102_v25 = vadd.f32 %v10410_v15, %v10507_v21  ;;  %v5104_v44 = vadd.f32 %v10417_v43, %v10517_v63 }
 0x17f   :  { %8141 = vst [vmem:[#allocation8 + $0x40] sm:$0xff] %v9631_v33  ;;  %v5314_v54 = vadd.f32 %v5313_v55, %v5201_v5  ;;  %v10625_v16 = vpop.f32.mrf.mxu1  ;;  %6288 = vmatprep.subr.bf16.mxu1 %v9294_v57  ;;  %v636_v26 = vld [vmem:[#allocation5 + $0x1098] sm:$0xff]  ;;  %v9006_v41 = vcombine.high %v10627_v51, %v10629_v45  ;;  %v5209_v35 = vadd.f32 %v10404_v22, %v5096_v62 }
 0x180   :  { %v5317_v47 = vpop.f32.mrf.mxu0  ;;  %5994 = vmatmul.mubr.bf16.gmra.mxu0 %v10633_v52  ;;  %v644_v48 = vld [vmem:[#allocation5 + $0x10d8] sm:$0xff]  ;;  %v5211_v5 = vadd.f32 %v10408_v46, %v5098_v56  ;;  %v9005_v55 = vcombine.low %v10627_v51, %v10629_v45  ;;  %v5217_v51 = vadd.f32 %v10419_v20, %v5104_v44 }
 0x181   :  { %v9635_v14 = vpack.c.bf16 %v5314_v54, %v5312_v31  ;;  %v10642_v28 = vpop.f32.mrf.mxu1  ;;  %6107 = vmatmul.mubr.bf16.gmra.mxu1 %v10390_v53  ;;  %6176 = vmatpush1.bf16.msra.mxu0 %v9037_v9  ;;  %v5318_v37 = vadd.f32 %v5317_v47, %v5205_v13  ;;  %v10649_v8 = vld [vmem:[#allocation2 + $0xa4] ss:$24 sps:$4 sm:$0xff]   ;;  %v9262_v39 = vcombine.high %v636_v26, %v644_v48  ;;  %v10677_v13 = vld [vmem:[#allocation2 + $0xa0] ss:$24 sps:$4 sm:$0xff]  }
 0x182   :  { %6289 = vmatpush1.bf16.msra.mxu1 %v9293_v59  ;;  %v5319_v19 = vpop.f32.mrf.mxu0  ;;  %6177 = vmatprep.subr.bf16.mxu0 %v9022_v38  ;;  %v10652_v53 = vld [vmem:[#allocation5 + $0x818] sm:$0xff]  ;;  %v9261_v43 = vcombine.low %v636_v26, %v644_v48  ;;  %v5106_v26 = vadd.f32 %v10424_v1, %v10507_v21  ;;  %v5108_v48 = vadd.f32 %v10428_v7, %v10517_v63  ;;  %v10693_v7 = vld [vmem:[#allocation2 + $0xd4] ss:$24 sps:$4 sm:$0xff]  }
 0x183   :  { %8145 = vst [vmem:[#allocation8 + $0x60] sm:$0xff] %v9635_v14  ;;  %v5320_v57 = vadd.f32 %v5319_v19, %v5207_v23  ;;  %v10647_v18 = vpop.f32.mrf.mxu1  ;;  %6290 = vmatprep.subr.bf16.mxu1 %v9278_v30  ;;  %6003 = vmatprep.mubr.bf16.mxu0 %v10649_v8  ;;  %v10654_v49 = vld [vmem:[#allocation5 + $0x858] sm:$0xff]  ;;  %v5215_v30 = vadd.f32 %v10415_v40, %v5102_v25  ;;  %v13294_v25 = vld [vmem:[#allocation15_spill] sm:$0xff] }
 0x184   :  { %v5321_v10 = vpop.f32.mrf.mxu0  ;;  %6116 = vmatprep.mubr.bf16.mxu1 %v10399_v34  ;;  %v620_v11 = vld [vmem:[#allocation5 + $0x1018] sm:$0xff]  ;;  %v8990_v34 = vcombine.high %v10652_v53, %v10654_v49  ;;  %v8989_v23 = vcombine.low %v10652_v53, %v10654_v49 }
 0x185   :  { %v628_v2 = vld [vmem:[#allocation5 + $0x1058] sm:$0xff]  ;;  %v9639_v33 = vpack.c.bf16 %v5320_v57, %v5318_v37  ;;  %v10663_v9 = vpop.f32.mrf.mxu1  ;;  %6178 = vmatpush1.bf16.msra.mxu0 %v9021_v6  ;;  %v5322_v59 = vadd.f32 %v5321_v10, %v5209_v35  ;;  %v5112_v57 = vadd.f32 %v10432_v61, %v10507_v21  ;;  %v13296_v35 = vld [vmem:[#allocation17_spill] sm:$0xff] }
 0x186   :  { %6291 = vmatpush1.bf16.msra.mxu1 %v9277_v17  ;;  %v5323_v15 = vpop.f32.mrf.mxu0  ;;  %6179 = vmatprep.subr.bf16.mxu0 %v9006_v41  ;;  %v9246_v46 = vcombine.high %v620_v11, %v628_v2  ;;  %v10671_v31 = vld [vmem:[#allocation5 + $0xf98] sm:$0xff]  ;;  %v9245_v56 = vcombine.low %v620_v11, %v628_v2 }
 0x187   :  { %8149 = vst [vmem:[#allocation8 + $0x80] sm:$0xff] %v9639_v33  ;;  %v5324_v38 = vadd.f32 %v5323_v15, %v5211_v5  ;;  %v10669_v22 = vpop.f32.mrf.mxu1  ;;  %6292 = vmatprep.subr.bf16.mxu1 %v9262_v39  ;;  %v10673_v54 = vld [vmem:[#allocation5 + $0xfd8] sm:$0xff]  ;;  %v5221_v5 = vadd.f32 %v13296_v35, %v5108_v48 }
 0x188   :  { %v5327_v45 = vpop.f32.mrf.mxu0  ;;  %6004 = vmatmul.mubr.bf16.gmra.mxu0 %v10677_v13  ;;  %v860_v47 = vld [vmem:[#allocation5 + $0x1798] sm:$0xff]  ;;  %v9230_v14 = vcombine.high %v10671_v31, %v10673_v54  ;;  %v9229_v15 = vcombine.low %v10671_v31, %v10673_v54  ;;  %v13298_v54 = vld [vmem:[#allocation21_spill] sm:$0xff] }
 0x189   :  { %v868_v6 = vld [vmem:[#allocation5 + $0x17d8] sm:$0xff]  ;;  %v9643_v62 = vpack.c.bf16 %v5324_v38, %v5322_v59  ;;  %v10686_v40 = vpop.f32.mrf.mxu1  ;;  %6117 = vmatmul.mubr.bf16.gmra.mxu1 %v10412_v3  ;;  %6180 = vmatpush1.bf16.msra.mxu0 %v9005_v55  ;;  %v5328_v19 = vadd.f32 %v5327_v45, %v5215_v30 }
 0x18a   :  { %6293 = vmatpush1.bf16.msra.mxu1 %v9261_v43  ;;  %v5329_v20 = vpop.f32.mrf.mxu0  ;;  %6181 = vmatprep.subr.bf16.mxu0 %v8990_v34  ;;  %v9486_v41 = vcombine.high %v860_v47, %v868_v6  ;;  %v10696_v3 = vld [vmem:[#allocation5 + $0xf18] sm:$0xff]  ;;  %v9485_v43 = vcombine.low %v860_v47, %v868_v6  ;;  %v10721_v47 = vld [vmem:[#allocation2 + $0xd0] ss:$24 sps:$4 sm:$0xff]  }
 0x18b   :  { %8153 = vst [vmem:[#allocation8 + $0xa0] sm:$0xff] %v9643_v62  ;;  %v5330_v17 = vadd.f32 %v5329_v20, %v5217_v51  ;;  %v10691_v1 = vpop.f32.mrf.mxu1  ;;  %6294 = vmatprep.subr.bf16.mxu1 %v9246_v46  ;;  %6013 = vmatprep.mubr.bf16.mxu0 %v10693_v7  ;;  %v10698_v37 = vld [vmem:[#allocation5 + $0xf58] sm:$0xff] }
 0x18c   :  { %v13293_v39 = vld [vmem:[#allocation20_spill] sm:$0xff]  ;;  %v5331_v49 = vpop.f32.mrf.mxu0  ;;  %6126 = vmatprep.mubr.bf16.mxu1 %v13294_v25  ;;  %v9214_v34 = vcombine.high %v10696_v3, %v10698_v37  ;;  %v9213_v6 = vcombine.low %v10696_v3, %v10698_v37 }
 0x18d   :  { %v5114_v53 = vadd.f32 %v13293_v39, %v10517_v63  ;;  %v844_v44 = vld [vmem:[#allocation5 + $0x1718] sm:$0xff]  ;;  %v9647_v33 = vpack.c.bf16 %v5330_v17, %v5328_v19  ;;  %v10707_v55 = vpop.f32.mrf.mxu1  ;;  %6182 = vmatpush1.bf16.msra.mxu0 %v8989_v23  ;;  %v13297_v23 = vld [vmem:[#allocation19_spill] sm:$0xff]  ;;  %v13300_v19 = vld [vmem:[#allocation25_spill] sm:$0xff] }
 0x18e   :  { %v852_v10 = vld [vmem:[#allocation5 + $0x1758] sm:$0xff]  ;;  %6295 = vmatpush1.bf16.msra.mxu1 %v9245_v56  ;;  %v5333_v61 = vpop.f32.mrf.mxu0  ;;  %6183 = vmatprep.subr.bf16.mxu0 %v9230_v14  ;;  %v5225_v31 = vadd.f32 %v13297_v23, %v5112_v57  ;;  %v13299_v56 = vld [vmem:[#allocation23_spill] sm:$0xff]  ;;  %v5118_v17 = vadd.f32 %v13300_v19, %v10517_v63  ;;  %v13301_v39 = vld [vmem:[#allocation18_spill] sm:$0xff] }
 0x18f   :  { %v13295_v11 = vld [vmem:[#allocation16_spill] sm:$0xff]  ;;  %8157 = vst [vmem:[#allocation8 + $0xc0] sm:$0xff] %v9647_v33  ;;  %v5334_v38 = vadd.f32 %v5333_v61, %v5221_v5  ;;  %v10713_v46 = vpop.f32.mrf.mxu1  ;;  %6296 = vmatprep.subr.bf16.mxu1 %v9486_v41  ;;  %v9470_v30 = vcombine.high %v844_v44, %v852_v10  ;;  %v5116_v14 = vadd.f32 %v13299_v56, %v10507_v21 }
 0x190   :  { %v5219_v2 = vadd.f32 %v13295_v11, %v5106_v26  ;;  %v10715_v51 = vld [vmem:[#allocation5 + $0xe98] sm:$0xff]  ;;  %v5227_v26 = vadd.f32 %v13298_v54, %v5114_v53  ;;  %v5337_v48 = vpop.f32.mrf.mxu0  ;;  %6014 = vmatmul.mubr.bf16.gmra.mxu0 %v10721_v47 }
 0x191   :  { %v10717_v45 = vld [vmem:[#allocation5 + $0xed8] sm:$0xff]  ;;  %v10730_v57 = vpop.f32.mrf.mxu1  ;;  %6127 = vmatmul.mubr.bf16.gmra.mxu1 %v13301_v39  ;;  %6184 = vmatpush2.bf16.msra.mxu0 %v9229_v15  ;;  %v5338_v37 = vadd.f32 %v5337_v48, %v5225_v31  ;;  %v13303_v15 = vld [vmem:[#allocation30_spill] sm:$0xff] }
 0x192   :  { %v5332_v59 = vadd.f32 %v5331_v49, %v5219_v2  ;;  %v828_v62 = vld [vmem:[#allocation5 + $0x1698] sm:$0xff]  ;;  %6297 = vmatpush2.bf16.msra.mxu1 %v9485_v43  ;;  %v5339_v53 = vpop.f32.mrf.mxu0  ;;  %6185 = vmatprep.subr.bf16.mxu0 %v9214_v34  ;;  %v9469_v49 = vcombine.low %v844_v44, %v852_v10  ;;  %v9198_v3 = vcombine.high %v10715_v51, %v10717_v45  ;;  %v13302_v44 = vld [vmem:[#allocation27_spill] sm:$0xff]  ;;  %v13304_v34 = vld [vmem:[#allocation22_spill] sm:$0xff] }
 0x193   :  { %v836_v20 = vld [vmem:[#allocation5 + $0x16d8] sm:$0xff]  ;;  %v5340_v25 = vadd.f32 %v5339_v53, %v5227_v26  ;;  %v10735_v11 = vpop.f32.mrf.mxu1  ;;  %6298 = vmatprep.subr.bf16.mxu1 %v9470_v30  ;;  %v5122_v10 = vadd.f32 %v13302_v44, %v10507_v21  ;;  %v5124_v61 = vadd.f32 %v13303_v15, %v10517_v63  ;;  %6136 = vmatprep.mubr.bf16.mxu1 %v13304_v34  ;;  %v13306_v31 = vld [vmem:[#allocation26_spill] sm:$0xff] }
 0x194   :  { %v9651_v41 = vpack.c.bf16 %v5334_v38, %v5332_v59  ;;  %v10737_v2 = vld [vmem:[#allocation2 + $0x104] ss:$24 sps:$4 sm:$0xff]   ;;  %v9454_v35 = vcombine.high %v828_v62, %v836_v20  ;;  %v5341_v43 = vpop.f32.mrf.mxu0  ;;  %v5231_v54 = vadd.f32 %v13306_v31, %v5118_v17  ;;  %v9197_v56 = vcombine.low %v10715_v51, %v10717_v45  ;;  %v13308_v45 = vld [vmem:[#allocation31_spill] sm:$0xff] }
 0x195   :  { %6023 = vmatprep.mubr.bf16.mxu0 %v10737_v2  ;;  %v10740_v5 = vld [vmem:[#allocation5 + $0xe18] sm:$0xff]  ;;  %v9655_v26 = vpack.c.bf16 %v5340_v25, %v5338_v37  ;;  %v10751_v48 = vpop.f32.mrf.mxu1  ;;  %6186 = vmatpush2.bf16.msra.mxu0 %v9213_v6  ;;  %v13307_v25 = vld [vmem:[#allocation29_spill] sm:$0xff] }
 0x196   :  { %8161 = vst [vmem:[#allocation8 + $0xe0] sm:$0xff] %v9651_v41  ;;  %v10742_v33 = vld [vmem:[#allocation5 + $0xe58] sm:$0xff]  ;;  %6299 = vmatpush2.bf16.msra.mxu1 %v9469_v49  ;;  %v5343_v19 = vpop.f32.mrf.mxu0  ;;  %6187 = vmatprep.subr.bf16.mxu0 %v9198_v3  ;;  %v9453_v41 = vcombine.low %v828_v62, %v836_v20  ;;  %v5235_v51 = vadd.f32 %v13307_v25, %v5122_v10 }
 0x197   :  { %v812_v59 = vld [vmem:[#allocation5 + $0x1618] sm:$0xff]  ;;  %v9182_v39 = vcombine.high %v10740_v5, %v10742_v33  ;;  %8165 = vst [vmem:[#allocation8 + $0x100] sm:$0xff] %v9655_v26  ;;  %v5344_v44 = vadd.f32 %v5343_v19, %v5231_v54  ;;  %6300 = vmatprep.subr.bf16.mxu1 %v9454_v35  ;;  %v5237_v49 = vadd.f32 %v13308_v45, %v5124_v61  ;;  %v13310_v35 = vld [vmem:[#allocation33_spill] sm:$0xff]  ;;  %v10781_v45 = vld [vmem:[#allocation2 + $0x134] ss:$24 sps:$4 sm:$0xff]  }
 0x198   :  { %v820_v38 = vld [vmem:[#allocation5 + $0x1658] sm:$0xff]  ;;  %v5347_v3 = vpop.f32.mrf.mxu0  ;;  %v9181_v20 = vcombine.low %v10740_v5, %v10742_v33  ;;  %v5126_v34 = vadd.f32 %v13310_v35, %v10507_v21  ;;  %13315 = vst [vmem:[#allocation17_spill] sm:$0xff] %v10781_v45  ;;  %v13319_v35 = vld [vmem:[#allocation34_spill] sm:$0xff] }
 0x199   :  { %v13305_v30 = vld [vmem:[#allocation24_spill] sm:$0xff]  ;;  %v9438_v17 = vcombine.high %v812_v59, %v820_v38  ;;  %6188 = vmatpush2.bf16.msra.mxu0 %v9197_v56  ;;  %v9437_v26 = vcombine.low %v812_v59, %v820_v38  ;;  %v5348_v33 = vadd.f32 %v5347_v3, %v5235_v51  ;;  %v13316_v59 = vld [vmem:[#allocation38_spill] sm:$0xff] }
 0x19a   :  { %v5229_v23 = vadd.f32 %v13305_v30, %v5116_v14  ;;  %v10757_v14 = vpop.f32.mrf.mxu1  ;;  %v10759_v37 = vld [vmem:[#allocation5 + $0xd98] sm:$0xff]  ;;  %v13311_v30 = vld [vmem:[#allocation35_spill] sm:$0xff]  ;;  %6301 = vmatpush2.bf16.msra.mxu1 %v9453_v41  ;;  %v5349_v54 = vpop.f32.mrf.mxu0  ;;  %6189 = vmatprep.subr.bf16.mxu0 %v9182_v39  ;;  %v5132_v38 = vadd.f32 %v13316_v59, %v10507_v21  ;;  %v13317_v41 = vld [vmem:[#allocation41_spill] sm:$0xff] }
 0x19b   :  { %v10761_v6 = vld [vmem:[#allocation5 + $0xdd8] sm:$0xff]  ;;  %v5350_v19 = vadd.f32 %v5349_v54, %v5237_v49  ;;  %6302 = vmatprep.subr.bf16.mxu1 %v9438_v17  ;;  %v5134_v39 = vadd.f32 %v13317_v41, %v10517_v63 }
 0x19c   :  { %v5342_v53 = vadd.f32 %v5341_v43, %v5229_v23  ;;  %v10765_v62 = vld [vmem:[#allocation2 + $0x100] ss:$24 sps:$4 sm:$0xff]   ;;  %v5128_v23 = vadd.f32 %v13311_v30, %v10517_v63  ;;  %v10774_v10 = vpop.f32.mrf.mxu1  ;;  %v9166_v5 = vcombine.high %v10759_v37, %v10761_v6  ;;  %v5351_v51 = vpop.f32.mrf.mxu0  ;;  %v5239_v30 = vadd.f32 %v13319_v35, %v5126_v34 }
 0x19d   :  { %13309 = vst [vmem:[#allocation20_spill] sm:$0xff] %v10765_v62  ;;  %6024 = vmatmul.mubr.bf16.gmra.mxu0 %v10765_v62  ;;  %v796_v15 = vld [vmem:[#allocation5 + $0x1598] sm:$0xff]  ;;  %13312 = vst [vmem:[#allocation15_spill] sm:$0xff] %v10774_v10  ;;  %v9663_v54 = vpack.c.bf16 %v5350_v19, %v5348_v33  ;;  %v9165_v59 = vcombine.low %v10759_v37, %v10761_v6 }
 0x19e   :  { %v804_v43 = vld [vmem:[#allocation5 + $0x15d8] sm:$0xff]  ;;  %v9659_v31 = vpack.c.bf16 %v5344_v44, %v5342_v53  ;;  %v10779_v25 = vpop.f32.mrf.mxu1  ;;  %6033 = vmatprep.mubr.bf16.mxu0 %v10781_v45  ;;  %6190 = vmatpush2.bf16.msra.mxu0 %v9181_v20  ;;  %v5353_v62 = vpop.f32.mrf.mxu0 }
 0x19f   :  { %v13313_v61 = vld [vmem:[#allocation28_spill] sm:$0xff]  ;;  %13314 = vst [vmem:[#allocation16_spill] sm:$0xff] %v10779_v25  ;;  %v9422_v53 = vcombine.high %v796_v15, %v804_v43  ;;  %6303 = vmatpush2.bf16.msra.mxu1 %v9437_v26  ;;  %6191 = vmatprep.subr.bf16.mxu0 %v9166_v5  ;;  %v9421_v41 = vcombine.low %v796_v15, %v804_v43  ;;  %8173 = vst [vmem:[#allocation8 + $0x140] sm:$0xff] %v9663_v54  ;;  %v13322_v26 = vld [vmem:[#allocation42_spill] sm:$0xff] }
 0x1a0   :  { %6137 = vmatmul.mubr.bf16.gmra.mxu1 %v13313_v61  ;;  %8169 = vst [vmem:[#allocation8 + $0x120] sm:$0xff] %v9659_v31  ;;  %v10784_v44 = vld [vmem:[#allocation5 + $0xd18] sm:$0xff]  ;;  %v10797_v45 = vpop.f32.mrf.mxu1  ;;  %v5352_v25 = vadd.f32 %v5351_v51, %v5239_v30  ;;  %v5247_v5 = vadd.f32 %v13322_v26, %v5134_v39  ;;  %v5357_v15 = vpop.f32.mrf.mxu0  ;;  %v10812_v43 = vld [vmem:[#allocation2 + $0x130] ss:$24 sps:$4 sm:$0xff]  }
 0x1a1   :  { %v10786_v56 = vld [vmem:[#allocation5 + $0xd58] sm:$0xff]  ;;  %6304 = vmatprep.subr.bf16.mxu1 %v9422_v53  ;;  %13323 = vst [vmem:[#allocation19_spill] sm:$0xff] %v10812_v43  ;;  %v13325_v30 = vld [vmem:[#allocation47_spill] sm:$0xff] }
 0x1a2   :  { %v13318_v49 = vld [vmem:[#allocation32_spill] sm:$0xff]  ;;  %v10803_v34 = vpop.f32.mrf.mxu1  ;;  %6192 = vmatpush2.bf16.msra.mxu0 %v9165_v59  ;;  %v5359_v54 = vpop.f32.mrf.mxu0 }
 0x1a3   :  { %6146 = vmatprep.mubr.bf16.mxu1 %v13318_v49  ;;  %v10793_v3 = vld [vmem:[#allocation5 + $0x1518] sm:$0xff]  ;;  %v9150_v49 = vcombine.high %v10784_v44, %v10786_v56  ;;  %6305 = vmatpush2.bf16.msra.mxu1 %v9421_v41  ;;  %v5360_v26 = vadd.f32 %v5359_v54, %v5247_v5  ;;  %v13331_v5 = vld [vmem:[#allocation43_spill] sm:$0xff] }
 0x1a4   :  { %v788_v17 = vld [vmem:[#allocation5 + $0x1558] sm:$0xff]  ;;  %v10825_v39 = vpop.f32.mrf.mxu1 }
 0x1a5   :  { %v13320_v31 = vld [vmem:[#allocation36_spill] sm:$0xff]  ;;  %6034 = vmatmul.mubr.bf16.gmra.mxu0 %v10812_v43  ;;  %13326 = vst [vmem:[#allocation21_spill] sm:$0xff] %v10825_v39  ;;  %6193 = vmatprep.subr.bf16.mxu0 %v9150_v49  ;;  %v5144_v49 = vadd.f32 %v10521_v50, %v10517_v63 }
 0x1a6   :  { %v5241_v61 = vadd.f32 %v13320_v31, %v5128_v23  ;;  %v9406_v23 = vcombine.high %v10793_v3, %v788_v17  ;;  %v10806_v33 = vld [vmem:[#allocation5 + $0xc98] sm:$0xff] }
 0x1a7   :  { %v10808_v20 = vld [vmem:[#allocation5 + $0xcd8] sm:$0xff] }
 0x1a8   :  { %v5354_v10 = vadd.f32 %v5353_v62, %v5241_v61  ;;  %v13321_v37 = vld [vmem:[#allocation40_spill] sm:$0xff]  ;;  %v9149_v62 = vcombine.low %v10784_v44, %v10786_v56  ;;  %v13327_v61 = vld [vmem:[#allocation39_spill] sm:$0xff]  ;;  %v9405_v44 = vcombine.low %v10793_v3, %v788_v17  ;;  %v9134_v56 = vcombine.high %v10806_v33, %v10808_v20  ;;  %6306 = vmatprep.subr.bf16.mxu1 %v9406_v23  ;;  %v13330_v3 = vld [vmem:[#allocation49_spill] sm:$0xff] }
 0x1a9   :  { %v5245_v6 = vadd.f32 %v13321_v37, %v5132_v38  ;;  %v10817_v19 = vld [vmem:[#allocation5 + $0x1498] sm:$0xff]  ;;  %v5138_v38 = vadd.f32 %v13325_v30, %v10517_v63  ;;  %6147 = vmatmul.mubr.bf16.gmra.mxu1 %v13327_v61  ;;  %v5142_v17 = vadd.f32 %v13330_v3, %v10507_v21  ;;  %v13332_v30 = vld [vmem:[#allocation46_spill] sm:$0xff]  ;;  %v9133_v3 = vcombine.low %v10806_v33, %v10808_v20  ;;  %v10866_v20 = vld [vmem:[#allocation5 + $0x3a0] sm:$0xff] }
 0x1aa   :  { %v10819_v53 = vld [vmem:[#allocation5 + $0x14d8] sm:$0xff]  ;;  %v9667_v31 = vpack.c.bf16 %v5354_v10, %v5352_v25  ;;  %6156 = vmatprep.mubr.bf16.mxu1 %v13331_v5  ;;  %6194 = vmatpush2.bf16.msra.mxu0 %v9149_v62  ;;  %v10868_v62 = vld [vmem:[#allocation5 + $0x3e0] sm:$0xff] }
 0x1ab   :  { %v13324_v51 = vld [vmem:[#allocation44_spill] sm:$0xff]  ;;  %v5358_v37 = vadd.f32 %v5357_v15, %v5245_v6  ;;  %v9390_v25 = vcombine.high %v10817_v19, %v10819_v53  ;;  %v5361_v6 = vpop.f32.mrf.mxu0  ;;  %6307 = vmatpush2.bf16.msra.mxu1 %v9405_v44  ;;  %6195 = vmatprep.subr.bf16.mxu0 %v9134_v56  ;;  %v9389_v5 = vcombine.low %v10817_v19, %v10819_v53  ;;  %v13335_v44 = vld [vmem:[#allocation51_spill] sm:$0xff]  ;;  %v13340_v53 = vld [vmem:[#allocation45_spill] sm:$0xff] }
 0x1ac   :  { %v5136_v35 = vadd.f32 %v13324_v51, %v10507_v21  ;;  %8177 = vst [vmem:[#allocation8 + $0x160] sm:$0xff] %v9667_v31  ;;  %v10831_v51 = vpop.f32.mrf.mxu1  ;;  %v10833_v10 = vld [vmem:[#allocation2 + $0x164] ss:$24 sps:$4 sm:$0xff]   ;;  %v5255_v56 = vadd.f32 %v13335_v44, %v5142_v17  ;;  %v5148_v17 = vadd.f32 %v10537_v4, %v10517_v63  ;;  %v8848_v63 = vcombine.high %v10866_v20, %v10868_v62 }
 0x1ad   :  { %13328 = vst [vmem:[#allocation23_spill] sm:$0xff] %v10831_v51  ;;  %13329 = vst [vmem:[#allocation25_spill] sm:$0xff] %v10833_v10  ;;  %6043 = vmatprep.mubr.bf16.mxu0 %v10833_v10  ;;  %v10838_v59 = vld [vmem:[#allocation5 + $0xc18] sm:$0xff]  ;;  %v9671_v10 = vpack.c.bf16 %v5360_v26, %v5358_v37  ;;  %v13334_v51 = vld [vmem:[#allocation37_spill] sm:$0xff]  ;;  %v5363_v39 = vpop.f32.mrf.mxu0  ;;  %6308 = vmatprep.subr.bf16.mxu1 %v9390_v25 }
 0x1ae   :  { %v10840_v41 = vld [vmem:[#allocation5 + $0xc58] sm:$0xff]  ;;  %v5249_v31 = vadd.f32 %v13332_v30, %v5136_v35  ;;  %v10853_v43 = vpop.f32.mrf.mxu1  ;;  %v13196_v50 = vsub.s32 2, %v13334_v51  ;;  %v477_v25 = vld [vmem:[#allocation5 + $0xba0] sm:$0xff]  ;;  %6196 = vmatpush2.bf16.msra.mxu0 %v9133_v3 }
 0x1af   :  { %v10847_v23 = vld [vmem:[#allocation5 + $0x1418] sm:$0xff]  ;;  %v9118_v35 = vcombine.high %v10838_v59, %v10840_v41  ;;  %8181 = vst [vmem:[#allocation8 + $0x180] sm:$0xff] %v9671_v10  ;;  %6309 = vmatpush2.bf16.msra.mxu1 %v9389_v5  ;;  %v10896_v3 = vld [vmem:[#allocation2 + $0xc] ss:$24 sps:$4 sm:$0xff]  }
 0x1b0   :  { %v10849_v15 = vld [vmem:[#allocation5 + $0x1458] sm:$0xff]  ;;  %v10862_v26 = vpop.f32.mrf.mxu1  ;;  %13341 = vst [vmem:[#allocation27_spill] sm:$0xff] %v10896_v3  ;;  %v10899_v5 = vld [vmem:[#allocation5 + $0x320] sm:$0xff] }
 0x1b1   :  { %v13333_v61 = vld [vmem:[#allocation48_spill] sm:$0xff]  ;;  %v9374_v33 = vcombine.high %v10847_v23, %v10849_v15  ;;  %6197 = vmatprep.subr.bf16.mxu0 %v9118_v35  ;;  %v10901_v35 = vld [vmem:[#allocation5 + $0x360] sm:$0xff] }
 0x1b2   :  { %v5251_v54 = vadd.f32 %v13333_v61, %v5138_v38  ;;  %v5362_v38 = vadd.f32 %v5361_v6, %v5249_v31  ;;  %v13336_v30 = vld [vmem:[#allocation52_spill] sm:$0xff]  ;;  %v5367_v61 = vpop.f32.mrf.mxu0  ;;  %v485_v6 = vld [vmem:[#allocation5 + $0xbe0] sm:$0xff]  ;;  %v13338_v31 = vld [vmem:[#allocation54_spill] sm:$0xff] }
 0x1b3   :  { %v5257_v19 = vadd.f32 %v13336_v30, %v5144_v49  ;;  %v10873_v10 = vld [vmem:[#allocation2 + $0x160] ss:$24 sps:$4 sm:$0xff]   ;;  %v10882_v49 = vpop.f32.mrf.mxu1  ;;  %v13339_v30 = vld [vmem:[#allocation50_spill] sm:$0xff]  ;;  %v5368_v4 = vadd.f32 %v5367_v61, %v5255_v56  ;;  %6310 = vmatprep.subr.bf16.mxu1 %v9374_v33  ;;  %v13344_v33 = vld [vmem:[#allocation55_spill] sm:$0xff] }
 0x1b4   :  { %v5364_v37 = vadd.f32 %v5363_v39, %v5251_v54  ;;  %13337 = vst [vmem:[#allocation18_spill] sm:$0xff] %v10873_v10  ;;  %6044 = vmatmul.mubr.bf16.gmra.mxu0 %v10873_v10  ;;  %v9117_v39 = vcombine.low %v10838_v59, %v10840_v41  ;;  %v5146_v54 = vadd.f32 %v13338_v31, %v10507_v21  ;;  %v5369_v59 = vpop.f32.mrf.mxu0  ;;  %v13343_v56 = vld [vmem:[#allocation53_spill] sm:$0xff] }
 0x1b5   :  { %6157 = vmatmul.mubr.bf16.gmra.mxu1 %v13339_v30  ;;  %v10888_v10 = vrot.slane %v13340_v53, %v13196_v50  ;;  %v9373_v21 = vcombine.low %v10847_v23, %v10849_v15  ;;  %v5370_v41 = vadd.f32 %v5369_v59, %v5257_v19  ;;  %6199 = vmatprep.mubr.bf16.mxu0 %v10896_v3  ;;  %v13342_v23 = vsub.s32 3, %v13334_v51  ;;  %v461_v19 = vld [vmem:[#allocation5 + $0xb20] sm:$0xff] }
 0x1b6   :  { %v9675_v44 = vpack.c.bf16 %v5364_v37, %v5362_v38  ;;  %v10894_v38 = vpop.f32.mrf.mxu1  ;;  %v9104_v37 = vcombine.high %v477_v25, %v485_v6  ;;  %v5371_v31 = vpop.f32.mrf.mxu0  ;;  %6312 = vmatprep.mubr.bf16.mxu1 %v13343_v56  ;;  %v469_v61 = vld [vmem:[#allocation5 + $0xb60] sm:$0xff]  ;;  %v5261_v30 = vadd.f32 %v10539_v29, %v5148_v17  ;;  %6198 = vmatpush2.bf16.msra.mxu0 %v9117_v39 }
 0x1b7   :  { %v10906_v15 = vrot.slane %v13340_v53, %v13342_v23  ;;  %v9679_v59 = vpack.c.bf16 %v5370_v41, %v5368_v4  ;;  %v8847_v3 = vcombine.low %v10866_v20, %v10868_v62  ;;  %6311 = vmatpush2.bf16.msra.mxu1 %v9373_v21  ;;  %6393 = vmatprep.subr.bf16.mxu0 %v8848_v63  ;;  %v10921_v4 = vld [vmem:[#allocation5 + $0x2a0] sm:$0xff] }
 0x1b8   :  { %8185 = vst [vmem:[#allocation8 + $0x1a0] sm:$0xff] %v9675_v44  ;;  %v5259_v44 = vadd.f32 %v13344_v33, %v5146_v54  ;;  %v10911_v50 = vpop.f32.mrf.mxu1  ;;  %v5373_v51 = vpop.f32.mrf.mxu0  ;;  %v9103_v53 = vcombine.low %v477_v25, %v485_v6  ;;  %v8832_v23 = vcombine.high %v10899_v5, %v10901_v35  ;;  %v5411_v56 = vadd.f32 %v10554_v12, %v10888_v10  ;;  %v10923_v20 = vld [vmem:[#allocation5 + $0x2e0] sm:$0xff] }
 0x1b9   :  { %8189 = vst [vmem:[#allocation8 + $0x1c0] sm:$0xff] %v9679_v59  ;;  %v5374_v29 = vadd.f32 %v5373_v51, %v5261_v30  ;;  %6506 = vmatprep.subr.bf16.mxu1 %v9104_v37  ;;  %v9088_v39 = vcombine.high %v461_v19, %v469_v61  ;;  %v10925_v21 = vld [vmem:[#allocation2 + $0x8] ss:$24 sps:$4 sm:$0xff]   ;;  %v8831_v25 = vcombine.low %v10899_v5, %v10901_v35 }
 0x1ba   :  { %v5372_v54 = vadd.f32 %v5371_v31, %v5259_v44  ;;  %v10919_v17 = vpop.f32.mrf.mxu1  ;;  %v5523_v62 = vpop.f32.mrf.mxu0  ;;  %13345 = vst [vmem:[#allocation30_spill] sm:$0xff] %v10925_v21  ;;  %v445_v12 = vld [vmem:[#allocation5 + $0xaa0] sm:$0xff]  ;;  %v5413_v51 = vadd.f32 %v10559_v32, %v10906_v15  ;;  %v13346_v31 = vld [vmem:[#allocation56_spill] sm:$0xff]  ;;  %v9087_v44 = vcombine.low %v461_v19, %v469_v61  ;;  %v8816_v30 = vcombine.high %v10921_v4, %v10923_v20 }
 0x1bb   :  { %v453_v6 = vld [vmem:[#allocation5 + $0xae0] sm:$0xff]  ;;  %v5524_v41 = vadd.f32 %v5523_v62, %v5411_v56  ;;  %v5415_v5 = vadd.f32 %v10575_v24, %v10888_v10  ;;  %v10937_v32 = vld [vmem:[#allocation2 + $0x3c] ss:$24 sps:$4 sm:$0xff]  }
 0x1bc   :  { %6200 = vmatmul.mubr.bf16.vlgmr.msra.gmra.mxu0 %v10925_v21  ;;  %v9683_v63 = vpack.c.bf16 %v5374_v29, %v5372_v54  ;;  %v5636_v37 = vpop.f32.mrf.mxu1  ;;  %v5525_v33 = vpop.f32.mrf.mxu0  ;;  %13347 = vst [vmem:[#allocation22_spill] sm:$0xff] %v10937_v32  ;;  %v9072_v56 = vcombine.high %v445_v12, %v453_v6  ;;  %v13348_v61 = vld [vmem:[#allocation57_spill] sm:$0xff]  ;;  %v5417_v29 = vadd.f32 %v10581_v42, %v10906_v15 }
 0x1bd   :  { %6313 = vmatmul.mubr.bf16.vlgmr.msra.gmra.mxu1 %v13346_v31  ;;  %6394 = vmatpush1.bf16.msra.mxu0 %v8847_v3  ;;  %v5526_v35 = vadd.f32 %v5525_v33, %v5413_v51  ;;  %v10940_v3 = vld [vmem:[#allocation5 + $0x220] sm:$0xff]  ;;  %v9071_v33 = vcombine.low %v445_v12, %v453_v6  ;;  %v5423_v12 = vadd.f32 %v10603_v27, %v10906_v15 }
 0x1be   :  { %6507 = vmatpush1.bf16.msra.mxu1 %v9103_v53  ;;  %6395 = vmatprep.subr.bf16.mxu0 %v8832_v23  ;;  %8193 = vst [vmem:[#allocation8 + $0x1e0] sm:$0xff] %v9683_v63  ;;  %v5638_v59 = vpop.f32.mrf.mxu1  ;;  %v10942_v53 = vld [vmem:[#allocation5 + $0x260] sm:$0xff]  ;;  %v5527_v19 = vpop.f32.mrf.mxu0  ;;  %v8815_v23 = vcombine.low %v10921_v4, %v10923_v20  ;;  %v5421_v4 = vadd.f32 %v10598_v0, %v10888_v10 }
 0x1bf   :  { %6508 = vmatprep.subr.bf16.mxu1 %v9088_v39  ;;  %6209 = vmatprep.mubr.bf16.mxu0 %v10937_v32  ;;  %v429_v24 = vld [vmem:[#allocation5 + $0xa20] sm:$0xff]  ;;  %v5637_v39 = vadd.f32 %v5636_v37, %v5524_v41  ;;  %v5639_v62 = vadd.f32 %v5638_v59, %v5526_v35  ;;  %v5528_v51 = vadd.f32 %v5527_v19, %v5415_v5 }
 0x1c0   :  { %6322 = vmatprep.mubr.bf16.mxu1 %v13348_v61  ;;  %v437_v54 = vld [vmem:[#allocation5 + $0xa60] sm:$0xff]  ;;  %v5640_v63 = vpop.f32.mrf.mxu1  ;;  %v5529_v31 = vpop.f32.mrf.mxu0  ;;  %v8800_v61 = vcombine.high %v10940_v3, %v10942_v53  ;;  %v8799_v0 = vcombine.low %v10940_v3, %v10942_v53  ;;  %v5425_v3 = vadd.f32 %v10619_v58, %v10888_v10 }
 0x1c1   :  { %6396 = vmatpush1.bf16.msra.mxu0 %v8831_v25  ;;  %v10951_v32 = vld [vmem:[#allocation5 + $0x1a0] sm:$0xff]  ;;  %v9624_v20 = vpack.c.bf16 %v5639_v62, %v5637_v39  ;;  %v5530_v21 = vadd.f32 %v5529_v31, %v5417_v29  ;;  %v9056_v41 = vcombine.high %v429_v24, %v437_v54  ;;  %v5641_v5 = vadd.f32 %v5640_v63, %v5528_v51 }
 0x1c2   :  { %6509 = vmatpush1.bf16.msra.mxu1 %v9087_v44  ;;  %6397 = vmatprep.subr.bf16.mxu0 %v8816_v30  ;;  %v5642_v42 = vpop.f32.mrf.mxu1  ;;  %v10955_v37 = vld [vmem:[#allocation5 + $0x1e0] sm:$0xff]  ;;  %v5533_v6 = vpop.f32.mrf.mxu0  ;;  %v10963_v30 = vld [vmem:[#allocation2 + $0x38] ss:$24 sps:$4 sm:$0xff]   ;;  %v9055_v27 = vcombine.low %v429_v24, %v437_v54  ;;  %v5427_v31 = vadd.f32 %v10625_v16, %v10906_v15  ;;  %v5431_v16 = vadd.f32 %v10642_v28, %v10888_v10 }
 0x1c3   :  { %6510 = vmatprep.subr.bf16.mxu1 %v9072_v56  ;;  %v10957_v25 = vld [vmem:[#allocation5 + $0x9a0] sm:$0xff]  ;;  %8134 = vst [vmem:[#allocation8 + $0x8] sm:$0xff] %v9624_v20  ;;  %v5643_v35 = vadd.f32 %v5642_v42, %v5530_v21  ;;  %v5534_v59 = vadd.f32 %v5533_v6, %v5421_v4  ;;  %v8784_v29 = vcombine.high %v10951_v32, %v10955_v37 }
 0x1c4   :  { %v10959_v44 = vld [vmem:[#allocation5 + $0x9e0] sm:$0xff]  ;;  %6210 = vmatmul.mubr.bf16.gmra.mxu0 %v10963_v30  ;;  %v5646_v56 = vpop.f32.mrf.mxu1  ;;  %v5535_v19 = vpop.f32.mrf.mxu0  ;;  %v8783_v54 = vcombine.low %v10951_v32, %v10955_v37 }
 0x1c5   :  { %6323 = vmatmul.mubr.bf16.gmra.mxu1 %v10589_v60  ;;  %6398 = vmatpush1.bf16.msra.mxu0 %v8815_v23  ;;  %v9040_v39 = vcombine.high %v10957_v25, %v10959_v44  ;;  %v9628_v53 = vpack.c.bf16 %v5643_v35, %v5641_v5  ;;  %v5536_v21 = vadd.f32 %v5535_v19, %v5423_v12  ;;  %v10975_v51 = vld [vmem:[#allocation2 + $0x6c] ss:$24 sps:$4 sm:$0xff]  }
 0x1c6   :  { %6511 = vmatpush1.bf16.msra.mxu1 %v9071_v33  ;;  %6399 = vmatprep.subr.bf16.mxu0 %v8800_v61  ;;  %v5648_v62 = vpop.f32.mrf.mxu1  ;;  %v10978_v60 = vld [vmem:[#allocation5 + $0x120] sm:$0xff]  ;;  %v5537_v24 = vpop.f32.mrf.mxu0  ;;  %v5647_v33 = vadd.f32 %v5646_v56, %v5534_v59 }
 0x1c7   :  { %6512 = vmatprep.subr.bf16.mxu1 %v9056_v41  ;;  %6219 = vmatprep.mubr.bf16.mxu0 %v10975_v51  ;;  %v10980_v23 = vld [vmem:[#allocation5 + $0x160] sm:$0xff]  ;;  %8138 = vst [vmem:[#allocation8 + $0x28] sm:$0xff] %v9628_v53  ;;  %v5649_v61 = vadd.f32 %v5648_v62, %v5536_v21  ;;  %v5538_v4 = vadd.f32 %v5537_v24, %v5425_v3 }
 0x1c8   :  { %6332 = vmatprep.mubr.bf16.mxu1 %v10605_v36  ;;  %v10985_v63 = vld [vmem:[#allocation5 + $0x920] sm:$0xff]  ;;  %v5650_v20 = vpop.f32.mrf.mxu1  ;;  %v5539_v42 = vpop.f32.mrf.mxu0  ;;  %v9039_v36 = vcombine.low %v10957_v25, %v10959_v44  ;;  %v8768_v32 = vcombine.high %v10978_v60, %v10980_v23  ;;  %v5433_v25 = vadd.f32 %v10647_v18, %v10906_v15  ;;  %v8767_v28 = vcombine.low %v10978_v60, %v10980_v23 }
 0x1c9   :  { %v405_v58 = vld [vmem:[#allocation5 + $0x960] sm:$0xff]  ;;  %6400 = vmatpush1.bf16.msra.mxu0 %v8799_v0  ;;  %v9632_v37 = vpack.c.bf16 %v5649_v61, %v5647_v33  ;;  %v5540_v12 = vadd.f32 %v5539_v42, %v5427_v31  ;;  %v5651_v19 = vadd.f32 %v5650_v20, %v5538_v4  ;;  %v5435_v62 = vadd.f32 %v10663_v9, %v10888_v10 }
 0x1ca   :  { %6513 = vmatpush1.bf16.msra.mxu1 %v9055_v27  ;;  %6401 = vmatprep.subr.bf16.mxu0 %v8784_v29  ;;  %v10993_v41 = vld [vmem:[#allocation5 + $0xa0] sm:$0xff]  ;;  %v5652_v6 = vpop.f32.mrf.mxu1  ;;  %v9024_v0 = vcombine.high %v10985_v63, %v405_v58  ;;  %v5543_v44 = vpop.f32.mrf.mxu0  ;;  %v9023_v18 = vcombine.low %v10985_v63, %v405_v58  ;;  %v5437_v61 = vadd.f32 %v10669_v22, %v10906_v15 }
 0x1cb   :  { %6514 = vmatprep.subr.bf16.mxu1 %v9040_v39  ;;  %v10998_v5 = vld [vmem:[#allocation5 + $0xe0] sm:$0xff]  ;;  %8142 = vst [vmem:[#allocation8 + $0x48] sm:$0xff] %v9632_v37  ;;  %v5653_v27 = vadd.f32 %v5652_v6, %v5540_v12  ;;  %v5544_v29 = vadd.f32 %v5543_v44, %v5431_v16  ;;  %v5441_v22 = vadd.f32 %v10686_v40, %v10888_v10 }
 0x1cc   :  { %v11000_v35 = vld [vmem:[#allocation5 + $0x8a0] sm:$0xff]  ;;  %v5656_v39 = vpop.f32.mrf.mxu1  ;;  %v5545_v3 = vpop.f32.mrf.mxu0  ;;  %v8752_v53 = vcombine.high %v10993_v41, %v10998_v5  ;;  %v8751_v31 = vcombine.low %v10993_v41, %v10998_v5 }
 0x1cd   :  { %v11002_v59 = vld [vmem:[#allocation5 + $0x8e0] sm:$0xff]  ;;  %6333 = vmatmul.mubr.bf16.gmra.mxu1 %v10633_v52  ;;  %6402 = vmatpush1.bf16.msra.mxu0 %v8783_v54  ;;  %v9636_v60 = vpack.c.bf16 %v5653_v27, %v5651_v19  ;;  %v5546_v23 = vadd.f32 %v5545_v3, %v5433_v25  ;;  %v11019_v52 = vld [vmem:[#allocation2 + $0x9c] ss:$24 sps:$4 sm:$0xff]   ;;  %v5657_v4 = vadd.f32 %v5656_v39, %v5544_v29 }
 0x1ce   :  { %v11006_v56 = vld [vmem:[#allocation2 + $0x68] ss:$24 sps:$4 sm:$0xff]   ;;  %6515 = vmatpush1.bf16.msra.mxu1 %v9039_v36  ;;  %6403 = vmatprep.subr.bf16.mxu0 %v8768_v32  ;;  %v9008_v21 = vcombine.high %v11000_v35, %v11002_v59  ;;  %v5658_v24 = vpop.f32.mrf.mxu1  ;;  %v5547_v58 = vpop.f32.mrf.mxu0 }
 0x1cf   :  { %6220 = vmatmul.mubr.bf16.gmra.mxu0 %v11006_v56  ;;  %6516 = vmatprep.subr.bf16.mxu1 %v9024_v0  ;;  %v11022_v54 = vld [vmem:[#allocation5 + $0x20] sm:$0xff]  ;;  %8146 = vst [vmem:[#allocation8 + $0x68] sm:$0xff] %v9636_v60  ;;  %v5659_v20 = vadd.f32 %v5658_v24, %v5546_v23  ;;  %v5548_v42 = vadd.f32 %v5547_v58, %v5435_v62 }
 0x1d0   :  { %6229 = vmatprep.mubr.bf16.mxu0 %v11019_v52  ;;  %v11024_v63 = vld [vmem:[#allocation5 + $0x60] sm:$0xff]  ;;  %6342 = vmatprep.mubr.bf16.mxu1 %v10649_v8  ;;  %v5660_v36 = vpop.f32.mrf.mxu1  ;;  %v5549_v32 = vpop.f32.mrf.mxu0  ;;  %v9007_v8 = vcombine.low %v11000_v35, %v11002_v59  ;;  %v5443_v35 = vadd.f32 %v10691_v1, %v10906_v15 }
 0x1d1   :  { %v11029_v33 = vld [vmem:[#allocation5 + $0x820] sm:$0xff]  ;;  %6404 = vmatpush1.bf16.msra.mxu0 %v8767_v28  ;;  %v8736_v41 = vcombine.high %v11022_v54, %v11024_v63  ;;  %v9640_v37 = vpack.c.bf16 %v5659_v20, %v5657_v4  ;;  %v5550_v12 = vadd.f32 %v5549_v32, %v5437_v61  ;;  %v11050_v28 = vld [vmem:[#allocation2 + $0x98] ss:$24 sps:$4 sm:$0xff]   ;;  %v8735_v40 = vcombine.low %v11022_v54, %v11024_v63 }
 0x1d2   :  { %v373_v9 = vld [vmem:[#allocation5 + $0x860] sm:$0xff]  ;;  %6517 = vmatpush1.bf16.msra.mxu1 %v9023_v18  ;;  %6405 = vmatprep.subr.bf16.mxu0 %v8752_v53  ;;  %v5662_v6 = vpop.f32.mrf.mxu1  ;;  %v5553_v59 = vpop.f32.mrf.mxu0  ;;  %v5661_v19 = vadd.f32 %v5660_v36, %v5548_v42 }
 0x1d3   :  { %v11037_v16 = vld [vmem:[#allocation5 + $0x7a0] sm:$0xff]  ;;  %6518 = vmatprep.subr.bf16.mxu1 %v9008_v21  ;;  %v8992_v0 = vcombine.high %v11029_v33, %v373_v9  ;;  %8150 = vst [vmem:[#allocation8 + $0x88] sm:$0xff] %v9640_v37  ;;  %v5663_v27 = vadd.f32 %v5662_v6, %v5550_v12  ;;  %v5554_v29 = vadd.f32 %v5553_v59, %v5441_v22 }
 0x1d4   :  { %v11042_v5 = vld [vmem:[#allocation5 + $0x7e0] sm:$0xff]  ;;  %v5666_v39 = vpop.f32.mrf.mxu1  ;;  %v5555_v3 = vpop.f32.mrf.mxu0  ;;  %v8991_v1 = vcombine.low %v11029_v33, %v373_v9  ;;  %v5445_v21 = vadd.f32 %v10707_v55, %v10888_v10  ;;  %v5447_v33 = vadd.f32 %v10713_v46, %v10906_v15  ;;  %v5451_v46 = vadd.f32 %v10730_v57, %v10888_v10 }
 0x1d5   :  { %v11044_v25 = vld [vmem:[#allocation5 + $0xfa0] sm:$0xff]  ;;  %6343 = vmatmul.mubr.bf16.gmra.mxu1 %v10677_v13  ;;  %6406 = vmatpush1.bf16.msra.mxu0 %v8751_v31  ;;  %v8976_v18 = vcombine.high %v11037_v16, %v11042_v5  ;;  %v9644_v62 = vpack.c.bf16 %v5663_v27, %v5661_v19  ;;  %v5556_v60 = vadd.f32 %v5555_v3, %v5443_v35 }
 0x1d6   :  { %v11046_v44 = vld [vmem:[#allocation5 + $0xfe0] sm:$0xff]  ;;  %6519 = vmatpush1.bf16.msra.mxu1 %v9007_v8  ;;  %6407 = vmatprep.subr.bf16.mxu0 %v8736_v41  ;;  %v5668_v23 = vpop.f32.mrf.mxu1  ;;  %v5557_v63 = vpop.f32.mrf.mxu0  ;;  %v8975_v58 = vcombine.low %v11037_v16, %v11042_v5  ;;  %v5667_v9 = vadd.f32 %v5666_v39, %v5554_v29  ;;  %v5455_v39 = vadd.f32 %v10751_v48, %v10888_v10 }
 0x1d7   :  { %6230 = vmatmul.mubr.bf16.gmra.mxu0 %v11050_v28  ;;  %v9232_v53 = vcombine.high %v11044_v25, %v11046_v44  ;;  %6520 = vmatprep.subr.bf16.mxu1 %v8992_v0  ;;  %v11063_v13 = vld [vmem:[#allocation2 + $0xcc] ss:$24 sps:$4 sm:$0xff]   ;;  %8154 = vst [vmem:[#allocation8 + $0xa8] sm:$0xff] %v9644_v62  ;;  %v5669_v61 = vadd.f32 %v5668_v23, %v5556_v60 }
 0x1d8   :  { %6239 = vmatprep.mubr.bf16.mxu0 %v11063_v13  ;;  %v11066_v24 = vld [vmem:[#allocation5 + $0x720] sm:$0xff]  ;;  %6352 = vmatprep.mubr.bf16.mxu1 %v10693_v7  ;;  %v5558_v4 = vadd.f32 %v5557_v63, %v5445_v21  ;;  %v5670_v20 = vpop.f32.mrf.mxu1  ;;  %v5559_v42 = vpop.f32.mrf.mxu0  ;;  %v9231_v7 = vcombine.low %v11044_v25, %v11046_v44  ;;  %v5453_v0 = vadd.f32 %v10735_v11, %v10906_v15 }
 0x1d9   :  { %v11068_v54 = vld [vmem:[#allocation5 + $0x760] sm:$0xff]  ;;  %6408 = vmatpush1.bf16.msra.mxu0 %v8735_v40  ;;  %v9648_v8 = vpack.c.bf16 %v5669_v61, %v5667_v9  ;;  %v5560_v41 = vadd.f32 %v5559_v42, %v5447_v33  ;;  %v13349_v61 = vld [vmem:[#allocation15_spill] sm:$0xff] }
 0x1da   :  { %v11073_v31 = vld [vmem:[#allocation5 + $0xf20] sm:$0xff]  ;;  %6521 = vmatpush1.bf16.msra.mxu1 %v8991_v1  ;;  %6409 = vmatprep.subr.bf16.mxu0 %v8976_v18  ;;  %v8960_v36 = vcombine.high %v11066_v24, %v11068_v54  ;;  %v5672_v16 = vpop.f32.mrf.mxu1  ;;  %v5563_v5 = vpop.f32.mrf.mxu0  ;;  %v8959_v57 = vcombine.low %v11066_v24, %v11068_v54  ;;  %v5671_v44 = vadd.f32 %v5670_v20, %v5558_v4 }
 0x1db   :  { %v597_v55 = vld [vmem:[#allocation5 + $0xf60] sm:$0xff]  ;;  %6522 = vmatprep.subr.bf16.mxu1 %v9232_v53  ;;  %8158 = vst [vmem:[#allocation8 + $0xc8] sm:$0xff] %v9648_v8  ;;  %v5673_v35 = vadd.f32 %v5672_v16, %v5560_v41  ;;  %v5564_v59 = vadd.f32 %v5563_v5, %v5451_v46  ;;  %v5457_v24 = vadd.f32 %v10757_v14, %v10906_v15  ;;  %v13350_v8 = vld [vmem:[#allocation16_spill] sm:$0xff] }
 0x1dc   :  { %v11081_v32 = vld [vmem:[#allocation5 + $0x6a0] sm:$0xff]  ;;  %v9216_v22 = vcombine.high %v11073_v31, %v597_v55  ;;  %v5676_v40 = vpop.f32.mrf.mxu1  ;;  %v5565_v19 = vpop.f32.mrf.mxu0  ;;  %v9215_v11 = vcombine.low %v11073_v31, %v597_v55  ;;  %v5461_v14 = vadd.f32 %v13349_v61, %v10888_v10  ;;  %v5463_v41 = vadd.f32 %v13350_v8, %v10906_v15 }
 0x1dd   :  { %v11086_v37 = vld [vmem:[#allocation5 + $0x6e0] sm:$0xff]  ;;  %6353 = vmatmul.mubr.bf16.gmra.mxu1 %v10721_v47  ;;  %6410 = vmatpush2.bf16.msra.mxu0 %v8975_v58  ;;  %v9652_v3 = vpack.c.bf16 %v5673_v35, %v5671_v44  ;;  %v5566_v1 = vadd.f32 %v5565_v19, %v5453_v0  ;;  %v11107_v47 = vld [vmem:[#allocation2 + $0xfc] ss:$24 sps:$4 sm:$0xff]   ;;  %v5677_v54 = vadd.f32 %v5676_v40, %v5564_v59 }
 0x1de   :  { %v11088_v12 = vld [vmem:[#allocation5 + $0xea0] sm:$0xff]  ;;  %6523 = vmatpush2.bf16.msra.mxu1 %v9231_v7  ;;  %6411 = vmatprep.subr.bf16.mxu0 %v8960_v36  ;;  %v8944_v27 = vcombine.high %v11081_v32, %v11086_v37  ;;  %v5678_v18 = vpop.f32.mrf.mxu1  ;;  %v5567_v62 = vpop.f32.mrf.mxu0  ;;  %v8943_v60 = vcombine.low %v11081_v32, %v11086_v37  ;;  %v5465_v19 = vadd.f32 %v10797_v45, %v10888_v10 }
 0x1df   :  { %v11090_v6 = vld [vmem:[#allocation5 + $0xee0] sm:$0xff]  ;;  %6524 = vmatprep.subr.bf16.mxu1 %v9216_v22  ;;  %6362 = vmatprep.mubr.bf16.mxu1 %v10737_v2  ;;  %8162 = vst [vmem:[#allocation8 + $0xe8] sm:$0xff] %v9652_v3  ;;  %v5679_v63 = vadd.f32 %v5678_v18, %v5566_v1  ;;  %v5568_v58 = vadd.f32 %v5567_v62, %v5455_v39  ;;  %v11138_v22 = vld [vmem:[#allocation2 + $0xf8] ss:$24 sps:$4 sm:$0xff]  }
 0x1e0   :  { %v11094_v25 = vld [vmem:[#allocation2 + $0xc8] ss:$24 sps:$4 sm:$0xff]   ;;  %v9200_v29 = vcombine.high %v11088_v12, %v11090_v6  ;;  %v5680_v31 = vpop.f32.mrf.mxu1  ;;  %v5569_v55 = vpop.f32.mrf.mxu0  ;;  %v9199_v2 = vcombine.low %v11088_v12, %v11090_v6  ;;  %v11151_v39 = vld [vmem:[#allocation2 + $0x12c] ss:$24 sps:$4 sm:$0xff]  }
 0x1e1   :  { %6240 = vmatmul.mubr.bf16.gmra.mxu0 %v11094_v25  ;;  %v11110_v53 = vld [vmem:[#allocation5 + $0x620] sm:$0xff]  ;;  %v9656_v4 = vpack.c.bf16 %v5679_v63, %v5677_v54  ;;  %v5570_v20 = vadd.f32 %v5569_v55, %v5457_v24  ;;  %v5681_v12 = vadd.f32 %v5680_v31, %v5568_v58 }
 0x1e2   :  { %6249 = vmatprep.mubr.bf16.mxu0 %v11107_v47  ;;  %v11112_v21 = vld [vmem:[#allocation5 + $0x660] sm:$0xff]  ;;  %6412 = vmatpush2.bf16.msra.mxu0 %v8959_v57  ;;  %v5682_v42 = vpop.f32.mrf.mxu1  ;;  %v5573_v16 = vpop.f32.mrf.mxu0  ;;  %v13351_v57 = vld [vmem:[#allocation20_spill] sm:$0xff] }
 0x1e3   :  { %v11117_v23 = vld [vmem:[#allocation5 + $0xe20] sm:$0xff]  ;;  %6525 = vmatpush2.bf16.msra.mxu1 %v9215_v11  ;;  %6413 = vmatprep.subr.bf16.mxu0 %v8944_v27  ;;  %v8928_v33 = vcombine.high %v11110_v53, %v11112_v21  ;;  %v8927_v37 = vcombine.low %v11110_v53, %v11112_v21  ;;  %8166 = vst [vmem:[#allocation8 + $0x108] sm:$0xff] %v9656_v4 }
 0x1e4   :  { %v565_v48 = vld [vmem:[#allocation5 + $0xe60] sm:$0xff]  ;;  %6526 = vmatprep.subr.bf16.mxu1 %v9200_v29  ;;  %v5683_v6 = vadd.f32 %v5682_v42, %v5570_v20  ;;  %v5574_v0 = vadd.f32 %v5573_v16, %v5461_v14  ;;  %v5686_v5 = vpop.f32.mrf.mxu1  ;;  %v5575_v44 = vpop.f32.mrf.mxu0 }
 0x1e5   :  { %v11125_v9 = vld [vmem:[#allocation5 + $0x5a0] sm:$0xff]  ;;  %v9184_v7 = vcombine.high %v11117_v23, %v565_v48  ;;  %6363 = vmatmul.mubr.bf16.gmra.mxu1 %v13351_v57  ;;  %v9183_v35 = vcombine.low %v11117_v23, %v565_v48  ;;  %v5576_v27 = vadd.f32 %v5575_v44, %v5463_v41 }
 0x1e6   :  { %v11130_v36 = vld [vmem:[#allocation5 + $0x5e0] sm:$0xff]  ;;  %6414 = vmatpush2.bf16.msra.mxu0 %v8943_v60  ;;  %v9660_v11 = vpack.c.bf16 %v5683_v6, %v5681_v12  ;;  %v5688_v29 = vpop.f32.mrf.mxu1  ;;  %v5577_v18 = vpop.f32.mrf.mxu0  ;;  %v5467_v60 = vadd.f32 %v10803_v34, %v10906_v15  ;;  %v5687_v23 = vadd.f32 %v5686_v5, %v5574_v0  ;;  %v13355_v6 = vld [vmem:[#allocation19_spill] sm:$0xff] }
 0x1e7   :  { %v11132_v32 = vld [vmem:[#allocation5 + $0xda0] sm:$0xff]  ;;  %6527 = vmatpush2.bf16.msra.mxu1 %v9199_v2  ;;  %6415 = vmatprep.subr.bf16.mxu0 %v8928_v33  ;;  %v8912_v59 = vcombine.high %v11125_v9, %v11130_v36  ;;  %v8911_v21 = vcombine.low %v11125_v9, %v11130_v36  ;;  %v5689_v48 = vadd.f32 %v5688_v29, %v5576_v27 }
 0x1e8   :  { %v11134_v46 = vld [vmem:[#allocation5 + $0xde0] sm:$0xff]  ;;  %6528 = vmatprep.subr.bf16.mxu1 %v9184_v7  ;;  %8170 = vst [vmem:[#allocation8 + $0x128] sm:$0xff] %v9660_v11  ;;  %v5578_v24 = vadd.f32 %v5577_v18, %v5465_v19  ;;  %v5690_v54 = vpop.f32.mrf.mxu1  ;;  %v5579_v63 = vpop.f32.mrf.mxu0  ;;  %v13354_v7 = vld [vmem:[#allocation23_spill] sm:$0xff] }
 0x1e9   :  { %6250 = vmatmul.mubr.bf16.gmra.mxu0 %v11138_v22  ;;  %v9168_v40 = vcombine.high %v11132_v32, %v11134_v46  ;;  %v11154_v3 = vld [vmem:[#allocation5 + $0x520] sm:$0xff]  ;;  %v9167_v58 = vcombine.low %v11132_v32, %v11134_v46  ;;  %v9664_v33 = vpack.c.bf16 %v5689_v48, %v5687_v23  ;;  %v5580_v9 = vadd.f32 %v5579_v63, %v5467_v60  ;;  %v11195_v11 = vld [vmem:[#allocation2 + $0x15c] ss:$24 sps:$4 sm:$0xff]  }
 0x1ea   :  { %6259 = vmatprep.mubr.bf16.mxu0 %v11151_v39  ;;  %v11156_v1 = vld [vmem:[#allocation5 + $0x560] sm:$0xff]  ;;  %6416 = vmatpush2.bf16.msra.mxu0 %v8927_v37  ;;  %v5692_v61 = vpop.f32.mrf.mxu1  ;;  %v5473_v36 = vadd.f32 %v13354_v7, %v10906_v15  ;;  %v5583_v32 = vpop.f32.mrf.mxu0  ;;  %v5691_v41 = vadd.f32 %v5690_v54, %v5578_v24 }
 0x1eb   :  { %v13352_v53 = vld [vmem:[#allocation17_spill] sm:$0xff]  ;;  %6529 = vmatpush2.bf16.msra.mxu1 %v9183_v35  ;;  %6417 = vmatprep.subr.bf16.mxu0 %v8912_v59  ;;  %v8896_v31 = vcombine.high %v11154_v3, %v11156_v1  ;;  %v8895_v8 = vcombine.low %v11154_v3, %v11156_v1  ;;  %8174 = vst [vmem:[#allocation8 + $0x148] sm:$0xff] %v9664_v33  ;;  %v11220_v33 = vld [vmem:[#allocation5 + $0x3a8] sm:$0xff] }
 0x1ec   :  { %6372 = vmatprep.mubr.bf16.mxu1 %v13352_v53  ;;  %v11161_v62 = vld [vmem:[#allocation5 + $0xd20] sm:$0xff]  ;;  %6530 = vmatprep.subr.bf16.mxu1 %v9168_v40  ;;  %v5693_v16 = vadd.f32 %v5692_v61, %v5580_v9  ;;  %v5696_v12 = vpop.f32.mrf.mxu1  ;;  %v5585_v0 = vpop.f32.mrf.mxu0  ;;  %v5475_v35 = vadd.f32 %v10853_v43, %v10888_v10  ;;  %v11222_v9 = vld [vmem:[#allocation5 + $0x3e8] sm:$0xff]  ;;  %v5483_v61 = vadd.f32 %v10894_v38, %v10906_v15 }
 0x1ed   :  { %v533_v45 = vld [vmem:[#allocation5 + $0xd60] sm:$0xff]  ;;  %6373 = vmatmul.mubr.bf16.gmra.mxu1 %v13355_v6  ;;  %v5586_v40 = vadd.f32 %v5585_v0, %v5473_v36 }
 0x1ee   :  { %v11169_v55 = vld [vmem:[#allocation5 + $0x4a0] sm:$0xff]  ;;  %v9152_v14 = vcombine.high %v11161_v62, %v533_v45  ;;  %6418 = vmatpush2.bf16.msra.mxu0 %v8911_v21  ;;  %v9151_v5 = vcombine.low %v11161_v62, %v533_v45  ;;  %v9668_v59 = vpack.c.bf16 %v5693_v16, %v5691_v41  ;;  %v5698_v19 = vpop.f32.mrf.mxu1  ;;  %v5587_v3 = vpop.f32.mrf.mxu0  ;;  %v5477_v21 = vadd.f32 %v10862_v26, %v10906_v15 }
 0x1ef   :  { %v13353_v2 = vld [vmem:[#allocation21_spill] sm:$0xff]  ;;  %6531 = vmatpush2.bf16.msra.mxu1 %v9167_v58  ;;  %6419 = vmatprep.subr.bf16.mxu0 %v8896_v31  ;;  %v5699_v45 = vadd.f32 %v5698_v19, %v5586_v40  ;;  %v5588_v60 = vadd.f32 %v5587_v3, %v5475_v35  ;;  %v5481_v26 = vadd.f32 %v10882_v49, %v10888_v10  ;;  %v206_v19 = vld [vmem:[#allocation5 + $0x328] sm:$0xff] }
 0x1f0   :  { %v5471_v34 = vadd.f32 %v13353_v2, %v10888_v10  ;;  %v11174_v4 = vld [vmem:[#allocation5 + $0x4e0] sm:$0xff]  ;;  %6532 = vmatprep.subr.bf16.mxu1 %v9152_v14  ;;  %8178 = vst [vmem:[#allocation8 + $0x168] sm:$0xff] %v9668_v59  ;;  %v5700_v23 = vpop.f32.mrf.mxu1  ;;  %v5589_v48 = vpop.f32.mrf.mxu0  ;;  %v8850_v16 = vcombine.high %v11220_v33, %v11222_v9  ;;  %v13358_v59 = vld [vmem:[#allocation27_spill] sm:$0xff] }
 0x1f1   :  { %v11176_v20 = vld [vmem:[#allocation5 + $0xca0] sm:$0xff]  ;;  %v8880_v57 = vcombine.high %v11169_v55, %v11174_v4  ;;  %v8879_v18 = vcombine.low %v11169_v55, %v11174_v4  ;;  %v5590_v31 = vadd.f32 %v5589_v48, %v5477_v21  ;;  %v11226_v4 = vld [vmem:[#allocation2 + $0x158] ss:$24 sps:$4 sm:$0xff]  }
 0x1f2   :  { %v11178_v42 = vld [vmem:[#allocation5 + $0xce0] sm:$0xff]  ;;  %v5584_v37 = vadd.f32 %v5583_v32, %v5471_v34  ;;  %6420 = vmatpush2.bf16.msra.mxu0 %v8895_v8  ;;  %v5702_v55 = vpop.f32.mrf.mxu1  ;;  %v5593_v14 = vpop.f32.mrf.mxu0  ;;  %v13357_v32 = vld [vmem:[#allocation18_spill] sm:$0xff] }
 0x1f3   :  { %v11182_v46 = vld [vmem:[#allocation2 + $0x128] ss:$24 sps:$4 sm:$0xff]   ;;  %v9136_v44 = vcombine.high %v11176_v20, %v11178_v42  ;;  %6533 = vmatpush2.bf16.msra.mxu1 %v9151_v5  ;;  %6421 = vmatprep.subr.bf16.mxu0 %v8880_v57  ;;  %v9135_v24 = vcombine.low %v11176_v20, %v11178_v42  ;;  %v5701_v20 = vadd.f32 %v5700_v23, %v5588_v60  ;;  %v11239_v5 = vld [vmem:[#allocation2 + $0x4] ss:$24 sps:$4 sm:$0xff]  }
 0x1f4   :  { %6260 = vmatmul.mubr.bf16.gmra.mxu0 %v11182_v46  ;;  %v11198_v27 = vld [vmem:[#allocation5 + $0x420] sm:$0xff]  ;;  %v5697_v62 = vadd.f32 %v5696_v12, %v5584_v37  ;;  %v5703_v42 = vadd.f32 %v5702_v55, %v5590_v31  ;;  %v5594_v7 = vadd.f32 %v5593_v14, %v5481_v26  ;;  %v5706_v36 = vpop.f32.mrf.mxu1  ;;  %v5595_v8 = vpop.f32.mrf.mxu0  ;;  %v5485_v37 = vadd.f32 %v10911_v50, %v10888_v10  ;;  %v13359_v31 = vld [vmem:[#allocation30_spill] sm:$0xff] }
 0x1f5   :  { %6269 = vmatprep.mubr.bf16.mxu0 %v11195_v11  ;;  %v11200_v29 = vld [vmem:[#allocation5 + $0x460] sm:$0xff]  ;;  %6534 = vmatprep.subr.bf16.mxu1 %v9136_v44  ;;  %v5596_v6 = vadd.f32 %v5595_v8, %v5483_v61  ;;  %v5487_v50 = vadd.f32 %v10919_v17, %v10906_v15  ;;  %v11261_v14 = vld [vmem:[#allocation2 + $0x34] ss:$24 sps:$4 sm:$0xff]  }
 0x1f6   :  { %v13356_v1 = vld [vmem:[#allocation25_spill] sm:$0xff]  ;;  %v8864_v54 = vcombine.high %v11198_v27, %v11200_v29  ;;  %v9672_v58 = vpack.c.bf16 %v5699_v45, %v5697_v62  ;;  %v8863_v49 = vcombine.low %v11198_v27, %v11200_v29  ;;  %6422 = vmatpush2.bf16.msra.mxu0 %v8879_v18  ;;  %v9676_v12 = vpack.c.bf16 %v5703_v42, %v5701_v20  ;;  %v5708_v0 = vpop.f32.mrf.mxu1  ;;  %v5597_v35 = vpop.f32.mrf.mxu0  ;;  %v214_v27 = vld [vmem:[#allocation5 + $0x368] sm:$0xff] }
 0x1f7   :  { %6382 = vmatprep.mubr.bf16.mxu1 %v13356_v1  ;;  %v11205_v53 = vld [vmem:[#allocation5 + $0xc20] sm:$0xff]  ;;  %6535 = vmatpush2.bf16.msra.mxu1 %v9135_v24  ;;  %v5707_v10 = vadd.f32 %v5706_v36, %v5594_v7  ;;  %v5709_v29 = vadd.f32 %v5708_v0, %v5596_v6  ;;  %v5598_v3 = vadd.f32 %v5597_v35, %v5485_v37  ;;  %v190_v24 = vld [vmem:[#allocation5 + $0x2a8] sm:$0xff] }
 0x1f8   :  { %v501_v43 = vld [vmem:[#allocation5 + $0xc60] sm:$0xff]  ;;  %8182 = vst [vmem:[#allocation8 + $0x188] sm:$0xff] %v9672_v58  ;;  %6383 = vmatmul.mubr.bf16.gmra.mxu1 %v13357_v32  ;;  %6423 = vmatprep.subr.bf16.mxu0 %v8864_v54  ;;  %8186 = vst [vmem:[#allocation8 + $0x1a8] sm:$0xff] %v9676_v12  ;;  %v5710_v1 = vpop.f32.mrf.mxu1  ;;  %v5599_v18 = vpop.f32.mrf.mxu0  ;;  %v8834_v60 = vcombine.high %v206_v19, %v214_v27  ;;  %v198_v54 = vld [vmem:[#allocation5 + $0x2e8] sm:$0xff] }
 0x1f9   :  { %v11213_v63 = vld [vmem:[#allocation5 + $0x13a0] sm:$0xff]  ;;  %v9120_v2 = vcombine.high %v11205_v53, %v501_v43  ;;  %v9119_v38 = vcombine.low %v11205_v53, %v501_v43  ;;  %6538 = vmatprep.mubr.bf16.mxu1 %v13358_v59  ;;  %v8849_v53 = vcombine.low %v11220_v33, %v11222_v9  ;;  %v9680_v21 = vpack.c.bf16 %v5709_v29, %v5707_v10  ;;  %v13360_v36 = vld [vmem:[#allocation22_spill] sm:$0xff] }
 0x1fa   :  { %v11218_v34 = vld [vmem:[#allocation5 + $0x13e0] sm:$0xff]  ;;  %6424 = vmatpush2.bf16.msra.mxu0 %v8863_v49  ;;  %v5600_v62 = vadd.f32 %v5599_v18, %v5487_v50  ;;  %v5712_v45 = vpop.f32.mrf.mxu1  ;;  %v11249_v17 = vpop.f32.mrf.mxu0  ;;  %v8818_v49 = vcombine.high %v190_v24, %v198_v54  ;;  %v174_v32 = vld [vmem:[#allocation5 + $0x228] sm:$0xff]  ;;  %v8817_v37 = vcombine.low %v190_v24, %v198_v54 }
 0x1fb   :  { %v9360_v41 = vcombine.high %v11213_v63, %v11218_v34  ;;  %6536 = vmatprep.subr.bf16.mxu1 %v9120_v2  ;;  %v717_v57 = vld [vmem:[#allocation5 + $0x1320] sm:$0xff]  ;;  %v9359_v40 = vcombine.low %v11213_v63, %v11218_v34  ;;  %8190 = vst [vmem:[#allocation8 + $0x1c8] sm:$0xff] %v9680_v21  ;;  %v5711_v63 = vadd.f32 %v5710_v1, %v5598_v3  ;;  %v182_v8 = vld [vmem:[#allocation5 + $0x268] sm:$0xff] }
 0x1fc   :  { %6270 = vmatmul.mubr.bf16.gmra.mxu0 %v11226_v4  ;;  %v725_v44 = vld [vmem:[#allocation5 + $0x1360] sm:$0xff]  ;;  %6537 = vmatpush2.bf16.msra.mxu1 %v9119_v38  ;;  %v5713_v26 = vadd.f32 %v5712_v45, %v5600_v62  ;;  %v11254_v58 = vpop.f32.mrf.mxu1  ;;  %v11257_v2 = vpop.f32.mrf.mxu0  ;;  %v8833_v34 = vcombine.low %v206_v19, %v214_v27  ;;  %v8802_v0 = vcombine.high %v174_v32, %v182_v8  ;;  %v11275_v59 = vld [vmem:[#allocation2 + $0x30] ss:$24 sps:$4 sm:$0xff]  }
 0x1fd   :  { %6425 = vmatprep.mubr.bf16.mxu0 %v11239_v5  ;;  %6619 = vmatprep.subr.bf16.mxu0 %v9360_v41  ;;  %v9344_v43 = vcombine.high %v717_v57, %v725_v44  ;;  %v701_v23 = vld [vmem:[#allocation5 + $0x12a0] sm:$0xff]  ;;  %v9343_v55 = vcombine.low %v717_v57, %v725_v44  ;;  %v166_v19 = vld [vmem:[#allocation5 + $0x1e8] sm:$0xff]  ;;  %v8801_v29 = vcombine.low %v174_v32, %v182_v8 }
 0x1fe   :  { %6732 = vmatprep.subr.bf16.mxu1 %v8850_v16  ;;  %v709_v15 = vld [vmem:[#allocation5 + $0x12e0] sm:$0xff]  ;;  %v9684_v9 = vpack.c.bf16 %v5713_v26, %v5711_v63  ;;  %v11259_v61 = vpop.f32.mrf.mxu1  ;;  %v11264_v7 = vpop.f32.mrf.mxu0  ;;  %v150_v45 = vld [vmem:[#allocation5 + $0x168] sm:$0xff] }
 0x1ff   :  { %v11251_v48 = vld [vmem:[#allocation2] ss:$24 sps:$4 sm:$0xff]   ;;  %v9328_v33 = vcombine.high %v701_v23, %v709_v15  ;;  %v9327_v41 = vcombine.low %v701_v23, %v709_v15  ;;  %v11285_v18 = vld [vmem:[#allocation2 + $0x64] ss:$24 sps:$4 sm:$0xff]  }
 0x200   :  { %6539 = vmatmul.mubr.bf16.vlgmr.msra.gmra.mxu1 %v13359_v31  ;;  %v685_v20 = vld [vmem:[#allocation5 + $0x1220] sm:$0xff]  ;;  %8194 = vst [vmem:[#allocation8 + $0x1e8] sm:$0xff] %v9684_v9  ;;  %v11267_v38 = vpop.f32.mrf.mxu1  ;;  %v11269_v16 = vpop.f32.mrf.mxu0  ;;  %v134_v9 = vld [vmem:[#allocation5 + $0xe8] sm:$0xff] }
 0x201   :  { %6733 = vmatpush1.bf16.msra.mxu1 %v8849_v53  ;;  %v693_v42 = vld [vmem:[#allocation5 + $0x1260] sm:$0xff]  ;;  %6548 = vmatprep.mubr.bf16.mxu1 %v13360_v36 }
 0x202   :  { %6734 = vmatprep.subr.bf16.mxu1 %v8834_v60  ;;  %v9312_v12 = vcombine.high %v685_v20, %v693_v42  ;;  %v11271_v6 = vpop.f32.mrf.mxu1  ;;  %v669_v57 = vld [vmem:[#allocation5 + $0x11a0] sm:$0xff]  ;;  %v11273_v35 = vpop.f32.mrf.mxu0  ;;  %v9311_v50 = vcombine.low %v685_v20, %v693_v42 }
 0x203   :  { %v677_v44 = vld [vmem:[#allocation5 + $0x11e0] sm:$0xff] }
 0x204   :  { %6426 = vmatmul.mubr.bf16.vlgmr.msra.gmra.mxu0 %v11251_v48  ;;  %v11278_v27 = vpop.f32.mrf.mxu1  ;;  %v11281_v10 = vpop.f32.mrf.mxu0  ;;  %v9296_v3 = vcombine.high %v669_v57, %v677_v44  ;;  %v661_v21 = vld [vmem:[#allocation5 + $0x1160] sm:$0xff]  ;;  %v9295_v23 = vcombine.low %v669_v57, %v677_v44  ;;  %v118_v44 = vld [vmem:[#allocation5 + $0x68] sm:$0xff] }
 0x205   :  { %6620 = vmatpush1.bf16.msra.mxu0 %v9359_v40  ;;  %6435 = vmatprep.mubr.bf16.mxu0 %v11261_v14  ;;  %v158_v40 = vld [vmem:[#allocation5 + $0x1a8] sm:$0xff]  ;;  %v637_v31 = vld [vmem:[#allocation5 + $0x10a0] sm:$0xff] }
 0x206   :  { %6621 = vmatprep.subr.bf16.mxu0 %v9344_v43  ;;  %6735 = vmatpush1.bf16.msra.mxu1 %v8833_v34  ;;  %v11283_v1 = vpop.f32.mrf.mxu1  ;;  %v8786_v53 = vcombine.high %v158_v40, %v166_v19  ;;  %v653_v43 = vld [vmem:[#allocation5 + $0x1120] sm:$0xff]  ;;  %v11288_v62 = vpop.f32.mrf.mxu0  ;;  %v8785_v24 = vcombine.low %v158_v40, %v166_v19 }
 0x207   :  { %6736 = vmatprep.subr.bf16.mxu1 %v8818_v49  ;;  %v9280_v54 = vcombine.high %v653_v43, %v661_v21  ;;  %v9279_v20 = vcombine.low %v653_v43, %v661_v21  ;;  %v861_v21 = vld [vmem:[#allocation5 + $0x17a0] sm:$0xff] }
 0x208   :  { %6549 = vmatmul.mubr.bf16.gmra.mxu1 %v10963_v30  ;;  %v142_v30 = vld [vmem:[#allocation5 + $0x128] sm:$0xff]  ;;  %v11291_v60 = vpop.f32.mrf.mxu1  ;;  %v11293_v15 = vpop.f32.mrf.mxu0 }
 0x209   :  { %6622 = vmatpush1.bf16.msra.mxu0 %v9343_v55  ;;  %6558 = vmatprep.mubr.bf16.mxu1 %v10975_v51  ;;  %v8770_v26 = vcombine.high %v142_v30, %v150_v45  ;;  %v645_v55 = vld [vmem:[#allocation5 + $0x10e0] sm:$0xff]  ;;  %v8769_v36 = vcombine.low %v142_v30, %v150_v45 }
 0x20a   :  { %6623 = vmatprep.subr.bf16.mxu0 %v9328_v33  ;;  %6737 = vmatpush1.bf16.msra.mxu1 %v8817_v37  ;;  %v11295_v63 = vpop.f32.mrf.mxu1  ;;  %v11297_v34 = vpop.f32.mrf.mxu0  ;;  %v11299_v51 = vld [vmem:[#allocation2 + $0x60] ss:$24 sps:$4 sm:$0xff]   ;;  %v126_v33 = vld [vmem:[#allocation5 + $0xa8] sm:$0xff]  ;;  %v9264_v32 = vcombine.high %v637_v31, %v645_v55  ;;  %v9263_v19 = vcombine.low %v637_v31, %v645_v55 }
 0x20b   :  { %6738 = vmatprep.subr.bf16.mxu1 %v8802_v0  ;;  %v8754_v37 = vcombine.high %v126_v33, %v134_v9  ;;  %v629_v0 = vld [vmem:[#allocation5 + $0x1060] sm:$0xff] }
 0x20c   :  { %6436 = vmatmul.mubr.bf16.gmra.mxu0 %v11275_v59  ;;  %v11302_v49 = vpop.f32.mrf.mxu1  ;;  %v11305_v42 = vpop.f32.mrf.mxu0  ;;  %v869_v30 = vld [vmem:[#allocation5 + $0x17e0] sm:$0xff] }
 0x20d   :  { %6624 = vmatpush1.bf16.msra.mxu0 %v9327_v41  ;;  %6445 = vmatprep.mubr.bf16.mxu0 %v11285_v18  ;;  %v11309_v41 = vld [vmem:[#allocation2 + $0x94] ss:$24 sps:$4 sm:$0xff]  }
 0x20e   :  { %6625 = vmatprep.subr.bf16.mxu0 %v9312_v12  ;;  %6739 = vmatpush1.bf16.msra.mxu1 %v8801_v29  ;;  %v11307_v8 = vpop.f32.mrf.mxu1  ;;  %v621_v12 = vld [vmem:[#allocation5 + $0x1020] sm:$0xff]  ;;  %v11312_v57 = vpop.f32.mrf.mxu0  ;;  %v8753_v29 = vcombine.low %v126_v33, %v134_v9  ;;  %v9488_v33 = vcombine.high %v861_v21, %v869_v30 }
 0x20f   :  { %6740 = vmatprep.subr.bf16.mxu1 %v8786_v53 }
 0x210   :  { %6559 = vmatmul.mubr.bf16.gmra.mxu1 %v11006_v56  ;;  %v110_v56 = vld [vmem:[#allocation5 + $0x28] sm:$0xff]  ;;  %v11315_v40 = vpop.f32.mrf.mxu1 }
 0x211   :  { %6626 = vmatpush1.bf16.msra.mxu0 %v9311_v50  ;;  %6568 = vmatprep.mubr.bf16.mxu1 %v11019_v52  ;;  %v11317_v50 = vpop.f32.mrf.mxu0  ;;  %v8738_v43 = vcombine.high %v110_v56, %v118_v44  ;;  %v11323_v52 = vld [vmem:[#allocation2 + $0x90] ss:$24 sps:$4 sm:$0xff]   ;;  %v8737_v55 = vcombine.low %v110_v56, %v118_v44  ;;  %v9487_v56 = vcombine.low %v861_v21, %v869_v30 }
 0x212   :  { %6627 = vmatprep.subr.bf16.mxu0 %v9296_v3  ;;  %6741 = vmatpush1.bf16.msra.mxu1 %v8785_v24  ;;  %v9248_v3 = vcombine.high %v621_v12, %v629_v0  ;;  %v11319_v53 = vpop.f32.mrf.mxu1  ;;  %13361 = vst [vmem:[#allocation24_spill] sm:$0xff] %v11323_v52  ;;  %v358_v24 = vld [vmem:[#allocation5 + $0x7e8] sm:$0xff] }
 0x213   :  { %6742 = vmatprep.subr.bf16.mxu1 %v8770_v26  ;;  %v11321_v45 = vpop.f32.mrf.mxu0  ;;  %v9247_v26 = vcombine.low %v621_v12, %v629_v0  ;;  %v342_v12 = vld [vmem:[#allocation5 + $0x768] sm:$0xff] }
 0x214   :  { %6446 = vmatmul.mubr.bf16.gmra.mxu0 %v11299_v51  ;;  %v326_v21 = vld [vmem:[#allocation5 + $0x6e8] sm:$0xff] }
 0x215   :  { %6628 = vmatpush1.bf16.msra.mxu0 %v9295_v23  ;;  %6455 = vmatprep.mubr.bf16.mxu0 %v11309_v41  ;;  %v350_v23 = vld [vmem:[#allocation5 + $0x7a8] sm:$0xff]  ;;  %v11329_v31 = vpop.f32.mrf.mxu0 }
 0x216   :  { %6629 = vmatprep.subr.bf16.mxu0 %v9280_v54  ;;  %6743 = vmatpush1.bf16.msra.mxu1 %v8769_v36  ;;  %v11326_v54 = vpop.f32.mrf.mxu1  ;;  %v8978_v36 = vcombine.high %v350_v23, %v358_v24 }
 0x217   :  { %6744 = vmatprep.subr.bf16.mxu1 %v8754_v37  ;;  %v853_v37 = vld [vmem:[#allocation5 + $0x1760] sm:$0xff] }
 0x218   :  { %6569 = vmatmul.mubr.bf16.gmra.mxu1 %v11050_v28  ;;  %v11331_v9 = vpop.f32.mrf.mxu1  ;;  %v334_v28 = vld [vmem:[#allocation5 + $0x728] sm:$0xff] }
 0x219   :  { %6630 = vmatpush1.bf16.msra.mxu0 %v9279_v20  ;;  %13362 = vst [vmem:[#allocation26_spill] sm:$0xff] %v11331_v9  ;;  %v11333_v20 = vld [vmem:[#allocation2 + $0xc4] ss:$24 sps:$4 sm:$0xff]   ;;  %6578 = vmatprep.mubr.bf16.mxu1 %v11063_v13  ;;  %v11347_v13 = vld [vmem:[#allocation2 + $0xc0] ss:$24 sps:$4 sm:$0xff]  }
 0x21a   :  { %6631 = vmatprep.subr.bf16.mxu0 %v9264_v32  ;;  %6745 = vmatpush1.bf16.msra.mxu1 %v8753_v29  ;;  %13363 = vst [vmem:[#allocation29_spill] sm:$0xff] %v11333_v20  ;;  %v845_v32 = vld [vmem:[#allocation5 + $0x1720] sm:$0xff]  ;;  %v11339_v0 = vpop.f32.mrf.mxu1  ;;  %13368 = vst [vmem:[#allocation38_spill] sm:$0xff] %v11347_v13 }
 0x21b   :  { %6746 = vmatprep.subr.bf16.mxu1 %v8738_v43  ;;  %13365 = vst [vmem:[#allocation33_spill] sm:$0xff] %v11339_v0  ;;  %v9472_v29 = vcombine.high %v845_v32, %v853_v37  ;;  %v8962_v43 = vcombine.high %v334_v28, %v342_v12  ;;  %v813_v0 = vld [vmem:[#allocation5 + $0x1620] sm:$0xff] }
 0x21c   :  { %6456 = vmatmul.mubr.bf16.gmra.mxu0 %v11323_v52  ;;  %v11336_v52 = vpop.f32.mrf.mxu0 }
 0x21d   :  { %6632 = vmatpush1.bf16.msra.mxu0 %v9263_v19  ;;  %6465 = vmatprep.mubr.bf16.mxu0 %v11333_v20  ;;  %13364 = vst [vmem:[#allocation31_spill] sm:$0xff] %v11336_v52  ;;  %v8977_v19 = vcombine.low %v350_v23, %v358_v24  ;;  %v829_v20 = vld [vmem:[#allocation5 + $0x16a0] sm:$0xff]  ;;  %v9471_v23 = vcombine.low %v845_v32, %v853_v37  ;;  %v310_v32 = vld [vmem:[#allocation5 + $0x668] sm:$0xff] }
 0x21e   :  { %6633 = vmatprep.subr.bf16.mxu0 %v9248_v3  ;;  %6747 = vmatpush1.bf16.msra.mxu1 %v8737_v55  ;;  %v11341_v44 = vpop.f32.mrf.mxu0  ;;  %v11343_v3 = vpop.f32.mrf.mxu1  ;;  %v837_v52 = vld [vmem:[#allocation5 + $0x16e0] sm:$0xff]  ;;  %v8961_v55 = vcombine.low %v334_v28, %v342_v12 }
 0x21f   :  { %13366 = vst [vmem:[#allocation35_spill] sm:$0xff] %v11343_v3  ;;  %6748 = vmatprep.subr.bf16.mxu1 %v8978_v36  ;;  %v11357_v3 = vld [vmem:[#allocation2 + $0xf4] ss:$24 sps:$4 sm:$0xff]   ;;  %v9455_v28 = vcombine.low %v829_v20, %v837_v52 }
 0x220   :  { %v11345_v9 = vpop.f32.mrf.mxu0  ;;  %v11350_v30 = vpop.f32.mrf.mxu1  ;;  %6579 = vmatmul.mubr.bf16.gmra.mxu1 %v11094_v25  ;;  %13371 = vst [vmem:[#allocation34_spill] sm:$0xff] %v11357_v3  ;;  %v302_v25 = vld [vmem:[#allocation5 + $0x628] sm:$0xff] }
 0x221   :  { %6634 = vmatpush1.bf16.msra.mxu0 %v9247_v26  ;;  %13367 = vst [vmem:[#allocation28_spill] sm:$0xff] %v11345_v9  ;;  %v318_v26 = vld [vmem:[#allocation5 + $0x6a8] sm:$0xff]  ;;  %13369 = vst [vmem:[#allocation41_spill] sm:$0xff] %v11350_v30  ;;  %v821_v30 = vld [vmem:[#allocation5 + $0x1660] sm:$0xff]  ;;  %6588 = vmatprep.mubr.bf16.mxu1 %v11107_v47 }
 0x222   :  { %6635 = vmatprep.subr.bf16.mxu0 %v9488_v33  ;;  %6749 = vmatpush2.bf16.msra.mxu1 %v8977_v19  ;;  %v11353_v24 = vpop.f32.mrf.mxu0  ;;  %v9456_v33 = vcombine.high %v829_v20, %v837_v52  ;;  %v11355_v36 = vpop.f32.mrf.mxu1  ;;  %v9440_v19 = vcombine.high %v813_v0, %v821_v30  ;;  %v11371_v47 = vld [vmem:[#allocation2 + $0xf0] ss:$24 sps:$4 sm:$0xff]  }
 0x223   :  { %13370 = vst [vmem:[#allocation32_spill] sm:$0xff] %v11355_v36  ;;  %6750 = vmatprep.subr.bf16.mxu1 %v8962_v43  ;;  %v8930_v43 = vcombine.high %v302_v25, %v310_v32  ;;  %13376 = vst [vmem:[#allocation47_spill] sm:$0xff] %v11371_v47  ;;  %v294_v52 = vld [vmem:[#allocation5 + $0x5e8] sm:$0xff] }
 0x224   :  { %6466 = vmatmul.mubr.bf16.gmra.mxu0 %v11347_v13  ;;  %v8946_v13 = vcombine.high %v318_v26, %v326_v21  ;;  %v11360_v9 = vpop.f32.mrf.mxu0  ;;  %v11363_v37 = vpop.f32.mrf.mxu1 }
 0x225   :  { %6636 = vmatpush2.bf16.msra.mxu0 %v9487_v56  ;;  %6475 = vmatprep.mubr.bf16.mxu0 %v11357_v3  ;;  %13372 = vst [vmem:[#allocation36_spill] sm:$0xff] %v11360_v9  ;;  %13373 = vst [vmem:[#allocation40_spill] sm:$0xff] %v11363_v37  ;;  %v8945_v56 = vcombine.low %v318_v26, %v326_v21  ;;  %v797_v3 = vld [vmem:[#allocation5 + $0x15a0] sm:$0xff]  ;;  %v9439_v26 = vcombine.low %v813_v0, %v821_v30  ;;  %v278_v0 = vld [vmem:[#allocation5 + $0x568] sm:$0xff] }
 0x226   :  { %6637 = vmatprep.subr.bf16.mxu0 %v9472_v29  ;;  %6751 = vmatpush2.bf16.msra.mxu1 %v8961_v55  ;;  %v11365_v12 = vpop.f32.mrf.mxu0  ;;  %v11367_v29 = vpop.f32.mrf.mxu1  ;;  %v805_v9 = vld [vmem:[#allocation5 + $0x15e0] sm:$0xff] }
 0x227   :  { %13374 = vst [vmem:[#allocation42_spill] sm:$0xff] %v11367_v29  ;;  %6752 = vmatprep.subr.bf16.mxu1 %v8946_v13  ;;  %v8929_v13 = vcombine.low %v302_v25, %v310_v32  ;;  %v9424_v55 = vcombine.high %v797_v3, %v805_v9  ;;  %v11381_v29 = vld [vmem:[#allocation2 + $0x124] ss:$24 sps:$4 sm:$0xff]   ;;  %v9423_v25 = vcombine.low %v797_v3, %v805_v9  ;;  %v262_v9 = vld [vmem:[#allocation5 + $0x4e8] sm:$0xff] }
 0x228   :  { %v11369_v36 = vpop.f32.mrf.mxu0  ;;  %v11374_v20 = vpop.f32.mrf.mxu1  ;;  %6589 = vmatmul.mubr.bf16.gmra.mxu1 %v11138_v22  ;;  %13379 = vst [vmem:[#allocation43_spill] sm:$0xff] %v11381_v29  ;;  %v781_v37 = vld [vmem:[#allocation5 + $0x1520] sm:$0xff]  ;;  %v270_v22 = vld [vmem:[#allocation5 + $0x528] sm:$0xff] }
 0x229   :  { %6638 = vmatpush2.bf16.msra.mxu0 %v9471_v23  ;;  %13375 = vst [vmem:[#allocation44_spill] sm:$0xff] %v11369_v36  ;;  %v286_v23 = vld [vmem:[#allocation5 + $0x5a8] sm:$0xff]  ;;  %13377 = vst [vmem:[#allocation39_spill] sm:$0xff] %v11374_v20  ;;  %v789_v20 = vld [vmem:[#allocation5 + $0x1560] sm:$0xff]  ;;  %6598 = vmatprep.mubr.bf16.mxu1 %v11151_v39 }
 0x22a   :  { %6639 = vmatprep.subr.bf16.mxu0 %v9456_v33  ;;  %6753 = vmatpush2.bf16.msra.mxu1 %v8945_v56  ;;  %v11377_v21 = vpop.f32.mrf.mxu0  ;;  %v11379_v33 = vpop.f32.mrf.mxu1  ;;  %v9408_v56 = vcombine.high %v781_v37, %v789_v20  ;;  %v11395_v39 = vld [vmem:[#allocation2 + $0x120] ss:$24 sps:$4 sm:$0xff]  }
 0x22b   :  { %13378 = vst [vmem:[#allocation49_spill] sm:$0xff] %v11379_v33  ;;  %6754 = vmatprep.subr.bf16.mxu1 %v8930_v43  ;;  %v8898_v43 = vcombine.high %v270_v22, %v278_v0  ;;  %13384 = vst [vmem:[#allocation54_spill] sm:$0xff] %v11395_v39 }
 0x22c   :  { %6476 = vmatmul.mubr.bf16.gmra.mxu0 %v11371_v47  ;;  %v8914_v47 = vcombine.high %v286_v23, %v294_v52  ;;  %v11384_v36 = vpop.f32.mrf.mxu0  ;;  %v11387_v30 = vpop.f32.mrf.mxu1 }
 0x22d   :  { %6640 = vmatpush2.bf16.msra.mxu0 %v9455_v28  ;;  %6485 = vmatprep.mubr.bf16.mxu0 %v11381_v29  ;;  %13380 = vst [vmem:[#allocation46_spill] sm:$0xff] %v11384_v36  ;;  %13381 = vst [vmem:[#allocation48_spill] sm:$0xff] %v11387_v30  ;;  %v8913_v28 = vcombine.low %v286_v23, %v294_v52  ;;  %v765_v29 = vld [vmem:[#allocation5 + $0x14a0] sm:$0xff]  ;;  %v9407_v23 = vcombine.low %v781_v37, %v789_v20  ;;  %v238_v37 = vld [vmem:[#allocation5 + $0x428] sm:$0xff] }
 0x22e   :  { %6641 = vmatprep.subr.bf16.mxu0 %v9440_v19  ;;  %6755 = vmatpush2.bf16.msra.mxu1 %v8929_v13  ;;  %v11389_v32 = vpop.f32.mrf.mxu0  ;;  %v11391_v19 = vpop.f32.mrf.mxu1  ;;  %v773_v36 = vld [vmem:[#allocation5 + $0x14e0] sm:$0xff]  ;;  %v246_v20 = vld [vmem:[#allocation5 + $0x468] sm:$0xff] }
 0x22f   :  { %13382 = vst [vmem:[#allocation51_spill] sm:$0xff] %v11391_v19  ;;  %6756 = vmatprep.subr.bf16.mxu1 %v8914_v47  ;;  %v8897_v47 = vcombine.low %v270_v22, %v278_v0  ;;  %v9392_v13 = vcombine.high %v765_v29, %v773_v36  ;;  %v11405_v19 = vld [vmem:[#allocation2 + $0x154] ss:$24 sps:$4 sm:$0xff]   ;;  %v749_v30 = vld [vmem:[#allocation5 + $0x1420] sm:$0xff] }
 0x230   :  { %v11393_v33 = vpop.f32.mrf.mxu0  ;;  %v11398_v3 = vpop.f32.mrf.mxu1  ;;  %6599 = vmatmul.mubr.bf16.gmra.mxu1 %v11182_v46  ;;  %13388 = vst [vmem:[#allocation55_spill] sm:$0xff] %v11405_v19  ;;  %v8866_v46 = vcombine.high %v238_v37, %v246_v20 }
 0x231   :  { %6642 = vmatpush2.bf16.msra.mxu0 %v9439_v26  ;;  %13383 = vst [vmem:[#allocation52_spill] sm:$0xff] %v11393_v33  ;;  %v254_v26 = vld [vmem:[#allocation5 + $0x4a8] sm:$0xff]  ;;  %13385 = vst [vmem:[#allocation50_spill] sm:$0xff] %v11398_v3  ;;  %v757_v3 = vld [vmem:[#allocation5 + $0x1460] sm:$0xff]  ;;  %6608 = vmatprep.mubr.bf16.mxu1 %v11195_v11 }
 0x232   :  { %6643 = vmatprep.subr.bf16.mxu0 %v9424_v55  ;;  %6757 = vmatpush2.bf16.msra.mxu1 %v8913_v28  ;;  %v11401_v52 = vpop.f32.mrf.mxu0  ;;  %v11403_v55 = vpop.f32.mrf.mxu1  ;;  %v13389_v33 = vld [vmem:[#allocation37_spill] sm:$0xff]  ;;  %v9391_v28 = vcombine.low %v765_v29, %v773_v36  ;;  %v486_v11 = vld [vmem:[#allocation5 + $0xbe8] sm:$0xff] }
 0x233   :  { %13386 = vst [vmem:[#allocation45_spill] sm:$0xff] %v11401_v52  ;;  %13387 = vst [vmem:[#allocation53_spill] sm:$0xff] %v11403_v55  ;;  %6758 = vmatprep.subr.bf16.mxu1 %v8898_v43  ;;  %v8881_v43 = vcombine.low %v254_v26, %v262_v9  ;;  %v11419_v52 = vld [vmem:[#allocation7] sm:$0xff]  ;;  %v13395_v22 = vsub.s32 4, %v13389_v33  ;;  %v11428_v29 = vld [vmem:[#allocation2 + $0x150] ss:$24 sps:$4 sm:$0xff]  }
 0x234   :  { %6486 = vmatmul.mubr.bf16.gmra.mxu0 %v11395_v39  ;;  %v8882_v39 = vcombine.high %v254_v26, %v262_v9  ;;  %v11413_v0 = vpop.f32.mrf.mxu1  ;;  %13394 = vst [vmem:[#allocation20_spill] sm:$0xff] %v11419_v52  ;;  %13397 = vst [vmem:[#allocation21_spill] sm:$0xff] %v11428_v29  ;;  %v734_v26 = vld [vmem:[#allocation5 + $0x13a8] sm:$0xff] }
 0x235   :  { %6644 = vmatpush2.bf16.msra.mxu0 %v9423_v25  ;;  %6495 = vmatprep.mubr.bf16.mxu0 %v11405_v19  ;;  %v11409_v25 = vpop.f32.mrf.mxu0  ;;  %13391 = vst [vmem:[#allocation57_spill] sm:$0xff] %v11413_v0  ;;  %v9376_v19 = vcombine.high %v749_v30, %v757_v3  ;;  %v11424_v0 = vrot.slane %v11419_v52, %v13395_v22  ;;  %v742_v9 = vld [vmem:[#allocation5 + $0x13e8] sm:$0xff] }
 0x236   :  { %6645 = vmatprep.subr.bf16.mxu0 %v9408_v56  ;;  %13390 = vst [vmem:[#allocation56_spill] sm:$0xff] %v11409_v25  ;;  %6759 = vmatpush2.bf16.msra.mxu1 %v8897_v47  ;;  %v11417_v55 = vpop.f32.mrf.mxu1  ;;  %v478_v25 = vld [vmem:[#allocation5 + $0xba8] sm:$0xff] }
 0x237   :  { %v11415_v56 = vpop.f32.mrf.mxu0  ;;  %13393 = vst [vmem:[#allocation16_spill] sm:$0xff] %v11417_v55  ;;  %6760 = vmatprep.subr.bf16.mxu1 %v8882_v39  ;;  %v13398_v39 = vsub.s32 5, %v13389_v33  ;;  %v8865_v55 = vcombine.low %v238_v37, %v246_v20  ;;  %v9105_v20 = vcombine.low %v478_v25, %v486_v11 }
 0x238   :  { %13392 = vst [vmem:[#allocation15_spill] sm:$0xff] %v11415_v56  ;;  %v11436_v47 = vpop.f32.mrf.mxu1  ;;  %6609 = vmatmul.mubr.bf16.gmra.mxu1 %v11226_v4  ;;  %v11443_v56 = vld [vmem:[#allocation2 + $0x14] ss:$24 sps:$4 sm:$0xff]   ;;  %v5750_v4 = vadd.f32 %v11249_v17, %v11424_v0 }
 0x239   :  { %6646 = vmatpush2.bf16.msra.mxu0 %v9407_v23  ;;  %v11426_v36 = vpop.f32.mrf.mxu0  ;;  %v11434_v23 = vrot.slane %v11419_v52, %v13398_v39  ;;  %13399 = vst [vmem:[#allocation23_spill] sm:$0xff] %v11436_v47  ;;  %13401 = vst [vmem:[#allocation25_spill] sm:$0xff] %v11443_v56  ;;  %v9362_v39 = vcombine.high %v734_v26, %v742_v9  ;;  %v462_v52 = vld [vmem:[#allocation5 + $0xb28] sm:$0xff]  ;;  %6764 = vmatprep.mubr.bf16.mxu1 %v11239_v5 }
 0x23a   :  { %6647 = vmatprep.subr.bf16.mxu0 %v9392_v13  ;;  %13396 = vst [vmem:[#allocation17_spill] sm:$0xff] %v11426_v36  ;;  %v9375_v13 = vcombine.low %v749_v30, %v757_v3  ;;  %6761 = vmatpush2.bf16.msra.mxu1 %v8881_v43  ;;  %v9106_v36 = vcombine.high %v478_v25, %v486_v11  ;;  %v470_v47 = vld [vmem:[#allocation5 + $0xb68] sm:$0xff] }
 0x23b   :  { %v11439_v22 = vpop.f32.mrf.mxu0  ;;  %6762 = vmatprep.subr.bf16.mxu1 %v8866_v46  ;;  %v726_v3 = vld [vmem:[#allocation5 + $0x1368] sm:$0xff]  ;;  %v5752_v37 = vadd.f32 %v11257_v2, %v11434_v23  ;;  %v9361_v43 = vcombine.low %v734_v26, %v742_v9  ;;  %v5863_v2 = vadd.f32 %v11254_v58, %v5750_v4  ;;  %v5754_v26 = vadd.f32 %v11264_v7, %v11424_v0  ;;  %v11479_v7 = vld [vmem:[#allocation2 + $0x44] ss:$24 sps:$4 sm:$0xff]  }
 0x23c   :  { %6496 = vmatmul.mubr.bf16.gmra.mxu0 %v11428_v29  ;;  %v11441_v29 = vpop.f32.mrf.mxu1  ;;  %v11459_v5 = vld [vmem:[#allocation5 + $0xaa8] sm:$0xff]  ;;  %v5756_v9 = vadd.f32 %v11269_v16, %v11434_v23  ;;  %13405 = vst [vmem:[#allocation22_spill] sm:$0xff] %v11479_v7 }
 0x23d   :  { %6648 = vmatpush2.bf16.msra.mxu0 %v9391_v28  ;;  %13400 = vst [vmem:[#allocation19_spill] sm:$0xff] %v11441_v29  ;;  %6651 = vmatprep.mubr.bf16.mxu0 %v11443_v56  ;;  %v11448_v30 = vpop.f32.mrf.mxu0  ;;  %v9090_v56 = vcombine.high %v462_v52, %v470_v47  ;;  %v11461_v29 = vld [vmem:[#allocation5 + $0xae8] sm:$0xff] }
 0x23e   :  { %6649 = vmatprep.subr.bf16.mxu0 %v9376_v19  ;;  %13402 = vst [vmem:[#allocation18_spill] sm:$0xff] %v11448_v30  ;;  %v718_v19 = vld [vmem:[#allocation5 + $0x1328] sm:$0xff]  ;;  %v11453_v46 = vpop.f32.mrf.mxu1  ;;  %6763 = vmatpush2.bf16.msra.mxu1 %v8865_v55  ;;  %v9089_v55 = vcombine.low %v462_v52, %v470_v47  ;;  %v9074_v52 = vcombine.high %v11459_v5, %v11461_v29 }
 0x23f   :  { %13403 = vst [vmem:[#allocation27_spill] sm:$0xff] %v11453_v46  ;;  %v11455_v28 = vpop.f32.mrf.mxu0  ;;  %6958 = vmatprep.subr.bf16.mxu1 %v9362_v39  ;;  %v9346_v30 = vcombine.high %v718_v19, %v726_v3  ;;  %v11464_v46 = vld [vmem:[#allocation2 + $0x10] ss:$24 sps:$4 sm:$0xff]   ;;  %v9345_v39 = vcombine.low %v718_v19, %v726_v3  ;;  %v5762_v19 = vadd.f32 %v11281_v10, %v11434_v23 }
 0x240   :  { %v11457_v17 = vpop.f32.mrf.mxu1  ;;  %13404 = vst [vmem:[#allocation30_spill] sm:$0xff] %v11464_v46  ;;  %v702_v25 = vld [vmem:[#allocation5 + $0x12a8] sm:$0xff] }
 0x241   :  { %6650 = vmatpush2.bf16.msra.mxu0 %v9375_v13  ;;  %v5975_v33 = vpop.f32.mrf.mxu0  ;;  %v710_v11 = vld [vmem:[#allocation5 + $0x12e8] sm:$0xff]  ;;  %6765 = vmatmul.mubr.bf16.vlgmr.msra.gmra.mxu1 %v11251_v48 }
 0x242   :  { %6845 = vmatprep.subr.bf16.mxu0 %v9106_v36  ;;  %v5865_v36 = vadd.f32 %v11259_v61, %v5752_v37  ;;  %v11472_v13 = vpop.f32.mrf.mxu1  ;;  %6959 = vmatpush1.bf16.msra.mxu1 %v9361_v43  ;;  %v5976_v47 = vadd.f32 %v5975_v33, %v5863_v2  ;;  %v9330_v16 = vcombine.high %v702_v25, %v710_v11  ;;  %v11482_v37 = vld [vmem:[#allocation5 + $0xa28] sm:$0xff] }
 0x243   :  { %v5977_v58 = vpop.f32.mrf.mxu0  ;;  %6960 = vmatprep.subr.bf16.mxu1 %v9346_v30  ;;  %v11484_v48 = vld [vmem:[#allocation5 + $0xa68] sm:$0xff]  ;;  %6774 = vmatprep.mubr.bf16.mxu1 %v11261_v14  ;;  %v5869_v43 = vadd.f32 %v11271_v6, %v5756_v9  ;;  %v9329_v10 = vcombine.low %v702_v25, %v710_v11  ;;  %v11507_v25 = vld [vmem:[#allocation2 + $0x40] ss:$24 sps:$4 sm:$0xff]  }
 0x244   :  { %6652 = vmatmul.mubr.bf16.vlgmr.msra.gmra.mxu0 %v11464_v46  ;;  %v5978_v61 = vadd.f32 %v5977_v58, %v5865_v36  ;;  %v11477_v4 = vpop.f32.mrf.mxu1  ;;  %v686_v3 = vld [vmem:[#allocation5 + $0x1228] sm:$0xff]  ;;  %v9073_v58 = vcombine.low %v11459_v5, %v11461_v29  ;;  %v9058_v14 = vcombine.high %v11482_v37, %v11484_v48  ;;  %v5875_v5 = vadd.f32 %v11283_v1, %v5762_v19 }
 0x245   :  { %6846 = vmatpush1.bf16.msra.mxu0 %v9105_v20  ;;  %6661 = vmatprep.mubr.bf16.mxu0 %v11479_v7  ;;  %v5979_v33 = vpop.f32.mrf.mxu0  ;;  %v694_v30 = vld [vmem:[#allocation5 + $0x1268] sm:$0xff]  ;;  %v5867_v20 = vadd.f32 %v11267_v38, %v5754_v26  ;;  %v9057_v11 = vcombine.low %v11482_v37, %v11484_v48 }
 0x246   :  { %6847 = vmatprep.subr.bf16.mxu0 %v9090_v56  ;;  %v5760_v56 = vadd.f32 %v11273_v35, %v11424_v0  ;;  %v9625_v2 = vpack.c.bf16 %v5978_v61, %v5976_v47  ;;  %v11493_v36 = vpop.f32.mrf.mxu1  ;;  %6961 = vmatpush1.bf16.msra.mxu1 %v9345_v39  ;;  %v9314_v6 = vcombine.high %v686_v3, %v694_v30  ;;  %v11501_v26 = vld [vmem:[#allocation5 + $0x9a8] sm:$0xff] }
 0x247   :  { %v5981_v35 = vpop.f32.mrf.mxu0  ;;  %v5980_v7 = vadd.f32 %v5979_v33, %v5867_v20  ;;  %6962 = vmatprep.subr.bf16.mxu1 %v9330_v16  ;;  %v670_v39 = vld [vmem:[#allocation5 + $0x11a8] sm:$0xff]  ;;  %v5764_v47 = vadd.f32 %v11288_v62, %v11424_v0  ;;  %v5766_v61 = vadd.f32 %v11293_v15, %v11434_v23  ;;  %v5770_v33 = vadd.f32 %v11297_v34, %v11424_v0 }
 0x248   :  { %8135 = vst [vmem:[#allocation8 + $0x10] sm:$0xff] %v9625_v2  ;;  %v5982_v46 = vadd.f32 %v5981_v35, %v5869_v43  ;;  %v11499_v38 = vpop.f32.mrf.mxu1  ;;  %v5873_v29 = vadd.f32 %v11278_v27, %v5760_v56  ;;  %v9313_v56 = vcombine.low %v686_v3, %v694_v30  ;;  %v11523_v15 = vld [vmem:[#allocation2 + $0x74] ss:$24 sps:$4 sm:$0xff]   ;;  %v5772_v3 = vadd.f32 %v11305_v42, %v11434_v23 }
 0x249   :  { %6848 = vmatpush1.bf16.msra.mxu0 %v9089_v55  ;;  %v11503_v55 = vld [vmem:[#allocation5 + $0x9e8] sm:$0xff]  ;;  %v5985_v9 = vpop.f32.mrf.mxu0  ;;  %6775 = vmatmul.mubr.bf16.gmra.mxu1 %v11275_v59  ;;  %v5877_v2 = vadd.f32 %v11291_v60, %v5764_v47 }
 0x24a   :  { %6849 = vmatprep.subr.bf16.mxu0 %v9074_v52  ;;  %v678_v52 = vld [vmem:[#allocation5 + $0x11e8] sm:$0xff]  ;;  %v9629_v16 = vpack.c.bf16 %v5982_v46, %v5980_v7  ;;  %v11516_v27 = vpop.f32.mrf.mxu1  ;;  %6963 = vmatpush1.bf16.msra.mxu1 %v9329_v10  ;;  %v9042_v37 = vcombine.high %v11501_v26, %v11503_v55  ;;  %v5986_v48 = vadd.f32 %v5985_v9, %v5873_v29 }
 0x24b   :  { %v5987_v1 = vpop.f32.mrf.mxu0  ;;  %6964 = vmatprep.subr.bf16.mxu1 %v9314_v6  ;;  %v9298_v46 = vcombine.high %v670_v39, %v678_v52  ;;  %v11526_v59 = vld [vmem:[#allocation5 + $0x928] sm:$0xff]  ;;  %6784 = vmatprep.mubr.bf16.mxu1 %v11285_v18  ;;  %v9297_v42 = vcombine.low %v670_v39, %v678_v52 }
 0x24c   :  { %6662 = vmatmul.mubr.bf16.gmra.mxu0 %v11507_v25  ;;  %8139 = vst [vmem:[#allocation8 + $0x30] sm:$0xff] %v9629_v16  ;;  %v5988_v19 = vadd.f32 %v5987_v1, %v5875_v5  ;;  %v11521_v62 = vpop.f32.mrf.mxu1  ;;  %v11528_v7 = vld [vmem:[#allocation5 + $0x968] sm:$0xff]  ;;  %v5774_v16 = vadd.f32 %v11312_v57, %v11424_v0  ;;  %v5776_v1 = vadd.f32 %v11317_v50, %v11434_v23  ;;  %v11567_v50 = vld [vmem:[#allocation2 + $0xa4] ss:$24 sps:$4 sm:$0xff]  }
 0x24d   :  { %6850 = vmatpush1.bf16.msra.mxu0 %v9073_v58  ;;  %6671 = vmatprep.mubr.bf16.mxu0 %v11523_v15  ;;  %v5989_v30 = vpop.f32.mrf.mxu0  ;;  %v654_v20 = vld [vmem:[#allocation5 + $0x1128] sm:$0xff]  ;;  %v5879_v58 = vadd.f32 %v11295_v63, %v5766_v61  ;;  %v9026_v18 = vcombine.high %v11526_v59, %v11528_v7  ;;  %v9025_v52 = vcombine.low %v11526_v59, %v11528_v7 }
 0x24e   :  { %6851 = vmatprep.subr.bf16.mxu0 %v9058_v14  ;;  %v662_v43 = vld [vmem:[#allocation5 + $0x1168] sm:$0xff]  ;;  %v9633_v35 = vpack.c.bf16 %v5988_v19, %v5986_v48  ;;  %v11537_v10 = vpop.f32.mrf.mxu1  ;;  %v9041_v14 = vcombine.low %v11501_v26, %v11503_v55  ;;  %6965 = vmatpush1.bf16.msra.mxu1 %v9313_v56  ;;  %v5990_v6 = vadd.f32 %v5989_v30, %v5877_v2 }
 0x24f   :  { %v5991_v34 = vpop.f32.mrf.mxu0  ;;  %6966 = vmatprep.subr.bf16.mxu1 %v9298_v46  ;;  %v9282_v63 = vcombine.high %v654_v20, %v662_v43  ;;  %v11545_v5 = vld [vmem:[#allocation5 + $0x8a8] sm:$0xff]  ;;  %v5883_v26 = vadd.f32 %v11302_v49, %v5770_v33  ;;  %v5885_v55 = vadd.f32 %v11307_v8, %v5772_v3  ;;  %v5780_v33 = vadd.f32 %v11321_v45, %v11424_v0 }
 0x250   :  { %8143 = vst [vmem:[#allocation8 + $0x50] sm:$0xff] %v9633_v35  ;;  %v5992_v29 = vadd.f32 %v5991_v34, %v5879_v58  ;;  %v11543_v60 = vpop.f32.mrf.mxu1  ;;  %v11547_v9 = vld [vmem:[#allocation5 + $0x8e8] sm:$0xff]  ;;  %v5782_v3 = vadd.f32 %v11329_v31, %v11434_v23  ;;  %v5887_v2 = vadd.f32 %v11315_v40, %v5774_v16  ;;  %v5889_v58 = vadd.f32 %v11319_v53, %v5776_v1 }
 0x251   :  { %6852 = vmatpush1.bf16.msra.mxu0 %v9057_v11  ;;  %v5995_v11 = vpop.f32.mrf.mxu0  ;;  %v11551_v39 = vld [vmem:[#allocation2 + $0x70] ss:$24 sps:$4 sm:$0xff]   ;;  %6785 = vmatmul.mubr.bf16.gmra.mxu1 %v11299_v51  ;;  %v9010_v48 = vcombine.high %v11545_v5, %v11547_v9  ;;  %v9009_v34 = vcombine.low %v11545_v5, %v11547_v9  ;;  %v5786_v1 = vadd.f32 %v11341_v44, %v11434_v23  ;;  %v11611_v44 = vld [vmem:[#allocation2 + $0xd4] ss:$24 sps:$4 sm:$0xff]  }
 0x252   :  { %6853 = vmatprep.subr.bf16.mxu0 %v9042_v37  ;;  %v638_v47 = vld [vmem:[#allocation5 + $0x10a8] sm:$0xff]  ;;  %v9637_v56 = vpack.c.bf16 %v5992_v29, %v5990_v6  ;;  %v11560_v49 = vpop.f32.mrf.mxu1  ;;  %6967 = vmatpush1.bf16.msra.mxu1 %v9297_v42  ;;  %v9281_v37 = vcombine.low %v654_v20, %v662_v43  ;;  %v5996_v19 = vadd.f32 %v5995_v11, %v5883_v26 }
 0x253   :  { %v646_v61 = vld [vmem:[#allocation5 + $0x10e8] sm:$0xff]  ;;  %v5997_v8 = vpop.f32.mrf.mxu0  ;;  %6968 = vmatprep.subr.bf16.mxu1 %v9282_v63  ;;  %6794 = vmatprep.mubr.bf16.mxu1 %v11309_v41  ;;  %v5893_v63 = vadd.f32 %v11326_v54, %v5780_v33 }
 0x254   :  { %6672 = vmatmul.mubr.bf16.gmra.mxu0 %v11551_v39  ;;  %8147 = vst [vmem:[#allocation8 + $0x70] sm:$0xff] %v9637_v56  ;;  %v5998_v46 = vadd.f32 %v5997_v8, %v5885_v55  ;;  %v11565_v57 = vpop.f32.mrf.mxu1  ;;  %v9266_v59 = vcombine.high %v638_v47, %v646_v61  ;;  %v11570_v51 = vld [vmem:[#allocation5 + $0x828] sm:$0xff]  ;;  %v9265_v31 = vcombine.low %v638_v47, %v646_v61  ;;  %v11595_v55 = vld [vmem:[#allocation2 + $0xa0] ss:$24 sps:$4 sm:$0xff]   ;;  %v13407_v61 = vld [vmem:[#allocation31_spill] sm:$0xff] }
 0x255   :  { %6854 = vmatpush1.bf16.msra.mxu0 %v9041_v14  ;;  %6681 = vmatprep.mubr.bf16.mxu0 %v11567_v50  ;;  %v11572_v7 = vld [vmem:[#allocation5 + $0x868] sm:$0xff]  ;;  %v5999_v30 = vpop.f32.mrf.mxu0  ;;  %v5784_v16 = vadd.f32 %v13407_v61, %v11424_v0  ;;  %v13408_v8 = vld [vmem:[#allocation24_spill] sm:$0xff] }
 0x256   :  { %6855 = vmatprep.subr.bf16.mxu0 %v9026_v18  ;;  %v622_v20 = vld [vmem:[#allocation5 + $0x1028] sm:$0xff]  ;;  %v9641_v35 = vpack.c.bf16 %v5998_v46, %v5996_v19  ;;  %v11581_v14 = vpop.f32.mrf.mxu1  ;;  %6969 = vmatpush1.bf16.msra.mxu1 %v9281_v37  ;;  %v8994_v41 = vcombine.high %v11570_v51, %v11572_v7  ;;  %v6000_v42 = vadd.f32 %v5999_v30, %v5887_v2  ;;  %v13409_v30 = vld [vmem:[#allocation28_spill] sm:$0xff] }
 0x257   :  { %v630_v43 = vld [vmem:[#allocation5 + $0x1068] sm:$0xff]  ;;  %v6001_v45 = vpop.f32.mrf.mxu0  ;;  %6970 = vmatprep.subr.bf16.mxu1 %v9266_v59  ;;  %v8993_v11 = vcombine.low %v11570_v51, %v11572_v7 }
 0x258   :  { %8151 = vst [vmem:[#allocation8 + $0x90] sm:$0xff] %v9641_v35  ;;  %v6002_v18 = vadd.f32 %v6001_v45, %v5889_v58  ;;  %v11587_v40 = vpop.f32.mrf.mxu1  ;;  %v9250_v53 = vcombine.high %v622_v20, %v630_v43  ;;  %v11589_v6 = vld [vmem:[#allocation5 + $0xfa8] sm:$0xff]  ;;  %v13410_v58 = vld [vmem:[#allocation29_spill] sm:$0xff] }
 0x259   :  { %6856 = vmatpush1.bf16.msra.mxu0 %v9025_v52  ;;  %v11591_v29 = vld [vmem:[#allocation5 + $0xfe8] sm:$0xff]  ;;  %v6005_v26 = vpop.f32.mrf.mxu0  ;;  %6795 = vmatmul.mubr.bf16.gmra.mxu1 %v13408_v8  ;;  %v13411_v45 = vld [vmem:[#allocation33_spill] sm:$0xff] }
 0x25a   :  { %6857 = vmatprep.subr.bf16.mxu0 %v9010_v48  ;;  %v13406_v5 = vld [vmem:[#allocation26_spill] sm:$0xff]  ;;  %v9645_v56 = vpack.c.bf16 %v6002_v18, %v6000_v42  ;;  %v11604_v54 = vpop.f32.mrf.mxu1  ;;  %6971 = vmatpush1.bf16.msra.mxu1 %v9265_v31  ;;  %v9249_v48 = vcombine.low %v622_v20, %v630_v43  ;;  %v9234_v19 = vcombine.high %v11589_v6, %v11591_v29  ;;  %v13413_v8 = vld [vmem:[#allocation41_spill] sm:$0xff] }
 0x25b   :  { %v5895_v9 = vadd.f32 %v13406_v5, %v5782_v3  ;;  %v862_v52 = vld [vmem:[#allocation5 + $0x17a8] sm:$0xff]  ;;  %v6007_v37 = vpop.f32.mrf.mxu0  ;;  %v6006_v46 = vadd.f32 %v6005_v26, %v5893_v63  ;;  %6972 = vmatprep.subr.bf16.mxu1 %v9250_v53  ;;  %v5790_v20 = vadd.f32 %v13409_v30, %v11424_v0  ;;  %v5792_v43 = vadd.f32 %v11353_v24, %v11434_v23 }
 0x25c   :  { %6682 = vmatmul.mubr.bf16.gmra.mxu0 %v11595_v55  ;;  %v870_v47 = vld [vmem:[#allocation5 + $0x17e8] sm:$0xff]  ;;  %8155 = vst [vmem:[#allocation8 + $0xb0] sm:$0xff] %v9645_v56  ;;  %v11609_v51 = vpop.f32.mrf.mxu1  ;;  %6804 = vmatprep.mubr.bf16.mxu1 %v13410_v58  ;;  %v5897_v31 = vadd.f32 %v13411_v45, %v5784_v16  ;;  %v9233_v63 = vcombine.low %v11589_v6, %v11591_v29  ;;  %v13414_v29 = vld [vmem:[#allocation32_spill] sm:$0xff] }
 0x25d   :  { %6858 = vmatpush1.bf16.msra.mxu0 %v9009_v34  ;;  %v6008_v59 = vadd.f32 %v6007_v37, %v5895_v9  ;;  %6691 = vmatprep.mubr.bf16.mxu0 %v11611_v44  ;;  %v9490_v7 = vcombine.high %v862_v52, %v870_v47  ;;  %v11614_v33 = vld [vmem:[#allocation5 + $0xf28] sm:$0xff]  ;;  %v6009_v2 = vpop.f32.mrf.mxu0  ;;  %v9489_v24 = vcombine.low %v862_v52, %v870_v47 }
 0x25e   :  { %6859 = vmatprep.subr.bf16.mxu0 %v8994_v41  ;;  %v11616_v3 = vld [vmem:[#allocation5 + $0xf68] sm:$0xff]  ;;  %v13412_v41 = vld [vmem:[#allocation35_spill] sm:$0xff]  ;;  %v11625_v53 = vpop.f32.mrf.mxu1  ;;  %6973 = vmatpush1.bf16.msra.mxu1 %v9249_v48  ;;  %v6010_v26 = vadd.f32 %v6009_v2, %v5897_v31  ;;  %v5903_v6 = vadd.f32 %v13413_v8, %v5790_v20  ;;  %v5905_v37 = vadd.f32 %v13414_v29, %v5792_v43 }
 0x25f   :  { %v846_v35 = vld [vmem:[#allocation5 + $0x1728] sm:$0xff]  ;;  %v5899_v42 = vadd.f32 %v13412_v41, %v5786_v1  ;;  %v9649_v18 = vpack.c.bf16 %v6008_v59, %v6006_v46  ;;  %v6011_v5 = vpop.f32.mrf.mxu0  ;;  %v9218_v9 = vcombine.high %v11614_v33, %v11616_v3  ;;  %6974 = vmatprep.subr.bf16.mxu1 %v9490_v7  ;;  %v9217_v47 = vcombine.low %v11614_v33, %v11616_v3  ;;  %v13415_v59 = vld [vmem:[#allocation36_spill] sm:$0xff] }
 0x260   :  { %v854_v34 = vld [vmem:[#allocation5 + $0x1768] sm:$0xff]  ;;  %v11631_v16 = vpop.f32.mrf.mxu1  ;;  %v5794_v7 = vadd.f32 %v13415_v59, %v11424_v0  ;;  %v5796_v30 = vadd.f32 %v11365_v12, %v11434_v23  ;;  %v11655_v12 = vld [vmem:[#allocation2 + $0x104] ss:$24 sps:$4 sm:$0xff]  }
 0x261   :  { %6860 = vmatpush1.bf16.msra.mxu0 %v8993_v11  ;;  %8159 = vst [vmem:[#allocation8 + $0xd0] sm:$0xff] %v9649_v18  ;;  %v6012_v61 = vadd.f32 %v6011_v5, %v5899_v42  ;;  %v9474_v1 = vcombine.high %v846_v35, %v854_v34  ;;  %v11633_v56 = vld [vmem:[#allocation5 + $0xea8] sm:$0xff]  ;;  %v6015_v48 = vpop.f32.mrf.mxu0  ;;  %v9473_v45 = vcombine.low %v846_v35, %v854_v34  ;;  %v13417_v35 = vld [vmem:[#allocation44_spill] sm:$0xff] }
 0x262   :  { %6861 = vmatprep.subr.bf16.mxu0 %v9234_v19  ;;  %v11635_v11 = vld [vmem:[#allocation5 + $0xee8] sm:$0xff]  ;;  %v11648_v20 = vpop.f32.mrf.mxu1  ;;  %6975 = vmatpush2.bf16.msra.mxu1 %v9489_v24  ;;  %v6016_v3 = vadd.f32 %v6015_v48, %v5903_v6  ;;  %v5800_v34 = vadd.f32 %v13417_v35, %v11424_v0  ;;  %v5802_v5 = vadd.f32 %v11377_v21, %v11434_v23 }
 0x263   :  { %v11639_v52 = vld [vmem:[#allocation2 + $0xd0] ss:$24 sps:$4 sm:$0xff]   ;;  %v9653_v2 = vpack.c.bf16 %v6012_v61, %v6010_v26  ;;  %v6017_v58 = vpop.f32.mrf.mxu0  ;;  %v9202_v33 = vcombine.high %v11633_v56, %v11635_v11  ;;  %6976 = vmatprep.subr.bf16.mxu1 %v9474_v1  ;;  %v13419_v1 = vld [vmem:[#allocation40_spill] sm:$0xff]  ;;  %v9201_v59 = vcombine.low %v11633_v56, %v11635_v11  ;;  %v13422_v11 = vld [vmem:[#allocation49_spill] sm:$0xff] }
 0x264   :  { %6692 = vmatmul.mubr.bf16.gmra.mxu0 %v11639_v52  ;;  %v830_v19 = vld [vmem:[#allocation5 + $0x16a8] sm:$0xff]  ;;  %v6018_v31 = vadd.f32 %v6017_v58, %v5905_v37  ;;  %v11653_v41 = vpop.f32.mrf.mxu1  ;;  %v5907_v8 = vadd.f32 %v13419_v1, %v5794_v7 }
 0x265   :  { %v838_v46 = vld [vmem:[#allocation5 + $0x16e8] sm:$0xff]  ;;  %6862 = vmatpush2.bf16.msra.mxu0 %v9233_v63  ;;  %8163 = vst [vmem:[#allocation8 + $0xf0] sm:$0xff] %v9653_v2  ;;  %6701 = vmatprep.mubr.bf16.mxu0 %v11655_v12  ;;  %v6019_v24 = vpop.f32.mrf.mxu0 }
 0x266   :  { %v13416_v43 = vld [vmem:[#allocation38_spill] sm:$0xff]  ;;  %6863 = vmatprep.subr.bf16.mxu0 %v9218_v9  ;;  %v9458_v42 = vcombine.high %v830_v19, %v838_v46  ;;  %v9657_v37 = vpack.c.bf16 %v6018_v31, %v6016_v3  ;;  %v11669_v48 = vpop.f32.mrf.mxu1  ;;  %6977 = vmatpush2.bf16.msra.mxu1 %v9473_v45  ;;  %v9457_v21 = vcombine.low %v830_v19, %v838_v46  ;;  %v13421_v31 = vld [vmem:[#allocation39_spill] sm:$0xff]  ;;  %v11683_v19 = vld [vmem:[#allocation2 + $0x100] ss:$24 sps:$4 sm:$0xff]  }
 0x267   :  { %6805 = vmatmul.mubr.bf16.gmra.mxu1 %v13416_v43  ;;  %v11658_v18 = vld [vmem:[#allocation5 + $0xe28] sm:$0xff]  ;;  %v6021_v2 = vpop.f32.mrf.mxu0  ;;  %v6020_v58 = vadd.f32 %v6019_v24, %v5907_v8  ;;  %v5913_v56 = vadd.f32 %v13421_v31, %v5800_v34  ;;  %v5915_v45 = vadd.f32 %v13422_v11, %v5802_v5  ;;  %13423 = vst [vmem:[#allocation26_spill] sm:$0xff] %v11683_v19  ;;  %v13426_v5 = vld [vmem:[#allocation47_spill] sm:$0xff] }
 0x268   :  { %v11660_v63 = vld [vmem:[#allocation5 + $0xe68] sm:$0xff]  ;;  %8167 = vst [vmem:[#allocation8 + $0x110] sm:$0xff] %v9657_v37  ;;  %v11675_v7 = vpop.f32.mrf.mxu1  ;;  %6978 = vmatprep.subr.bf16.mxu1 %v9458_v42  ;;  %v5806_v8 = vadd.f32 %v11389_v32, %v11434_v23  ;;  %v13431_v11 = vld [vmem:[#allocation43_spill] sm:$0xff] }
 0x269   :  { %v13418_v9 = vld [vmem:[#allocation34_spill] sm:$0xff]  ;;  %6864 = vmatpush2.bf16.msra.mxu0 %v9217_v47  ;;  %v9186_v43 = vcombine.high %v11658_v18, %v11660_v63  ;;  %v9185_v46 = vcombine.low %v11658_v18, %v11660_v63 }
 0x26a   :  { %6814 = vmatprep.mubr.bf16.mxu1 %v13418_v9  ;;  %v814_v26 = vld [vmem:[#allocation5 + $0x1628] sm:$0xff]  ;;  %6865 = vmatprep.subr.bf16.mxu0 %v9202_v33  ;;  %v6025_v33 = vpop.f32.mrf.mxu0  ;;  %v11692_v34 = vpop.f32.mrf.mxu1 }
 0x26b   :  { %v822_v61 = vld [vmem:[#allocation5 + $0x1668] sm:$0xff]  ;;  %13425 = vst [vmem:[#allocation31_spill] sm:$0xff] %v11692_v34  ;;  %6979 = vmatpush2.bf16.msra.mxu1 %v9457_v21  ;;  %v6026_v63 = vadd.f32 %v6025_v33, %v5913_v56  ;;  %v13430_v21 = vld [vmem:[#allocation45_spill] sm:$0xff]  ;;  %v13432_v33 = vld [vmem:[#allocation48_spill] sm:$0xff] }
 0x26c   :  { %v13420_v6 = vld [vmem:[#allocation42_spill] sm:$0xff]  ;;  %6702 = vmatmul.mubr.bf16.gmra.mxu0 %v11683_v19  ;;  %v9441_v37 = vcombine.low %v814_v26, %v822_v61  ;;  %v11697_v31 = vpop.f32.mrf.mxu1 }
 0x26d   :  { %v5909_v29 = vadd.f32 %v13420_v6, %v5796_v30  ;;  %v9442_v30 = vcombine.high %v814_v26, %v822_v61  ;;  %v11677_v3 = vld [vmem:[#allocation5 + $0xda8] sm:$0xff]  ;;  %6866 = vmatpush2.bf16.msra.mxu0 %v9201_v59  ;;  %13427 = vst [vmem:[#allocation24_spill] sm:$0xff] %v11697_v31  ;;  %v13429_v26 = vld [vmem:[#allocation52_spill] sm:$0xff] }
 0x26e   :  { %v11679_v47 = vld [vmem:[#allocation5 + $0xde8] sm:$0xff]  ;;  %6867 = vmatprep.subr.bf16.mxu0 %v9186_v43  ;;  %v5810_v61 = vadd.f32 %v13429_v26, %v11424_v0  ;;  %v5812_v43 = vadd.f32 %v13430_v21, %v11434_v23 }
 0x26f   :  { %v6022_v35 = vadd.f32 %v6021_v2, %v5909_v29  ;;  %v798_v24 = vld [vmem:[#allocation5 + $0x15a8] sm:$0xff]  ;;  %6815 = vmatmul.mubr.bf16.gmra.mxu1 %v13426_v5  ;;  %v6027_v29 = vpop.f32.mrf.mxu0  ;;  %v9170_v18 = vcombine.high %v11677_v3, %v11679_v47  ;;  %6980 = vmatprep.subr.bf16.mxu1 %v9442_v30  ;;  %v9169_v26 = vcombine.low %v11677_v3, %v11679_v47 }
 0x270   :  { %v806_v9 = vld [vmem:[#allocation5 + $0x15e8] sm:$0xff]  ;;  %v6028_v2 = vadd.f32 %v6027_v29, %v5915_v45  ;;  %6824 = vmatprep.mubr.bf16.mxu1 %v13431_v11  ;;  %6981 = vmatpush2.bf16.msra.mxu1 %v9441_v37  ;;  %v13435_v37 = vld [vmem:[#allocation53_spill] sm:$0xff] }
 0x271   :  { %v13424_v42 = vld [vmem:[#allocation46_spill] sm:$0xff]  ;;  %v9661_v6 = vpack.c.bf16 %v6022_v35, %v6020_v58  ;;  %v9426_v58 = vcombine.high %v798_v24, %v806_v9  ;;  %v6029_v56 = vpop.f32.mrf.mxu0  ;;  %6868 = vmatpush2.bf16.msra.mxu0 %v9185_v46  ;;  %v9425_v21 = vcombine.low %v798_v24, %v806_v9 }
 0x272   :  { %v5804_v1 = vadd.f32 %v13424_v42, %v11424_v0  ;;  %v11699_v32 = vld [vmem:[#allocation2 + $0x134] ss:$24 sps:$4 sm:$0xff]   ;;  %v9665_v29 = vpack.c.bf16 %v6028_v2, %v6026_v63  ;;  %6869 = vmatprep.subr.bf16.mxu0 %v9170_v18  ;;  %v5925_v18 = vadd.f32 %v13435_v37, %v5812_v43  ;;  %v11730_v9 = vld [vmem:[#allocation2 + $0x130] ss:$24 sps:$4 sm:$0xff]  }
 0x273   :  { %8171 = vst [vmem:[#allocation8 + $0x130] sm:$0xff] %v9661_v6  ;;  %13428 = vst [vmem:[#allocation28_spill] sm:$0xff] %v11699_v32  ;;  %6711 = vmatprep.mubr.bf16.mxu0 %v11699_v32  ;;  %v11702_v35 = vld [vmem:[#allocation5 + $0xd28] sm:$0xff]  ;;  %v13433_v6 = vld [vmem:[#allocation51_spill] sm:$0xff]  ;;  %v11715_v32 = vpop.f32.mrf.mxu1  ;;  %v6031_v19 = vpop.f32.mrf.mxu0  ;;  %6982 = vmatprep.subr.bf16.mxu1 %v9426_v58 }
 0x274   :  { %v11704_v59 = vld [vmem:[#allocation5 + $0xd68] sm:$0xff]  ;;  %v5917_v42 = vadd.f32 %v13432_v33, %v5804_v1  ;;  %v5919_v5 = vadd.f32 %v13433_v6, %v5806_v8  ;;  %8175 = vst [vmem:[#allocation8 + $0x150] sm:$0xff] %v9665_v29  ;;  %13436 = vst [vmem:[#allocation29_spill] sm:$0xff] %v11730_v9  ;;  %6712 = vmatmul.mubr.bf16.gmra.mxu0 %v11730_v9  ;;  %6983 = vmatpush2.bf16.msra.mxu1 %v9425_v21 }
 0x275   :  { %v11711_v45 = vld [vmem:[#allocation5 + $0x1528] sm:$0xff]  ;;  %v9154_v11 = vcombine.high %v11702_v35, %v11704_v59  ;;  %v11721_v1 = vpop.f32.mrf.mxu1  ;;  %v6035_v24 = vpop.f32.mrf.mxu0  ;;  %6870 = vmatpush2.bf16.msra.mxu0 %v9169_v26 }
 0x276   :  { %v790_v30 = vld [vmem:[#allocation5 + $0x1568] sm:$0xff]  ;;  %v6030_v31 = vadd.f32 %v6029_v56, %v5917_v42  ;;  %v6032_v34 = vadd.f32 %v6031_v19, %v5919_v5  ;;  %v9153_v19 = vcombine.low %v11702_v35, %v11704_v59  ;;  %v13437_v56 = vld [vmem:[#allocation56_spill] sm:$0xff]  ;;  %v13438_v42 = vld [vmem:[#allocation15_spill] sm:$0xff] }
 0x277   :  { %v9410_v8 = vcombine.high %v11711_v45, %v790_v30  ;;  %v11724_v63 = vld [vmem:[#allocation5 + $0xca8] sm:$0xff]  ;;  %v5814_v33 = vadd.f32 %v13437_v56, %v11424_v0  ;;  %v11743_v43 = vpop.f32.mrf.mxu1  ;;  %v6037_v29 = vpop.f32.mrf.mxu0  ;;  %6871 = vmatprep.subr.bf16.mxu0 %v9154_v11  ;;  %v9409_v35 = vcombine.low %v11711_v45, %v790_v30  ;;  %v13443_v45 = vld [vmem:[#allocation17_spill] sm:$0xff]  ;;  %v5822_v11 = vadd.f32 %v11439_v22, %v11434_v23 }
 0x278   :  { %v11726_v46 = vld [vmem:[#allocation5 + $0xce8] sm:$0xff]  ;;  %v9669_v6 = vpack.c.bf16 %v6032_v34, %v6030_v31  ;;  %13439 = vst [vmem:[#allocation33_spill] sm:$0xff] %v11743_v43  ;;  %v6038_v37 = vadd.f32 %v6037_v29, %v5925_v18  ;;  %v11751_v34 = vld [vmem:[#allocation2 + $0x164] ss:$24 sps:$4 sm:$0xff]   ;;  %v5820_v30 = vadd.f32 %v13443_v45, %v11424_v0  ;;  %v13444_v18 = vld [vmem:[#allocation55_spill] sm:$0xff] }
 0x279   :  { %v13434_v3 = vld [vmem:[#allocation50_spill] sm:$0xff]  ;;  %v9138_v59 = vcombine.high %v11724_v63, %v11726_v46  ;;  %v11749_v56 = vpop.f32.mrf.mxu1  ;;  %6984 = vmatprep.subr.bf16.mxu1 %v9410_v8  ;;  %13442 = vst [vmem:[#allocation41_spill] sm:$0xff] %v11751_v34  ;;  %6721 = vmatprep.mubr.bf16.mxu0 %v11751_v34  ;;  %v9137_v45 = vcombine.low %v11724_v63, %v11726_v46  ;;  %v11784_v46 = vld [vmem:[#allocation5 + $0x3b0] sm:$0xff] }
 0x27a   :  { %v5923_v47 = vadd.f32 %v13434_v3, %v5810_v61  ;;  %v11735_v2 = vld [vmem:[#allocation5 + $0x14a8] sm:$0xff]  ;;  %v5816_v61 = vadd.f32 %v13438_v42, %v11434_v23  ;;  %8179 = vst [vmem:[#allocation8 + $0x170] sm:$0xff] %v9669_v6  ;;  %13441 = vst [vmem:[#allocation35_spill] sm:$0xff] %v11749_v56  ;;  %v13445_v42 = vld [vmem:[#allocation57_spill] sm:$0xff]  ;;  %6872 = vmatpush2.bf16.msra.mxu0 %v9153_v19  ;;  %6985 = vmatpush2.bf16.msra.mxu1 %v9409_v35 }
 0x27b   :  { %v11737_v58 = vld [vmem:[#allocation5 + $0x14e8] sm:$0xff]  ;;  %v5927_v6 = vadd.f32 %v13445_v42, %v5814_v33  ;;  %v11771_v9 = vpop.f32.mrf.mxu1  ;;  %v13447_v56 = vld [vmem:[#allocation37_spill] sm:$0xff]  ;;  %6873 = vmatprep.subr.bf16.mxu0 %v9138_v59  ;;  %v11786_v19 = vld [vmem:[#allocation5 + $0x3f0] sm:$0xff] }
 0x27c   :  { %v13440_v5 = vld [vmem:[#allocation54_spill] sm:$0xff]  ;;  %v6036_v3 = vadd.f32 %v6035_v24, %v5923_v47  ;;  %v9394_v31 = vcombine.high %v11735_v2, %v11737_v58  ;;  %v6039_v47 = vpop.f32.mrf.mxu0  ;;  %v13221_v22 = vsub.s32 6, %v13447_v56  ;;  %v13448_v35 = vld [vmem:[#allocation23_spill] sm:$0xff] }
 0x27d   :  { %6825 = vmatmul.mubr.bf16.gmra.mxu1 %v13440_v5  ;;  %v11756_v26 = vld [vmem:[#allocation5 + $0xc28] sm:$0xff]  ;;  %v13446_v5 = vld [vmem:[#allocation16_spill] sm:$0xff]  ;;  %v5933_v59 = vadd.f32 %v13448_v35, %v5820_v30  ;;  %v13449_v42 = vld [vmem:[#allocation19_spill] sm:$0xff]  ;;  %v5826_v30 = vadd.f32 %v11455_v28, %v11434_v23  ;;  %v8852_v23 = vcombine.high %v11784_v46, %v11786_v19 }
 0x27e   :  { %v11758_v21 = vld [vmem:[#allocation5 + $0xc68] sm:$0xff]  ;;  %6834 = vmatprep.mubr.bf16.mxu1 %v13444_v18  ;;  %v5929_v29 = vadd.f32 %v13446_v5, %v5816_v61  ;;  %v9673_v34 = vpack.c.bf16 %v6038_v37, %v6036_v3  ;;  %v6041_v43 = vpop.f32.mrf.mxu0  ;;  %v9393_v18 = vcombine.low %v11735_v2, %v11737_v58  ;;  %v6040_v61 = vadd.f32 %v6039_v47, %v5927_v6  ;;  %v11780_v37 = vpop.f32.mrf.mxu1  ;;  %v487_v47 = vld [vmem:[#allocation5 + $0xbf0] sm:$0xff]  ;;  %v13453_v58 = vld [vmem:[#allocation20_spill] sm:$0xff] }
 0x27f   :  { %v11765_v8 = vld [vmem:[#allocation5 + $0x1428] sm:$0xff]  ;;  %v9122_v33 = vcombine.high %v11756_v26, %v11758_v21  ;;  %6986 = vmatprep.subr.bf16.mxu1 %v9394_v31  ;;  %v5935_v2 = vadd.f32 %v13449_v42, %v5822_v11  ;;  %v479_v31 = vld [vmem:[#allocation5 + $0xbb0] sm:$0xff]  ;;  %v13452_v42 = vld [vmem:[#allocation21_spill] sm:$0xff]  ;;  %6874 = vmatpush2.bf16.msra.mxu0 %v9137_v45 }
 0x280   :  { %v11767_v24 = vld [vmem:[#allocation5 + $0x1468] sm:$0xff]  ;;  %8183 = vst [vmem:[#allocation8 + $0x190] sm:$0xff] %v9673_v34  ;;  %v6042_v3 = vadd.f32 %v6041_v43, %v5929_v29  ;;  %v6045_v5 = vpop.f32.mrf.mxu0  ;;  %v11791_v34 = vld [vmem:[#allocation2 + $0x160] ss:$24 sps:$4 sm:$0xff]   ;;  %v9121_v43 = vcombine.low %v11756_v26, %v11758_v21  ;;  %v11800_v11 = vpop.f32.mrf.mxu1  ;;  %6987 = vmatpush2.bf16.msra.mxu1 %v9393_v18  ;;  %v11817_v18 = vld [vmem:[#allocation5 + $0x330] sm:$0xff] }
 0x281   :  { %v9378_v63 = vcombine.high %v11765_v8, %v11767_v24  ;;  %13450 = vst [vmem:[#allocation32_spill] sm:$0xff] %v11791_v34  ;;  %6722 = vmatmul.mubr.bf16.gmra.mxu0 %v11791_v34  ;;  %v13451_v6 = vld [vmem:[#allocation18_spill] sm:$0xff]  ;;  %v11806_v34 = vrot.slane %v13453_v58, %v13221_v22  ;;  %6875 = vmatprep.subr.bf16.mxu0 %v9122_v33  ;;  %v11819_v33 = vld [vmem:[#allocation5 + $0x370] sm:$0xff] }
 0x282   :  { %v5824_v29 = vadd.f32 %v13451_v6, %v11424_v0  ;;  %v9677_v35 = vpack.c.bf16 %v6042_v3, %v6040_v61  ;;  %v6047_v26 = vpop.f32.mrf.mxu0  ;;  %v9377_v0 = vcombine.low %v11765_v8, %v11767_v24  ;;  %v6046_v28 = vadd.f32 %v6045_v5, %v5933_v59  ;;  %v11812_v61 = vpop.f32.mrf.mxu1  ;;  %v11814_v45 = vld [vmem:[#allocation2 + $0xc] ss:$24 sps:$4 sm:$0xff]   ;;  %v471_v5 = vld [vmem:[#allocation5 + $0xb70] sm:$0xff] }
 0x283   :  { %v6048_v21 = vadd.f32 %v6047_v26, %v5935_v2  ;;  %6988 = vmatprep.subr.bf16.mxu1 %v9378_v63  ;;  %13454 = vst [vmem:[#allocation36_spill] sm:$0xff] %v11814_v45  ;;  %6877 = vmatprep.mubr.bf16.mxu0 %v11814_v45  ;;  %v9108_v3 = vcombine.high %v479_v31, %v487_v47  ;;  %v13455_v8 = vsub.s32 7, %v13447_v56  ;;  %v13456_v59 = vld [vmem:[#allocation25_spill] sm:$0xff]  ;;  %v463_v2 = vld [vmem:[#allocation5 + $0xb30] sm:$0xff] }
 0x284   :  { %8187 = vst [vmem:[#allocation8 + $0x1b0] sm:$0xff] %v9677_v35  ;;  %v6049_v6 = vpop.f32.mrf.mxu0  ;;  %v13457_v63 = vld [vmem:[#allocation27_spill] sm:$0xff]  ;;  %v11829_v22 = vpop.f32.mrf.mxu1  ;;  %6876 = vmatpush2.bf16.msra.mxu0 %v9121_v43  ;;  %v8851_v45 = vcombine.low %v11784_v46, %v11786_v19  ;;  %6989 = vmatpush2.bf16.msra.mxu1 %v9377_v0  ;;  %v9092_v43 = vcombine.high %v463_v2, %v471_v5  ;;  %v11843_v0 = vld [vmem:[#allocation2 + $0x8] ss:$24 sps:$4 sm:$0xff]  }
 0x285   :  { %6835 = vmatmul.mubr.bf16.gmra.mxu1 %v13452_v42  ;;  %v11824_v24 = vrot.slane %v13453_v58, %v13455_v8  ;;  %v5937_v35 = vadd.f32 %v13457_v63, %v5824_v29  ;;  %v5939_v42 = vadd.f32 %v11457_v17, %v5826_v30  ;;  %v9681_v26 = vpack.c.bf16 %v6048_v21, %v6046_v28  ;;  %v11839_v28 = vld [vmem:[#allocation5 + $0x2b0] sm:$0xff] }
 0x286   :  { %6990 = vmatprep.mubr.bf16.mxu1 %v13456_v59  ;;  %v6051_v56 = vpop.f32.mrf.mxu0  ;;  %7071 = vmatprep.subr.bf16.mxu0 %v8852_v23  ;;  %v9107_v58 = vcombine.low %v479_v31, %v487_v47  ;;  %v8836_v8 = vcombine.high %v11817_v18, %v11819_v33  ;;  %v6089_v59 = vadd.f32 %v11472_v13, %v11806_v34  ;;  %v11837_v30 = vpop.f32.mrf.mxu1  ;;  %v11841_v46 = vld [vmem:[#allocation5 + $0x2f0] sm:$0xff] }
 0x287   :  { %8191 = vst [vmem:[#allocation8 + $0x1d0] sm:$0xff] %v9681_v26  ;;  %v6050_v29 = vadd.f32 %v6049_v6, %v5937_v35  ;;  %v6052_v17 = vadd.f32 %v6051_v56, %v5939_v42  ;;  %7184 = vmatprep.subr.bf16.mxu1 %v9108_v3  ;;  %13458 = vst [vmem:[#allocation38_spill] sm:$0xff] %v11843_v0  ;;  %v8835_v31 = vcombine.low %v11817_v18, %v11819_v33  ;;  %v447_v13 = vld [vmem:[#allocation5 + $0xab0] sm:$0xff]  ;;  %v13459_v6 = vld [vmem:[#allocation30_spill] sm:$0xff] }
 0x288   :  { %v6201_v19 = vpop.f32.mrf.mxu0  ;;  %v455_v47 = vld [vmem:[#allocation5 + $0xaf0] sm:$0xff]  ;;  %v6091_v56 = vadd.f32 %v11477_v4, %v11824_v24  ;;  %v6314_v3 = vpop.f32.mrf.mxu1  ;;  %v9091_v35 = vcombine.low %v463_v2, %v471_v5  ;;  %v8820_v42 = vcombine.high %v11839_v28, %v11841_v46  ;;  %v6093_v18 = vadd.f32 %v11493_v36, %v11806_v34  ;;  %v13461_v5 = vld [vmem:[#allocation22_spill] sm:$0xff] }
 0x289   :  { %6878 = vmatmul.mubr.bf16.vlgmr.msra.gmra.mxu0 %v11843_v0  ;;  %v9685_v23 = vpack.c.bf16 %v6052_v17, %v6050_v29  ;;  %v6202_v21 = vadd.f32 %v6201_v19, %v6089_v59  ;;  %v11855_v4 = vld [vmem:[#allocation2 + $0x3c] ss:$24 sps:$4 sm:$0xff]   ;;  %v9076_v59 = vcombine.high %v447_v13, %v455_v47  ;;  %v6095_v17 = vadd.f32 %v11499_v38, %v11824_v24 }
 0x28a   :  { %7072 = vmatpush1.bf16.msra.mxu0 %v8851_v45  ;;  %v6203_v63 = vpop.f32.mrf.mxu0  ;;  %v6316_v26 = vpop.f32.mrf.mxu1  ;;  %13460 = vst [vmem:[#allocation44_spill] sm:$0xff] %v11855_v4  ;;  %6887 = vmatprep.mubr.bf16.mxu0 %v11855_v4  ;;  %v11858_v45 = vld [vmem:[#allocation5 + $0x230] sm:$0xff] }
 0x28b   :  { %7073 = vmatprep.subr.bf16.mxu0 %v8836_v8  ;;  %8195 = vst [vmem:[#allocation8 + $0x1f0] sm:$0xff] %v9685_v23  ;;  %v6204_v33 = vadd.f32 %v6203_v63, %v6091_v56  ;;  %v8819_v8 = vcombine.low %v11839_v28, %v11841_v46  ;;  %v431_v36 = vld [vmem:[#allocation5 + $0xa30] sm:$0xff]  ;;  %v9075_v63 = vcombine.low %v447_v13, %v455_v47 }
 0x28c   :  { %v6205_v2 = vpop.f32.mrf.mxu0  ;;  %v439_v29 = vld [vmem:[#allocation5 + $0xa70] sm:$0xff]  ;;  %v6318_v23 = vpop.f32.mrf.mxu1  ;;  %v6099_v28 = vadd.f32 %v11516_v27, %v11806_v34  ;;  %v6101_v13 = vadd.f32 %v11521_v62, %v11824_v24 }
 0x28d   :  { %6991 = vmatmul.mubr.bf16.vlgmr.msra.gmra.mxu1 %v13459_v6  ;;  %v6317_v19 = vadd.f32 %v6316_v26, %v6204_v33  ;;  %v6206_v56 = vadd.f32 %v6205_v2, %v6093_v18  ;;  %v11869_v4 = vld [vmem:[#allocation5 + $0x1b0] sm:$0xff]  ;;  %v9059_v62 = vcombine.low %v431_v36, %v439_v29 }
 0x28e   :  { %7185 = vmatpush1.bf16.msra.mxu1 %v9107_v58  ;;  %v11860_v58 = vld [vmem:[#allocation5 + $0x270] sm:$0xff]  ;;  %7000 = vmatprep.mubr.bf16.mxu1 %v13461_v5  ;;  %v6207_v6 = vpop.f32.mrf.mxu0  ;;  %v6320_v38 = vpop.f32.mrf.mxu1 }
 0x28f   :  { %7186 = vmatprep.subr.bf16.mxu1 %v9092_v43  ;;  %v6315_v43 = vadd.f32 %v6314_v3, %v6202_v21  ;;  %7074 = vmatpush1.bf16.msra.mxu0 %v8835_v31  ;;  %v8804_v5 = vcombine.high %v11858_v45, %v11860_v58  ;;  %v6208_v0 = vadd.f32 %v6207_v6, %v6095_v17  ;;  %v11873_v3 = vld [vmem:[#allocation5 + $0x1f0] sm:$0xff] }
 0x290   :  { %7075 = vmatprep.subr.bf16.mxu0 %v8820_v42  ;;  %v9060_v21 = vcombine.high %v431_v36, %v439_v29  ;;  %v11875_v31 = vld [vmem:[#allocation5 + $0x9b0] sm:$0xff]  ;;  %v6211_v47 = vpop.f32.mrf.mxu0  ;;  %v8803_v27 = vcombine.low %v11858_v45, %v11860_v58  ;;  %v6319_v18 = vadd.f32 %v6318_v23, %v6206_v56  ;;  %v8788_v17 = vcombine.high %v11869_v4, %v11873_v3  ;;  %v11893_v56 = vld [vmem:[#allocation2 + $0x6c] ss:$24 sps:$4 sm:$0xff]  }
 0x291   :  { %v9626_v46 = vpack.c.bf16 %v6317_v19, %v6315_v43  ;;  %v11881_v42 = vld [vmem:[#allocation2 + $0x38] ss:$24 sps:$4 sm:$0xff]   ;;  %v6321_v33 = vadd.f32 %v6320_v38, %v6208_v0  ;;  %v6212_v26 = vadd.f32 %v6211_v47, %v6099_v28  ;;  %v6103_v45 = vadd.f32 %v11537_v10, %v11806_v34 }
 0x292   :  { %7187 = vmatpush1.bf16.msra.mxu1 %v9091_v35  ;;  %v11877_v35 = vld [vmem:[#allocation5 + $0x9f0] sm:$0xff]  ;;  %6888 = vmatmul.mubr.bf16.gmra.mxu0 %v11881_v42  ;;  %v6213_v2 = vpop.f32.mrf.mxu0  ;;  %v8787_v29 = vcombine.low %v11869_v4, %v11873_v3  ;;  %v6105_v6 = vadd.f32 %v11543_v60, %v11824_v24  ;;  %v6109_v60 = vadd.f32 %v11560_v49, %v11806_v34 }
 0x293   :  { %7188 = vmatprep.subr.bf16.mxu1 %v9076_v59  ;;  %8136 = vst [vmem:[#allocation8 + $0x18] sm:$0xff] %v9626_v46  ;;  %v6324_v59 = vpop.f32.mrf.mxu1  ;;  %7076 = vmatpush1.bf16.msra.mxu0 %v8819_v8  ;;  %v9044_v43 = vcombine.high %v11875_v31, %v11877_v35  ;;  %v9630_v58 = vpack.c.bf16 %v6321_v33, %v6319_v18  ;;  %v11898_v8 = vld [vmem:[#allocation5 + $0x170] sm:$0xff] }
 0x294   :  { %7077 = vmatprep.subr.bf16.mxu0 %v8804_v5  ;;  %v6214_v0 = vadd.f32 %v6213_v2, %v6101_v13  ;;  %6897 = vmatprep.mubr.bf16.mxu0 %v11893_v56  ;;  %v6215_v36 = vpop.f32.mrf.mxu0  ;;  %v11903_v23 = vld [vmem:[#allocation5 + $0x930] sm:$0xff] }
 0x295   :  { %7001 = vmatmul.mubr.bf16.gmra.mxu1 %v11507_v25  ;;  %v6326_v19 = vpop.f32.mrf.mxu1  ;;  %v11896_v25 = vld [vmem:[#allocation5 + $0x130] sm:$0xff]  ;;  %8140 = vst [vmem:[#allocation8 + $0x38] sm:$0xff] %v9630_v58  ;;  %v6216_v28 = vadd.f32 %v6215_v36, %v6103_v45 }
 0x296   :  { %7189 = vmatpush1.bf16.msra.mxu1 %v9075_v63  ;;  %7010 = vmatprep.mubr.bf16.mxu1 %v11523_v15  ;;  %v407_v10 = vld [vmem:[#allocation5 + $0x970] sm:$0xff]  ;;  %v6325_v63 = vadd.f32 %v6324_v59, %v6212_v26  ;;  %v6327_v5 = vadd.f32 %v6326_v19, %v6214_v0  ;;  %v6217_v38 = vpop.f32.mrf.mxu0  ;;  %v9043_v15 = vcombine.low %v11875_v31, %v11877_v35  ;;  %v11924_v59 = vld [vmem:[#allocation2 + $0x68] ss:$24 sps:$4 sm:$0xff]  }
 0x297   :  { %7190 = vmatprep.subr.bf16.mxu1 %v9060_v21  ;;  %v6328_v46 = vpop.f32.mrf.mxu1  ;;  %7078 = vmatpush1.bf16.msra.mxu0 %v8803_v27  ;;  %v8772_v4 = vcombine.high %v11896_v25, %v11898_v8  ;;  %v11911_v21 = vld [vmem:[#allocation5 + $0xb0] sm:$0xff]  ;;  %v6218_v13 = vadd.f32 %v6217_v38, %v6105_v6  ;;  %v9028_v27 = vcombine.high %v11903_v23, %v407_v10 }
 0x298   :  { %7079 = vmatprep.subr.bf16.mxu0 %v8788_v17  ;;  %v9634_v3 = vpack.c.bf16 %v6327_v5, %v6325_v63  ;;  %v11916_v18 = vld [vmem:[#allocation5 + $0xf0] sm:$0xff]  ;;  %v6111_v31 = vadd.f32 %v11565_v57, %v11824_v24  ;;  %v6221_v35 = vpop.f32.mrf.mxu0  ;;  %v8771_v49 = vcombine.low %v11896_v25, %v11898_v8  ;;  %v6329_v2 = vadd.f32 %v6328_v46, %v6216_v28 }
 0x299   :  { %v6330_v47 = vpop.f32.mrf.mxu1  ;;  %v11918_v33 = vld [vmem:[#allocation5 + $0x8b0] sm:$0xff]  ;;  %v6222_v17 = vadd.f32 %v6221_v35, %v6109_v60  ;;  %v9027_v57 = vcombine.low %v11903_v23, %v407_v10  ;;  %v8756_v58 = vcombine.high %v11911_v21, %v11916_v18  ;;  %v6113_v19 = vadd.f32 %v11581_v14, %v11806_v34 }
 0x29a   :  { %7191 = vmatpush1.bf16.msra.mxu1 %v9059_v62  ;;  %v11920_v26 = vld [vmem:[#allocation5 + $0x8f0] sm:$0xff]  ;;  %6898 = vmatmul.mubr.bf16.gmra.mxu0 %v11924_v59  ;;  %8144 = vst [vmem:[#allocation8 + $0x58] sm:$0xff] %v9634_v3  ;;  %v6331_v62 = vadd.f32 %v6330_v47, %v6218_v13  ;;  %v6223_v45 = vpop.f32.mrf.mxu0  ;;  %v8755_v6 = vcombine.low %v11911_v21, %v11916_v18 }
 0x29b   :  { %7192 = vmatprep.subr.bf16.mxu1 %v9044_v43  ;;  %v6334_v43 = vpop.f32.mrf.mxu1  ;;  %7080 = vmatpush1.bf16.msra.mxu0 %v8787_v29  ;;  %v9012_v0 = vcombine.high %v11918_v33, %v11920_v26  ;;  %v6224_v8 = vadd.f32 %v6223_v45, %v6111_v31  ;;  %v11940_v29 = vld [vmem:[#allocation5 + $0x30] sm:$0xff]  ;;  %v6115_v5 = vadd.f32 %v11587_v40, %v11824_v24 }
 0x29c   :  { %7081 = vmatprep.subr.bf16.mxu0 %v8772_v4  ;;  %v9638_v25 = vpack.c.bf16 %v6331_v62, %v6329_v2  ;;  %v11942_v23 = vld [vmem:[#allocation5 + $0x70] sm:$0xff]  ;;  %v6225_v10 = vpop.f32.mrf.mxu0  ;;  %v6335_v28 = vadd.f32 %v6334_v43, %v6222_v17  ;;  %v6119_v40 = vadd.f32 %v11604_v54, %v11806_v34 }
 0x29d   :  { %7011 = vmatmul.mubr.bf16.gmra.mxu1 %v11551_v39  ;;  %v6336_v36 = vpop.f32.mrf.mxu1  ;;  %v11937_v39 = vld [vmem:[#allocation2 + $0x9c] ss:$24 sps:$4 sm:$0xff]   ;;  %v6226_v38 = vadd.f32 %v6225_v10, %v6113_v19  ;;  %v8740_v21 = vcombine.high %v11940_v29, %v11942_v23  ;;  %v8739_v54 = vcombine.low %v11940_v29, %v11942_v23 }
 0x29e   :  { %7193 = vmatpush1.bf16.msra.mxu1 %v9043_v15  ;;  %6907 = vmatprep.mubr.bf16.mxu0 %v11937_v39  ;;  %v11947_v63 = vld [vmem:[#allocation5 + $0x830] sm:$0xff]  ;;  %8148 = vst [vmem:[#allocation8 + $0x78] sm:$0xff] %v9638_v25  ;;  %v6337_v46 = vadd.f32 %v6336_v36, %v6224_v8  ;;  %v6227_v4 = vpop.f32.mrf.mxu0 }
 0x29f   :  { %7194 = vmatprep.subr.bf16.mxu1 %v9028_v27  ;;  %7020 = vmatprep.mubr.bf16.mxu1 %v11567_v50  ;;  %v375_v14 = vld [vmem:[#allocation5 + $0x870] sm:$0xff]  ;;  %v6338_v15 = vpop.f32.mrf.mxu1  ;;  %v9011_v50 = vcombine.low %v11918_v33, %v11920_v26  ;;  %v6228_v13 = vadd.f32 %v6227_v4, %v6115_v5  ;;  %v6121_v33 = vadd.f32 %v11609_v51, %v11824_v24 }
 0x2a0   :  { %7082 = vmatpush1.bf16.msra.mxu0 %v8771_v49  ;;  %v11955_v60 = vld [vmem:[#allocation5 + $0x7b0] sm:$0xff]  ;;  %v9642_v3 = vpack.c.bf16 %v6337_v46, %v6335_v28  ;;  %v8996_v27 = vcombine.high %v11947_v63, %v375_v14  ;;  %v6231_v26 = vpop.f32.mrf.mxu0  ;;  %v6339_v2 = vadd.f32 %v6338_v15, %v6226_v38  ;;  %v8995_v51 = vcombine.low %v11947_v63, %v375_v14 }
 0x2a1   :  { %7083 = vmatprep.subr.bf16.mxu0 %v8756_v58  ;;  %v6340_v47 = vpop.f32.mrf.mxu1  ;;  %v11960_v18 = vld [vmem:[#allocation5 + $0x7f0] sm:$0xff]  ;;  %v6232_v17 = vadd.f32 %v6231_v26, %v6119_v40  ;;  %v6125_v63 = vadd.f32 %v11631_v16, %v11824_v24  ;;  %v6129_v16 = vadd.f32 %v11648_v20, %v11806_v34 }
 0x2a2   :  { %7195 = vmatpush1.bf16.msra.mxu1 %v9027_v57  ;;  %v11962_v31 = vld [vmem:[#allocation5 + $0xfb0] sm:$0xff]  ;;  %8152 = vst [vmem:[#allocation8 + $0x98] sm:$0xff] %v9642_v3  ;;  %v6341_v62 = vadd.f32 %v6340_v47, %v6228_v13  ;;  %v6233_v45 = vpop.f32.mrf.mxu0  ;;  %v8980_v57 = vcombine.high %v11955_v60, %v11960_v18  ;;  %v8979_v10 = vcombine.low %v11955_v60, %v11960_v18 }
 0x2a3   :  { %7196 = vmatprep.subr.bf16.mxu1 %v9012_v0  ;;  %v11964_v35 = vld [vmem:[#allocation5 + $0xff0] sm:$0xff]  ;;  %v6344_v43 = vpop.f32.mrf.mxu1  ;;  %v6123_v0 = vadd.f32 %v11625_v53, %v11806_v34  ;;  %v6234_v25 = vadd.f32 %v6233_v45, %v6121_v33 }
 0x2a4   :  { %v11968_v49 = vld [vmem:[#allocation2 + $0x98] ss:$24 sps:$4 sm:$0xff]   ;;  %7084 = vmatpush1.bf16.msra.mxu0 %v8755_v6  ;;  %v9236_v58 = vcombine.high %v11962_v31, %v11964_v35  ;;  %v9646_v19 = vpack.c.bf16 %v6341_v62, %v6339_v2  ;;  %v6235_v23 = vpop.f32.mrf.mxu0  ;;  %v6345_v14 = vadd.f32 %v6344_v43, %v6232_v17  ;;  %v6133_v43 = vadd.f32 %v11669_v48, %v11806_v34 }
 0x2a5   :  { %6908 = vmatmul.mubr.bf16.gmra.mxu0 %v11968_v49  ;;  %7021 = vmatmul.mubr.bf16.gmra.mxu1 %v11595_v55  ;;  %v6346_v8 = vpop.f32.mrf.mxu1  ;;  %v11981_v55 = vld [vmem:[#allocation2 + $0xcc] ss:$24 sps:$4 sm:$0xff]   ;;  %v11984_v36 = vld [vmem:[#allocation5 + $0x730] sm:$0xff]  ;;  %v6236_v28 = vadd.f32 %v6235_v23, %v6123_v0 }
 0x2a6   :  { %7197 = vmatpush1.bf16.msra.mxu1 %v9011_v50  ;;  %7085 = vmatprep.subr.bf16.mxu0 %v8740_v21  ;;  %v11986_v29 = vld [vmem:[#allocation5 + $0x770] sm:$0xff]  ;;  %8156 = vst [vmem:[#allocation8 + $0xb8] sm:$0xff] %v9646_v19  ;;  %v6347_v5 = vadd.f32 %v6346_v8, %v6234_v25  ;;  %v6237_v38 = vpop.f32.mrf.mxu0 }
 0x2a7   :  { %7198 = vmatprep.subr.bf16.mxu1 %v8996_v27  ;;  %6917 = vmatprep.mubr.bf16.mxu0 %v11981_v55  ;;  %v11991_v6 = vld [vmem:[#allocation5 + $0xf30] sm:$0xff]  ;;  %v6348_v46 = vpop.f32.mrf.mxu1  ;;  %v8964_v15 = vcombine.high %v11984_v36, %v11986_v29  ;;  %v6238_v21 = vadd.f32 %v6237_v38, %v6125_v63  ;;  %v6131_v27 = vadd.f32 %v11653_v41, %v11824_v24 }
 0x2a8   :  { %7030 = vmatprep.mubr.bf16.mxu1 %v11611_v44  ;;  %v599_v53 = vld [vmem:[#allocation5 + $0xf70] sm:$0xff]  ;;  %7086 = vmatpush1.bf16.msra.mxu0 %v8739_v54  ;;  %v9235_v44 = vcombine.low %v11962_v31, %v11964_v35  ;;  %v9650_v50 = vpack.c.bf16 %v6347_v5, %v6345_v14  ;;  %v6241_v18 = vpop.f32.mrf.mxu0  ;;  %v12012_v31 = vld [vmem:[#allocation2 + $0xc8] ss:$24 sps:$4 sm:$0xff]   ;;  %v8963_v20 = vcombine.low %v11984_v36, %v11986_v29 }
 0x2a9   :  { %7087 = vmatprep.subr.bf16.mxu0 %v8980_v57  ;;  %v11999_v4 = vld [vmem:[#allocation5 + $0x6b0] sm:$0xff]  ;;  %v6350_v60 = vpop.f32.mrf.mxu1  ;;  %v9220_v40 = vcombine.high %v11991_v6, %v599_v53  ;;  %v6349_v35 = vadd.f32 %v6348_v46, %v6236_v28  ;;  %v6242_v26 = vadd.f32 %v6241_v18, %v6129_v16  ;;  %v9219_v41 = vcombine.low %v11991_v6, %v599_v53 }
 0x2aa   :  { %7199 = vmatpush1.bf16.msra.mxu1 %v8995_v51  ;;  %v12004_v3 = vld [vmem:[#allocation5 + $0x6f0] sm:$0xff]  ;;  %8160 = vst [vmem:[#allocation8 + $0xd8] sm:$0xff] %v9650_v50  ;;  %v6351_v33 = vadd.f32 %v6350_v60, %v6238_v21  ;;  %v6243_v2 = vpop.f32.mrf.mxu0  ;;  %v6135_v36 = vadd.f32 %v11675_v7, %v11824_v24  ;;  %v13463_v50 = vld [vmem:[#allocation24_spill] sm:$0xff] }
 0x2ab   :  { %7200 = vmatprep.subr.bf16.mxu1 %v9236_v58  ;;  %v12006_v13 = vld [vmem:[#allocation5 + $0xeb0] sm:$0xff]  ;;  %v6354_v54 = vpop.f32.mrf.mxu1  ;;  %v8948_v62 = vcombine.high %v11999_v4, %v12004_v3  ;;  %v6244_v51 = vadd.f32 %v6243_v2, %v6131_v27  ;;  %v8947_v25 = vcombine.low %v11999_v4, %v12004_v3  ;;  %v6141_v21 = vadd.f32 %v13463_v50, %v11824_v24 }
 0x2ac   :  { %v12008_v47 = vld [vmem:[#allocation5 + $0xef0] sm:$0xff]  ;;  %7088 = vmatpush2.bf16.msra.mxu0 %v8979_v10  ;;  %v9654_v45 = vpack.c.bf16 %v6351_v33, %v6349_v35  ;;  %v6245_v19 = vpop.f32.mrf.mxu0  ;;  %v6355_v29 = vadd.f32 %v6354_v54, %v6242_v26  ;;  %v6143_v2 = vadd.f32 %v11715_v32, %v11806_v34 }
 0x2ad   :  { %6918 = vmatmul.mubr.bf16.gmra.mxu0 %v12012_v31  ;;  %7031 = vmatmul.mubr.bf16.gmra.mxu1 %v11639_v52  ;;  %v9204_v17 = vcombine.high %v12006_v13, %v12008_v47  ;;  %v6356_v57 = vpop.f32.mrf.mxu1  ;;  %v12025_v52 = vld [vmem:[#allocation2 + $0xfc] ss:$24 sps:$4 sm:$0xff]   ;;  %v6246_v10 = vadd.f32 %v6245_v19, %v6133_v43  ;;  %v12069_v43 = vld [vmem:[#allocation2 + $0x12c] ss:$24 sps:$4 sm:$0xff]  }
 0x2ae   :  { %7201 = vmatpush2.bf16.msra.mxu1 %v9235_v44  ;;  %7089 = vmatprep.subr.bf16.mxu0 %v8964_v15  ;;  %v12028_v58 = vld [vmem:[#allocation5 + $0x630] sm:$0xff]  ;;  %8164 = vst [vmem:[#allocation8 + $0xf8] sm:$0xff] %v9654_v45  ;;  %v6357_v23 = vadd.f32 %v6356_v57, %v6244_v51  ;;  %v6247_v53 = vpop.f32.mrf.mxu0 }
 0x2af   :  { %7202 = vmatprep.subr.bf16.mxu1 %v9220_v40  ;;  %6927 = vmatprep.mubr.bf16.mxu0 %v12025_v52  ;;  %v12030_v0 = vld [vmem:[#allocation5 + $0x670] sm:$0xff]  ;;  %v6358_v6 = vpop.f32.mrf.mxu1  ;;  %v6248_v46 = vadd.f32 %v6247_v53, %v6135_v36 }
 0x2b0   :  { %7040 = vmatprep.mubr.bf16.mxu1 %v11655_v12  ;;  %v12035_v8 = vld [vmem:[#allocation5 + $0xe30] sm:$0xff]  ;;  %7090 = vmatpush2.bf16.msra.mxu0 %v8963_v20  ;;  %v9203_v12 = vcombine.low %v12006_v13, %v12008_v47  ;;  %v8932_v63 = vcombine.high %v12028_v58, %v12030_v0  ;;  %v9658_v28 = vpack.c.bf16 %v6357_v23, %v6355_v29  ;;  %v6251_v60 = vpop.f32.mrf.mxu0  ;;  %v13464_v20 = vld [vmem:[#allocation26_spill] sm:$0xff] }
 0x2b1   :  { %v567_v48 = vld [vmem:[#allocation5 + $0xe70] sm:$0xff]  ;;  %7091 = vmatprep.subr.bf16.mxu0 %v8948_v62  ;;  %v6360_v38 = vpop.f32.mrf.mxu1  ;;  %v8931_v3 = vcombine.low %v12028_v58, %v12030_v0  ;;  %v6359_v13 = vadd.f32 %v6358_v6, %v6246_v10  ;;  %v13465_v58 = vld [vmem:[#allocation28_spill] sm:$0xff] }
 0x2b2   :  { %7203 = vmatpush2.bf16.msra.mxu1 %v9219_v41  ;;  %v12043_v14 = vld [vmem:[#allocation5 + $0x5b0] sm:$0xff]  ;;  %v9188_v44 = vcombine.high %v12035_v8, %v567_v48  ;;  %8168 = vst [vmem:[#allocation8 + $0x118] sm:$0xff] %v9658_v28  ;;  %v6361_v47 = vadd.f32 %v6360_v38, %v6248_v46  ;;  %v6253_v35 = vpop.f32.mrf.mxu0  ;;  %v9187_v33 = vcombine.low %v12035_v8, %v567_v48 }
 0x2b3   :  { %v13462_v5 = vld [vmem:[#allocation31_spill] sm:$0xff]  ;;  %7204 = vmatprep.subr.bf16.mxu1 %v9204_v17  ;;  %v6364_v18 = vpop.f32.mrf.mxu1  ;;  %v6254_v62 = vadd.f32 %v6253_v35, %v6141_v21 }
 0x2b4   :  { %v6139_v7 = vadd.f32 %v13462_v5, %v11806_v34  ;;  %v12048_v15 = vld [vmem:[#allocation5 + $0x5f0] sm:$0xff]  ;;  %7092 = vmatpush2.bf16.msra.mxu0 %v8947_v25  ;;  %v9662_v41 = vpack.c.bf16 %v6361_v47, %v6359_v13  ;;  %v6255_v57 = vpop.f32.mrf.mxu0  ;;  %v6145_v25 = vadd.f32 %v11721_v1, %v11824_v24  ;;  %v13468_v47 = vld [vmem:[#allocation29_spill] sm:$0xff] }
 0x2b5   :  { %v12050_v4 = vld [vmem:[#allocation5 + $0xdb0] sm:$0xff]  ;;  %7041 = vmatmul.mubr.bf16.gmra.mxu1 %v13464_v20  ;;  %7093 = vmatprep.subr.bf16.mxu0 %v8932_v63  ;;  %v8916_v26 = vcombine.high %v12043_v14, %v12048_v15  ;;  %v6366_v17 = vpop.f32.mrf.mxu1  ;;  %v8915_v0 = vcombine.low %v12043_v14, %v12048_v15  ;;  %v6256_v36 = vadd.f32 %v6255_v57, %v6143_v2 }
 0x2b6   :  { %v12052_v16 = vld [vmem:[#allocation5 + $0xdf0] sm:$0xff]  ;;  %v6252_v27 = vadd.f32 %v6251_v60, %v6139_v7  ;;  %7205 = vmatpush2.bf16.msra.mxu1 %v9203_v12  ;;  %7050 = vmatprep.mubr.bf16.mxu1 %v13465_v58  ;;  %8172 = vst [vmem:[#allocation8 + $0x138] sm:$0xff] %v9662_v41  ;;  %v6367_v48 = vadd.f32 %v6366_v17, %v6254_v62  ;;  %v6257_v23 = vpop.f32.mrf.mxu0  ;;  %v13466_v12 = vld [vmem:[#allocation33_spill] sm:$0xff] }
 0x2b7   :  { %v12056_v40 = vld [vmem:[#allocation2 + $0xf8] ss:$24 sps:$4 sm:$0xff]   ;;  %v9172_v54 = vcombine.high %v12050_v4, %v12052_v16  ;;  %7206 = vmatprep.subr.bf16.mxu1 %v9188_v44  ;;  %v6368_v29 = vpop.f32.mrf.mxu1  ;;  %v9171_v10 = vcombine.low %v12050_v4, %v12052_v16  ;;  %v6149_v1 = vadd.f32 %v13466_v12, %v11806_v34  ;;  %v6258_v14 = vadd.f32 %v6257_v23, %v6145_v25  ;;  %v12100_v16 = vld [vmem:[#allocation2 + $0x128] ss:$24 sps:$4 sm:$0xff]   ;;  %v12113_v41 = vld [vmem:[#allocation2 + $0x15c] ss:$24 sps:$4 sm:$0xff]  }
 0x2b8   :  { %6928 = vmatmul.mubr.bf16.gmra.mxu0 %v12056_v40  ;;  %v12072_v45 = vld [vmem:[#allocation5 + $0x530] sm:$0xff]  ;;  %v6365_v8 = vadd.f32 %v6364_v18, %v6252_v27  ;;  %v6261_v4 = vpop.f32.mrf.mxu0  ;;  %v6369_v21 = vadd.f32 %v6368_v29, %v6256_v36 }
 0x2b9   :  { %6937 = vmatprep.mubr.bf16.mxu0 %v12069_v43  ;;  %v12074_v51 = vld [vmem:[#allocation5 + $0x570] sm:$0xff]  ;;  %7094 = vmatpush2.bf16.msra.mxu0 %v8931_v3  ;;  %v6370_v5 = vpop.f32.mrf.mxu1  ;;  %v6262_v3 = vadd.f32 %v6261_v4, %v6149_v1  ;;  %v13470_v4 = vld [vmem:[#allocation32_spill] sm:$0xff] }
 0x2ba   :  { %v12079_v19 = vld [vmem:[#allocation5 + $0xd30] sm:$0xff]  ;;  %7207 = vmatpush2.bf16.msra.mxu1 %v9187_v33  ;;  %7095 = vmatprep.subr.bf16.mxu0 %v8916_v26  ;;  %v8900_v6 = vcombine.high %v12072_v45, %v12074_v51  ;;  %v9666_v63 = vpack.c.bf16 %v6367_v48, %v6365_v8  ;;  %v8899_v50 = vcombine.low %v12072_v45, %v12074_v51  ;;  %v6263_v27 = vpop.f32.mrf.mxu0  ;;  %v13469_v51 = vld [vmem:[#allocation41_spill] sm:$0xff] }
 0x2bb   :  { %v535_v32 = vld [vmem:[#allocation5 + $0xd70] sm:$0xff]  ;;  %7208 = vmatprep.subr.bf16.mxu1 %v9172_v54  ;;  %v6371_v60 = vadd.f32 %v6370_v5, %v6258_v14  ;;  %v6374_v13 = vpop.f32.mrf.mxu1  ;;  %v6153_v33 = vadd.f32 %v11771_v9, %v11806_v34  ;;  %v12140_v14 = vld [vmem:[#allocation5 + $0x3f8] sm:$0xff]  ;;  %v6161_v5 = vadd.f32 %v11812_v61, %v11824_v24 }
 0x2bc   :  { %v12087_v53 = vld [vmem:[#allocation5 + $0x4b0] sm:$0xff]  ;;  %v9156_v7 = vcombine.high %v12079_v19, %v535_v32  ;;  %8176 = vst [vmem:[#allocation8 + $0x158] sm:$0xff] %v9666_v63  ;;  %v9155_v18 = vcombine.low %v12079_v19, %v535_v32  ;;  %v6265_v45 = vpop.f32.mrf.mxu0  ;;  %v6375_v19 = vadd.f32 %v6374_v13, %v6262_v3  ;;  %v12138_v63 = vld [vmem:[#allocation5 + $0x3b8] sm:$0xff]  ;;  %v6163_v3 = vadd.f32 %v11829_v22, %v11806_v34 }
 0x2bd   :  { %v12092_v28 = vld [vmem:[#allocation5 + $0x4f0] sm:$0xff]  ;;  %7051 = vmatmul.mubr.bf16.gmra.mxu1 %v13468_v47  ;;  %7096 = vmatpush2.bf16.msra.mxu0 %v8915_v0  ;;  %v9670_v26 = vpack.c.bf16 %v6371_v60, %v6369_v21  ;;  %v6376_v2 = vpop.f32.mrf.mxu1  ;;  %v6155_v0 = vadd.f32 %v11780_v37, %v11824_v24  ;;  %v6266_v25 = vadd.f32 %v6265_v45, %v6153_v33 }
 0x2be   :  { %v12094_v46 = vld [vmem:[#allocation5 + $0xcb0] sm:$0xff]  ;;  %7209 = vmatpush2.bf16.msra.mxu1 %v9171_v10  ;;  %7097 = vmatprep.subr.bf16.mxu0 %v8900_v6  ;;  %v8884_v20 = vcombine.high %v12087_v53, %v12092_v28  ;;  %v8883_v57 = vcombine.low %v12087_v53, %v12092_v28  ;;  %v6267_v48 = vpop.f32.mrf.mxu0  ;;  %v6159_v37 = vadd.f32 %v11800_v11, %v11806_v34 }
 0x2bf   :  { %v12096_v38 = vld [vmem:[#allocation5 + $0xcf0] sm:$0xff]  ;;  %7210 = vmatprep.subr.bf16.mxu1 %v9156_v7  ;;  %7060 = vmatprep.mubr.bf16.mxu1 %v13469_v51  ;;  %8180 = vst [vmem:[#allocation8 + $0x178] sm:$0xff] %v9670_v26  ;;  %v6378_v8 = vpop.f32.mrf.mxu1  ;;  %v6268_v6 = vadd.f32 %v6267_v48, %v6155_v0  ;;  %v8854_v60 = vcombine.high %v12138_v63, %v12140_v14  ;;  %v13471_v26 = vld [vmem:[#allocation36_spill] sm:$0xff] }
 0x2c0   :  { %v13467_v44 = vld [vmem:[#allocation35_spill] sm:$0xff]  ;;  %6938 = vmatmul.mubr.bf16.gmra.mxu0 %v12100_v16  ;;  %v9140_v35 = vcombine.high %v12094_v46, %v12096_v38  ;;  %v9139_v36 = vcombine.low %v12094_v46, %v12096_v38  ;;  %v6271_v7 = vpop.f32.mrf.mxu0  ;;  %v6379_v46 = vadd.f32 %v6378_v8, %v6266_v25  ;;  %v6165_v22 = vadd.f32 %v11837_v30, %v11824_v24  ;;  %v12169_v48 = vld [vmem:[#allocation2] ss:$24 sps:$4 sm:$0xff]  }
 0x2c1   :  { %v6151_v15 = vadd.f32 %v13467_v44, %v11824_v24  ;;  %6947 = vmatprep.mubr.bf16.mxu0 %v12113_v41  ;;  %v12116_v62 = vld [vmem:[#allocation5 + $0x430] sm:$0xff]  ;;  %7098 = vmatpush2.bf16.msra.mxu0 %v8899_v50  ;;  %v6380_v53 = vpop.f32.mrf.mxu1  ;;  %v6272_v44 = vadd.f32 %v6271_v7, %v6159_v37 }
 0x2c2   :  { %v12118_v17 = vld [vmem:[#allocation5 + $0x470] sm:$0xff]  ;;  %7211 = vmatpush2.bf16.msra.mxu1 %v9155_v18  ;;  %7099 = vmatprep.subr.bf16.mxu0 %v8884_v20  ;;  %v6381_v38 = vadd.f32 %v6380_v53, %v6268_v6  ;;  %v6273_v50 = vpop.f32.mrf.mxu0  ;;  %v12157_v18 = vld [vmem:[#allocation2 + $0x4] ss:$24 sps:$4 sm:$0xff]   ;;  %v13472_v6 = vld [vmem:[#allocation38_spill] sm:$0xff] }
 0x2c3   :  { %v6264_v54 = vadd.f32 %v6263_v27, %v6151_v15  ;;  %v12123_v58 = vld [vmem:[#allocation5 + $0xc30] sm:$0xff]  ;;  %v8868_v29 = vcombine.high %v12116_v62, %v12118_v17  ;;  %7212 = vmatprep.subr.bf16.mxu1 %v9140_v35  ;;  %v8867_v11 = vcombine.low %v12116_v62, %v12118_v17  ;;  %v6384_v15 = vpop.f32.mrf.mxu1  ;;  %v6274_v47 = vadd.f32 %v6273_v50, %v6161_v5  ;;  %v216_v62 = vld [vmem:[#allocation5 + $0x378] sm:$0xff] }
 0x2c4   :  { %v503_v9 = vld [vmem:[#allocation5 + $0xc70] sm:$0xff]  ;;  %v9678_v13 = vpack.c.bf16 %v6381_v38, %v6379_v46  ;;  %v6275_v33 = vpop.f32.mrf.mxu0  ;;  %v6385_v34 = vadd.f32 %v6384_v15, %v6272_v44  ;;  %v13473_v15 = vld [vmem:[#allocation44_spill] sm:$0xff] }
 0x2c5   :  { %v6377_v32 = vadd.f32 %v6376_v2, %v6264_v54  ;;  %v12131_v23 = vld [vmem:[#allocation5 + $0x13b0] sm:$0xff]  ;;  %v9124_v12 = vcombine.high %v12123_v58, %v503_v9  ;;  %7061 = vmatmul.mubr.bf16.gmra.mxu1 %v13470_v4  ;;  %7100 = vmatpush2.bf16.msra.mxu0 %v8883_v57  ;;  %v9123_v61 = vcombine.low %v12123_v58, %v503_v9  ;;  %v6386_v27 = vpop.f32.mrf.mxu1  ;;  %v208_v2 = vld [vmem:[#allocation5 + $0x338] sm:$0xff] }
 0x2c6   :  { %v12136_v1 = vld [vmem:[#allocation5 + $0x13f0] sm:$0xff]  ;;  %7213 = vmatpush2.bf16.msra.mxu1 %v9139_v36  ;;  %7101 = vmatprep.subr.bf16.mxu0 %v8868_v29  ;;  %8188 = vst [vmem:[#allocation8 + $0x1b8] sm:$0xff] %v9678_v13  ;;  %v6387_v17 = vadd.f32 %v6386_v27, %v6274_v47  ;;  %v6276_v45 = vadd.f32 %v6275_v33, %v6163_v3  ;;  %v6277_v57 = vpop.f32.mrf.mxu0  ;;  %v192_v36 = vld [vmem:[#allocation5 + $0x2b8] sm:$0xff] }
 0x2c7   :  { %v9674_v10 = vpack.c.bf16 %v6377_v32, %v6375_v19  ;;  %v12144_v28 = vld [vmem:[#allocation2 + $0x158] ss:$24 sps:$4 sm:$0xff]   ;;  %v9364_v21 = vcombine.high %v12131_v23, %v12136_v1  ;;  %7214 = vmatprep.subr.bf16.mxu1 %v9124_v12  ;;  %7216 = vmatprep.mubr.bf16.mxu1 %v13471_v26  ;;  %v9363_v54 = vcombine.low %v12131_v23, %v12136_v1  ;;  %v6388_v51 = vpop.f32.mrf.mxu1  ;;  %v12179_v7 = vld [vmem:[#allocation2 + $0x34] ss:$24 sps:$4 sm:$0xff]  }
 0x2c8   :  { %6948 = vmatmul.mubr.bf16.gmra.mxu0 %v12144_v28  ;;  %v719_v20 = vld [vmem:[#allocation5 + $0x1330] sm:$0xff]  ;;  %v8853_v58 = vcombine.low %v12138_v63, %v12140_v14  ;;  %v9682_v0 = vpack.c.bf16 %v6387_v17, %v6385_v34  ;;  %v6278_v19 = vadd.f32 %v6277_v57, %v6165_v22  ;;  %v8838_v25 = vcombine.high %v208_v2, %v216_v62  ;;  %v12167_v30 = vpop.f32.mrf.mxu0  ;;  %v200_v29 = vld [vmem:[#allocation5 + $0x2f8] sm:$0xff] }
 0x2c9   :  { %8184 = vst [vmem:[#allocation8 + $0x198] sm:$0xff] %v9674_v10  ;;  %7103 = vmatprep.mubr.bf16.mxu0 %v12157_v18  ;;  %v727_v35 = vld [vmem:[#allocation5 + $0x1370] sm:$0xff]  ;;  %7102 = vmatpush2.bf16.msra.mxu0 %v8867_v11  ;;  %v6390_v32 = vpop.f32.mrf.mxu1  ;;  %v6389_v23 = vadd.f32 %v6388_v51, %v6276_v45  ;;  %v8837_v1 = vcombine.low %v208_v2, %v216_v62  ;;  %v176_v4 = vld [vmem:[#allocation5 + $0x238] sm:$0xff] }
 0x2ca   :  { %7215 = vmatpush2.bf16.msra.mxu1 %v9123_v61  ;;  %7297 = vmatprep.subr.bf16.mxu0 %v9364_v21  ;;  %v9348_v9 = vcombine.high %v719_v20, %v727_v35  ;;  %v703_v8 = vld [vmem:[#allocation5 + $0x12b0] sm:$0xff]  ;;  %8192 = vst [vmem:[#allocation8 + $0x1d8] sm:$0xff] %v9682_v0  ;;  %v6391_v37 = vadd.f32 %v6390_v32, %v6278_v19  ;;  %v12175_v12 = vpop.f32.mrf.mxu0  ;;  %v184_v50 = vld [vmem:[#allocation5 + $0x278] sm:$0xff] }
 0x2cb   :  { %7410 = vmatprep.subr.bf16.mxu1 %v8854_v60  ;;  %v711_v24 = vld [vmem:[#allocation5 + $0x12f0] sm:$0xff]  ;;  %v12172_v10 = vpop.f32.mrf.mxu1  ;;  %v9347_v53 = vcombine.low %v719_v20, %v727_v35  ;;  %v8822_v11 = vcombine.high %v192_v36, %v200_v29  ;;  %v8821_v3 = vcombine.low %v192_v36, %v200_v29  ;;  %v8806_v27 = vcombine.high %v176_v4, %v184_v50  ;;  %v168_v2 = vld [vmem:[#allocation5 + $0x1f8] sm:$0xff] }
 0x2cc   :  { %v9332_v63 = vcombine.high %v703_v8, %v711_v24  ;;  %v9686_v14 = vpack.c.bf16 %v6391_v37, %v6389_v23  ;;  %v687_v46 = vld [vmem:[#allocation5 + $0x1230] sm:$0xff]  ;;  %v12182_v44 = vpop.f32.mrf.mxu0  ;;  %v9331_v21 = vcombine.low %v703_v8, %v711_v24  ;;  %v8805_v17 = vcombine.low %v176_v4, %v184_v50  ;;  %v12203_v57 = vld [vmem:[#allocation2 + $0x64] ss:$24 sps:$4 sm:$0xff]  }
 0x2cd   :  { %7217 = vmatmul.mubr.bf16.vlgmr.msra.gmra.mxu1 %v13472_v6  ;;  %v12177_v5 = vpop.f32.mrf.mxu1  ;;  %v695_v38 = vld [vmem:[#allocation5 + $0x1270] sm:$0xff]  ;;  %v152_v32 = vld [vmem:[#allocation5 + $0x178] sm:$0xff] }
 0x2ce   :  { %7411 = vmatpush1.bf16.msra.mxu1 %v8853_v58  ;;  %7226 = vmatprep.mubr.bf16.mxu1 %v13473_v15  ;;  %8196 = vst [vmem:[#allocation8 + $0x1f8] sm:$0xff] %v9686_v14  ;;  %v12187_v60 = vpop.f32.mrf.mxu0  ;;  %v9316_v13 = vcombine.high %v687_v46, %v695_v38  ;;  %v671_v20 = vld [vmem:[#allocation5 + $0x11b0] sm:$0xff]  ;;  %v9315_v22 = vcombine.low %v687_v46, %v695_v38  ;;  %v136_v14 = vld [vmem:[#allocation5 + $0xf8] sm:$0xff] }
 0x2cf   :  { %7412 = vmatprep.subr.bf16.mxu1 %v8838_v25  ;;  %v12185_v61 = vpop.f32.mrf.mxu1  ;;  %v679_v35 = vld [vmem:[#allocation5 + $0x11f0] sm:$0xff] }
 0x2d0   :  { %7104 = vmatmul.mubr.bf16.vlgmr.msra.gmra.mxu0 %v12169_v48  ;;  %v12191_v33 = vpop.f32.mrf.mxu0  ;;  %v12193_v26 = vld [vmem:[#allocation2 + $0x30] ss:$24 sps:$4 sm:$0xff]   ;;  %v9300_v45 = vcombine.high %v671_v20, %v679_v35  ;;  %v9299_v8 = vcombine.low %v671_v20, %v679_v35  ;;  %v120_v35 = vld [vmem:[#allocation5 + $0x78] sm:$0xff] }
 0x2d1   :  { %7298 = vmatpush1.bf16.msra.mxu0 %v9363_v54  ;;  %7113 = vmatprep.mubr.bf16.mxu0 %v12179_v7  ;;  %v12189_v47 = vpop.f32.mrf.mxu1  ;;  %v160_v54 = vld [vmem:[#allocation5 + $0x1b8] sm:$0xff]  ;;  %v663_v0 = vld [vmem:[#allocation5 + $0x1170] sm:$0xff] }
 0x2d2   :  { %7299 = vmatprep.subr.bf16.mxu0 %v9348_v9  ;;  %7413 = vmatpush1.bf16.msra.mxu1 %v8837_v1  ;;  %v12199_v34 = vpop.f32.mrf.mxu0  ;;  %v8790_v58 = vcombine.high %v160_v54, %v168_v2  ;;  %v655_v9 = vld [vmem:[#allocation5 + $0x1130] sm:$0xff]  ;;  %v8789_v36 = vcombine.low %v160_v54, %v168_v2 }
 0x2d3   :  { %7414 = vmatprep.subr.bf16.mxu1 %v8822_v11  ;;  %v12196_v62 = vpop.f32.mrf.mxu1  ;;  %v9284_v29 = vcombine.high %v655_v9, %v663_v0  ;;  %v639_v6 = vld [vmem:[#allocation5 + $0x10b0] sm:$0xff]  ;;  %v9283_v46 = vcombine.low %v655_v9, %v663_v0 }
 0x2d4   :  { %v12206_v19 = vpop.f32.mrf.mxu0  ;;  %v863_v0 = vld [vmem:[#allocation5 + $0x17b0] sm:$0xff] }
 0x2d5   :  { %7300 = vmatpush1.bf16.msra.mxu0 %v9347_v53  ;;  %7227 = vmatmul.mubr.bf16.gmra.mxu1 %v11881_v42  ;;  %v12201_v51 = vpop.f32.mrf.mxu1  ;;  %v144_v42 = vld [vmem:[#allocation5 + $0x138] sm:$0xff]  ;;  %v647_v53 = vld [vmem:[#allocation5 + $0x10f0] sm:$0xff] }
 0x2d6   :  { %7301 = vmatprep.subr.bf16.mxu0 %v9332_v63  ;;  %7415 = vmatpush1.bf16.msra.mxu1 %v8821_v3  ;;  %v12211_v24 = vpop.f32.mrf.mxu0  ;;  %v8774_v37 = vcombine.high %v144_v42, %v152_v32  ;;  %v128_v63 = vld [vmem:[#allocation5 + $0xb8] sm:$0xff]  ;;  %v8773_v15 = vcombine.low %v144_v42, %v152_v32  ;;  %v9268_v4 = vcombine.high %v639_v6, %v647_v53  ;;  %v871_v42 = vld [vmem:[#allocation5 + $0x17f0] sm:$0xff] }
 0x2d7   :  { %7416 = vmatprep.subr.bf16.mxu1 %v8806_v27  ;;  %7236 = vmatprep.mubr.bf16.mxu1 %v11893_v56  ;;  %v12209_v25 = vpop.f32.mrf.mxu1  ;;  %v12217_v56 = vld [vmem:[#allocation2 + $0x60] ss:$24 sps:$4 sm:$0xff]   ;;  %v8758_v3 = vcombine.high %v128_v63, %v136_v14  ;;  %v631_v27 = vld [vmem:[#allocation5 + $0x1070] sm:$0xff]  ;;  %v9267_v2 = vcombine.low %v639_v6, %v647_v53 }
 0x2d8   :  { %7114 = vmatmul.mubr.bf16.gmra.mxu0 %v12193_v26  ;;  %v12215_v1 = vpop.f32.mrf.mxu0 }
 0x2d9   :  { %7302 = vmatpush1.bf16.msra.mxu0 %v9331_v21  ;;  %7123 = vmatprep.mubr.bf16.mxu0 %v12203_v57  ;;  %v12213_v23 = vpop.f32.mrf.mxu1  ;;  %v12227_v21 = vld [vmem:[#allocation2 + $0x94] ss:$24 sps:$4 sm:$0xff]  }
 0x2da   :  { %7303 = vmatprep.subr.bf16.mxu0 %v9316_v13  ;;  %7417 = vmatpush1.bf16.msra.mxu1 %v8805_v17  ;;  %v12223_v38 = vpop.f32.mrf.mxu0  ;;  %v623_v13 = vld [vmem:[#allocation5 + $0x1030] sm:$0xff]  ;;  %v8757_v17 = vcombine.low %v128_v63, %v136_v14  ;;  %v9492_v63 = vcombine.high %v863_v0, %v871_v42 }
 0x2db   :  { %7418 = vmatprep.subr.bf16.mxu1 %v8790_v58  ;;  %v12220_v11 = vpop.f32.mrf.mxu1 }
 0x2dc   :  { %v12230_v20 = vpop.f32.mrf.mxu0 }
 0x2dd   :  { %7304 = vmatpush1.bf16.msra.mxu0 %v9315_v22  ;;  %7237 = vmatmul.mubr.bf16.gmra.mxu1 %v11924_v59  ;;  %v12225_v50 = vpop.f32.mrf.mxu1  ;;  %v112_v59 = vld [vmem:[#allocation5 + $0x38] sm:$0xff] }
 0x2de   :  { %7305 = vmatprep.subr.bf16.mxu0 %v9300_v45  ;;  %7419 = vmatpush1.bf16.msra.mxu1 %v8789_v36  ;;  %v12235_v22 = vpop.f32.mrf.mxu0  ;;  %v9252_v45 = vcombine.high %v623_v13, %v631_v27  ;;  %v8742_v9 = vcombine.high %v112_v59, %v120_v35  ;;  %v360_v36 = vld [vmem:[#allocation5 + $0x7f8] sm:$0xff]  ;;  %v8741_v53 = vcombine.low %v112_v59, %v120_v35 }
 0x2df   :  { %7420 = vmatprep.subr.bf16.mxu1 %v8774_v37  ;;  %7246 = vmatprep.mubr.bf16.mxu1 %v11937_v39  ;;  %v12233_v54 = vpop.f32.mrf.mxu1  ;;  %v12241_v39 = vld [vmem:[#allocation2 + $0x90] ss:$24 sps:$4 sm:$0xff]   ;;  %v9251_v37 = vcombine.low %v623_v13, %v631_v27  ;;  %v344_v13 = vld [vmem:[#allocation5 + $0x778] sm:$0xff]  ;;  %v9491_v59 = vcombine.low %v863_v0, %v871_v42 }
 0x2e0   :  { %7124 = vmatmul.mubr.bf16.gmra.mxu0 %v12217_v56  ;;  %v12239_v32 = vpop.f32.mrf.mxu0  ;;  %13474 = vst [vmem:[#allocation34_spill] sm:$0xff] %v12241_v39  ;;  %v328_v0 = vld [vmem:[#allocation5 + $0x6f8] sm:$0xff] }
 0x2e1   :  { %7306 = vmatpush1.bf16.msra.mxu0 %v9299_v8  ;;  %7133 = vmatprep.mubr.bf16.mxu0 %v12227_v21  ;;  %v12237_v58 = vpop.f32.mrf.mxu1  ;;  %v352_v8 = vld [vmem:[#allocation5 + $0x7b8] sm:$0xff] }
 0x2e2   :  { %7307 = vmatprep.subr.bf16.mxu0 %v9284_v29  ;;  %7421 = vmatpush1.bf16.msra.mxu1 %v8773_v15  ;;  %v12247_v6 = vpop.f32.mrf.mxu0  ;;  %v8982_v15 = vcombine.high %v352_v8, %v360_v36 }
 0x2e3   :  { %7422 = vmatprep.subr.bf16.mxu1 %v8758_v3  ;;  %v12244_v29 = vpop.f32.mrf.mxu1  ;;  %v855_v3 = vld [vmem:[#allocation5 + $0x1770] sm:$0xff] }
 0x2e5   :  { %7308 = vmatpush1.bf16.msra.mxu0 %v9283_v46  ;;  %7247 = vmatmul.mubr.bf16.gmra.mxu1 %v11968_v49  ;;  %v12249_v14 = vpop.f32.mrf.mxu1  ;;  %v12251_v46 = vld [vmem:[#allocation2 + $0xc4] ss:$24 sps:$4 sm:$0xff]  }
 0x2e6   :  { %7309 = vmatprep.subr.bf16.mxu0 %v9268_v4  ;;  %7423 = vmatpush1.bf16.msra.mxu1 %v8757_v17  ;;  %13475 = vst [vmem:[#allocation40_spill] sm:$0xff] %v12249_v14  ;;  %13476 = vst [vmem:[#allocation42_spill] sm:$0xff] %v12251_v46  ;;  %v847_v4 = vld [vmem:[#allocation5 + $0x1730] sm:$0xff]  ;;  %v336_v49 = vld [vmem:[#allocation5 + $0x738] sm:$0xff] }
 0x2e7   :  { %7424 = vmatprep.subr.bf16.mxu1 %v8742_v9  ;;  %7256 = vmatprep.mubr.bf16.mxu1 %v11981_v55  ;;  %v12257_v27 = vpop.f32.mrf.mxu1  ;;  %v9476_v17 = vcombine.high %v847_v4, %v855_v3  ;;  %v8966_v9 = vcombine.high %v336_v49, %v344_v13  ;;  %v12265_v55 = vld [vmem:[#allocation2 + $0xc0] ss:$24 sps:$4 sm:$0xff]  }
 0x2e8   :  { %7134 = vmatmul.mubr.bf16.gmra.mxu0 %v12241_v39  ;;  %v12254_v39 = vpop.f32.mrf.mxu0  ;;  %13478 = vst [vmem:[#allocation49_spill] sm:$0xff] %v12257_v27  ;;  %13481 = vst [vmem:[#allocation52_spill] sm:$0xff] %v12265_v55  ;;  %v815_v27 = vld [vmem:[#allocation5 + $0x1630] sm:$0xff] }
 0x2e9   :  { %7310 = vmatpush1.bf16.msra.mxu0 %v9267_v2  ;;  %7143 = vmatprep.mubr.bf16.mxu0 %v12251_v46  ;;  %13477 = vst [vmem:[#allocation39_spill] sm:$0xff] %v12254_v39  ;;  %v8981_v2 = vcombine.low %v352_v8, %v360_v36  ;;  %v831_v46 = vld [vmem:[#allocation5 + $0x16b0] sm:$0xff]  ;;  %v9475_v8 = vcombine.low %v847_v4, %v855_v3  ;;  %v312_v4 = vld [vmem:[#allocation5 + $0x678] sm:$0xff] }
 0x2ea   :  { %7311 = vmatprep.subr.bf16.mxu0 %v9252_v45  ;;  %7425 = vmatpush1.bf16.msra.mxu1 %v8741_v53  ;;  %v12259_v35 = vpop.f32.mrf.mxu0  ;;  %v12261_v45 = vpop.f32.mrf.mxu1  ;;  %v839_v39 = vld [vmem:[#allocation5 + $0x16f0] sm:$0xff]  ;;  %v8965_v53 = vcombine.low %v336_v49, %v344_v13 }
 0x2eb   :  { %13479 = vst [vmem:[#allocation46_spill] sm:$0xff] %v12261_v45  ;;  %7426 = vmatprep.subr.bf16.mxu1 %v8982_v15  ;;  %v12275_v45 = vld [vmem:[#allocation2 + $0xf4] ss:$24 sps:$4 sm:$0xff]   ;;  %v9459_v49 = vcombine.low %v831_v46, %v839_v39 }
 0x2ec   :  { %v12263_v14 = vpop.f32.mrf.mxu0  ;;  %v12268_v42 = vpop.f32.mrf.mxu1  ;;  %13484 = vst [vmem:[#allocation48_spill] sm:$0xff] %v12275_v45 }
 0x2ed   :  { %7312 = vmatpush1.bf16.msra.mxu0 %v9251_v37  ;;  %13480 = vst [vmem:[#allocation47_spill] sm:$0xff] %v12263_v14  ;;  %v320_v37 = vld [vmem:[#allocation5 + $0x6b8] sm:$0xff]  ;;  %13482 = vst [vmem:[#allocation45_spill] sm:$0xff] %v12268_v42  ;;  %7257 = vmatmul.mubr.bf16.gmra.mxu1 %v12012_v31  ;;  %v823_v42 = vld [vmem:[#allocation5 + $0x1670] sm:$0xff] }
 0x2ee   :  { %7313 = vmatprep.subr.bf16.mxu0 %v9492_v63  ;;  %7427 = vmatpush2.bf16.msra.mxu1 %v8981_v2  ;;  %v12271_v36 = vpop.f32.mrf.mxu0  ;;  %v9460_v63 = vcombine.high %v831_v46, %v839_v39  ;;  %v12273_v15 = vpop.f32.mrf.mxu1  ;;  %v304_v31 = vld [vmem:[#allocation5 + $0x638] sm:$0xff]  ;;  %v9444_v2 = vcombine.high %v815_v27, %v823_v42 }
 0x2ef   :  { %13483 = vst [vmem:[#allocation43_spill] sm:$0xff] %v12273_v15  ;;  %7428 = vmatprep.subr.bf16.mxu1 %v8966_v9  ;;  %7266 = vmatprep.mubr.bf16.mxu1 %v12025_v52  ;;  %v8934_v9 = vcombine.high %v304_v31, %v312_v4  ;;  %v12289_v52 = vld [vmem:[#allocation2 + $0xf0] ss:$24 sps:$4 sm:$0xff]   ;;  %v296_v39 = vld [vmem:[#allocation5 + $0x5f8] sm:$0xff] }
 0x2f0   :  { %7144 = vmatmul.mubr.bf16.gmra.mxu0 %v12265_v55  ;;  %v8950_v55 = vcombine.high %v320_v37, %v328_v0  ;;  %v12278_v14 = vpop.f32.mrf.mxu0  ;;  %v12281_v3 = vpop.f32.mrf.mxu1  ;;  %13489 = vst [vmem:[#allocation15_spill] sm:$0xff] %v12289_v52 }
 0x2f1   :  { %7314 = vmatpush2.bf16.msra.mxu0 %v9491_v59  ;;  %7153 = vmatprep.mubr.bf16.mxu0 %v12275_v45  ;;  %13485 = vst [vmem:[#allocation51_spill] sm:$0xff] %v12278_v14  ;;  %13486 = vst [vmem:[#allocation50_spill] sm:$0xff] %v12281_v3  ;;  %v8949_v59 = vcombine.low %v320_v37, %v328_v0  ;;  %v799_v45 = vld [vmem:[#allocation5 + $0x15b0] sm:$0xff]  ;;  %v9443_v37 = vcombine.low %v815_v27, %v823_v42  ;;  %v280_v27 = vld [vmem:[#allocation5 + $0x578] sm:$0xff] }
 0x2f2   :  { %7315 = vmatprep.subr.bf16.mxu0 %v9476_v17  ;;  %7429 = vmatpush2.bf16.msra.mxu1 %v8965_v53  ;;  %v12283_v13 = vpop.f32.mrf.mxu0  ;;  %v12285_v17 = vpop.f32.mrf.mxu1  ;;  %v807_v14 = vld [vmem:[#allocation5 + $0x15f0] sm:$0xff] }
 0x2f3   :  { %13487 = vst [vmem:[#allocation53_spill] sm:$0xff] %v12285_v17  ;;  %7430 = vmatprep.subr.bf16.mxu1 %v8950_v55  ;;  %v8933_v55 = vcombine.low %v304_v31, %v312_v4  ;;  %v9428_v53 = vcombine.high %v799_v45, %v807_v14  ;;  %v12299_v17 = vld [vmem:[#allocation2 + $0x124] ss:$24 sps:$4 sm:$0xff]   ;;  %v783_v3 = vld [vmem:[#allocation5 + $0x1530] sm:$0xff]  ;;  %v9427_v31 = vcombine.low %v799_v45, %v807_v14 }
 0x2f4   :  { %v12287_v15 = vpop.f32.mrf.mxu0  ;;  %v12292_v46 = vpop.f32.mrf.mxu1  ;;  %13492 = vst [vmem:[#allocation55_spill] sm:$0xff] %v12299_v17  ;;  %v264_v14 = vld [vmem:[#allocation5 + $0x4f8] sm:$0xff] }
 0x2f5   :  { %7316 = vmatpush2.bf16.msra.mxu0 %v9475_v8  ;;  %13488 = vst [vmem:[#allocation56_spill] sm:$0xff] %v12287_v15  ;;  %v288_v8 = vld [vmem:[#allocation5 + $0x5b8] sm:$0xff]  ;;  %13490 = vst [vmem:[#allocation54_spill] sm:$0xff] %v12292_v46  ;;  %7267 = vmatmul.mubr.bf16.gmra.mxu1 %v12056_v40  ;;  %v791_v46 = vld [vmem:[#allocation5 + $0x1570] sm:$0xff] }
 0x2f6   :  { %7317 = vmatprep.subr.bf16.mxu0 %v9460_v63  ;;  %7431 = vmatpush2.bf16.msra.mxu1 %v8949_v59  ;;  %v12295_v0 = vpop.f32.mrf.mxu0  ;;  %v12297_v63 = vpop.f32.mrf.mxu1  ;;  %v272_v40 = vld [vmem:[#allocation5 + $0x538] sm:$0xff]  ;;  %v9412_v59 = vcombine.high %v783_v3, %v791_v46 }
 0x2f7   :  { %13491 = vst [vmem:[#allocation17_spill] sm:$0xff] %v12297_v63  ;;  %7432 = vmatprep.subr.bf16.mxu1 %v8934_v9  ;;  %7276 = vmatprep.mubr.bf16.mxu1 %v12069_v43  ;;  %v8902_v9 = vcombine.high %v272_v40, %v280_v27  ;;  %v12313_v43 = vld [vmem:[#allocation2 + $0x120] ss:$24 sps:$4 sm:$0xff]  }
 0x2f8   :  { %7154 = vmatmul.mubr.bf16.gmra.mxu0 %v12289_v52  ;;  %v8918_v52 = vcombine.high %v288_v8, %v296_v39  ;;  %v12302_v15 = vpop.f32.mrf.mxu0  ;;  %v12305_v42 = vpop.f32.mrf.mxu1  ;;  %13498 = vst [vmem:[#allocation21_spill] sm:$0xff] %v12313_v43 }
 0x2f9   :  { %7318 = vmatpush2.bf16.msra.mxu0 %v9459_v49  ;;  %7163 = vmatprep.mubr.bf16.mxu0 %v12299_v17  ;;  %13493 = vst [vmem:[#allocation57_spill] sm:$0xff] %v12302_v15  ;;  %13494 = vst [vmem:[#allocation16_spill] sm:$0xff] %v12305_v42  ;;  %v8917_v49 = vcombine.low %v288_v8, %v296_v39  ;;  %v767_v17 = vld [vmem:[#allocation5 + $0x14b0] sm:$0xff]  ;;  %v9411_v8 = vcombine.low %v783_v3, %v791_v46  ;;  %v248_v3 = vld [vmem:[#allocation5 + $0x478] sm:$0xff] }
 0x2fa   :  { %7319 = vmatprep.subr.bf16.mxu0 %v9444_v2  ;;  %7433 = vmatpush2.bf16.msra.mxu1 %v8933_v55  ;;  %v12307_v4 = vpop.f32.mrf.mxu0  ;;  %v12309_v2 = vpop.f32.mrf.mxu1  ;;  %v775_v15 = vld [vmem:[#allocation5 + $0x14f0] sm:$0xff]  ;;  %v12329_v46 = vld [vmem:[#allocation7 + $0x8] sm:$0xff] }
 0x2fb   :  { %13495 = vst [vmem:[#allocation23_spill] sm:$0xff] %v12307_v4  ;;  %13496 = vst [vmem:[#allocation19_spill] sm:$0xff] %v12309_v2  ;;  %7434 = vmatprep.subr.bf16.mxu1 %v8918_v52  ;;  %v8901_v52 = vcombine.low %v272_v40, %v280_v27  ;;  %v9396_v55 = vcombine.high %v767_v17, %v775_v15  ;;  %v12323_v2 = vld [vmem:[#allocation2 + $0x154] ss:$24 sps:$4 sm:$0xff]   ;;  %v9395_v27 = vcombine.low %v767_v17, %v775_v15  ;;  %v12344_v15 = vld [vmem:[#allocation2 + $0x150] ss:$24 sps:$4 sm:$0xff]  }
 0x2fc   :  { %v12311_v63 = vpop.f32.mrf.mxu0  ;;  %v12316_v45 = vpop.f32.mrf.mxu1  ;;  %13502 = vst [vmem:[#allocation30_spill] sm:$0xff] %v12323_v2  ;;  %v751_v42 = vld [vmem:[#allocation5 + $0x1430] sm:$0xff]  ;;  %13504 = vst [vmem:[#allocation31_spill] sm:$0xff] %v12329_v46  ;;  %v736_v17 = vld [vmem:[#allocation5 + $0x13b8] sm:$0xff] }
 0x2fd   :  { %7320 = vmatpush2.bf16.msra.mxu0 %v9443_v37  ;;  %13497 = vst [vmem:[#allocation18_spill] sm:$0xff] %v12311_v63  ;;  %v256_v37 = vld [vmem:[#allocation5 + $0x4b8] sm:$0xff]  ;;  %13499 = vst [vmem:[#allocation20_spill] sm:$0xff] %v12316_v45  ;;  %7277 = vmatmul.mubr.bf16.gmra.mxu1 %v12100_v16  ;;  %v759_v45 = vld [vmem:[#allocation5 + $0x1470] sm:$0xff] }
 0x2fe   :  { %7321 = vmatprep.subr.bf16.mxu0 %v9428_v53  ;;  %7435 = vmatpush2.bf16.msra.mxu1 %v8917_v49  ;;  %v12319_v39 = vpop.f32.mrf.mxu0  ;;  %v12321_v53 = vpop.f32.mrf.mxu1  ;;  %v240_v16 = vld [vmem:[#allocation5 + $0x438] sm:$0xff]  ;;  %v8885_v49 = vcombine.low %v256_v37, %v264_v14  ;;  %13510 = vst [vmem:[#allocation33_spill] sm:$0xff] %v12344_v15 }
 0x2ff   :  { %13500 = vst [vmem:[#allocation25_spill] sm:$0xff] %v12319_v39  ;;  %13501 = vst [vmem:[#allocation27_spill] sm:$0xff] %v12321_v53  ;;  %7436 = vmatprep.subr.bf16.mxu1 %v8902_v9  ;;  %7286 = vmatprep.mubr.bf16.mxu1 %v12113_v41  ;;  %v488_v41 = vld [vmem:[#allocation5 + $0xbf8] sm:$0xff]  ;;  %v13507_v53 = vld [vmem:[#allocation37_spill] sm:$0xff] }
 0x300   :  { %7164 = vmatmul.mubr.bf16.gmra.mxu0 %v12313_v43  ;;  %v8886_v43 = vcombine.high %v256_v37, %v264_v14  ;;  %v12326_v63 = vpop.f32.mrf.mxu0  ;;  %v12331_v40 = vpop.f32.mrf.mxu1  ;;  %v13508_v39 = vsub.s32 0, %v13507_v53  ;;  %v744_v37 = vld [vmem:[#allocation5 + $0x13f8] sm:$0xff]  ;;  %v13511_v14 = vsub.s32 1, %v13507_v53 }
 0x301   :  { %7322 = vmatpush2.bf16.msra.mxu0 %v9427_v31  ;;  %7173 = vmatprep.mubr.bf16.mxu0 %v12323_v2  ;;  %13503 = vst [vmem:[#allocation22_spill] sm:$0xff] %v12326_v63  ;;  %13505 = vst [vmem:[#allocation24_spill] sm:$0xff] %v12331_v40  ;;  %v8870_v2 = vcombine.high %v240_v16, %v248_v3  ;;  %v480_v63 = vld [vmem:[#allocation5 + $0xbb8] sm:$0xff] }
 0x302   :  { %7323 = vmatprep.subr.bf16.mxu0 %v9412_v59  ;;  %7437 = vmatpush2.bf16.msra.mxu1 %v8901_v52  ;;  %v12333_v31 = vpop.f32.mrf.mxu0  ;;  %v9380_v59 = vcombine.high %v751_v42, %v759_v45  ;;  %v12335_v9 = vpop.f32.mrf.mxu1  ;;  %v12340_v4 = vrot.slane %v12329_v46, %v13508_v39  ;;  %v9379_v39 = vcombine.low %v751_v42, %v759_v45  ;;  %v472_v53 = vld [vmem:[#allocation5 + $0xb78] sm:$0xff] }
 0x303   :  { %13506 = vst [vmem:[#allocation26_spill] sm:$0xff] %v12335_v9  ;;  %7438 = vmatprep.subr.bf16.mxu1 %v8886_v43  ;;  %v12350_v43 = vrot.slane %v12329_v46, %v13511_v14  ;;  %v9110_v9 = vcombine.high %v480_v63, %v488_v41  ;;  %v9366_v14 = vcombine.high %v736_v17, %v744_v37  ;;  %v464_v46 = vld [vmem:[#allocation5 + $0xb38] sm:$0xff] }
 0x304   :  { %v12342_v40 = vpop.f32.mrf.mxu0  ;;  %v720_v45 = vld [vmem:[#allocation5 + $0x1338] sm:$0xff] }
 0x305   :  { %7324 = vmatpush2.bf16.msra.mxu0 %v9411_v8  ;;  %13509 = vst [vmem:[#allocation28_spill] sm:$0xff] %v12342_v40  ;;  %v12352_v8 = vpop.f32.mrf.mxu1  ;;  %7287 = vmatmul.mubr.bf16.gmra.mxu1 %v12144_v28  ;;  %v12359_v40 = vld [vmem:[#allocation2 + $0x14] ss:$24 sps:$4 sm:$0xff]   ;;  %v6428_v28 = vadd.f32 %v12167_v30, %v12340_v4 }
 0x306   :  { %7325 = vmatprep.subr.bf16.mxu0 %v9396_v55  ;;  %13512 = vst [vmem:[#allocation35_spill] sm:$0xff] %v12352_v8  ;;  %7439 = vmatpush2.bf16.msra.mxu1 %v8885_v49  ;;  %v12355_v52 = vpop.f32.mrf.mxu0  ;;  %v8869_v55 = vcombine.low %v240_v16, %v248_v3  ;;  %13514 = vst [vmem:[#allocation41_spill] sm:$0xff] %v12359_v40  ;;  %v728_v16 = vld [vmem:[#allocation5 + $0x1378] sm:$0xff]  ;;  %v6430_v3 = vadd.f32 %v12175_v12, %v12350_v43 }
 0x307   :  { %7440 = vmatprep.subr.bf16.mxu1 %v8870_v2  ;;  %7442 = vmatprep.mubr.bf16.mxu1 %v12157_v18  ;;  %v12375_v18 = vld [vmem:[#allocation5 + $0xab8] sm:$0xff]  ;;  %v6541_v12 = vadd.f32 %v12172_v10, %v6428_v28 }
 0x308   :  { %7174 = vmatmul.mubr.bf16.gmra.mxu0 %v12344_v15  ;;  %v12357_v15 = vpop.f32.mrf.mxu1  ;;  %v12364_v42 = vpop.f32.mrf.mxu0 }
 0x309   :  { %7326 = vmatpush2.bf16.msra.mxu0 %v9395_v27  ;;  %13513 = vst [vmem:[#allocation29_spill] sm:$0xff] %v12357_v15  ;;  %7329 = vmatprep.mubr.bf16.mxu0 %v12359_v40  ;;  %13515 = vst [vmem:[#allocation32_spill] sm:$0xff] %v12364_v42  ;;  %v9109_v27 = vcombine.low %v480_v63, %v488_v41  ;;  %v9094_v40 = vcombine.high %v464_v46, %v472_v53  ;;  %v12377_v15 = vld [vmem:[#allocation5 + $0xaf8] sm:$0xff] }
 0x30a   :  { %7327 = vmatprep.subr.bf16.mxu0 %v9380_v59  ;;  %v12369_v2 = vpop.f32.mrf.mxu1  ;;  %7441 = vmatpush2.bf16.msra.mxu1 %v8869_v55  ;;  %v12371_v49 = vpop.f32.mrf.mxu0  ;;  %v9365_v59 = vcombine.low %v736_v17, %v744_v37  ;;  %v9350_v42 = vcombine.high %v720_v45, %v728_v16  ;;  %v9093_v63 = vcombine.low %v464_v46, %v472_v53  ;;  %v704_v41 = vld [vmem:[#allocation5 + $0x12b8] sm:$0xff] }
 0x30b   :  { %13516 = vst [vmem:[#allocation36_spill] sm:$0xff] %v12369_v2  ;;  %7636 = vmatprep.subr.bf16.mxu1 %v9366_v14  ;;  %v12380_v2 = vld [vmem:[#allocation2 + $0x10] ss:$24 sps:$4 sm:$0xff]   ;;  %v6543_v17 = vadd.f32 %v12177_v5, %v6430_v3  ;;  %v6432_v37 = vadd.f32 %v12182_v44, %v12340_v4  ;;  %v9349_v14 = vcombine.low %v720_v45, %v728_v16  ;;  %v12395_v44 = vld [vmem:[#allocation2 + $0x44] ss:$24 sps:$4 sm:$0xff]  }
 0x30c   :  { %v12373_v30 = vpop.f32.mrf.mxu1  ;;  %v6653_v8 = vpop.f32.mrf.mxu0  ;;  %13517 = vst [vmem:[#allocation38_spill] sm:$0xff] %v12380_v2  ;;  %v9078_v53 = vcombine.high %v12375_v18, %v12377_v15  ;;  %13518 = vst [vmem:[#allocation44_spill] sm:$0xff] %v12395_v44  ;;  %v12398_v3 = vld [vmem:[#allocation5 + $0xa38] sm:$0xff]  ;;  %v6440_v45 = vadd.f32 %v12199_v34, %v12350_v43 }
 0x30d   :  { %7328 = vmatpush2.bf16.msra.mxu0 %v9379_v39  ;;  %v6434_v39 = vadd.f32 %v12187_v60, %v12350_v43  ;;  %7443 = vmatmul.mubr.bf16.vlgmr.msra.gmra.mxu1 %v12169_v48  ;;  %v6654_v46 = vadd.f32 %v6653_v8, %v6541_v12  ;;  %v12400_v48 = vld [vmem:[#allocation5 + $0xa78] sm:$0xff] }
 0x30e   :  { %7523 = vmatprep.subr.bf16.mxu0 %v9110_v9  ;;  %v712_v9 = vld [vmem:[#allocation5 + $0x12f8] sm:$0xff]  ;;  %v12388_v55 = vpop.f32.mrf.mxu1  ;;  %7637 = vmatpush1.bf16.msra.mxu1 %v9365_v59  ;;  %v6655_v10 = vpop.f32.mrf.mxu0 }
 0x30f   :  { %v6656_v5 = vadd.f32 %v6655_v10, %v6543_v17  ;;  %7638 = vmatprep.subr.bf16.mxu1 %v9350_v42  ;;  %v9334_v60 = vcombine.high %v704_v41, %v712_v9  ;;  %7452 = vmatprep.mubr.bf16.mxu1 %v12179_v7  ;;  %v688_v16 = vld [vmem:[#allocation5 + $0x1238] sm:$0xff]  ;;  %v6547_v59 = vadd.f32 %v12189_v47, %v6434_v39 }
 0x310   :  { %7330 = vmatmul.mubr.bf16.vlgmr.msra.gmra.mxu0 %v12380_v2  ;;  %v12393_v28 = vpop.f32.mrf.mxu1  ;;  %v6657_v8 = vpop.f32.mrf.mxu0  ;;  %v696_v42 = vld [vmem:[#allocation5 + $0x1278] sm:$0xff]  ;;  %v9077_v10 = vcombine.low %v12375_v18, %v12377_v15  ;;  %v9333_v34 = vcombine.low %v704_v41, %v712_v9  ;;  %v9062_v7 = vcombine.high %v12398_v3, %v12400_v48  ;;  %v6553_v18 = vadd.f32 %v12201_v51, %v6440_v45 }
 0x311   :  { %7524 = vmatpush1.bf16.msra.mxu0 %v9109_v27  ;;  %7339 = vmatprep.mubr.bf16.mxu0 %v12395_v44  ;;  %v6545_v27 = vadd.f32 %v12185_v61, %v6432_v37  ;;  %v9687_v12 = vpack.c.bf16 %v6656_v5, %v6654_v46  ;;  %v9318_v47 = vcombine.high %v688_v16, %v696_v42  ;;  %v12417_v37 = vld [vmem:[#allocation5 + $0x9b8] sm:$0xff] }
 0x312   :  { %7525 = vmatprep.subr.bf16.mxu0 %v9094_v40  ;;  %v6438_v40 = vadd.f32 %v12191_v33, %v12340_v4  ;;  %v12409_v17 = vpop.f32.mrf.mxu1  ;;  %7639 = vmatpush1.bf16.msra.mxu1 %v9349_v14  ;;  %v6659_v33 = vpop.f32.mrf.mxu0  ;;  %v12423_v41 = vld [vmem:[#allocation2 + $0x40] ss:$24 sps:$4 sm:$0xff]   ;;  %v9061_v9 = vcombine.low %v12398_v3, %v12400_v48  ;;  %v6442_v46 = vadd.f32 %v12206_v19, %v12340_v4 }
 0x313   :  { %8581 = vst [vmem:[#allocation9] sm:$0xff] %v9687_v12  ;;  %v6658_v44 = vadd.f32 %v6657_v8, %v6545_v27  ;;  %v6660_v2 = vadd.f32 %v6659_v33, %v6547_v59  ;;  %7640 = vmatprep.subr.bf16.mxu1 %v9334_v60  ;;  %v672_v14 = vld [vmem:[#allocation5 + $0x11b8] sm:$0xff]  ;;  %v6444_v5 = vadd.f32 %v12211_v24, %v12350_v43  ;;  %v12439_v24 = vld [vmem:[#allocation2 + $0x74] ss:$24 sps:$4 sm:$0xff]  }
 0x314   :  { %v12415_v61 = vpop.f32.mrf.mxu1  ;;  %v6551_v15 = vadd.f32 %v12196_v62, %v6438_v40  ;;  %v6663_v39 = vpop.f32.mrf.mxu0  ;;  %v9317_v40 = vcombine.low %v688_v16, %v696_v42  ;;  %v6448_v8 = vadd.f32 %v12215_v1, %v12340_v4  ;;  %v6450_v16 = vadd.f32 %v12223_v38, %v12350_v43  ;;  %v656_v27 = vld [vmem:[#allocation5 + $0x1138] sm:$0xff] }
 0x315   :  { %7526 = vmatpush1.bf16.msra.mxu0 %v9093_v63  ;;  %v12419_v63 = vld [vmem:[#allocation5 + $0x9f8] sm:$0xff]  ;;  %v9691_v60 = vpack.c.bf16 %v6660_v2, %v6658_v44  ;;  %7453 = vmatmul.mubr.bf16.gmra.mxu1 %v12193_v26  ;;  %v6555_v12 = vadd.f32 %v12209_v25, %v6442_v46 }
 0x316   :  { %7527 = vmatprep.subr.bf16.mxu0 %v9078_v53  ;;  %v680_v53 = vld [vmem:[#allocation5 + $0x11f8] sm:$0xff]  ;;  %v12432_v62 = vpop.f32.mrf.mxu1  ;;  %7641 = vmatpush1.bf16.msra.mxu1 %v9333_v34  ;;  %v6665_v51 = vpop.f32.mrf.mxu0  ;;  %v9046_v3 = vcombine.high %v12417_v37, %v12419_v63  ;;  %v6664_v48 = vadd.f32 %v6663_v39, %v6551_v15 }
 0x317   :  { %8585 = vst [vmem:[#allocation9 + $0x20] sm:$0xff] %v9691_v60  ;;  %v6666_v45 = vadd.f32 %v6665_v51, %v6553_v18  ;;  %7642 = vmatprep.subr.bf16.mxu1 %v9318_v47  ;;  %v9302_v2 = vcombine.high %v672_v14, %v680_v53  ;;  %v12442_v26 = vld [vmem:[#allocation5 + $0x938] sm:$0xff]  ;;  %7462 = vmatprep.mubr.bf16.mxu1 %v12203_v57 }
 0x318   :  { %7340 = vmatmul.mubr.bf16.gmra.mxu0 %v12423_v41  ;;  %v12437_v19 = vpop.f32.mrf.mxu1  ;;  %v12444_v44 = vld [vmem:[#allocation5 + $0x978] sm:$0xff]  ;;  %v6667_v42 = vpop.f32.mrf.mxu0  ;;  %v9301_v38 = vcombine.low %v672_v14, %v680_v53  ;;  %v12467_v14 = vld [vmem:[#allocation2 + $0x70] ss:$24 sps:$4 sm:$0xff]   ;;  %v6452_v60 = vadd.f32 %v12230_v20, %v12340_v4  ;;  %v6454_v51 = vadd.f32 %v12235_v22, %v12350_v43 }
 0x319   :  { %7528 = vmatpush1.bf16.msra.mxu0 %v9077_v10  ;;  %7349 = vmatprep.mubr.bf16.mxu0 %v12439_v24  ;;  %v664_v59 = vld [vmem:[#allocation5 + $0x1178] sm:$0xff]  ;;  %v6557_v10 = vadd.f32 %v12213_v23, %v6444_v5  ;;  %v9695_v33 = vpack.c.bf16 %v6666_v45, %v6664_v48  ;;  %v9030_v57 = vcombine.high %v12442_v26, %v12444_v44 }
 0x31a   :  { %7529 = vmatprep.subr.bf16.mxu0 %v9062_v7  ;;  %v12453_v34 = vpop.f32.mrf.mxu1  ;;  %v9045_v7 = vcombine.low %v12417_v37, %v12419_v63  ;;  %7643 = vmatpush1.bf16.msra.mxu1 %v9317_v40  ;;  %v6669_v1 = vpop.f32.mrf.mxu0  ;;  %v6668_v47 = vadd.f32 %v6667_v42, %v6555_v12  ;;  %v9286_v23 = vcombine.high %v656_v27, %v664_v59  ;;  %v12461_v18 = vld [vmem:[#allocation5 + $0x8b8] sm:$0xff] }
 0x31b   :  { %8589 = vst [vmem:[#allocation9 + $0x40] sm:$0xff] %v9695_v33  ;;  %v6670_v15 = vadd.f32 %v6669_v1, %v6557_v10  ;;  %7644 = vmatprep.subr.bf16.mxu1 %v9302_v2  ;;  %v12463_v39 = vld [vmem:[#allocation5 + $0x8f8] sm:$0xff]  ;;  %v6561_v37 = vadd.f32 %v12220_v11, %v6448_v8  ;;  %v6563_v63 = vadd.f32 %v12225_v50, %v6450_v16 }
 0x31c   :  { %v12459_v25 = vpop.f32.mrf.mxu1  ;;  %v9029_v53 = vcombine.low %v12442_v26, %v12444_v44  ;;  %v640_v46 = vld [vmem:[#allocation5 + $0x10b8] sm:$0xff]  ;;  %v9014_v48 = vcombine.high %v12461_v18, %v12463_v39  ;;  %v6458_v8 = vadd.f32 %v12239_v32, %v12340_v4  ;;  %v6460_v16 = vadd.f32 %v12247_v6, %v12350_v43 }
 0x31d   :  { %7530 = vmatpush1.bf16.msra.mxu0 %v9061_v9  ;;  %v6673_v9 = vpop.f32.mrf.mxu0  ;;  %v648_v5 = vld [vmem:[#allocation5 + $0x10f8] sm:$0xff]  ;;  %v9699_v40 = vpack.c.bf16 %v6670_v15, %v6668_v47  ;;  %7463 = vmatmul.mubr.bf16.gmra.mxu1 %v12217_v56  ;;  %v6565_v12 = vadd.f32 %v12233_v54, %v6452_v60  ;;  %v6567_v10 = vadd.f32 %v12237_v58, %v6454_v51 }
 0x31e   :  { %7531 = vmatprep.subr.bf16.mxu0 %v9046_v3  ;;  %v12476_v11 = vpop.f32.mrf.mxu1  ;;  %7645 = vmatpush1.bf16.msra.mxu1 %v9301_v38  ;;  %v9285_v3 = vcombine.low %v656_v27, %v664_v59  ;;  %v6674_v45 = vadd.f32 %v6673_v9, %v6561_v37  ;;  %v12483_v22 = vld [vmem:[#allocation2 + $0xa4] ss:$24 sps:$4 sm:$0xff]   ;;  %v9270_v26 = vcombine.high %v640_v46, %v648_v5 }
 0x31f   :  { %v6675_v50 = vpop.f32.mrf.mxu0  ;;  %8593 = vst [vmem:[#allocation9 + $0x60] sm:$0xff] %v9699_v40  ;;  %7646 = vmatprep.subr.bf16.mxu1 %v9286_v23  ;;  %v12486_v56 = vld [vmem:[#allocation5 + $0x838] sm:$0xff]  ;;  %7472 = vmatprep.mubr.bf16.mxu1 %v12227_v21  ;;  %v9013_v1 = vcombine.low %v12461_v18, %v12463_v39  ;;  %v9269_v6 = vcombine.low %v640_v46, %v648_v5  ;;  %v13520_v5 = vld [vmem:[#allocation39_spill] sm:$0xff] }
 0x320   :  { %7350 = vmatmul.mubr.bf16.gmra.mxu0 %v12467_v14  ;;  %v6676_v2 = vadd.f32 %v6675_v50, %v6563_v63  ;;  %v12481_v20 = vpop.f32.mrf.mxu1  ;;  %v12488_v44 = vld [vmem:[#allocation5 + $0x878] sm:$0xff]  ;;  %v6571_v23 = vadd.f32 %v12244_v29, %v6458_v8  ;;  %v6462_v60 = vadd.f32 %v13520_v5, %v12340_v4  ;;  %v6464_v51 = vadd.f32 %v12259_v35, %v12350_v43  ;;  %v13521_v50 = vld [vmem:[#allocation34_spill] sm:$0xff] }
 0x321   :  { %7532 = vmatpush1.bf16.msra.mxu0 %v9045_v7  ;;  %7359 = vmatprep.mubr.bf16.mxu0 %v12483_v22  ;;  %v6677_v42 = vpop.f32.mrf.mxu0  ;;  %v624_v27 = vld [vmem:[#allocation5 + $0x1038] sm:$0xff]  ;;  %v8998_v21 = vcombine.high %v12486_v56, %v12488_v44  ;;  %v8997_v9 = vcombine.low %v12486_v56, %v12488_v44  ;;  %v12527_v35 = vld [vmem:[#allocation2 + $0xd4] ss:$24 sps:$4 sm:$0xff]  }
 0x322   :  { %7533 = vmatprep.subr.bf16.mxu0 %v9030_v57  ;;  %v632_v59 = vld [vmem:[#allocation5 + $0x1078] sm:$0xff]  ;;  %v9703_v33 = vpack.c.bf16 %v6676_v2, %v6674_v45  ;;  %v12497_v7 = vpop.f32.mrf.mxu1  ;;  %7647 = vmatpush1.bf16.msra.mxu1 %v9285_v3  ;;  %v6678_v38 = vadd.f32 %v6677_v42, %v6565_v12  ;;  %v13522_v42 = vld [vmem:[#allocation47_spill] sm:$0xff] }
 0x323   :  { %v6679_v32 = vpop.f32.mrf.mxu0  ;;  %7648 = vmatprep.subr.bf16.mxu1 %v9270_v26  ;;  %v9254_v58 = vcombine.high %v624_v27, %v632_v59  ;;  %v12505_v47 = vld [vmem:[#allocation5 + $0xfb8] sm:$0xff] }
 0x324   :  { %8597 = vst [vmem:[#allocation9 + $0x80] sm:$0xff] %v9703_v33  ;;  %v6680_v57 = vadd.f32 %v6679_v32, %v6567_v10  ;;  %v12503_v54 = vpop.f32.mrf.mxu1  ;;  %v12507_v15 = vld [vmem:[#allocation5 + $0xff8] sm:$0xff]  ;;  %v13523_v10 = vld [vmem:[#allocation42_spill] sm:$0xff]  ;;  %v13524_v32 = vld [vmem:[#allocation49_spill] sm:$0xff] }
 0x325   :  { %7534 = vmatpush1.bf16.msra.mxu0 %v9029_v53  ;;  %v13519_v18 = vld [vmem:[#allocation40_spill] sm:$0xff]  ;;  %v6683_v37 = vpop.f32.mrf.mxu0  ;;  %7473 = vmatmul.mubr.bf16.gmra.mxu1 %v13521_v50  ;;  %v9238_v45 = vcombine.high %v12505_v47, %v12507_v15  ;;  %v13526_v50 = vld [vmem:[#allocation45_spill] sm:$0xff] }
 0x326   :  { %7535 = vmatprep.subr.bf16.mxu0 %v9014_v48  ;;  %v6573_v39 = vadd.f32 %v13519_v18, %v6460_v16  ;;  %v12511_v63 = vld [vmem:[#allocation2 + $0xa0] ss:$24 sps:$4 sm:$0xff]   ;;  %v9707_v40 = vpack.c.bf16 %v6680_v57, %v6678_v38  ;;  %v12520_v29 = vpop.f32.mrf.mxu1  ;;  %7649 = vmatpush1.bf16.msra.mxu1 %v9269_v6  ;;  %v9253_v48 = vcombine.low %v624_v27, %v632_v59 }
 0x327   :  { %v864_v53 = vld [vmem:[#allocation5 + $0x17b8] sm:$0xff]  ;;  %v6685_v3 = vpop.f32.mrf.mxu0  ;;  %v6684_v2 = vadd.f32 %v6683_v37, %v6571_v23  ;;  %7650 = vmatprep.subr.bf16.mxu1 %v9254_v58  ;;  %v6468_v27 = vadd.f32 %v13522_v42, %v12340_v4  ;;  %v6470_v59 = vadd.f32 %v12271_v36, %v12350_v43  ;;  %7482 = vmatprep.mubr.bf16.mxu1 %v13523_v10 }
 0x328   :  { %7360 = vmatmul.mubr.bf16.gmra.mxu0 %v12511_v63  ;;  %v872_v46 = vld [vmem:[#allocation5 + $0x17f8] sm:$0xff]  ;;  %8601 = vst [vmem:[#allocation9 + $0xa0] sm:$0xff] %v9707_v40  ;;  %v6686_v26 = vadd.f32 %v6685_v3, %v6573_v39  ;;  %v12525_v56 = vpop.f32.mrf.mxu1  ;;  %v6575_v6 = vadd.f32 %v13524_v32, %v6462_v60  ;;  %v9237_v23 = vcombine.low %v12505_v47, %v12507_v15  ;;  %v13527_v15 = vld [vmem:[#allocation43_spill] sm:$0xff] }
 0x329   :  { %7536 = vmatpush1.bf16.msra.mxu0 %v9013_v1  ;;  %7369 = vmatprep.mubr.bf16.mxu0 %v12527_v35  ;;  %v9494_v44 = vcombine.high %v864_v53, %v872_v46  ;;  %v12530_v8 = vld [vmem:[#allocation5 + $0xf38] sm:$0xff]  ;;  %v6687_v12 = vpop.f32.mrf.mxu0  ;;  %v9493_v36 = vcombine.low %v864_v53, %v872_v46  ;;  %v6581_v47 = vadd.f32 %v13526_v50, %v6468_v27  ;;  %v12555_v53 = vld [vmem:[#allocation2 + $0xd0] ss:$24 sps:$4 sm:$0xff]  }
 0x32a   :  { %7537 = vmatprep.subr.bf16.mxu0 %v8998_v21  ;;  %v12532_v16 = vld [vmem:[#allocation5 + $0xf78] sm:$0xff]  ;;  %v13525_v21 = vld [vmem:[#allocation46_spill] sm:$0xff]  ;;  %v9711_v57 = vpack.c.bf16 %v6686_v26, %v6684_v2  ;;  %v12541_v58 = vpop.f32.mrf.mxu1  ;;  %7651 = vmatpush1.bf16.msra.mxu1 %v9253_v48  ;;  %v6688_v37 = vadd.f32 %v6687_v12, %v6575_v6  ;;  %v6583_v3 = vadd.f32 %v13527_v15, %v6470_v59  ;;  %v13528_v26 = vld [vmem:[#allocation51_spill] sm:$0xff] }
 0x32b   :  { %v848_v33 = vld [vmem:[#allocation5 + $0x1738] sm:$0xff]  ;;  %v6577_v38 = vadd.f32 %v13525_v21, %v6464_v51  ;;  %v6689_v18 = vpop.f32.mrf.mxu0  ;;  %v9222_v39 = vcombine.high %v12530_v8, %v12532_v16  ;;  %7652 = vmatprep.subr.bf16.mxu1 %v9494_v44  ;;  %v9221_v46 = vcombine.low %v12530_v8, %v12532_v16  ;;  %v6472_v44 = vadd.f32 %v13528_v26, %v12340_v4 }
 0x32c   :  { %v856_v1 = vld [vmem:[#allocation5 + $0x1778] sm:$0xff]  ;;  %8605 = vst [vmem:[#allocation9 + $0xc0] sm:$0xff] %v9711_v57  ;;  %v12547_v60 = vpop.f32.mrf.mxu1  ;;  %v6474_v42 = vadd.f32 %v12283_v13, %v12350_v43 }
 0x32d   :  { %7538 = vmatpush1.bf16.msra.mxu0 %v8997_v9  ;;  %v6690_v5 = vadd.f32 %v6689_v18, %v6577_v38  ;;  %v9478_v51 = vcombine.high %v848_v33, %v856_v1  ;;  %v12549_v40 = vld [vmem:[#allocation5 + $0xeb8] sm:$0xff]  ;;  %v6693_v48 = vpop.f32.mrf.mxu0  ;;  %v9477_v32 = vcombine.low %v848_v33, %v856_v1  ;;  %v6480_v18 = vadd.f32 %v12295_v0, %v12350_v43 }
 0x32e   :  { %7539 = vmatprep.subr.bf16.mxu0 %v9238_v45  ;;  %v12551_v9 = vld [vmem:[#allocation5 + $0xef8] sm:$0xff]  ;;  %v12564_v27 = vpop.f32.mrf.mxu1  ;;  %7653 = vmatpush2.bf16.msra.mxu1 %v9493_v36  ;;  %v6694_v16 = vadd.f32 %v6693_v48, %v6581_v47  ;;  %v13533_v47 = vld [vmem:[#allocation53_spill] sm:$0xff] }
 0x32f   :  { %v832_v45 = vld [vmem:[#allocation5 + $0x16b8] sm:$0xff]  ;;  %v9715_v12 = vpack.c.bf16 %v6690_v5, %v6688_v37  ;;  %v6695_v10 = vpop.f32.mrf.mxu0  ;;  %v9206_v8 = vcombine.high %v12549_v40, %v12551_v9  ;;  %7654 = vmatprep.subr.bf16.mxu1 %v9478_v51  ;;  %v13532_v51 = vld [vmem:[#allocation50_spill] sm:$0xff]  ;;  %v6587_v15 = vadd.f32 %v13533_v47, %v6474_v42  ;;  %v9205_v26 = vcombine.low %v12549_v40, %v12551_v9  ;;  %v13536_v9 = vld [vmem:[#allocation17_spill] sm:$0xff] }
 0x330   :  { %7370 = vmatmul.mubr.bf16.gmra.mxu0 %v12555_v53  ;;  %v840_v2 = vld [vmem:[#allocation5 + $0x16f8] sm:$0xff]  ;;  %v6696_v6 = vadd.f32 %v6695_v10, %v6583_v3  ;;  %v12569_v21 = vpop.f32.mrf.mxu1  ;;  %v6585_v50 = vadd.f32 %v13532_v51, %v6472_v44 }
 0x331   :  { %v13529_v59 = vld [vmem:[#allocation52_spill] sm:$0xff]  ;;  %7540 = vmatpush2.bf16.msra.mxu0 %v9237_v23  ;;  %8609 = vst [vmem:[#allocation9 + $0xe0] sm:$0xff] %v9715_v12  ;;  %v9462_v38 = vcombine.high %v832_v45, %v840_v2  ;;  %v6697_v36 = vpop.f32.mrf.mxu0  ;;  %v9461_v0 = vcombine.low %v832_v45, %v840_v2 }
 0x332   :  { %7483 = vmatmul.mubr.bf16.gmra.mxu1 %v13529_v59  ;;  %7541 = vmatprep.subr.bf16.mxu0 %v9222_v39  ;;  %v12571_v13 = vld [vmem:[#allocation2 + $0x104] ss:$24 sps:$4 sm:$0xff]   ;;  %v9719_v3 = vpack.c.bf16 %v6696_v6, %v6694_v16  ;;  %v12585_v48 = vpop.f32.mrf.mxu1  ;;  %v6698_v10 = vadd.f32 %v6697_v36, %v6585_v50  ;;  %v13535_v6 = vld [vmem:[#allocation54_spill] sm:$0xff]  ;;  %v12599_v45 = vld [vmem:[#allocation2 + $0x100] ss:$24 sps:$4 sm:$0xff]  }
 0x333   :  { %7379 = vmatprep.mubr.bf16.mxu0 %v12571_v13  ;;  %v12574_v57 = vld [vmem:[#allocation5 + $0xe38] sm:$0xff]  ;;  %7655 = vmatpush2.bf16.msra.mxu1 %v9477_v32  ;;  %v6699_v12 = vpop.f32.mrf.mxu0  ;;  %v6593_v32 = vadd.f32 %v13536_v9, %v6480_v18  ;;  %13537 = vst [vmem:[#allocation39_spill] sm:$0xff] %v12599_v45  ;;  %v13539_v50 = vld [vmem:[#allocation23_spill] sm:$0xff] }
 0x334   :  { %v12576_v23 = vld [vmem:[#allocation5 + $0xe78] sm:$0xff]  ;;  %8613 = vst [vmem:[#allocation9 + $0x100] sm:$0xff] %v9719_v3  ;;  %v12591_v44 = vpop.f32.mrf.mxu1  ;;  %7656 = vmatprep.subr.bf16.mxu1 %v9462_v38  ;;  %v13538_v38 = vld [vmem:[#allocation57_spill] sm:$0xff]  ;;  %v6484_v47 = vadd.f32 %v13539_v50, %v12350_v43  ;;  %v13541_v18 = vld [vmem:[#allocation15_spill] sm:$0xff] }
 0x335   :  { %v13530_v33 = vld [vmem:[#allocation56_spill] sm:$0xff]  ;;  %7542 = vmatpush2.bf16.msra.mxu0 %v9221_v46  ;;  %v9190_v59 = vcombine.high %v12574_v57, %v12576_v23  ;;  %13534 = vst [vmem:[#allocation40_spill] sm:$0xff] %v12591_v44  ;;  %v9189_v2 = vcombine.low %v12574_v57, %v12576_v23  ;;  %v6482_v51 = vadd.f32 %v13538_v38, %v12340_v4  ;;  %v12615_v38 = vld [vmem:[#allocation2 + $0x134] ss:$24 sps:$4 sm:$0xff]  }
 0x336   :  { %v6478_v1 = vadd.f32 %v13530_v33, %v12340_v4  ;;  %v13531_v39 = vld [vmem:[#allocation48_spill] sm:$0xff]  ;;  %7543 = vmatprep.subr.bf16.mxu0 %v9206_v8  ;;  %v6700_v33 = vadd.f32 %v6699_v12, %v6587_v15  ;;  %v6703_v8 = vpop.f32.mrf.mxu0  ;;  %13543 = vst [vmem:[#allocation42_spill] sm:$0xff] %v12615_v38 }
 0x337   :  { %7492 = vmatprep.mubr.bf16.mxu1 %v13531_v39  ;;  %v816_v37 = vld [vmem:[#allocation5 + $0x1638] sm:$0xff]  ;;  %7657 = vmatpush2.bf16.msra.mxu1 %v9461_v0  ;;  %v13545_v0 = vld [vmem:[#allocation25_spill] sm:$0xff] }
 0x338   :  { %v824_v5 = vld [vmem:[#allocation5 + $0x1678] sm:$0xff]  ;;  %v6591_v40 = vadd.f32 %v13535_v6, %v6478_v1  ;;  %7380 = vmatmul.mubr.bf16.gmra.mxu0 %v12599_v45  ;;  %v9723_v15 = vpack.c.bf16 %v6700_v33, %v6698_v10  ;;  %v12608_v1 = vpop.f32.mrf.mxu1  ;;  %v6705_v3 = vpop.f32.mrf.mxu0 }
 0x339   :  { %v9446_v42 = vcombine.high %v816_v37, %v824_v5  ;;  %v12593_v16 = vld [vmem:[#allocation5 + $0xdb8] sm:$0xff]  ;;  %13540 = vst [vmem:[#allocation34_spill] sm:$0xff] %v12608_v1  ;;  %7544 = vmatpush2.bf16.msra.mxu0 %v9205_v26  ;;  %v9445_v12 = vcombine.low %v816_v37, %v824_v5  ;;  %v6706_v6 = vadd.f32 %v6705_v3, %v6593_v32  ;;  %v13544_v37 = vld [vmem:[#allocation18_spill] sm:$0xff]  ;;  %v13546_v32 = vld [vmem:[#allocation55_spill] sm:$0xff] }
 0x33a   :  { %v12595_v46 = vld [vmem:[#allocation5 + $0xdf8] sm:$0xff]  ;;  %7493 = vmatmul.mubr.bf16.gmra.mxu1 %v13541_v18  ;;  %7545 = vmatprep.subr.bf16.mxu0 %v9190_v59  ;;  %8617 = vst [vmem:[#allocation9 + $0x120] sm:$0xff] %v9723_v15  ;;  %v6704_v23 = vadd.f32 %v6703_v8, %v6591_v40  ;;  %v12613_v9 = vpop.f32.mrf.mxu1  ;;  %v6488_v5 = vadd.f32 %v13544_v37, %v12340_v4  ;;  %v6707_v40 = vpop.f32.mrf.mxu0  ;;  %v13548_v18 = vld [vmem:[#allocation19_spill] sm:$0xff] }
 0x33b   :  { %v800_v36 = vld [vmem:[#allocation5 + $0x15b8] sm:$0xff]  ;;  %v9174_v57 = vcombine.high %v12593_v16, %v12595_v46  ;;  %13542 = vst [vmem:[#allocation47_spill] sm:$0xff] %v12613_v9  ;;  %7658 = vmatprep.subr.bf16.mxu1 %v9446_v42  ;;  %7389 = vmatprep.mubr.bf16.mxu0 %v12615_v38  ;;  %v6490_v59 = vadd.f32 %v13545_v0, %v12350_v43 }
 0x33c   :  { %v808_v39 = vld [vmem:[#allocation5 + $0x15f8] sm:$0xff]  ;;  %7502 = vmatprep.mubr.bf16.mxu1 %v13546_v32  ;;  %v6597_v3 = vadd.f32 %v13548_v18, %v6484_v47  ;;  %v9727_v38 = vpack.c.bf16 %v6706_v6, %v6704_v23  ;;  %v12629_v45 = vpop.f32.mrf.mxu1  ;;  %v9173_v9 = vcombine.low %v12593_v16, %v12595_v46  ;;  %7659 = vmatpush2.bf16.msra.mxu1 %v9445_v12  ;;  %v6709_v37 = vpop.f32.mrf.mxu0  ;;  %v13551_v46 = vld [vmem:[#allocation27_spill] sm:$0xff] }
 0x33d   :  { %v9430_v10 = vcombine.high %v800_v36, %v808_v39  ;;  %v12618_v33 = vld [vmem:[#allocation5 + $0xd38] sm:$0xff]  ;;  %7546 = vmatpush2.bf16.msra.mxu0 %v9189_v2  ;;  %v9429_v0 = vcombine.low %v800_v36, %v808_v39  ;;  %v6603_v12 = vadd.f32 %v13551_v46, %v6490_v59  ;;  %v12643_v36 = vld [vmem:[#allocation2 + $0x130] ss:$24 sps:$4 sm:$0xff]   ;;  %v13555_v59 = vld [vmem:[#allocation21_spill] sm:$0xff] }
 0x33e   :  { %v12620_v26 = vld [vmem:[#allocation5 + $0xd78] sm:$0xff]  ;;  %7547 = vmatprep.subr.bf16.mxu0 %v9174_v57  ;;  %8621 = vst [vmem:[#allocation9 + $0x140] sm:$0xff] %v9727_v38  ;;  %v6710_v44 = vadd.f32 %v6709_v37, %v6597_v3  ;;  %v6713_v57 = vpop.f32.mrf.mxu0  ;;  %13552 = vst [vmem:[#allocation46_spill] sm:$0xff] %v12643_v36 }
 0x33f   :  { %v784_v8 = vld [vmem:[#allocation5 + $0x1538] sm:$0xff]  ;;  %v9158_v32 = vcombine.high %v12618_v33, %v12620_v26  ;;  %7660 = vmatprep.subr.bf16.mxu1 %v9430_v10  ;;  %v9157_v39 = vcombine.low %v12618_v33, %v12620_v26  ;;  %v13553_v10 = vld [vmem:[#allocation22_spill] sm:$0xff] }
 0x340   :  { %v792_v42 = vld [vmem:[#allocation5 + $0x1578] sm:$0xff]  ;;  %7390 = vmatmul.mubr.bf16.gmra.mxu0 %v12643_v36  ;;  %7661 = vmatpush2.bf16.msra.mxu1 %v9429_v0  ;;  %v6715_v3 = vpop.f32.mrf.mxu0 }
 0x341   :  { %v13547_v50 = vld [vmem:[#allocation16_spill] sm:$0xff]  ;;  %v9414_v47 = vcombine.high %v784_v8, %v792_v42  ;;  %7548 = vmatpush2.bf16.msra.mxu0 %v9173_v9  ;;  %v9413_v37 = vcombine.low %v784_v8, %v792_v42  ;;  %v6500_v8 = vadd.f32 %v12355_v52, %v12350_v43 }
 0x342   :  { %v6595_v15 = vadd.f32 %v13547_v50, %v6482_v51  ;;  %v12635_v51 = vpop.f32.mrf.mxu1  ;;  %v12637_v23 = vld [vmem:[#allocation5 + $0xcb8] sm:$0xff]  ;;  %v6492_v50 = vadd.f32 %v13553_v10, %v12340_v4  ;;  %7503 = vmatmul.mubr.bf16.gmra.mxu1 %v13555_v59  ;;  %7549 = vmatprep.subr.bf16.mxu0 %v9158_v32  ;;  %v6717_v42 = vpop.f32.mrf.mxu0  ;;  %v13559_v10 = vld [vmem:[#allocation30_spill] sm:$0xff] }
 0x343   :  { %13549 = vst [vmem:[#allocation49_spill] sm:$0xff] %v12635_v51  ;;  %v12639_v2 = vld [vmem:[#allocation5 + $0xcf8] sm:$0xff]  ;;  %7662 = vmatprep.subr.bf16.mxu1 %v9414_v47  ;;  %7512 = vmatprep.mubr.bf16.mxu1 %v13559_v10 }
 0x344   :  { %v6708_v1 = vadd.f32 %v6707_v40, %v6595_v15  ;;  %v13550_v6 = vld [vmem:[#allocation20_spill] sm:$0xff]  ;;  %v6494_v15 = vadd.f32 %v12333_v31, %v12350_v43  ;;  %v9142_v33 = vcombine.high %v12637_v23, %v12639_v2  ;;  %v9141_v36 = vcombine.low %v12637_v23, %v12639_v2  ;;  %7663 = vmatpush2.bf16.msra.mxu1 %v9413_v37 }
 0x345   :  { %v6601_v16 = vadd.f32 %v13550_v6, %v6488_v5  ;;  %v768_v38 = vld [vmem:[#allocation5 + $0x14b8] sm:$0xff]  ;;  %v12652_v5 = vpop.f32.mrf.mxu1  ;;  %v6716_v6 = vadd.f32 %v6715_v3, %v6603_v12  ;;  %7550 = vmatpush2.bf16.msra.mxu0 %v9157_v39 }
 0x346   :  { %v776_v40 = vld [vmem:[#allocation5 + $0x14f8] sm:$0xff]  ;;  %v9731_v18 = vpack.c.bf16 %v6710_v44, %v6708_v1  ;;  %13554 = vst [vmem:[#allocation45_spill] sm:$0xff] %v12652_v5  ;;  %7551 = vmatprep.subr.bf16.mxu0 %v9142_v33 }
 0x347   :  { %v6714_v26 = vadd.f32 %v6713_v57, %v6601_v16  ;;  %v12657_v46 = vpop.f32.mrf.mxu1  ;;  %v12659_v31 = vld [vmem:[#allocation2 + $0x164] ss:$24 sps:$4 sm:$0xff]   ;;  %v9398_v44 = vcombine.high %v768_v38, %v776_v40  ;;  %v9397_v52 = vcombine.low %v768_v38, %v776_v40  ;;  %v6504_v40 = vadd.f32 %v12371_v49, %v12350_v43 }
 0x348   :  { %8625 = vst [vmem:[#allocation9 + $0x160] sm:$0xff] %v9731_v18  ;;  %13556 = vst [vmem:[#allocation43_spill] sm:$0xff] %v12657_v46  ;;  %7399 = vmatprep.mubr.bf16.mxu0 %v12659_v31  ;;  %v496_v1 = vld [vmem:[#allocation5 + $0xc38] sm:$0xff]  ;;  %v13561_v18 = vld [vmem:[#allocation26_spill] sm:$0xff] }
 0x349   :  { %13557 = vst [vmem:[#allocation51_spill] sm:$0xff] %v12659_v31  ;;  %v504_v9 = vld [vmem:[#allocation5 + $0xc78] sm:$0xff]  ;;  %v6607_v59 = vadd.f32 %v13561_v18, %v6494_v15  ;;  %v9735_v3 = vpack.c.bf16 %v6716_v6, %v6714_v26  ;;  %v12669_v31 = vpop.f32.mrf.mxu1  ;;  %7664 = vmatprep.subr.bf16.mxu1 %v9398_v44  ;;  %v13562_v15 = vld [vmem:[#allocation35_spill] sm:$0xff]  ;;  %v13563_v6 = vld [vmem:[#allocation29_spill] sm:$0xff]  ;;  %7552 = vmatpush2.bf16.msra.mxu0 %v9141_v36 }
 0x34a   :  { %v13558_v0 = vld [vmem:[#allocation28_spill] sm:$0xff]  ;;  %v9126_v46 = vcombine.high %v496_v1, %v504_v9  ;;  %v9125_v23 = vcombine.low %v496_v1, %v504_v9  ;;  %v13565_v44 = vld [vmem:[#allocation33_spill] sm:$0xff]  ;;  %7665 = vmatpush2.bf16.msra.mxu1 %v9397_v52 }
 0x34b   :  { %v6498_v32 = vadd.f32 %v13558_v0, %v12340_v4  ;;  %v752_v16 = vld [vmem:[#allocation5 + $0x1438] sm:$0xff]  ;;  %v6719_v0 = vpop.f32.mrf.mxu0  ;;  %8629 = vst [vmem:[#allocation9 + $0x180] sm:$0xff] %v9735_v3  ;;  %v12673_v51 = vpop.f32.mrf.mxu1  ;;  %7513 = vmatmul.mubr.bf16.gmra.mxu1 %v13565_v44  ;;  %v9979_v43 = vld [vmem:[#allocation2 + $0xc] ss:$24 sps:$4 sm:$0xff]  }
 0x34c   :  { %v760_v12 = vld [vmem:[#allocation5 + $0x1478] sm:$0xff]  ;;  %v6720_v5 = vadd.f32 %v6719_v0, %v6607_v59  ;;  %7553 = vmatprep.subr.bf16.mxu0 %v9126_v46  ;;  %v13568_v59 = vld [vmem:[#allocation31_spill] sm:$0xff]  ;;  %v6617_v46 = vadd.f32 %v12373_v30, %v6504_v40 }
 0x34d   :  { %v13560_v57 = vld [vmem:[#allocation24_spill] sm:$0xff]  ;;  %v6611_v26 = vadd.f32 %v13562_v15, %v6498_v32  ;;  %v6723_v39 = vpop.f32.mrf.mxu0  ;;  %v12684_v33 = vpop.f32.mrf.mxu1  ;;  %7554 = vmatpush2.bf16.msra.mxu0 %v9125_v23  ;;  %v13572_v23 = vld [vmem:[#allocation38_spill] sm:$0xff] }
 0x34e   :  { %v6605_v47 = vadd.f32 %v13560_v57, %v6492_v50  ;;  %v9382_v50 = vcombine.high %v752_v16, %v760_v12  ;;  %v6613_v57 = vadd.f32 %v13563_v6, %v6500_v8  ;;  %v12677_v18 = vld [vmem:[#allocation2 + $0x160] ss:$24 sps:$4 sm:$0xff]   ;;  %v9381_v8 = vcombine.low %v752_v16, %v760_v12  ;;  %v9981_v44 = vld [vmem:[#allocation2 + $0x3c] ss:$24 sps:$4 sm:$0xff]  }
 0x34f   :  { %7400 = vmatmul.mubr.bf16.gmra.mxu0 %v12677_v18  ;;  %v13564_v2 = vld [vmem:[#allocation32_spill] sm:$0xff]  ;;  %v6725_v32 = vpop.f32.mrf.mxu0  ;;  %v12692_v3 = vpop.f32.mrf.mxu1 }
 0x350   :  { %v6718_v10 = vadd.f32 %v6717_v42, %v6605_v47  ;;  %v6502_v38 = vadd.f32 %v13564_v2, %v12340_v4  ;;  %v13566_v42 = vld [vmem:[#allocation37_spill] sm:$0xff]  ;;  %v6724_v4 = vadd.f32 %v6723_v39, %v6611_v26  ;;  %v6726_v9 = vadd.f32 %v6725_v32, %v6613_v57  ;;  %7666 = vmatprep.subr.bf16.mxu1 %v9382_v50  ;;  %v13570_v36 = vld [vmem:[#allocation36_spill] sm:$0xff] }
 0x351   :  { %v13567_v47 = vsub.s32 2, %v13566_v42  ;;  %7555 = vmatprep.mubr.bf16.mxu0 %v9979_v43  ;;  %v6727_v49 = vpop.f32.mrf.mxu0  ;;  %v13571_v16 = vsub.s32 3, %v13566_v42  ;;  %7667 = vmatpush2.bf16.msra.mxu1 %v9381_v8  ;;  %v9980_v39 = vld [vmem:[#allocation2 + $0x8] ss:$24 sps:$4 sm:$0xff]  }
 0x352   :  { %v9739_v37 = vpack.c.bf16 %v6720_v5, %v6718_v10  ;;  %v13569_v5 = vld [vmem:[#allocation41_spill] sm:$0xff]  ;;  %v6615_v0 = vadd.f32 %v13570_v36, %v6502_v38  ;;  %v9743_v52 = vpack.c.bf16 %v6726_v9, %v6724_v4  ;;  %v12702_v10 = vpop.f32.mrf.mxu1 }
 0x353   :  { %v12690_v1 = vrot.slane %v13568_v59, %v13567_v47  ;;  %7668 = vmatprep.mubr.bf16.mxu1 %v13569_v5  ;;  %v12700_v12 = vrot.slane %v13568_v59, %v13571_v16  ;;  %v6729_v50 = vpop.f32.mrf.mxu0 }
 0x354   :  { %8633 = vst [vmem:[#allocation9 + $0x1a0] sm:$0xff] %v9739_v37  ;;  %8637 = vst [vmem:[#allocation9 + $0x1c0] sm:$0xff] %v9743_v52  ;;  %v6728_v26 = vadd.f32 %v6727_v49, %v6615_v0  ;;  %v6730_v6 = vadd.f32 %v6729_v50, %v6617_v46  ;;  %v12706_v57 = vpop.f32.mrf.mxu1  ;;  %7669 = vmatmul.mubr.bf16.vlgmr.msra.gmra.mxu1 %v13572_v23 }
 0x355   :  { %v6767_v15 = vadd.f32 %v12388_v55, %v12690_v1  ;;  %v6879_v30 = vpop.f32.mrf.mxu0  ;;  %v6769_v2 = vadd.f32 %v12393_v28, %v12700_v12  ;;  %v13573_v55 = vld [vmem:[#allocation44_spill] sm:$0xff]  ;;  %v6771_v8 = vadd.f32 %v12409_v17, %v12690_v1  ;;  %v6773_v28 = vadd.f32 %v12415_v61, %v12700_v12 }
 0x356   :  { %v9747_v38 = vpack.c.bf16 %v6730_v6, %v6728_v26  ;;  %v6992_v37 = vpop.f32.mrf.mxu1  ;;  %7678 = vmatprep.mubr.bf16.mxu1 %v13573_v55  ;;  %v6777_v0 = vadd.f32 %v12432_v62, %v12690_v1  ;;  %v6779_v17 = vadd.f32 %v12437_v19, %v12700_v12  ;;  %v6781_v62 = vadd.f32 %v12453_v34, %v12690_v1 }
 0x357   :  { %7556 = vmatmul.mubr.bf16.vlgmr.msra.gmra.mxu0 %v9980_v39  ;;  %v6880_v40 = vadd.f32 %v6879_v30, %v6767_v15  ;;  %v6881_v32 = vpop.f32.mrf.mxu0  ;;  %v9982_v15 = vld [vmem:[#allocation2 + $0x38] ss:$24 sps:$4 sm:$0xff]   ;;  %v9983_v39 = vld [vmem:[#allocation2 + $0x6c] ss:$24 sps:$4 sm:$0xff]   ;;  %v6783_v23 = vadd.f32 %v12459_v25, %v12700_v12  ;;  %v6789_v34 = vadd.f32 %v12481_v20, %v12700_v12 }
 0x358   :  { %7565 = vmatprep.mubr.bf16.mxu0 %v9981_v44  ;;  %8641 = vst [vmem:[#allocation9 + $0x1e0] sm:$0xff] %v9747_v38  ;;  %v6882_v47 = vadd.f32 %v6881_v32, %v6769_v2  ;;  %v6994_v59 = vpop.f32.mrf.mxu1 }
 0x359   :  { %v6883_v4 = vpop.f32.mrf.mxu0  ;;  %v6993_v9 = vadd.f32 %v6992_v37, %v6880_v40 }
 0x35a   :  { %v6995_v43 = vadd.f32 %v6994_v59, %v6882_v47  ;;  %v6884_v49 = vadd.f32 %v6883_v4, %v6771_v8  ;;  %v6996_v5 = vpop.f32.mrf.mxu1  ;;  %v6787_v47 = vadd.f32 %v12476_v11, %v12690_v1  ;;  %v6791_v11 = vadd.f32 %v12497_v7, %v12690_v1 }
 0x35b   :  { %v6885_v36 = vpop.f32.mrf.mxu0  ;;  %v6799_v7 = vadd.f32 %v12525_v56, %v12700_v12 }
 0x35c   :  { %v9688_v46 = vpack.c.bf16 %v6995_v43, %v6993_v9  ;;  %v6886_v16 = vadd.f32 %v6885_v36, %v6773_v28  ;;  %v6998_v52 = vpop.f32.mrf.mxu1  ;;  %v6997_v26 = vadd.f32 %v6996_v5, %v6884_v49  ;;  %7679 = vmatmul.mubr.bf16.gmra.mxu1 %v12423_v41  ;;  %v9984_v9 = vld [vmem:[#allocation2 + $0x68] ss:$24 sps:$4 sm:$0xff]   ;;  %v9985_v36 = vld [vmem:[#allocation2 + $0x9c] ss:$24 sps:$4 sm:$0xff]  }
 0x35d   :  { %v6889_v50 = vpop.f32.mrf.mxu0  ;;  %7688 = vmatprep.mubr.bf16.mxu1 %v12439_v24 }
 0x35e   :  { %8582 = vst [vmem:[#allocation9 + $0x8] sm:$0xff] %v9688_v46  ;;  %v6999_v61 = vadd.f32 %v6998_v52, %v6886_v16  ;;  %v6890_v6 = vadd.f32 %v6889_v50, %v6777_v0  ;;  %v7002_v30 = vpop.f32.mrf.mxu1 }
 0x35f   :  { %7566 = vmatmul.mubr.bf16.gmra.mxu0 %v9982_v15  ;;  %v6891_v2 = vpop.f32.mrf.mxu0 }
 0x360   :  { %7575 = vmatprep.mubr.bf16.mxu0 %v9983_v39  ;;  %v9692_v38 = vpack.c.bf16 %v6999_v61, %v6997_v26  ;;  %v6892_v19 = vadd.f32 %v6891_v2, %v6779_v17  ;;  %v7004_v40 = vpop.f32.mrf.mxu1  ;;  %v7003_v44 = vadd.f32 %v7002_v30, %v6890_v6  ;;  %v6793_v17 = vadd.f32 %v12503_v54, %v12700_v12 }
 0x361   :  { %v6893_v37 = vpop.f32.mrf.mxu0  ;;  %v6797_v6 = vadd.f32 %v12520_v29, %v12690_v1  ;;  %v6801_v29 = vadd.f32 %v12541_v58, %v12690_v1  ;;  %v6809_v58 = vadd.f32 %v12569_v21, %v12700_v12 }
 0x362   :  { %8586 = vst [vmem:[#allocation9 + $0x28] sm:$0xff] %v9692_v38  ;;  %v7005_v32 = vadd.f32 %v7004_v40, %v6892_v19  ;;  %v6894_v55 = vadd.f32 %v6893_v37, %v6781_v62  ;;  %v7006_v41 = vpop.f32.mrf.mxu1  ;;  %v9986_v62 = vld [vmem:[#allocation2 + $0x98] ss:$24 sps:$4 sm:$0xff]   ;;  %v9987_v37 = vld [vmem:[#allocation2 + $0xcc] ss:$24 sps:$4 sm:$0xff]  }
 0x363   :  { %v6895_v8 = vpop.f32.mrf.mxu0 }
 0x364   :  { %v9696_v24 = vpack.c.bf16 %v7005_v32, %v7003_v44  ;;  %v6896_v59 = vadd.f32 %v6895_v8, %v6783_v23  ;;  %v7008_v4 = vpop.f32.mrf.mxu1  ;;  %v7007_v25 = vadd.f32 %v7006_v41, %v6894_v55  ;;  %7689 = vmatmul.mubr.bf16.gmra.mxu1 %v12467_v14  ;;  %v6803_v41 = vadd.f32 %v12547_v60, %v12700_v12 }
 0x365   :  { %v6899_v28 = vpop.f32.mrf.mxu0  ;;  %7698 = vmatprep.mubr.bf16.mxu1 %v12483_v22 }
 0x366   :  { %8590 = vst [vmem:[#allocation9 + $0x48] sm:$0xff] %v9696_v24  ;;  %v7009_v43 = vadd.f32 %v7008_v4, %v6896_v59  ;;  %v6900_v49 = vadd.f32 %v6899_v28, %v6787_v47  ;;  %v7012_v5 = vpop.f32.mrf.mxu1  ;;  %v6807_v4 = vadd.f32 %v12564_v27, %v12690_v1  ;;  %v6811_v27 = vadd.f32 %v12585_v48, %v12690_v1  ;;  %v13576_v48 = vld [vmem:[#allocation47_spill] sm:$0xff] }
 0x367   :  { %7576 = vmatmul.mubr.bf16.gmra.mxu0 %v9984_v9  ;;  %v6901_v0 = vpop.f32.mrf.mxu0 }
 0x368   :  { %7585 = vmatprep.mubr.bf16.mxu0 %v9985_v36  ;;  %v9700_v46 = vpack.c.bf16 %v7009_v43, %v7007_v25  ;;  %v6902_v20 = vadd.f32 %v6901_v0, %v6789_v34  ;;  %v7014_v16 = vpop.f32.mrf.mxu1  ;;  %v7013_v50 = vadd.f32 %v7012_v5, %v6900_v49  ;;  %v9988_v25 = vld [vmem:[#allocation2 + $0xc8] ss:$24 sps:$4 sm:$0xff]   ;;  %v9989_v36 = vld [vmem:[#allocation2 + $0xfc] ss:$24 sps:$4 sm:$0xff]  }
 0x369   :  { %v6903_v52 = vpop.f32.mrf.mxu0 }
 0x36a   :  { %8594 = vst [vmem:[#allocation9 + $0x68] sm:$0xff] %v9700_v46  ;;  %v7015_v15 = vadd.f32 %v7014_v16, %v6902_v20  ;;  %v6904_v26 = vadd.f32 %v6903_v52, %v6791_v11  ;;  %v7016_v14 = vpop.f32.mrf.mxu1  ;;  %v13574_v16 = vld [vmem:[#allocation40_spill] sm:$0xff] }
 0x36b   :  { %v6905_v61 = vpop.f32.mrf.mxu0  ;;  %v6813_v52 = vadd.f32 %v13574_v16, %v12700_v12 }
 0x36c   :  { %v9704_v22 = vpack.c.bf16 %v7015_v15, %v7013_v50  ;;  %v6906_v30 = vadd.f32 %v6905_v61, %v6793_v17  ;;  %v7018_v39 = vpop.f32.mrf.mxu1  ;;  %v7017_v54 = vadd.f32 %v7016_v14, %v6904_v26  ;;  %7699 = vmatmul.mubr.bf16.gmra.mxu1 %v12511_v63  ;;  %v13575_v14 = vld [vmem:[#allocation34_spill] sm:$0xff] }
 0x36d   :  { %v6909_v2 = vpop.f32.mrf.mxu0  ;;  %7708 = vmatprep.mubr.bf16.mxu1 %v12527_v35  ;;  %v6817_v61 = vadd.f32 %v13575_v14, %v12690_v1 }
 0x36e   :  { %8598 = vst [vmem:[#allocation9 + $0x88] sm:$0xff] %v9704_v22  ;;  %v7019_v38 = vadd.f32 %v7018_v39, %v6906_v30  ;;  %v6910_v19 = vadd.f32 %v6909_v2, %v6797_v6  ;;  %v7022_v40 = vpop.f32.mrf.mxu1  ;;  %v6819_v30 = vadd.f32 %v13576_v48, %v12700_v12 }
 0x36f   :  { %7586 = vmatmul.mubr.bf16.gmra.mxu0 %v9986_v62  ;;  %v6911_v23 = vpop.f32.mrf.mxu0 }
 0x370   :  { %7595 = vmatprep.mubr.bf16.mxu0 %v9987_v37  ;;  %v9708_v44 = vpack.c.bf16 %v7019_v38, %v7017_v54  ;;  %v6912_v56 = vadd.f32 %v6911_v23, %v6799_v7  ;;  %v7024_v32 = vpop.f32.mrf.mxu1  ;;  %v7023_v8 = vadd.f32 %v7022_v40, %v6910_v19  ;;  %v9990_v7 = vld [vmem:[#allocation2 + $0xf8] ss:$24 sps:$4 sm:$0xff]   ;;  %v9991_v40 = vld [vmem:[#allocation2 + $0x12c] ss:$24 sps:$4 sm:$0xff]  }
 0x371   :  { %v6913_v55 = vpop.f32.mrf.mxu0  ;;  %v13577_v19 = vld [vmem:[#allocation39_spill] sm:$0xff]  ;;  %v13578_v23 = vld [vmem:[#allocation42_spill] sm:$0xff] }
 0x372   :  { %8602 = vst [vmem:[#allocation9 + $0xa8] sm:$0xff] %v9708_v44  ;;  %v7025_v47 = vadd.f32 %v7024_v32, %v6912_v56  ;;  %v6914_v24 = vadd.f32 %v6913_v55, %v6801_v29  ;;  %v7026_v63 = vpop.f32.mrf.mxu1  ;;  %v6821_v29 = vadd.f32 %v12629_v45, %v12690_v1  ;;  %v13581_v45 = vld [vmem:[#allocation43_spill] sm:$0xff] }
 0x373   :  { %v6915_v59 = vpop.f32.mrf.mxu0 }
 0x374   :  { %v9712_v35 = vpack.c.bf16 %v7025_v47, %v7023_v8  ;;  %v6916_v34 = vadd.f32 %v6915_v59, %v6803_v41  ;;  %v7028_v28 = vpop.f32.mrf.mxu1  ;;  %v7027_v60 = vadd.f32 %v7026_v63, %v6914_v24  ;;  %7709 = vmatmul.mubr.bf16.gmra.mxu1 %v12555_v53  ;;  %v13579_v41 = vld [vmem:[#allocation49_spill] sm:$0xff] }
 0x375   :  { %v6919_v9 = vpop.f32.mrf.mxu0  ;;  %7718 = vmatprep.mubr.bf16.mxu1 %v12571_v13  ;;  %v6823_v8 = vadd.f32 %v13579_v41, %v12700_v12 }
 0x376   :  { %8606 = vst [vmem:[#allocation9 + $0xc8] sm:$0xff] %v9712_v35  ;;  %v7029_v43 = vadd.f32 %v7028_v28, %v6916_v34  ;;  %v6920_v49 = vadd.f32 %v6919_v9, %v6807_v4  ;;  %v7032_v5 = vpop.f32.mrf.mxu1  ;;  %v13580_v35 = vld [vmem:[#allocation45_spill] sm:$0xff] }
 0x377   :  { %7596 = vmatmul.mubr.bf16.gmra.mxu0 %v9988_v25  ;;  %v6921_v0 = vpop.f32.mrf.mxu0  ;;  %v6827_v34 = vadd.f32 %v13580_v35, %v12690_v1  ;;  %v6829_v25 = vadd.f32 %v13581_v45, %v12700_v12 }
 0x378   :  { %7605 = vmatprep.mubr.bf16.mxu0 %v9989_v36  ;;  %v9716_v11 = vpack.c.bf16 %v7029_v43, %v7027_v60  ;;  %v6922_v21 = vadd.f32 %v6921_v0, %v6809_v58  ;;  %v7034_v46 = vpop.f32.mrf.mxu1  ;;  %v7033_v17 = vadd.f32 %v7032_v5, %v6920_v49  ;;  %v9992_v43 = vld [vmem:[#allocation2 + $0x128] ss:$24 sps:$4 sm:$0xff]  }
 0x379   :  { %v6923_v20 = vpop.f32.mrf.mxu0 }
 0x37a   :  { %8610 = vst [vmem:[#allocation9 + $0xe8] sm:$0xff] %v9716_v11  ;;  %v7035_v50 = vadd.f32 %v7034_v46, %v6922_v21  ;;  %v6924_v15 = vadd.f32 %v6923_v20, %v6811_v27  ;;  %v7036_v53 = vpop.f32.mrf.mxu1  ;;  %v13582_v27 = vld [vmem:[#allocation46_spill] sm:$0xff]  ;;  %v9993_v11 = vld [vmem:[#allocation2 + $0x15c] ss:$24 sps:$4 sm:$0xff]   ;;  %v6831_v20 = vadd.f32 %v12669_v31, %v12690_v1 }
 0x37b   :  { %v6925_v26 = vpop.f32.mrf.mxu0  ;;  %v13583_v46 = vld [vmem:[#allocation51_spill] sm:$0xff] }
 0x37c   :  { %v9720_v13 = vpack.c.bf16 %v7035_v50, %v7033_v17  ;;  %v6926_v6 = vadd.f32 %v6925_v26, %v6813_v52  ;;  %v7038_v22 = vpop.f32.mrf.mxu1  ;;  %v7037_v2 = vadd.f32 %v7036_v53, %v6924_v15  ;;  %7719 = vmatmul.mubr.bf16.gmra.mxu1 %v13577_v19  ;;  %v6833_v15 = vadd.f32 %v12673_v51, %v12700_v12 }
 0x37d   :  { %v6929_v39 = vpop.f32.mrf.mxu0  ;;  %7728 = vmatprep.mubr.bf16.mxu1 %v13578_v23 }
 0x37e   :  { %8614 = vst [vmem:[#allocation9 + $0x108] sm:$0xff] %v9720_v13  ;;  %v7039_v62 = vadd.f32 %v7038_v22, %v6926_v6  ;;  %v6930_v54 = vadd.f32 %v6929_v39, %v6817_v61  ;;  %v7042_v38 = vpop.f32.mrf.mxu1  ;;  %v6837_v6 = vadd.f32 %v12684_v33, %v12690_v1  ;;  %v9994_v39 = vld [vmem:[#allocation2 + $0x158] ss:$24 sps:$4 sm:$0xff]   ;;  %v6841_v33 = vadd.f32 %v12702_v10, %v12690_v1 }
 0x37f   :  { %7606 = vmatmul.mubr.bf16.gmra.mxu0 %v9990_v7  ;;  %v6931_v37 = vpop.f32.mrf.mxu0  ;;  %v6839_v7 = vadd.f32 %v12692_v3, %v12700_v12 }
 0x380   :  { %7615 = vmatprep.mubr.bf16.mxu0 %v9991_v40  ;;  %v9724_v44 = vpack.c.bf16 %v7039_v62, %v7037_v2  ;;  %v6932_v56 = vadd.f32 %v6931_v37, %v6819_v30  ;;  %v7044_v32 = vpop.f32.mrf.mxu1  ;;  %v7043_v47 = vadd.f32 %v7042_v38, %v6930_v54 }
 0x381   :  { %v6933_v55 = vpop.f32.mrf.mxu0 }
 0x382   :  { %8618 = vst [vmem:[#allocation9 + $0x128] sm:$0xff] %v9724_v44  ;;  %v7045_v24 = vadd.f32 %v7044_v32, %v6932_v56  ;;  %v6934_v63 = vadd.f32 %v6933_v55, %v6821_v29  ;;  %v7046_v59 = vpop.f32.mrf.mxu1  ;;  %v6843_v29 = vadd.f32 %v12706_v57, %v12700_v12 }
 0x383   :  { %v6935_v4 = vpop.f32.mrf.mxu0 }
 0x384   :  { %v9728_v28 = vpack.c.bf16 %v7045_v24, %v7043_v47  ;;  %v6936_v58 = vadd.f32 %v6935_v4, %v6823_v8  ;;  %v7048_v9 = vpop.f32.mrf.mxu1  ;;  %v7047_v49 = vadd.f32 %v7046_v59, %v6934_v63  ;;  %7729 = vmatmul.mubr.bf16.gmra.mxu1 %v13582_v27 }
 0x385   :  { %v6939_v60 = vpop.f32.mrf.mxu0  ;;  %7738 = vmatprep.mubr.bf16.mxu1 %v13583_v46 }
 0x386   :  { %8622 = vst [vmem:[#allocation9 + $0x148] sm:$0xff] %v9728_v28  ;;  %v7049_v5 = vadd.f32 %v7048_v9, %v6936_v58  ;;  %v6940_v36 = vadd.f32 %v6939_v60, %v6827_v34  ;;  %v7052_v0 = vpop.f32.mrf.mxu1 }
 0x387   :  { %7616 = vmatmul.mubr.bf16.gmra.mxu0 %v9992_v43  ;;  %v6941_v21 = vpop.f32.mrf.mxu0 }
 0x388   :  { %7625 = vmatprep.mubr.bf16.mxu0 %v9993_v11  ;;  %v9732_v16 = vpack.c.bf16 %v7049_v5, %v7047_v49  ;;  %v6942_v52 = vadd.f32 %v6941_v21, %v6829_v25  ;;  %v7054_v17 = vpop.f32.mrf.mxu1  ;;  %v7053_v53 = vadd.f32 %v7052_v0, %v6940_v36 }
 0x389   :  { %v6943_v50 = vpop.f32.mrf.mxu0 }
 0x38a   :  { %8626 = vst [vmem:[#allocation9 + $0x168] sm:$0xff] %v9732_v16  ;;  %v7055_v26 = vadd.f32 %v7054_v17, %v6942_v52  ;;  %v6944_v14 = vadd.f32 %v6943_v50, %v6831_v20  ;;  %v7056_v61 = vpop.f32.mrf.mxu1 }
 0x38b   :  { %v6945_v13 = vpop.f32.mrf.mxu0 }
 0x38c   :  { %v9736_v22 = vpack.c.bf16 %v7055_v26, %v7053_v53  ;;  %v6946_v48 = vadd.f32 %v6945_v13, %v6833_v15  ;;  %v7058_v30 = vpop.f32.mrf.mxu1  ;;  %v7057_v51 = vadd.f32 %v7056_v61, %v6944_v14  ;;  %7739 = vmatmul.mubr.bf16.gmra.mxu1 %v12677_v18 }
 0x38d   :  { %v6949_v31 = vpop.f32.mrf.mxu0 }
 0x38e   :  { %8630 = vst [vmem:[#allocation9 + $0x188] sm:$0xff] %v9736_v22  ;;  %v7059_v2 = vadd.f32 %v7058_v30, %v6946_v48  ;;  %v6950_v62 = vadd.f32 %v6949_v31, %v6837_v6  ;;  %v7062_v54 = vpop.f32.mrf.mxu1 }
 0x38f   :  { %7626 = vmatmul.mubr.bf16.gmra.mxu0 %v9994_v39  ;;  %v6951_v38 = vpop.f32.mrf.mxu0 }
 0x390   :  { %v9740_v19 = vpack.c.bf16 %v7059_v2, %v7057_v51  ;;  %v6952_v40 = vadd.f32 %v6951_v38, %v6839_v7  ;;  %v7064_v37 = vpop.f32.mrf.mxu1  ;;  %v7063_v3 = vadd.f32 %v7062_v54, %v6950_v62 }
 0x391   :  { %v6953_v23 = vpop.f32.mrf.mxu0 }
 0x392   :  { %8634 = vst [vmem:[#allocation9 + $0x1a8] sm:$0xff] %v9740_v19  ;;  %v7065_v44 = vadd.f32 %v7064_v37, %v6952_v40  ;;  %v6954_v56 = vadd.f32 %v6953_v23, %v6841_v33  ;;  %v7066_v32 = vpop.f32.mrf.mxu1 }
 0x393   :  { %v6955_v55 = vpop.f32.mrf.mxu0 }
 0x394   :  { %v9744_v41 = vpack.c.bf16 %v7065_v44, %v7063_v3  ;;  %v6956_v8 = vadd.f32 %v6955_v55, %v6843_v29  ;;  %v7068_v18 = vpop.f32.mrf.mxu1  ;;  %v7067_v1 = vadd.f32 %v7066_v32, %v6954_v56 }
 0x395   :  { %v12785_v47 = vpop.f32.mrf.mxu0 }
 0x396   :  { %8638 = vst [vmem:[#allocation9 + $0x1c8] sm:$0xff] %v9744_v41  ;;  %v7069_v10 = vadd.f32 %v7068_v18, %v6956_v8  ;;  %v12787_v24 = vpop.f32.mrf.mxu1  ;;  %v12899_v41 = vld [vmem:[#allocation7 + $0x8] sm:$0xff]  ;;  %v13592_v8 = vsub.s32 4, %v13566_v42 }
 0x397   :  { %v12789_v63 = vpop.f32.mrf.mxu0  ;;  %13591 = vst [vmem:[#allocation57_spill] sm:$0xff] %v12899_v41 }
 0x398   :  { %v9748_v59 = vpack.c.bf16 %v7069_v10, %v7067_v1  ;;  %v12791_v12 = vpop.f32.mrf.mxu1  ;;  %v12904_v18 = vrot.slane %v12899_v41, %v13592_v8  ;;  %v13593_v1 = vsub.s32 5, %v13566_v42 }
 0x399   :  { %v12793_v57 = vpop.f32.mrf.mxu0 }
 0x39a   :  { %8642 = vst [vmem:[#allocation9 + $0x1e8] sm:$0xff] %v9748_v59  ;;  %v12795_v4 = vpop.f32.mrf.mxu1  ;;  %v12909_v10 = vrot.slane %v12899_v41, %v13593_v1 }
 0x39b   :  { %v12797_v35 = vpop.f32.mrf.mxu0 }
 0x39c   :  { %v12799_v34 = vpop.f32.mrf.mxu1  ;;  %v7108_v8 = vadd.f32 %v12789_v63, %v12909_v10 }
 0x39d   :  { %v12801_v28 = vpop.f32.mrf.mxu0 }
 0x39e   :  { %v12803_v58 = vpop.f32.mrf.mxu1 }
 0x39f   :  { %v12805_v9 = vpop.f32.mrf.mxu0 }
 0x3a0   :  { %v12807_v45 = vpop.f32.mrf.mxu1 }
 0x3a1   :  { %v12809_v25 = vpop.f32.mrf.mxu0 }
 0x3a2   :  { %v12811_v60 = vpop.f32.mrf.mxu1 }
 0x3a3   :  { %v12813_v43 = vpop.f32.mrf.mxu0 }
 0x3a4   :  { %v12815_v49 = vpop.f32.mrf.mxu1 }
 0x3a5   :  { %v12817_v5 = vpop.f32.mrf.mxu0 }
 0x3a6   :  { %v12819_v36 = vpop.f32.mrf.mxu1 }
 0x3a7   :  { %v12821_v0 = vpop.f32.mrf.mxu0 }
 0x3a8   :  { %v12823_v27 = vpop.f32.mrf.mxu1 }
 0x3a9   :  { %v12825_v11 = vpop.f32.mrf.mxu0 }
 0x3aa   :  { %v12827_v21 = vpop.f32.mrf.mxu1 }
 0x3ab   :  { %v12829_v46 = vpop.f32.mrf.mxu0 }
 0x3ac   :  { %v12831_v20 = vpop.f32.mrf.mxu1 }
 0x3ad   :  { %v12833_v16 = vpop.f32.mrf.mxu0 }
 0x3ae   :  { %v12835_v52 = vpop.f32.mrf.mxu1 }
 0x3af   :  { %v12837_v17 = vpop.f32.mrf.mxu0 }
 0x3b0   :  { %v12839_v50 = vpop.f32.mrf.mxu1 }
 0x3b1   :  { %v12841_v15 = vpop.f32.mrf.mxu0 }
 0x3b2   :  { %v12843_v53 = vpop.f32.mrf.mxu1 }
 0x3b3   :  { %v12845_v26 = vpop.f32.mrf.mxu0 }
 0x3b4   :  { %v12847_v14 = vpop.f32.mrf.mxu1 }
 0x3b5   :  { %v12849_v61 = vpop.f32.mrf.mxu0 }
 0x3b6   :  { %v12851_v13 = vpop.f32.mrf.mxu1 }
 0x3b7   :  { %v12853_v6 = vpop.f32.mrf.mxu0 }
 0x3b8   :  { %v12855_v22 = vpop.f32.mrf.mxu1 }
 0x3b9   :  { %v12857_v48 = vpop.f32.mrf.mxu0 }
 0x3ba   :  { %v12859_v30 = vpop.f32.mrf.mxu1 }
 0x3bb   :  { %v12861_v31 = vpop.f32.mrf.mxu0 }
 0x3bc   :  { %v12863_v39 = vpop.f32.mrf.mxu1 }
 0x3bd   :  { %v12865_v7 = vpop.f32.mrf.mxu0 }
 0x3be   :  { %v12867_v51 = vpop.f32.mrf.mxu1 }
 0x3bf   :  { %v12869_v2 = vpop.f32.mrf.mxu0 }
 0x3c0   :  { %v12871_v62 = vpop.f32.mrf.mxu1 }
 0x3c1   :  { %v12873_v54 = vpop.f32.mrf.mxu0 }
 0x3c2   :  { %v12875_v38 = vpop.f32.mrf.mxu1 }
 0x3c3   :  { %v12877_v33 = vpop.f32.mrf.mxu0 }
 0x3c4   :  { %v12879_v19 = vpop.f32.mrf.mxu1 }
 0x3c5   :  { %v12881_v40 = vpop.f32.mrf.mxu0 }
 0x3c6   :  { %v12883_v37 = vpop.f32.mrf.mxu1 }
 0x3c7   :  { %13584 = vst [vmem:[#allocation52_spill] sm:$0xff] %v12883_v37  ;;  %v12885_v23 = vpop.f32.mrf.mxu0 }
 0x3c8   :  { %v12887_v29 = vpop.f32.mrf.mxu1 }
 0x3c9   :  { %13585 = vst [vmem:[#allocation56_spill] sm:$0xff] %v12887_v29  ;;  %v12889_v3 = vpop.f32.mrf.mxu0 }
 0x3ca   :  { %13586 = vst [vmem:[#allocation48_spill] sm:$0xff] %v12889_v3  ;;  %v12891_v44 = vpop.f32.mrf.mxu1 }
 0x3cb   :  { %13587 = vst [vmem:[#allocation50_spill] sm:$0xff] %v12891_v44  ;;  %v12893_v56 = vpop.f32.mrf.mxu0 }
 0x3cc   :  { %13588 = vst [vmem:[#allocation53_spill] sm:$0xff] %v12893_v56  ;;  %v12895_v32 = vpop.f32.mrf.mxu1 }
 0x3cd   :  { %13589 = vst [vmem:[#allocation54_spill] sm:$0xff] %v12895_v32  ;;  %v12897_v55 = vpop.f32.mrf.mxu0 }
 0x3ce   :  { %13590 = vst [vmem:[#allocation17_spill] sm:$0xff] %v12897_v55  ;;  %v12911_v59 = vpop.f32.mrf.mxu1  ;;  %v7106_v55 = vadd.f32 %v12785_v47, %v12904_v18  ;;  %v7112_v47 = vadd.f32 %v12797_v35, %v12909_v10 }
 0x3cf   :  { %13594 = vst [vmem:[#allocation23_spill] sm:$0xff] %v12911_v59  ;;  %v12913_v44 = vpop.f32.mrf.mxu0 }
 0x3d0   :  { %13595 = vst [vmem:[#allocation15_spill] sm:$0xff] %v12913_v44  ;;  %v12915_v56 = vpop.f32.mrf.mxu1  ;;  %v7219_v59 = vadd.f32 %v12787_v24, %v7106_v55  ;;  %v7221_v44 = vadd.f32 %v12791_v12, %v7108_v8  ;;  %v7225_v12 = vadd.f32 %v12799_v34, %v7112_v47 }
 0x3d1   :  { %13596 = vst [vmem:[#allocation18_spill] sm:$0xff] %v12915_v56  ;;  %v12917_v32 = vpop.f32.mrf.mxu0 }
 0x3d2   :  { %13597 = vst [vmem:[#allocation25_spill] sm:$0xff] %v12917_v32  ;;  %v12923_v3 = vpop.f32.mrf.mxu1  ;;  %v7110_v32 = vadd.f32 %v12793_v57, %v12904_v18  ;;  %v7118_v57 = vadd.f32 %v12805_v9, %v12909_v10 }
 0x3d3   :  { %13598 = vst [vmem:[#allocation55_spill] sm:$0xff] %v12923_v3  ;;  %v12925_v42 = vpop.f32.mrf.mxu0 }
 0x3d4   :  { %13599 = vst [vmem:[#allocation16_spill] sm:$0xff] %v12925_v42  ;;  %v12927_v1 = vpop.f32.mrf.mxu1  ;;  %v7223_v24 = vadd.f32 %v12795_v4, %v7110_v32 }
 0x3d5   :  { %13600 = vst [vmem:[#allocation19_spill] sm:$0xff] %v12927_v1  ;;  %v7331_v41 = vpop.f32.mrf.mxu0  ;;  %v7116_v1 = vadd.f32 %v12801_v28, %v12904_v18 }
 0x3d6   :  { %v12935_v56 = vpop.f32.mrf.mxu1  ;;  %v7332_v29 = vadd.f32 %v7331_v41, %v7219_v59 }
 0x3d7   :  { %v7333_v63 = vpop.f32.mrf.mxu0 }
 0x3d8   :  { %v7334_v3 = vadd.f32 %v7333_v63, %v7221_v44  ;;  %v12937_v37 = vpop.f32.mrf.mxu1 }
 0x3d9   :  { %v7335_v42 = vpop.f32.mrf.mxu0 }
 0x3da   :  { %v9689_v55 = vpack.c.bf16 %v7334_v3, %v7332_v29  ;;  %v12945_v35 = vpop.f32.mrf.mxu1  ;;  %v7336_v44 = vadd.f32 %v7335_v42, %v7223_v24 }
 0x3db   :  { %v7337_v41 = vpop.f32.mrf.mxu0 }
 0x3dc   :  { %8583 = vst [vmem:[#allocation9 + $0x10] sm:$0xff] %v9689_v55  ;;  %v7338_v59 = vadd.f32 %v7337_v41, %v7225_v12  ;;  %v12947_v8 = vpop.f32.mrf.mxu1 }
 0x3dd   :  { %10067 = shalt.err (!%p10064_p5)
}
 0x3de   :  { %s10112_s8 = smov 512   ;;  %s10113_s9 = smov 32   ;;  %v7229_v42 = vadd.f32 %v12803_v58, %v7116_v1  ;;  %v7341_v4 = vpop.f32.mrf.mxu0  ;;  %v7231_v34 = vadd.f32 %v12807_v45, %v7118_v57  ;;  %v7120_v28 = vadd.f32 %v12809_v25, %v12904_v18  ;;  %v7122_v9 = vadd.f32 %v12813_v43, %v12909_v10  ;;  %v12961_v3 = vpop.f32.mrf.mxu1 }
 0x3df   :  { %8656 = dma.vmem_to_hbm [thread:$0]  %s8651_s2, 8192, %s13174_s3, [#allocation4], %s10112_s8, %s10112_s8, %s10113_s9   ;;  %v9693_v29 = vpack.c.bf16 %v7338_v59, %v7336_v44  ;;  %v7126_v58 = vadd.f32 %v12817_v5, %v12904_v18  ;;  %v7128_v43 = vadd.f32 %v12821_v0, %v12909_v10 }
 0x3e0   :  { %v7343_v32 = vpop.f32.mrf.mxu0  ;;  %v7342_v47 = vadd.f32 %v7341_v4, %v7229_v42  ;;  %v12963_v24 = vpop.f32.mrf.mxu1  ;;  %v7233_v45 = vadd.f32 %v12811_v60, %v7120_v28  ;;  %v7235_v25 = vadd.f32 %v12815_v49, %v7122_v9  ;;  %v7130_v60 = vadd.f32 %v12825_v11, %v12904_v18  ;;  %s10114_s3 = smov [#allocation9]  }
 0x3e1   :  { %8587 = vst [vmem:[#allocation9 + $0x30] sm:$0xff] %v9693_v29  ;;  %v7344_v63 = vadd.f32 %v7343_v32, %v7231_v34  ;;  %v7239_v42 = vadd.f32 %v12819_v36, %v7126_v58  ;;  %v7241_v4 = vadd.f32 %v12823_v27, %v7128_v43  ;;  %v7132_v49 = vadd.f32 %v12829_v46, %v12909_v10  ;;  %s8662_s12 = sshll.u32 %s10114_s3, 4  ;;  %s8663_s12 = int_to_ptr.vmem [resolvable:$true] %s8662_s12 }
 0x3e2   :  { %v7345_v1 = vpop.f32.mrf.mxu0  ;;  %v12971_v57 = vpop.f32.mrf.mxu1  ;;  %v7136_v36 = vadd.f32 %v12833_v16, %v12904_v18  ;;  %v7243_v27 = vadd.f32 %v12827_v21, %v7130_v60  ;;  %v7138_v46 = vadd.f32 %v12837_v17, %v12909_v10  ;;  %v7140_v21 = vadd.f32 %v12841_v15, %v12904_v18  ;;  %s10076_s13 = scalar_lea.vmem %s8663_s12, 8192  ;;  %p10081_p7 = scmp.lt.s32.totalorder %s8663_s12, %s8663_s12 }
 0x3e3   :  { %v9697_v12 = vpack.c.bf16 %v7344_v63, %v7342_v47  ;;  %v7346_v41 = vadd.f32 %v7345_v1, %v7233_v45  ;;  %v7245_v11 = vadd.f32 %v12831_v20, %v7132_v49  ;;  %v7142_v20 = vadd.f32 %v12845_v26, %v12909_v10  ;;  %p10077_p6 = scmp.ne.s32.totalorder %s8663_s12, %s10076_s13  ;;  %p10082_p8 = scmp.lt.s32.totalorder %s10076_s13, %s10076_s13 }
 0x3e4   :  { %v7347_v55 = vpop.f32.mrf.mxu0  ;;  %v12973_v59 = vpop.f32.mrf.mxu1  ;;  %v7148_v26 = vadd.f32 %v12853_v6, %v12909_v10 }
 0x3e5   :  { %8591 = vst [vmem:[#allocation9 + $0x50] sm:$0xff] %v9697_v12  ;;  %v7348_v44 = vadd.f32 %v7347_v55, %v7235_v25  ;;  %v7249_v12 = vadd.f32 %v12835_v52, %v7136_v36  ;;  %v7251_v55 = vadd.f32 %v12839_v50, %v7138_v46  ;;  %v7146_v52 = vadd.f32 %v12849_v61, %v12904_v18  ;;  %p10083_p9 = por %p10082_p8, %p10081_p7 }
 0x3e6   :  { %v7351_v5 = vpop.f32.mrf.mxu0  ;;  %v12981_v34 = vpop.f32.mrf.mxu1  ;;  %v7253_v50 = vadd.f32 %v12843_v53, %v7140_v21  ;;  %v7255_v15 = vadd.f32 %v12847_v14, %v7142_v20  ;;  %v7150_v53 = vadd.f32 %v12857_v48, %v12904_v18  ;;  %v7152_v14 = vadd.f32 %v12861_v31, %v12909_v10 }
 0x3e7   :  { %v9701_v0 = vpack.c.bf16 %v7348_v44, %v7346_v41  ;;  %v7352_v9 = vadd.f32 %v7351_v5, %v7239_v42  ;;  %v7158_v31 = vadd.f32 %v12869_v2, %v12909_v10  ;;  %p10084_p10 = pnand %p10083_p9, %p10077_p6 }
 0x3e8   :  { %v7353_v28 = vpop.f32.mrf.mxu0  ;;  %v12983_v32 = vpop.f32.mrf.mxu1  ;;  %v7265_v48 = vadd.f32 %v12863_v39, %v7152_v14  ;;  %v7162_v39 = vadd.f32 %v12877_v33, %v12909_v10  ;;  %v7168_v33 = vadd.f32 %v12885_v23, %v12909_v10  ;;  %v13602_v14 = vld [vmem:[#allocation56_spill] sm:$0xff] }
 0x3e9   :  { %8595 = vst [vmem:[#allocation9 + $0x70] sm:$0xff] %v9701_v0  ;;  %v7354_v29 = vadd.f32 %v7353_v28, %v7241_v4 }
 0x3ea   :  { %v7355_v47 = vpop.f32.mrf.mxu0  ;;  %v12991_v58 = vpop.f32.mrf.mxu1 }
 0x3eb   :  { %v9705_v63 = vpack.c.bf16 %v7354_v29, %v7352_v9  ;;  %v7356_v45 = vadd.f32 %v7355_v47, %v7243_v27  ;;  %v7259_v47 = vadd.f32 %v12851_v13, %v7146_v52  ;;  %v7261_v27 = vadd.f32 %v12855_v22, %v7148_v26 }
 0x3ec   :  { %v7357_v1 = vpop.f32.mrf.mxu0  ;;  %v12993_v43 = vpop.f32.mrf.mxu1  ;;  %v7156_v13 = vadd.f32 %v12865_v7, %v12904_v18  ;;  %v7263_v22 = vadd.f32 %v12859_v30, %v7150_v53  ;;  %v7160_v30 = vadd.f32 %v12873_v54, %v12904_v18  ;;  %v7275_v54 = vadd.f32 %v12879_v19, %v7162_v39 }
 0x3ed   :  { %8599 = vst [vmem:[#allocation9 + $0x90] sm:$0xff] %v9705_v63  ;;  %v7358_v25 = vadd.f32 %v7357_v1, %v7245_v11 }
 0x3ee   :  { %v7361_v16 = vpop.f32.mrf.mxu0  ;;  %v13001_v41 = vpop.f32.mrf.mxu1 }
 0x3ef   :  { %v9709_v17 = vpack.c.bf16 %v7358_v25, %v7356_v45  ;;  %v7362_v42 = vadd.f32 %v7361_v16, %v7249_v12 }
 0x3f0   :  { %v7363_v44 = vpop.f32.mrf.mxu0  ;;  %v13003_v4 = vpop.f32.mrf.mxu1 }
 0x3f1   :  { %8603 = vst [vmem:[#allocation9 + $0xb0] sm:$0xff] %v9709_v17  ;;  %v7364_v5 = vadd.f32 %v7363_v44, %v7251_v55  ;;  %v7269_v44 = vadd.f32 %v12867_v51, %v7156_v13  ;;  %v7166_v51 = vadd.f32 %v12881_v40, %v12904_v18 }
 0x3f2   :  { %v7365_v60 = vpop.f32.mrf.mxu0  ;;  %v13011_v0 = vpop.f32.mrf.mxu1 }
 0x3f3   :  { %v9713_v49 = vpack.c.bf16 %v7364_v5, %v7362_v42  ;;  %v7366_v9 = vadd.f32 %v7365_v60, %v7253_v50  ;;  %v7271_v42 = vadd.f32 %v12871_v62, %v7158_v31  ;;  %v7273_v62 = vadd.f32 %v12875_v38, %v7160_v30  ;;  %v13603_v38 = vld [vmem:[#allocation48_spill] sm:$0xff]  ;;  %v13605_v31 = vld [vmem:[#allocation17_spill] sm:$0xff] }
 0x3f4   :  { %v7367_v28 = vpop.f32.mrf.mxu0  ;;  %v13013_v36 = vpop.f32.mrf.mxu1  ;;  %v7170_v19 = vadd.f32 %v13603_v38, %v12904_v18 }
 0x3f5   :  { %8607 = vst [vmem:[#allocation9 + $0xd0] sm:$0xff] %v9713_v49  ;;  %v7368_v29 = vadd.f32 %v7367_v28, %v7255_v15 }
 0x3f6   :  { %v7371_v61 = vpop.f32.mrf.mxu0  ;;  %v13021_v11 = vpop.f32.mrf.mxu1 }
 0x3f7   :  { %v9717_v6 = vpack.c.bf16 %v7368_v29, %v7366_v9  ;;  %v7372_v63 = vadd.f32 %v7371_v61, %v7259_v47 }
 0x3f8   :  { %v7373_v46 = vpop.f32.mrf.mxu0  ;;  %v13023_v45 = vpop.f32.mrf.mxu1 }
 0x3f9   :  { %8611 = vst [vmem:[#allocation9 + $0xf0] sm:$0xff] %v9717_v6  ;;  %v7374_v1 = vadd.f32 %v7373_v46, %v7261_v27  ;;  %v13601_v27 = vld [vmem:[#allocation52_spill] sm:$0xff]  ;;  %v7281_v6 = vadd.f32 %v13602_v14, %v7168_v33  ;;  %v13604_v46 = vld [vmem:[#allocation53_spill] sm:$0xff]  ;;  %v13610_v33 = vld [vmem:[#allocation18_spill] sm:$0xff] }
 0x3fa   :  { %v7375_v25 = vpop.f32.mrf.mxu0  ;;  %v13031_v16 = vpop.f32.mrf.mxu1  ;;  %v7279_v53 = vadd.f32 %v13601_v27, %v7166_v51  ;;  %v7172_v23 = vadd.f32 %v13604_v46, %v12909_v10 }
 0x3fb   :  { %v9721_v12 = vpack.c.bf16 %v7374_v1, %v7372_v63  ;;  %v7376_v21 = vadd.f32 %v7375_v25, %v7263_v22 }
 0x3fc   :  { %v7377_v55 = vpop.f32.mrf.mxu0  ;;  %v13033_v17 = vpop.f32.mrf.mxu1 }
 0x3fd   :  { %8615 = vst [vmem:[#allocation9 + $0x110] sm:$0xff] %v9721_v12  ;;  %v7378_v20 = vadd.f32 %v7377_v55, %v7265_v48  ;;  %v7176_v12 = vadd.f32 %v13605_v31, %v12904_v18  ;;  %v13617_v31 = vld [vmem:[#allocation19_spill] sm:$0xff] }
 0x3fe   :  { %v7381_v7 = vpop.f32.mrf.mxu0  ;;  %v13041_v5 = vpop.f32.mrf.mxu1 }
 0x3ff   :  { %v9725_v2 = vpack.c.bf16 %v7378_v20, %v7376_v21  ;;  %v7382_v60 = vadd.f32 %v7381_v7, %v7269_v44  ;;  %v13606_v21 = vld [vmem:[#allocation50_spill] sm:$0xff] }
 0x400   :  { %v7383_v52 = vpop.f32.mrf.mxu0  ;;  %v13043_v15 = vpop.f32.mrf.mxu1  ;;  %v7283_v20 = vadd.f32 %v13606_v21, %v7170_v19  ;;  %v13607_v44 = vld [vmem:[#allocation54_spill] sm:$0xff]  ;;  %v13615_v19 = vld [vmem:[#allocation57_spill] sm:$0xff] }
 0x401   :  { %8619 = vst [vmem:[#allocation9 + $0x130] sm:$0xff] %v9725_v2  ;;  %v7384_v50 = vadd.f32 %v7383_v52, %v7271_v42  ;;  %v7285_v7 = vadd.f32 %v13607_v44, %v7172_v23  ;;  %v13608_v42 = vld [vmem:[#allocation15_spill] sm:$0xff] }
 0x402   :  { %v7385_v26 = vpop.f32.mrf.mxu0  ;;  %v13051_v28 = vpop.f32.mrf.mxu1  ;;  %v7178_v30 = vadd.f32 %v13608_v42, %v12909_v10 }
 0x403   :  { %v9729_v49 = vpack.c.bf16 %v7384_v50, %v7382_v60  ;;  %v7386_v29 = vadd.f32 %v7385_v26, %v7273_v62  ;;  %v13609_v26 = vld [vmem:[#allocation23_spill] sm:$0xff] }
 0x404   :  { %v7387_v9 = vpop.f32.mrf.mxu0  ;;  %v13053_v61 = vpop.f32.mrf.mxu1  ;;  %v7289_v62 = vadd.f32 %v13609_v26, %v7176_v12 }
 0x405   :  { %8623 = vst [vmem:[#allocation9 + $0x150] sm:$0xff] %v9729_v49  ;;  %v7388_v47 = vadd.f32 %v7387_v9, %v7275_v54  ;;  %v7291_v49 = vadd.f32 %v13610_v33, %v7178_v30  ;;  %v13611_v9 = vld [vmem:[#allocation25_spill] sm:$0xff] }
 0x406   :  { %v7391_v40 = vpop.f32.mrf.mxu0  ;;  %v13061_v1 = vpop.f32.mrf.mxu1 }
 0x407   :  { %v9733_v63 = vpack.c.bf16 %v7388_v47, %v7386_v29  ;;  %v7392_v25 = vadd.f32 %v7391_v40, %v7279_v53  ;;  %v7180_v29 = vadd.f32 %v13611_v9, %v12904_v18  ;;  %v13612_v47 = vld [vmem:[#allocation16_spill] sm:$0xff] }
 0x408   :  { %v7393_v13 = vpop.f32.mrf.mxu0  ;;  %v13063_v48 = vpop.f32.mrf.mxu1  ;;  %v7182_v27 = vadd.f32 %v13612_v47, %v12909_v10 }
 0x409   :  { %8627 = vst [vmem:[#allocation9 + $0x170] sm:$0xff] %v9733_v63  ;;  %v7394_v22 = vadd.f32 %v7393_v13, %v7281_v6  ;;  %v13613_v6 = vld [vmem:[#allocation37_spill] sm:$0xff] }
 0x40a   :  { %v7395_v55 = vpop.f32.mrf.mxu0  ;;  %v13071_v2 = vpop.f32.mrf.mxu1  ;;  %v13614_v38 = vsub.s32 6, %v13613_v6  ;;  %v7295_v12 = vadd.f32 %v13617_v31, %v7182_v27  ;;  %v13618_v10 = vsub.s32 7, %v13613_v6 }
 0x40b   :  { %v9737_v39 = vpack.c.bf16 %v7394_v22, %v7392_v25  ;;  %v7396_v60 = vadd.f32 %v7395_v55, %v7283_v20  ;;  %v13616_v22 = vld [vmem:[#allocation55_spill] sm:$0xff] }
 0x40c   :  { %v7397_v52 = vpop.f32.mrf.mxu0  ;;  %v13073_v51 = vpop.f32.mrf.mxu1  ;;  %v13086_v46 = vrot.slane %v13615_v19, %v13614_v38  ;;  %v7293_v18 = vadd.f32 %v13616_v22, %v7180_v29  ;;  %v13095_v55 = vrot.slane %v13615_v19, %v13618_v10 }
 0x40d   :  { %8631 = vst [vmem:[#allocation9 + $0x190] sm:$0xff] %v9737_v39  ;;  %v7398_v50 = vadd.f32 %v7397_v52, %v7285_v7 }
 0x40e   :  { %v13081_v40 = vpop.f32.mrf.mxu1  ;;  %v7445_v7 = vadd.f32 %v12935_v56, %v13086_v46  ;;  %v7449_v33 = vadd.f32 %v12945_v35, %v13086_v46  ;;  %v7451_v29 = vadd.f32 %v12947_v8, %v13095_v55  ;;  %v7457_v35 = vadd.f32 %v12963_v24, %v13095_v55 }
 0x40f   :  { %v7401_v54 = vpop.f32.mrf.mxu0  ;;  %v9741_v53 = vpack.c.bf16 %v7398_v50, %v7396_v60  ;;  %v7447_v60 = vadd.f32 %v12937_v37, %v13095_v55  ;;  %v7455_v37 = vadd.f32 %v12961_v3, %v13086_v46 }
 0x410   :  { %v7402_v23 = vadd.f32 %v7401_v54, %v7289_v62  ;;  %v13088_v13 = vpop.f32.mrf.mxu1 }
 0x411   :  { %v7403_v14 = vpop.f32.mrf.mxu0  ;;  %8635 = vst [vmem:[#allocation9 + $0x1b0] sm:$0xff] %v9741_v53 }
 0x412   :  { %v7404_v63 = vadd.f32 %v7403_v14, %v7291_v49  ;;  %v13097_v20 = vpop.f32.mrf.mxu1 }
 0x413   :  { %v7405_v25 = vpop.f32.mrf.mxu0 }
 0x414   :  { %v9745_v21 = vpack.c.bf16 %v7404_v63, %v7402_v23  ;;  %v7406_v42 = vadd.f32 %v7405_v25, %v7293_v18  ;;  %v13101_v39 = vpop.f32.mrf.mxu1 }
 0x415   :  { %v7407_v44 = vpop.f32.mrf.mxu0 }
 0x416   :  { %8639 = vst [vmem:[#allocation9 + $0x1d0] sm:$0xff] %v9745_v21  ;;  %v7408_v30 = vadd.f32 %v7407_v44, %v7295_v12  ;;  %v7670_v62 = vpop.f32.mrf.mxu1  ;;  %v7459_v12 = vadd.f32 %v12971_v57, %v13086_v46 }
 0x417   :  { %v7557_v52 = vpop.f32.mrf.mxu0 }
 0x418   :  { %v9749_v50 = vpack.c.bf16 %v7408_v30, %v7406_v42  ;;  %v7558_v26 = vadd.f32 %v7557_v52, %v7445_v7  ;;  %v7672_v9 = vpop.f32.mrf.mxu1  ;;  %v7461_v7 = vadd.f32 %v12973_v59, %v13095_v55 }
 0x419   :  { %v7559_v54 = vpop.f32.mrf.mxu0 }
 0x41a   :  { %8643 = vst [vmem:[#allocation9 + $0x1f0] sm:$0xff] %v9749_v50  ;;  %v7560_v49 = vadd.f32 %v7559_v54, %v7447_v60  ;;  %v7671_v47 = vadd.f32 %v7670_v62, %v7558_v26  ;;  %v7674_v14 = vpop.f32.mrf.mxu1  ;;  %v7465_v50 = vadd.f32 %v12981_v34, %v13086_v46 }
 0x41b   :  { %v7561_v56 = vpop.f32.mrf.mxu0 }
 0x41c   :  { %v7673_v27 = vadd.f32 %v7672_v9, %v7560_v49  ;;  %v7562_v53 = vadd.f32 %v7561_v56, %v7449_v33  ;;  %v7676_v23 = vpop.f32.mrf.mxu1  ;;  %v7467_v33 = vadd.f32 %v12983_v32, %v13095_v55 }
 0x41d   :  { %v7563_v6 = vpop.f32.mrf.mxu0 }
 0x41e   :  { %v9690_v38 = vpack.c.bf16 %v7673_v27, %v7671_v47  ;;  %v7564_v19 = vadd.f32 %v7563_v6, %v7451_v29  ;;  %v7675_v25 = vadd.f32 %v7674_v14, %v7562_v53  ;;  %v7680_v8 = vpop.f32.mrf.mxu1  ;;  %v7469_v47 = vadd.f32 %v12991_v58, %v13086_v46 }
 0x41f   :  { %v7567_v63 = vpop.f32.mrf.mxu0  ;;  %v7471_v6 = vadd.f32 %v12993_v43, %v13095_v55 }
 0x420   :  { %8584 = vst [vmem:[#allocation9 + $0x18] sm:$0xff] %v9690_v38  ;;  %v7677_v22 = vadd.f32 %v7676_v23, %v7564_v19  ;;  %v7568_v18 = vadd.f32 %v7567_v63, %v7455_v37  ;;  %v7682_v44 = vpop.f32.mrf.mxu1  ;;  %v7475_v63 = vadd.f32 %v13001_v41, %v13086_v46 }
 0x421   :  { %v7569_v31 = vpop.f32.mrf.mxu0 }
 0x422   :  { %v9694_v10 = vpack.c.bf16 %v7677_v22, %v7675_v25  ;;  %v7570_v21 = vadd.f32 %v7569_v31, %v7457_v35  ;;  %v7681_v42 = vadd.f32 %v7680_v8, %v7568_v18  ;;  %v7684_v52 = vpop.f32.mrf.mxu1  ;;  %v7477_v18 = vadd.f32 %v13003_v4, %v13095_v55 }
 0x423   :  { %v7571_v3 = vpop.f32.mrf.mxu0 }
 0x424   :  { %8588 = vst [vmem:[#allocation9 + $0x38] sm:$0xff] %v9694_v10  ;;  %v7683_v30 = vadd.f32 %v7682_v44, %v7570_v21  ;;  %v7572_v24 = vadd.f32 %v7571_v3, %v7459_v12  ;;  %v7686_v54 = vpop.f32.mrf.mxu1  ;;  %v7479_v21 = vadd.f32 %v13011_v0, %v13086_v46 }
 0x425   :  { %v7573_v60 = vpop.f32.mrf.mxu0 }
 0x426   :  { %v9698_v26 = vpack.c.bf16 %v7683_v30, %v7681_v42  ;;  %v7574_v62 = vadd.f32 %v7573_v60, %v7461_v7  ;;  %v7685_v49 = vadd.f32 %v7684_v52, %v7572_v24  ;;  %v7690_v56 = vpop.f32.mrf.mxu1  ;;  %v7481_v42 = vadd.f32 %v13013_v36, %v13095_v55 }
 0x427   :  { %v7577_v57 = vpop.f32.mrf.mxu0 }
 0x428   :  { %8592 = vst [vmem:[#allocation9 + $0x58] sm:$0xff] %v9698_v26  ;;  %v7687_v9 = vadd.f32 %v7686_v54, %v7574_v62  ;;  %v7578_v59 = vadd.f32 %v7577_v57, %v7465_v50  ;;  %v7692_v14 = vpop.f32.mrf.mxu1  ;;  %v7485_v50 = vadd.f32 %v13021_v11, %v13086_v46  ;;  %v7487_v57 = vadd.f32 %v13023_v45, %v13095_v55 }
 0x429   :  { %v7579_v29 = vpop.f32.mrf.mxu0 }
 0x42a   :  { %v9702_v27 = vpack.c.bf16 %v7687_v9, %v7685_v49  ;;  %v7580_v53 = vadd.f32 %v7579_v29, %v7467_v33  ;;  %v7691_v37 = vadd.f32 %v7690_v56, %v7578_v59  ;;  %v7694_v19 = vpop.f32.mrf.mxu1  ;;  %v7489_v56 = vadd.f32 %v13031_v16, %v13086_v46 }
 0x42b   :  { %v7581_v34 = vpop.f32.mrf.mxu0 }
 0x42c   :  { %8596 = vst [vmem:[#allocation9 + $0x78] sm:$0xff] %v9702_v27  ;;  %v7693_v38 = vadd.f32 %v7692_v14, %v7580_v53  ;;  %v7582_v32 = vadd.f32 %v7581_v34, %v7469_v47  ;;  %v7696_v22 = vpop.f32.mrf.mxu1  ;;  %v7491_v53 = vadd.f32 %v13033_v17, %v13095_v55 }
 0x42d   :  { %v7583_v23 = vpop.f32.mrf.mxu0 }
 0x42e   :  { %v9706_v35 = vpack.c.bf16 %v7693_v38, %v7691_v37  ;;  %v7584_v25 = vadd.f32 %v7583_v23, %v7471_v6  ;;  %v7695_v8 = vadd.f32 %v7694_v19, %v7582_v32  ;;  %v7700_v12 = vpop.f32.mrf.mxu1  ;;  %v7495_v38 = vadd.f32 %v13041_v5, %v13086_v46 }
 0x42f   :  { %v7587_v58 = vpop.f32.mrf.mxu0 }
 0x430   :  { %8600 = vst [vmem:[#allocation9 + $0x98] sm:$0xff] %v9706_v35  ;;  %v7697_v31 = vadd.f32 %v7696_v22, %v7584_v25  ;;  %v7588_v43 = vadd.f32 %v7587_v58, %v7475_v63  ;;  %v7702_v7 = vpop.f32.mrf.mxu1  ;;  %v7497_v63 = vadd.f32 %v13043_v15, %v13095_v55 }
 0x431   :  { %v7589_v10 = vpop.f32.mrf.mxu0 }
 0x432   :  { %v9710_v44 = vpack.c.bf16 %v7697_v31, %v7695_v8  ;;  %v7590_v3 = vadd.f32 %v7589_v10, %v7477_v18  ;;  %v7701_v30 = vadd.f32 %v7700_v12, %v7588_v43  ;;  %v7704_v52 = vpop.f32.mrf.mxu1  ;;  %v7499_v18 = vadd.f32 %v13051_v28, %v13086_v46 }
 0x433   :  { %v7591_v41 = vpop.f32.mrf.mxu0  ;;  %v7501_v12 = vadd.f32 %v13053_v61, %v13095_v55 }
 0x434   :  { %8604 = vst [vmem:[#allocation9 + $0xb8] sm:$0xff] %v9710_v44  ;;  %v7703_v24 = vadd.f32 %v7702_v7, %v7590_v3  ;;  %v7592_v4 = vadd.f32 %v7591_v41, %v7479_v21  ;;  %v7706_v54 = vpop.f32.mrf.mxu1  ;;  %v7505_v7 = vadd.f32 %v13061_v1, %v13086_v46 }
 0x435   :  { %v7593_v60 = vpop.f32.mrf.mxu0 }
 0x436   :  { %v9714_v26 = vpack.c.bf16 %v7703_v24, %v7701_v30  ;;  %v7594_v62 = vadd.f32 %v7593_v60, %v7481_v42  ;;  %v7705_v33 = vadd.f32 %v7704_v52, %v7592_v4  ;;  %v7710_v9 = vpop.f32.mrf.mxu1  ;;  %v7507_v24 = vadd.f32 %v13063_v48, %v13095_v55 }
 0x437   :  { %v7597_v0 = vpop.f32.mrf.mxu0 }
 0x438   :  { %8608 = vst [vmem:[#allocation9 + $0xd8] sm:$0xff] %v9714_v26  ;;  %v7707_v49 = vadd.f32 %v7706_v54, %v7594_v62  ;;  %v7598_v36 = vadd.f32 %v7597_v0, %v7485_v50  ;;  %v7712_v27 = vpop.f32.mrf.mxu1  ;;  %v7509_v26 = vadd.f32 %v13071_v2, %v13086_v46 }
 0x439   :  { %v7599_v59 = vpop.f32.mrf.mxu0 }
 0x43a   :  { %v9718_v29 = vpack.c.bf16 %v7707_v49, %v7705_v33  ;;  %v7600_v47 = vadd.f32 %v7599_v59, %v7487_v57  ;;  %v7711_v14 = vadd.f32 %v7710_v9, %v7598_v36  ;;  %v7714_v6 = vpop.f32.mrf.mxu1  ;;  %v7511_v57 = vadd.f32 %v13073_v51, %v13095_v55 }
 0x43b   :  { %v7601_v11 = vpop.f32.mrf.mxu0  ;;  %v7515_v59 = vadd.f32 %v13081_v40, %v13086_v46 }
 0x43c   :  { %8612 = vst [vmem:[#allocation9 + $0xf8] sm:$0xff] %v9718_v29  ;;  %v7713_v34 = vadd.f32 %v7712_v27, %v7600_v47  ;;  %v7602_v45 = vadd.f32 %v7601_v11, %v7489_v56  ;;  %v7716_v23 = vpop.f32.mrf.mxu1  ;;  %v7517_v27 = vadd.f32 %v13088_v13, %v13095_v55 }
 0x43d   :  { %v7603_v37 = vpop.f32.mrf.mxu0 }
 0x43e   :  { %v9722_v32 = vpack.c.bf16 %v7713_v34, %v7711_v14  ;;  %v7604_v19 = vadd.f32 %v7603_v37, %v7491_v53  ;;  %v7715_v35 = vadd.f32 %v7714_v6, %v7602_v45  ;;  %v7720_v22 = vpop.f32.mrf.mxu1  ;;  %v7519_v45 = vadd.f32 %v13097_v20, %v13086_v46 }
 0x43f   :  { %v7607_v16 = vpop.f32.mrf.mxu0 }
 0x440   :  { %8616 = vst [vmem:[#allocation9 + $0x118] sm:$0xff] %v9722_v32  ;;  %v7717_v25 = vadd.f32 %v7716_v23, %v7604_v19  ;;  %v7608_v17 = vadd.f32 %v7607_v16, %v7495_v38  ;;  %v7722_v43 = vpop.f32.mrf.mxu1  ;;  %v7521_v32 = vadd.f32 %v13101_v39, %v13095_v55 }
 0x441   :  { %v7609_v58 = vpop.f32.mrf.mxu0 }
 0x442   :  { %v9726_v8 = vpack.c.bf16 %v7717_v25, %v7715_v35  ;;  %v7610_v31 = vadd.f32 %v7609_v58, %v7497_v63  ;;  %v7721_v10 = vadd.f32 %v7720_v22, %v7608_v17  ;;  %v7724_v44 = vpop.f32.mrf.mxu1 }
 0x443   :  { %v7611_v5 = vpop.f32.mrf.mxu0 }
 0x444   :  { %8620 = vst [vmem:[#allocation9 + $0x138] sm:$0xff] %v9726_v8  ;;  %v7723_v21 = vadd.f32 %v7722_v43, %v7610_v31  ;;  %v7612_v15 = vadd.f32 %v7611_v5, %v7499_v18  ;;  %v7726_v30 = vpop.f32.mrf.mxu1 }
 0x445   :  { %v7613_v3 = vpop.f32.mrf.mxu0 }
 0x446   :  { %v9730_v41 = vpack.c.bf16 %v7723_v21, %v7721_v10  ;;  %v7614_v42 = vadd.f32 %v7613_v3, %v7501_v12  ;;  %v7725_v4 = vadd.f32 %v7724_v44, %v7612_v15  ;;  %v7730_v60 = vpop.f32.mrf.mxu1 }
 0x447   :  { %v7617_v28 = vpop.f32.mrf.mxu0 }
 0x448   :  { %8624 = vst [vmem:[#allocation9 + $0x158] sm:$0xff] %v9730_v41  ;;  %v7727_v52 = vadd.f32 %v7726_v30, %v7614_v42  ;;  %v7618_v61 = vadd.f32 %v7617_v28, %v7505_v7  ;;  %v7732_v0 = vpop.f32.mrf.mxu1 }
 0x449   :  { %v7619_v50 = vpop.f32.mrf.mxu0 }
 0x44a   :  { %v9734_v62 = vpack.c.bf16 %v7727_v52, %v7725_v4  ;;  %v7620_v54 = vadd.f32 %v7619_v50, %v7507_v24  ;;  %v7731_v33 = vadd.f32 %v7730_v60, %v7618_v61  ;;  %v7734_v36 = vpop.f32.mrf.mxu1 }
 0x44b   :  { %v7621_v1 = vpop.f32.mrf.mxu0 }
 0x44c   :  { %8628 = vst [vmem:[#allocation9 + $0x178] sm:$0xff] %v9734_v62  ;;  %v7733_v49 = vadd.f32 %v7732_v0, %v7620_v54  ;;  %v7622_v48 = vadd.f32 %v7621_v1, %v7509_v26  ;;  %v7736_v47 = vpop.f32.mrf.mxu1 }
 0x44d   :  { %v7623_v9 = vpop.f32.mrf.mxu0 }
 0x44e   :  { %v9738_v56 = vpack.c.bf16 %v7733_v49, %v7731_v33  ;;  %v7624_v29 = vadd.f32 %v7623_v9, %v7511_v57  ;;  %v7735_v11 = vadd.f32 %v7734_v36, %v7622_v48  ;;  %v7740_v14 = vpop.f32.mrf.mxu1 }
 0x44f   :  { %v7627_v2 = vpop.f32.mrf.mxu0 }
 0x450   :  { %8632 = vst [vmem:[#allocation9 + $0x198] sm:$0xff] %v9738_v56  ;;  %v7737_v53 = vadd.f32 %v7736_v47, %v7624_v29  ;;  %v7628_v51 = vadd.f32 %v7627_v2, %v7515_v59  ;;  %v7742_v38 = vpop.f32.mrf.mxu1 }
 0x451   :  { %v7629_v34 = vpop.f32.mrf.mxu0 }
 0x452   :  { %v9742_v6 = vpack.c.bf16 %v7737_v53, %v7735_v11  ;;  %v7630_v37 = vadd.f32 %v7629_v34, %v7517_v27  ;;  %v7741_v19 = vadd.f32 %v7740_v14, %v7628_v51  ;;  %v7744_v16 = vpop.f32.mrf.mxu1 }
 0x453   :  { %v7631_v40 = vpop.f32.mrf.mxu0 }
 0x454   :  { %8636 = vst [vmem:[#allocation9 + $0x1b8] sm:$0xff] %v9742_v6  ;;  %v7743_v23 = vadd.f32 %v7742_v38, %v7630_v37  ;;  %v7632_v13 = vadd.f32 %v7631_v40, %v7519_v45  ;;  %v7746_v17 = vpop.f32.mrf.mxu1 }
 0x455   :  { %v7633_v63 = vpop.f32.mrf.mxu0 }
 0x456   :  { %v9746_v35 = vpack.c.bf16 %v7743_v23, %v7741_v19  ;;  %v7634_v25 = vadd.f32 %v7633_v63, %v7521_v32  ;;  %v7745_v46 = vadd.f32 %v7744_v16, %v7632_v13 }
 0x458   :  { %8640 = vst [vmem:[#allocation9 + $0x1d8] sm:$0xff] %v9746_v35  ;;  %v7747_v20 = vadd.f32 %v7746_v17, %v7634_v25 }
 0x45a   :  { %v9750_v22 = vpack.c.bf16 %v7747_v20, %v7745_v46 }
 0x45c   :  { %8644 = vst [vmem:[#allocation9 + $0x1f8] sm:$0xff] %v9750_v22 }
 0x45d   :  { %10087 = shalt.err (!%p10084_p10)
}
 0x45e   :  { %8668 = dma.vmem_to_hbm [thread:$0]  %s8663_s12, 8192, %s13175_s4, [#allocation10], %s10112_s8, %s10112_s8, %s10113_s9  }
 0x45f   :  { %10100 = dma.done.wait [#allocation4], 8192  }
 0x460   :  { %10101 = vsyncadd [#allocation4], 4294959104 }
 0x461   :  { %10102 = dma.done.wait [#allocation10], 8192  }
 0x462   :  { %10103 = vsyncadd [#allocation10], 4294959104 }
 0x463   :  { %8675 = vsyncpa [#allocation3], 1 }
 0x464   :  { %8676 = vsyncpa [#allocation6], 1 }
 0x465   :  { %8677 = vsyncpa [#allocation4], 1 }
 0x466   :  { %8678 = vsyncpa [#allocation10], 1 }

</bundles_post_ra>
